<compile_context>
chip_gen: v7x
topology: tpu7x:2x2x1
jax: 0.10.0
libtpu: 0.0.40
codegen_flags: <defaults>
</compile_context>

<pallas_src>
import jax
import jax.numpy as jnp
from jax.experimental import pallas as pl
from jax.experimental.pallas import tpu as pltpu

N_FEAT = 9                      # input / hidden width
N_OUT = 2                       # output width
LANE = 128
SUBLANE = 8
CHUNK = 16                      # sublanes per inner-loop step (2 vregs / slab)
ROW_QUANTUM = CHUNK * LANE      # 2048 batch rows == one chunk of work


def _cdiv(a, b):
    return -(-a // b)


def _round_up(n, m):
    return _cdiv(n, m) * m


def _dense(h, W, b, apply_relu):
    """h: list of n_in slabs, each (CHUNK, LANE) f32.
    W: n_out x n_in nested list of already-loaded scalar values.
    b: n_out list of scalar values.
    Pure VPU: scalar * batch vreg, accumulate, bias, ReLU.  Fully unrolled."""
    out = []
    n_out, n_in = len(W), len(W[0])
    for o in range(n_out):
        acc = h[0] * W[o][0]
        for i in range(1, n_in):
            acc = acc + h[i] * W[o][i]
        acc = acc + b[o]
        if apply_relu:
            acc = jnp.maximum(acc, 0.0)
        out.append(acc)
    return out


def _mlp_kernel(x_ref,
                w1_ref, b1_ref, w2_ref, b2_ref, w3_ref, b3_ref,
                w4_ref, b4_ref, w5_ref, b5_ref, wo_ref, bo_ref,
                out_ref):
    """Fused 6-layer MLP on one batch tile.

    x_ref:   (9,  SUB, 128) VMEM   -- feature-major activations, batch on lanes
    w*_ref:  flat (out*in,) SMEM   -- PyTorch (out,in) weights, flattened
    b*_ref:  (out,)        SMEM
    out_ref: (2,  SUB, 128) VMEM
    """
    sub = x_ref.shape[1]            # static; multiple of CHUNK by construction
    n_chunks = sub // CHUNK

    layer_refs = [
        (w1_ref, b1_ref, N_FEAT, N_FEAT, True),
        (w2_ref, b2_ref, N_FEAT, N_FEAT, True),
        (w3_ref, b3_ref, N_FEAT, N_FEAT, True),
        (w4_ref, b4_ref, N_FEAT, N_FEAT, True),
        (w5_ref, b5_ref, N_FEAT, N_FEAT, True),
        (wo_ref, bo_ref, N_OUT, N_FEAT, False),
    ]

    # Hoist every SMEM scalar read (weights + biases) out of the chunk loop:
    # ~470 sld's happen once per grid step instead of once per chunk, keeping
    # the scalar slots off the critical path of the VALU-bound inner loop.
    layers = []
    for w_ref, b_ref, n_out, n_in, relu in layer_refs:
        W = [[w_ref[o * n_in + i] for i in range(n_in)] for o in range(n_out)]
        b = [b_ref[o] for o in range(n_out)]
        layers.append((W, b, relu))

    @pl.loop(0, n_chunks)
    def _(c):
        s = pl.multiple_of(c * CHUNK, CHUNK)
        # Two vregs per feature for this 2048-row chunk -> good ILP, no spills.
        h = [x_ref[i, pl.ds(s, CHUNK), :] for i in range(N_FEAT)]
        for W, b, relu in layers:
            h = _dense(h, W, b, relu)
        for o in range(N_OUT):
            out_ref[o, pl.ds(s, CHUNK), :] = h[o]


def _pick_tiling(B, batch_tile):
    """Pick (rows_per_tile, padded_rows, n_tiles) in ROW_QUANTUM units.

    Guarantees >= 2 grid steps whenever B spans >= 2 quanta (so v7x can shard
    the batch over its 2 TensorCores), caps the tile at `batch_tile`, and
    rebalances the tile size so tail padding stays minimal."""
    max_units = batch_tile // ROW_QUANTUM
    b_units = _cdiv(max(B, 1), ROW_QUANTUM)
    if b_units <= 1:
        tile_units = 1
    else:
        tile_units = min(max_units, _cdiv(b_units, 2))
        n_tiles = _cdiv(b_units, tile_units)
        tile_units = _cdiv(b_units, n_tiles)        # rebalance -> minimal padding
    bt = tile_units * ROW_QUANTUM
    n_tiles = _cdiv(b_units * ROW_QUANTUM, bt)
    return bt, n_tiles * bt, n_tiles


def net_forward_feature_major(x_t, params, *, batch_tile=32768):
    """x_t: (9, Bpad//128, 128) float32 feature-major slab (batch on lanes),
    with Bpad a multiple of ROW_QUANTUM (2048).  Returns the feature-major
    logits slab (2, Bpad//128, 128).  Use this entry point directly when the
    surrounding ops can produce/consume feature-major activations, avoiding
    the wrapper-side transpose copies entirely."""
    assert batch_tile % ROW_QUANTUM == 0
    nf, nblk, lane = x_t.shape
    assert nf == N_FEAT and lane == LANE
    b_pad = nblk * LANE
    assert b_pad % ROW_QUANTUM == 0

    bt, b_pad2, n_tiles = _pick_tiling(b_pad, batch_tile)
    assert b_pad2 == b_pad, "feature-major input must already be tile-padded"
    sub = bt // LANE

    flat = lambda a: a.reshape(-1).astype(jnp.float32)
    args = (
        x_t.astype(jnp.float32),
        flat(params["w1"]), flat(params["b1"]),
        flat(params["w2"]), flat(params["b2"]),
        flat(params["w3"]), flat(params["b3"]),
        flat(params["w4"]), flat(params["b4"]),
        flat(params["w5"]), flat(params["b5"]),
        flat(params["wo"]), flat(params["bo"]),
    )

    smem_spec = pl.BlockSpec(memory_space=pltpu.MemorySpace.SMEM)
    x_spec = pl.BlockSpec((N_FEAT, sub, LANE), lambda i: (0, i, 0))
    out_spec = pl.BlockSpec((N_OUT, sub, LANE), lambda i: (0, i, 0))

    return pl.pallas_call(
        _mlp_kernel,
        out_shape=jax.ShapeDtypeStruct((N_OUT, b_pad // LANE, LANE), jnp.float32),
        grid_spec=pltpu.PrefetchScalarGridSpec(
            num_scalar_prefetch=0,
            grid=(n_tiles,),
            in_specs=[x_spec] + [smem_spec] * 12,
            out_specs=out_spec,
        ),
        compiler_params=pltpu.CompilerParams(
            dimension_semantics=("parallel",),   # v7x: shard batch grid over 2 TCs
        ),
    )(*args)


def net_forward(x, params, *, batch_tile=32768):
    """x: (B, 9) float32.  params: PyTorch-layout weights (out,in), biases (out,).

    Returns (B, 2) float32 logits, identical to the PyTorch Net forward.
    Note: this wrapper does one pad+transpose copy on the way in (36 B/row) and
    a tiny one on the way out (8 B/row); callers that can keep feature-major
    activations should use net_forward_feature_major and skip both."""
    B, F = x.shape
    assert F == N_FEAT

    _, b_pad, _ = _pick_tiling(B, batch_tile)

    # Single pad+transpose+reshape copy: batch goes onto (sublane, lane).
    x_pad = jnp.pad(x.astype(jnp.float32), ((0, b_pad - B), (0, 0)))
    x_t = x_pad.T.reshape(N_FEAT, b_pad // LANE, LANE)

    out_t = net_forward_feature_major(x_t, params, batch_tile=batch_tile)

    out = out_t.reshape(N_OUT, b_pad).T          # (b_pad, 2), batch-major again
    return out[:B]


def init_params(key):
    """PyTorch nn.Linear default init: U(-1/sqrt(fan_in), 1/sqrt(fan_in)),
    weights stored (out_features, in_features), biases (out_features,)."""
    dims = [(N_FEAT, N_FEAT)] * 5 + [(N_FEAT, N_OUT)]
    names = ["1", "2", "3", "4", "5", "o"]
    params = {}
    for (fan_in, fan_out), name in zip(dims, names):
        key, kw, kb = jax.random.split(key, 3)
        bound = 1.0 / jnp.sqrt(jnp.float32(fan_in))
        params[f"w{name}"] = jax.random.uniform(
            kw, (fan_out, fan_in), jnp.float32, minval=-bound, maxval=bound)
        params[f"b{name}"] = jax.random.uniform(
            kb, (fan_out,), jnp.float32, minval=-bound, maxval=bound)
    return params


def _reference_forward(x, params):
    """Plain-JAX reference (PyTorch semantics: y = x @ W.T + b)."""
    h = x
    for name in ["1", "2", "3", "4", "5"]:
        h = jnp.maximum(h @ params[f"w{name}"].T + params[f"b{name}"], 0.0)
    return h @ params["wo"].T + params["bo"]


if __name__ == "__main__":
    key = jax.random.PRNGKey(0)
    key, kx1, kx2 = jax.random.split(key, 3)
    params = init_params(key)

    # Small-batch case (matches the module spec; single padded tile).
    B1 = 8
    x1 = jax.random.normal(kx1, (B1, N_FEAT), dtype=jnp.float32)
    out1 = jax.block_until_ready(net_forward(x1, params))
    ref1 = _reference_forward(x1, params)
    assert out1.shape == (B1, 2)
    assert jnp.allclose(out1, ref1, atol=1e-5, rtol=1e-5), "mismatch (B=8)"

    # Multi-tile + batch-remainder case (exercises the grid, >=2 tiles for the
    # v7x megacore path, padding and output slicing).
    B2 = 2500
    x2 = jax.random.normal(kx2, (B2, N_FEAT), dtype=jnp.float32)
    out2 = jax.block_until_ready(net_forward(x2, params))
    ref2 = _reference_forward(x2, params)
    assert out2.shape == (B2, 2)
    assert jnp.allclose(out2, ref2, atol=1e-5, rtol=1e-5), "mismatch (B=2500)"

    print("KERNEL_OK")
</pallas_src>

<mosaic_0001>
module attributes {stable_mosaic.version = 11 : i64} {
  func.func @_mlp_kernel(%arg0: i32, %arg1: memref<9x16x128xf32, #tpu.memory_space<vmem>>, %arg2: memref<81xf32, #tpu.memory_space<smem>>, %arg3: memref<9xf32, #tpu.memory_space<smem>>, %arg4: memref<81xf32, #tpu.memory_space<smem>>, %arg5: memref<9xf32, #tpu.memory_space<smem>>, %arg6: memref<81xf32, #tpu.memory_space<smem>>, %arg7: memref<9xf32, #tpu.memory_space<smem>>, %arg8: memref<81xf32, #tpu.memory_space<smem>>, %arg9: memref<9xf32, #tpu.memory_space<smem>>, %arg10: memref<81xf32, #tpu.memory_space<smem>>, %arg11: memref<9xf32, #tpu.memory_space<smem>>, %arg12: memref<18xf32, #tpu.memory_space<smem>>, %arg13: memref<2xf32, #tpu.memory_space<smem>>, %arg14: memref<2x16x128xf32, #tpu.memory_space<vmem>>) attributes {dimension_semantics = [#tpu.dimension_semantics<parallel>], iteration_bounds = array<i64: 1>, scalar_prefetch = 0 : i64, scratch_operands = 0 : i64, tpu.core_type = #tpu.core_type<tc>, window_params = [{transform_indices = @transform_0, window_bounds = array<i64: 9, 16, 128>}, {transform_indices = @transform_1, window_bounds = array<i64: 81>}, {transform_indices = @transform_2, window_bounds = array<i64: 9>}, {transform_indices = @transform_3, window_bounds = array<i64: 81>}, {transform_indices = @transform_4, window_bounds = array<i64: 9>}, {transform_indices = @transform_5, window_bounds = array<i64: 81>}, {transform_indices = @transform_6, window_bounds = array<i64: 9>}, {transform_indices = @transform_7, window_bounds = array<i64: 81>}, {transform_indices = @transform_8, window_bounds = array<i64: 9>}, {transform_indices = @transform_9, window_bounds = array<i64: 81>}, {transform_indices = @transform_10, window_bounds = array<i64: 9>}, {transform_indices = @transform_11, window_bounds = array<i64: 18>}, {transform_indices = @transform_12, window_bounds = array<i64: 2>}, {transform_indices = @transform_13, window_bounds = array<i64: 2, 16, 128>}]} {
    %c0 = arith.constant 0 : index
    %0 = memref.load %arg2[%c0] : memref<81xf32, #tpu.memory_space<smem>>
    %c1 = arith.constant 1 : index
    %1 = memref.load %arg2[%c1] : memref<81xf32, #tpu.memory_space<smem>>
    %c2 = arith.constant 2 : index
    %2 = memref.load %arg2[%c2] : memref<81xf32, #tpu.memory_space<smem>>
    %c3 = arith.constant 3 : index
    %3 = memref.load %arg2[%c3] : memref<81xf32, #tpu.memory_space<smem>>
    %c4 = arith.constant 4 : index
    %4 = memref.load %arg2[%c4] : memref<81xf32, #tpu.memory_space<smem>>
    %c5 = arith.constant 5 : index
    %5 = memref.load %arg2[%c5] : memref<81xf32, #tpu.memory_space<smem>>
    %c6 = arith.constant 6 : index
    %6 = memref.load %arg2[%c6] : memref<81xf32, #tpu.memory_space<smem>>
    %c7 = arith.constant 7 : index
    %7 = memref.load %arg2[%c7] : memref<81xf32, #tpu.memory_space<smem>>
    %c8 = arith.constant 8 : index
    %8 = memref.load %arg2[%c8] : memref<81xf32, #tpu.memory_space<smem>>
    %c9 = arith.constant 9 : index
    %9 = memref.load %arg2[%c9] : memref<81xf32, #tpu.memory_space<smem>>
    %c10 = arith.constant 10 : index
    %10 = memref.load %arg2[%c10] : memref<81xf32, #tpu.memory_space<smem>>
    %c11 = arith.constant 11 : index
    %11 = memref.load %arg2[%c11] : memref<81xf32, #tpu.memory_space<smem>>
    %c12 = arith.constant 12 : index
    %12 = memref.load %arg2[%c12] : memref<81xf32, #tpu.memory_space<smem>>
    %c13 = arith.constant 13 : index
    %13 = memref.load %arg2[%c13] : memref<81xf32, #tpu.memory_space<smem>>
    %c14 = arith.constant 14 : index
    %14 = memref.load %arg2[%c14] : memref<81xf32, #tpu.memory_space<smem>>
    %c15 = arith.constant 15 : index
    %15 = memref.load %arg2[%c15] : memref<81xf32, #tpu.memory_space<smem>>
    %c16 = arith.constant 16 : index
    %16 = memref.load %arg2[%c16] : memref<81xf32, #tpu.memory_space<smem>>
    %c17 = arith.constant 17 : index
    %17 = memref.load %arg2[%c17] : memref<81xf32, #tpu.memory_space<smem>>
    %c18 = arith.constant 18 : index
    %18 = memref.load %arg2[%c18] : memref<81xf32, #tpu.memory_space<smem>>
    %c19 = arith.constant 19 : index
    %19 = memref.load %arg2[%c19] : memref<81xf32, #tpu.memory_space<smem>>
    %c20 = arith.constant 20 : index
    %20 = memref.load %arg2[%c20] : memref<81xf32, #tpu.memory_space<smem>>
    %c21 = arith.constant 21 : index
    %21 = memref.load %arg2[%c21] : memref<81xf32, #tpu.memory_space<smem>>
    %c22 = arith.constant 22 : index
    %22 = memref.load %arg2[%c22] : memref<81xf32, #tpu.memory_space<smem>>
    %c23 = arith.constant 23 : index
    %23 = memref.load %arg2[%c23] : memref<81xf32, #tpu.memory_space<smem>>
    %c24 = arith.constant 24 : index
    %24 = memref.load %arg2[%c24] : memref<81xf32, #tpu.memory_space<smem>>
    %c25 = arith.constant 25 : index
    %25 = memref.load %arg2[%c25] : memref<81xf32, #tpu.memory_space<smem>>
    %c26 = arith.constant 26 : index
    %26 = memref.load %arg2[%c26] : memref<81xf32, #tpu.memory_space<smem>>
    %c27 = arith.constant 27 : index
    %27 = memref.load %arg2[%c27] : memref<81xf32, #tpu.memory_space<smem>>
    %c28 = arith.constant 28 : index
    %28 = memref.load %arg2[%c28] : memref<81xf32, #tpu.memory_space<smem>>
    %c29 = arith.constant 29 : index
    %29 = memref.load %arg2[%c29] : memref<81xf32, #tpu.memory_space<smem>>
    %c30 = arith.constant 30 : index
    %30 = memref.load %arg2[%c30] : memref<81xf32, #tpu.memory_space<smem>>
    %c31 = arith.constant 31 : index
    %31 = memref.load %arg2[%c31] : memref<81xf32, #tpu.memory_space<smem>>
    %c32 = arith.constant 32 : index
    %32 = memref.load %arg2[%c32] : memref<81xf32, #tpu.memory_space<smem>>
    %c33 = arith.constant 33 : index
    %33 = memref.load %arg2[%c33] : memref<81xf32, #tpu.memory_space<smem>>
    %c34 = arith.constant 34 : index
    %34 = memref.load %arg2[%c34] : memref<81xf32, #tpu.memory_space<smem>>
    %c35 = arith.constant 35 : index
    %35 = memref.load %arg2[%c35] : memref<81xf32, #tpu.memory_space<smem>>
    %c36 = arith.constant 36 : index
    %36 = memref.load %arg2[%c36] : memref<81xf32, #tpu.memory_space<smem>>
    %c37 = arith.constant 37 : index
    %37 = memref.load %arg2[%c37] : memref<81xf32, #tpu.memory_space<smem>>
    %c38 = arith.constant 38 : index
    %38 = memref.load %arg2[%c38] : memref<81xf32, #tpu.memory_space<smem>>
    %c39 = arith.constant 39 : index
    %39 = memref.load %arg2[%c39] : memref<81xf32, #tpu.memory_space<smem>>
    %c40 = arith.constant 40 : index
    %40 = memref.load %arg2[%c40] : memref<81xf32, #tpu.memory_space<smem>>
    %c41 = arith.constant 41 : index
    %41 = memref.load %arg2[%c41] : memref<81xf32, #tpu.memory_space<smem>>
    %c42 = arith.constant 42 : index
    %42 = memref.load %arg2[%c42] : memref<81xf32, #tpu.memory_space<smem>>
    %c43 = arith.constant 43 : index
    %43 = memref.load %arg2[%c43] : memref<81xf32, #tpu.memory_space<smem>>
    %c44 = arith.constant 44 : index
    %44 = memref.load %arg2[%c44] : memref<81xf32, #tpu.memory_space<smem>>
    %c45 = arith.constant 45 : index
    %45 = memref.load %arg2[%c45] : memref<81xf32, #tpu.memory_space<smem>>
    %c46 = arith.constant 46 : index
    %46 = memref.load %arg2[%c46] : memref<81xf32, #tpu.memory_space<smem>>
    %c47 = arith.constant 47 : index
    %47 = memref.load %arg2[%c47] : memref<81xf32, #tpu.memory_space<smem>>
    %c48 = arith.constant 48 : index
    %48 = memref.load %arg2[%c48] : memref<81xf32, #tpu.memory_space<smem>>
    %c49 = arith.constant 49 : index
    %49 = memref.load %arg2[%c49] : memref<81xf32, #tpu.memory_space<smem>>
    %c50 = arith.constant 50 : index
    %50 = memref.load %arg2[%c50] : memref<81xf32, #tpu.memory_space<smem>>
    %c51 = arith.constant 51 : index
    %51 = memref.load %arg2[%c51] : memref<81xf32, #tpu.memory_space<smem>>
    %c52 = arith.constant 52 : index
    %52 = memref.load %arg2[%c52] : memref<81xf32, #tpu.memory_space<smem>>
    %c53 = arith.constant 53 : index
    %53 = memref.load %arg2[%c53] : memref<81xf32, #tpu.memory_space<smem>>
    %c54 = arith.constant 54 : index
    %54 = memref.load %arg2[%c54] : memref<81xf32, #tpu.memory_space<smem>>
    %c55 = arith.constant 55 : index
    %55 = memref.load %arg2[%c55] : memref<81xf32, #tpu.memory_space<smem>>
    %c56 = arith.constant 56 : index
    %56 = memref.load %arg2[%c56] : memref<81xf32, #tpu.memory_space<smem>>
    %c57 = arith.constant 57 : index
    %57 = memref.load %arg2[%c57] : memref<81xf32, #tpu.memory_space<smem>>
    %c58 = arith.constant 58 : index
    %58 = memref.load %arg2[%c58] : memref<81xf32, #tpu.memory_space<smem>>
    %c59 = arith.constant 59 : index
    %59 = memref.load %arg2[%c59] : memref<81xf32, #tpu.memory_space<smem>>
    %c60 = arith.constant 60 : index
    %60 = memref.load %arg2[%c60] : memref<81xf32, #tpu.memory_space<smem>>
    %c61 = arith.constant 61 : index
    %61 = memref.load %arg2[%c61] : memref<81xf32, #tpu.memory_space<smem>>
    %c62 = arith.constant 62 : index
    %62 = memref.load %arg2[%c62] : memref<81xf32, #tpu.memory_space<smem>>
    %c63 = arith.constant 63 : index
    %63 = memref.load %arg2[%c63] : memref<81xf32, #tpu.memory_space<smem>>
    %c64 = arith.constant 64 : index
    %64 = memref.load %arg2[%c64] : memref<81xf32, #tpu.memory_space<smem>>
    %c65 = arith.constant 65 : index
    %65 = memref.load %arg2[%c65] : memref<81xf32, #tpu.memory_space<smem>>
    %c66 = arith.constant 66 : index
    %66 = memref.load %arg2[%c66] : memref<81xf32, #tpu.memory_space<smem>>
    %c67 = arith.constant 67 : index
    %67 = memref.load %arg2[%c67] : memref<81xf32, #tpu.memory_space<smem>>
    %c68 = arith.constant 68 : index
    %68 = memref.load %arg2[%c68] : memref<81xf32, #tpu.memory_space<smem>>
    %c69 = arith.constant 69 : index
    %69 = memref.load %arg2[%c69] : memref<81xf32, #tpu.memory_space<smem>>
    %c70 = arith.constant 70 : index
    %70 = memref.load %arg2[%c70] : memref<81xf32, #tpu.memory_space<smem>>
    %c71 = arith.constant 71 : index
    %71 = memref.load %arg2[%c71] : memref<81xf32, #tpu.memory_space<smem>>
    %c72 = arith.constant 72 : index
    %72 = memref.load %arg2[%c72] : memref<81xf32, #tpu.memory_space<smem>>
    %c73 = arith.constant 73 : index
    %73 = memref.load %arg2[%c73] : memref<81xf32, #tpu.memory_space<smem>>
    %c74 = arith.constant 74 : index
    %74 = memref.load %arg2[%c74] : memref<81xf32, #tpu.memory_space<smem>>
    %c75 = arith.constant 75 : index
    %75 = memref.load %arg2[%c75] : memref<81xf32, #tpu.memory_space<smem>>
    %c76 = arith.constant 76 : index
    %76 = memref.load %arg2[%c76] : memref<81xf32, #tpu.memory_space<smem>>
    %c77 = arith.constant 77 : index
    %77 = memref.load %arg2[%c77] : memref<81xf32, #tpu.memory_space<smem>>
    %c78 = arith.constant 78 : index
    %78 = memref.load %arg2[%c78] : memref<81xf32, #tpu.memory_space<smem>>
    %c79 = arith.constant 79 : index
    %79 = memref.load %arg2[%c79] : memref<81xf32, #tpu.memory_space<smem>>
    %c80 = arith.constant 80 : index
    %80 = memref.load %arg2[%c80] : memref<81xf32, #tpu.memory_space<smem>>
    %c0_0 = arith.constant 0 : index
    %81 = memref.load %arg3[%c0_0] : memref<9xf32, #tpu.memory_space<smem>>
    %c1_1 = arith.constant 1 : index
    %82 = memref.load %arg3[%c1_1] : memref<9xf32, #tpu.memory_space<smem>>
    %c2_2 = arith.constant 2 : index
    %83 = memref.load %arg3[%c2_2] : memref<9xf32, #tpu.memory_space<smem>>
    %c3_3 = arith.constant 3 : index
    %84 = memref.load %arg3[%c3_3] : memref<9xf32, #tpu.memory_space<smem>>
    %c4_4 = arith.constant 4 : index
    %85 = memref.load %arg3[%c4_4] : memref<9xf32, #tpu.memory_space<smem>>
    %c5_5 = arith.constant 5 : index
    %86 = memref.load %arg3[%c5_5] : memref<9xf32, #tpu.memory_space<smem>>
    %c6_6 = arith.constant 6 : index
    %87 = memref.load %arg3[%c6_6] : memref<9xf32, #tpu.memory_space<smem>>
    %c7_7 = arith.constant 7 : index
    %88 = memref.load %arg3[%c7_7] : memref<9xf32, #tpu.memory_space<smem>>
    %c8_8 = arith.constant 8 : index
    %89 = memref.load %arg3[%c8_8] : memref<9xf32, #tpu.memory_space<smem>>
    %c0_9 = arith.constant 0 : index
    %90 = memref.load %arg4[%c0_9] : memref<81xf32, #tpu.memory_space<smem>>
    %c1_10 = arith.constant 1 : index
    %91 = memref.load %arg4[%c1_10] : memref<81xf32, #tpu.memory_space<smem>>
    %c2_11 = arith.constant 2 : index
    %92 = memref.load %arg4[%c2_11] : memref<81xf32, #tpu.memory_space<smem>>
    %c3_12 = arith.constant 3 : index
    %93 = memref.load %arg4[%c3_12] : memref<81xf32, #tpu.memory_space<smem>>
    %c4_13 = arith.constant 4 : index
    %94 = memref.load %arg4[%c4_13] : memref<81xf32, #tpu.memory_space<smem>>
    %c5_14 = arith.constant 5 : index
    %95 = memref.load %arg4[%c5_14] : memref<81xf32, #tpu.memory_space<smem>>
    %c6_15 = arith.constant 6 : index
    %96 = memref.load %arg4[%c6_15] : memref<81xf32, #tpu.memory_space<smem>>
    %c7_16 = arith.constant 7 : index
    %97 = memref.load %arg4[%c7_16] : memref<81xf32, #tpu.memory_space<smem>>
    %c8_17 = arith.constant 8 : index
    %98 = memref.load %arg4[%c8_17] : memref<81xf32, #tpu.memory_space<smem>>
    %c9_18 = arith.constant 9 : index
    %99 = memref.load %arg4[%c9_18] : memref<81xf32, #tpu.memory_space<smem>>
    %c10_19 = arith.constant 10 : index
    %100 = memref.load %arg4[%c10_19] : memref<81xf32, #tpu.memory_space<smem>>
    %c11_20 = arith.constant 11 : index
    %101 = memref.load %arg4[%c11_20] : memref<81xf32, #tpu.memory_space<smem>>
    %c12_21 = arith.constant 12 : index
    %102 = memref.load %arg4[%c12_21] : memref<81xf32, #tpu.memory_space<smem>>
    %c13_22 = arith.constant 13 : index
    %103 = memref.load %arg4[%c13_22] : memref<81xf32, #tpu.memory_space<smem>>
    %c14_23 = arith.constant 14 : index
    %104 = memref.load %arg4[%c14_23] : memref<81xf32, #tpu.memory_space<smem>>
    %c15_24 = arith.constant 15 : index
    %105 = memref.load %arg4[%c15_24] : memref<81xf32, #tpu.memory_space<smem>>
    %c16_25 = arith.constant 16 : index
    %106 = memref.load %arg4[%c16_25] : memref<81xf32, #tpu.memory_space<smem>>
    %c17_26 = arith.constant 17 : index
    %107 = memref.load %arg4[%c17_26] : memref<81xf32, #tpu.memory_space<smem>>
    %c18_27 = arith.constant 18 : index
    %108 = memref.load %arg4[%c18_27] : memref<81xf32, #tpu.memory_space<smem>>
    %c19_28 = arith.constant 19 : index
    %109 = memref.load %arg4[%c19_28] : memref<81xf32, #tpu.memory_space<smem>>
    %c20_29 = arith.constant 20 : index
    %110 = memref.load %arg4[%c20_29] : memref<81xf32, #tpu.memory_space<smem>>
    %c21_30 = arith.constant 21 : index
    %111 = memref.load %arg4[%c21_30] : memref<81xf32, #tpu.memory_space<smem>>
    %c22_31 = arith.constant 22 : index
    %112 = memref.load %arg4[%c22_31] : memref<81xf32, #tpu.memory_space<smem>>
    %c23_32 = arith.constant 23 : index
    %113 = memref.load %arg4[%c23_32] : memref<81xf32, #tpu.memory_space<smem>>
    %c24_33 = arith.constant 24 : index
    %114 = memref.load %arg4[%c24_33] : memref<81xf32, #tpu.memory_space<smem>>
    %c25_34 = arith.constant 25 : index
    %115 = memref.load %arg4[%c25_34] : memref<81xf32, #tpu.memory_space<smem>>
    %c26_35 = arith.constant 26 : index
    %116 = memref.load %arg4[%c26_35] : memref<81xf32, #tpu.memory_space<smem>>
    %c27_36 = arith.constant 27 : index
    %117 = memref.load %arg4[%c27_36] : memref<81xf32, #tpu.memory_space<smem>>
    %c28_37 = arith.constant 28 : index
    %118 = memref.load %arg4[%c28_37] : memref<81xf32, #tpu.memory_space<smem>>
    %c29_38 = arith.constant 29 : index
    %119 = memref.load %arg4[%c29_38] : memref<81xf32, #tpu.memory_space<smem>>
    %c30_39 = arith.constant 30 : index
    %120 = memref.load %arg4[%c30_39] : memref<81xf32, #tpu.memory_space<smem>>
    %c31_40 = arith.constant 31 : index
    %121 = memref.load %arg4[%c31_40] : memref<81xf32, #tpu.memory_space<smem>>
    %c32_41 = arith.constant 32 : index
    %122 = memref.load %arg4[%c32_41] : memref<81xf32, #tpu.memory_space<smem>>
    %c33_42 = arith.constant 33 : index
    %123 = memref.load %arg4[%c33_42] : memref<81xf32, #tpu.memory_space<smem>>
    %c34_43 = arith.constant 34 : index
    %124 = memref.load %arg4[%c34_43] : memref<81xf32, #tpu.memory_space<smem>>
    %c35_44 = arith.constant 35 : index
    %125 = memref.load %arg4[%c35_44] : memref<81xf32, #tpu.memory_space<smem>>
    %c36_45 = arith.constant 36 : index
    %126 = memref.load %arg4[%c36_45] : memref<81xf32, #tpu.memory_space<smem>>
    %c37_46 = arith.constant 37 : index
    %127 = memref.load %arg4[%c37_46] : memref<81xf32, #tpu.memory_space<smem>>
    %c38_47 = arith.constant 38 : index
    %128 = memref.load %arg4[%c38_47] : memref<81xf32, #tpu.memory_space<smem>>
    %c39_48 = arith.constant 39 : index
    %129 = memref.load %arg4[%c39_48] : memref<81xf32, #tpu.memory_space<smem>>
    %c40_49 = arith.constant 40 : index
    %130 = memref.load %arg4[%c40_49] : memref<81xf32, #tpu.memory_space<smem>>
    %c41_50 = arith.constant 41 : index
    %131 = memref.load %arg4[%c41_50] : memref<81xf32, #tpu.memory_space<smem>>
    %c42_51 = arith.constant 42 : index
    %132 = memref.load %arg4[%c42_51] : memref<81xf32, #tpu.memory_space<smem>>
    %c43_52 = arith.constant 43 : index
    %133 = memref.load %arg4[%c43_52] : memref<81xf32, #tpu.memory_space<smem>>
    %c44_53 = arith.constant 44 : index
    %134 = memref.load %arg4[%c44_53] : memref<81xf32, #tpu.memory_space<smem>>
    %c45_54 = arith.constant 45 : index
    %135 = memref.load %arg4[%c45_54] : memref<81xf32, #tpu.memory_space<smem>>
    %c46_55 = arith.constant 46 : index
    %136 = memref.load %arg4[%c46_55] : memref<81xf32, #tpu.memory_space<smem>>
    %c47_56 = arith.constant 47 : index
    %137 = memref.load %arg4[%c47_56] : memref<81xf32, #tpu.memory_space<smem>>
    %c48_57 = arith.constant 48 : index
    %138 = memref.load %arg4[%c48_57] : memref<81xf32, #tpu.memory_space<smem>>
    %c49_58 = arith.constant 49 : index
    %139 = memref.load %arg4[%c49_58] : memref<81xf32, #tpu.memory_space<smem>>
    %c50_59 = arith.constant 50 : index
    %140 = memref.load %arg4[%c50_59] : memref<81xf32, #tpu.memory_space<smem>>
    %c51_60 = arith.constant 51 : index
    %141 = memref.load %arg4[%c51_60] : memref<81xf32, #tpu.memory_space<smem>>
    %c52_61 = arith.constant 52 : index
    %142 = memref.load %arg4[%c52_61] : memref<81xf32, #tpu.memory_space<smem>>
    %c53_62 = arith.constant 53 : index
    %143 = memref.load %arg4[%c53_62] : memref<81xf32, #tpu.memory_space<smem>>
    %c54_63 = arith.constant 54 : index
    %144 = memref.load %arg4[%c54_63] : memref<81xf32, #tpu.memory_space<smem>>
    %c55_64 = arith.constant 55 : index
    %145 = memref.load %arg4[%c55_64] : memref<81xf32, #tpu.memory_space<smem>>
    %c56_65 = arith.constant 56 : index
    %146 = memref.load %arg4[%c56_65] : memref<81xf32, #tpu.memory_space<smem>>
    %c57_66 = arith.constant 57 : index
    %147 = memref.load %arg4[%c57_66] : memref<81xf32, #tpu.memory_space<smem>>
    %c58_67 = arith.constant 58 : index
    %148 = memref.load %arg4[%c58_67] : memref<81xf32, #tpu.memory_space<smem>>
    %c59_68 = arith.constant 59 : index
    %149 = memref.load %arg4[%c59_68] : memref<81xf32, #tpu.memory_space<smem>>
    %c60_69 = arith.constant 60 : index
    %150 = memref.load %arg4[%c60_69] : memref<81xf32, #tpu.memory_space<smem>>
    %c61_70 = arith.constant 61 : index
    %151 = memref.load %arg4[%c61_70] : memref<81xf32, #tpu.memory_space<smem>>
    %c62_71 = arith.constant 62 : index
    %152 = memref.load %arg4[%c62_71] : memref<81xf32, #tpu.memory_space<smem>>
    %c63_72 = arith.constant 63 : index
    %153 = memref.load %arg4[%c63_72] : memref<81xf32, #tpu.memory_space<smem>>
    %c64_73 = arith.constant 64 : index
    %154 = memref.load %arg4[%c64_73] : memref<81xf32, #tpu.memory_space<smem>>
    %c65_74 = arith.constant 65 : index
    %155 = memref.load %arg4[%c65_74] : memref<81xf32, #tpu.memory_space<smem>>
    %c66_75 = arith.constant 66 : index
    %156 = memref.load %arg4[%c66_75] : memref<81xf32, #tpu.memory_space<smem>>
    %c67_76 = arith.constant 67 : index
    %157 = memref.load %arg4[%c67_76] : memref<81xf32, #tpu.memory_space<smem>>
    %c68_77 = arith.constant 68 : index
    %158 = memref.load %arg4[%c68_77] : memref<81xf32, #tpu.memory_space<smem>>
    %c69_78 = arith.constant 69 : index
    %159 = memref.load %arg4[%c69_78] : memref<81xf32, #tpu.memory_space<smem>>
    %c70_79 = arith.constant 70 : index
    %160 = memref.load %arg4[%c70_79] : memref<81xf32, #tpu.memory_space<smem>>
    %c71_80 = arith.constant 71 : index
    %161 = memref.load %arg4[%c71_80] : memref<81xf32, #tpu.memory_space<smem>>
    %c72_81 = arith.constant 72 : index
    %162 = memref.load %arg4[%c72_81] : memref<81xf32, #tpu.memory_space<smem>>
    %c73_82 = arith.constant 73 : index
    %163 = memref.load %arg4[%c73_82] : memref<81xf32, #tpu.memory_space<smem>>
    %c74_83 = arith.constant 74 : index
    %164 = memref.load %arg4[%c74_83] : memref<81xf32, #tpu.memory_space<smem>>
    %c75_84 = arith.constant 75 : index
    %165 = memref.load %arg4[%c75_84] : memref<81xf32, #tpu.memory_space<smem>>
    %c76_85 = arith.constant 76 : index
    %166 = memref.load %arg4[%c76_85] : memref<81xf32, #tpu.memory_space<smem>>
    %c77_86 = arith.constant 77 : index
    %167 = memref.load %arg4[%c77_86] : memref<81xf32, #tpu.memory_space<smem>>
    %c78_87 = arith.constant 78 : index
    %168 = memref.load %arg4[%c78_87] : memref<81xf32, #tpu.memory_space<smem>>
    %c79_88 = arith.constant 79 : index
    %169 = memref.load %arg4[%c79_88] : memref<81xf32, #tpu.memory_space<smem>>
    %c80_89 = arith.constant 80 : index
    %170 = memref.load %arg4[%c80_89] : memref<81xf32, #tpu.memory_space<smem>>
    %c0_90 = arith.constant 0 : index
    %171 = memref.load %arg5[%c0_90] : memref<9xf32, #tpu.memory_space<smem>>
    %c1_91 = arith.constant 1 : index
    %172 = memref.load %arg5[%c1_91] : memref<9xf32, #tpu.memory_space<smem>>
    %c2_92 = arith.constant 2 : index
    %173 = memref.load %arg5[%c2_92] : memref<9xf32, #tpu.memory_space<smem>>
    %c3_93 = arith.constant 3 : index
    %174 = memref.load %arg5[%c3_93] : memref<9xf32, #tpu.memory_space<smem>>
    %c4_94 = arith.constant 4 : index
    %175 = memref.load %arg5[%c4_94] : memref<9xf32, #tpu.memory_space<smem>>
    %c5_95 = arith.constant 5 : index
    %176 = memref.load %arg5[%c5_95] : memref<9xf32, #tpu.memory_space<smem>>
    %c6_96 = arith.constant 6 : index
    %177 = memref.load %arg5[%c6_96] : memref<9xf32, #tpu.memory_space<smem>>
    %c7_97 = arith.constant 7 : index
    %178 = memref.load %arg5[%c7_97] : memref<9xf32, #tpu.memory_space<smem>>
    %c8_98 = arith.constant 8 : index
    %179 = memref.load %arg5[%c8_98] : memref<9xf32, #tpu.memory_space<smem>>
    %c0_99 = arith.constant 0 : index
    %180 = memref.load %arg6[%c0_99] : memref<81xf32, #tpu.memory_space<smem>>
    %c1_100 = arith.constant 1 : index
    %181 = memref.load %arg6[%c1_100] : memref<81xf32, #tpu.memory_space<smem>>
    %c2_101 = arith.constant 2 : index
    %182 = memref.load %arg6[%c2_101] : memref<81xf32, #tpu.memory_space<smem>>
    %c3_102 = arith.constant 3 : index
    %183 = memref.load %arg6[%c3_102] : memref<81xf32, #tpu.memory_space<smem>>
    %c4_103 = arith.constant 4 : index
    %184 = memref.load %arg6[%c4_103] : memref<81xf32, #tpu.memory_space<smem>>
    %c5_104 = arith.constant 5 : index
    %185 = memref.load %arg6[%c5_104] : memref<81xf32, #tpu.memory_space<smem>>
    %c6_105 = arith.constant 6 : index
    %186 = memref.load %arg6[%c6_105] : memref<81xf32, #tpu.memory_space<smem>>
    %c7_106 = arith.constant 7 : index
    %187 = memref.load %arg6[%c7_106] : memref<81xf32, #tpu.memory_space<smem>>
    %c8_107 = arith.constant 8 : index
    %188 = memref.load %arg6[%c8_107] : memref<81xf32, #tpu.memory_space<smem>>
    %c9_108 = arith.constant 9 : index
    %189 = memref.load %arg6[%c9_108] : memref<81xf32, #tpu.memory_space<smem>>
    %c10_109 = arith.constant 10 : index
    %190 = memref.load %arg6[%c10_109] : memref<81xf32, #tpu.memory_space<smem>>
    %c11_110 = arith.constant 11 : index
    %191 = memref.load %arg6[%c11_110] : memref<81xf32, #tpu.memory_space<smem>>
    %c12_111 = arith.constant 12 : index
    %192 = memref.load %arg6[%c12_111] : memref<81xf32, #tpu.memory_space<smem>>
    %c13_112 = arith.constant 13 : index
    %193 = memref.load %arg6[%c13_112] : memref<81xf32, #tpu.memory_space<smem>>
    %c14_113 = arith.constant 14 : index
    %194 = memref.load %arg6[%c14_113] : memref<81xf32, #tpu.memory_space<smem>>
    %c15_114 = arith.constant 15 : index
    %195 = memref.load %arg6[%c15_114] : memref<81xf32, #tpu.memory_space<smem>>
    %c16_115 = arith.constant 16 : index
    %196 = memref.load %arg6[%c16_115] : memref<81xf32, #tpu.memory_space<smem>>
    %c17_116 = arith.constant 17 : index
    %197 = memref.load %arg6[%c17_116] : memref<81xf32, #tpu.memory_space<smem>>
    %c18_117 = arith.constant 18 : index
    %198 = memref.load %arg6[%c18_117] : memref<81xf32, #tpu.memory_space<smem>>
    %c19_118 = arith.constant 19 : index
    %199 = memref.load %arg6[%c19_118] : memref<81xf32, #tpu.memory_space<smem>>
    %c20_119 = arith.constant 20 : index
    %200 = memref.load %arg6[%c20_119] : memref<81xf32, #tpu.memory_space<smem>>
    %c21_120 = arith.constant 21 : index
    %201 = memref.load %arg6[%c21_120] : memref<81xf32, #tpu.memory_space<smem>>
    %c22_121 = arith.constant 22 : index
    %202 = memref.load %arg6[%c22_121] : memref<81xf32, #tpu.memory_space<smem>>
    %c23_122 = arith.constant 23 : index
    %203 = memref.load %arg6[%c23_122] : memref<81xf32, #tpu.memory_space<smem>>
    %c24_123 = arith.constant 24 : index
    %204 = memref.load %arg6[%c24_123] : memref<81xf32, #tpu.memory_space<smem>>
    %c25_124 = arith.constant 25 : index
    %205 = memref.load %arg6[%c25_124] : memref<81xf32, #tpu.memory_space<smem>>
    %c26_125 = arith.constant 26 : index
    %206 = memref.load %arg6[%c26_125] : memref<81xf32, #tpu.memory_space<smem>>
    %c27_126 = arith.constant 27 : index
    %207 = memref.load %arg6[%c27_126] : memref<81xf32, #tpu.memory_space<smem>>
    %c28_127 = arith.constant 28 : index
    %208 = memref.load %arg6[%c28_127] : memref<81xf32, #tpu.memory_space<smem>>
    %c29_128 = arith.constant 29 : index
    %209 = memref.load %arg6[%c29_128] : memref<81xf32, #tpu.memory_space<smem>>
    %c30_129 = arith.constant 30 : index
    %210 = memref.load %arg6[%c30_129] : memref<81xf32, #tpu.memory_space<smem>>
    %c31_130 = arith.constant 31 : index
    %211 = memref.load %arg6[%c31_130] : memref<81xf32, #tpu.memory_space<smem>>
    %c32_131 = arith.constant 32 : index
    %212 = memref.load %arg6[%c32_131] : memref<81xf32, #tpu.memory_space<smem>>
    %c33_132 = arith.constant 33 : index
    %213 = memref.load %arg6[%c33_132] : memref<81xf32, #tpu.memory_space<smem>>
    %c34_133 = arith.constant 34 : index
    %214 = memref.load %arg6[%c34_133] : memref<81xf32, #tpu.memory_space<smem>>
    %c35_134 = arith.constant 35 : index
    %215 = memref.load %arg6[%c35_134] : memref<81xf32, #tpu.memory_space<smem>>
    %c36_135 = arith.constant 36 : index
    %216 = memref.load %arg6[%c36_135] : memref<81xf32, #tpu.memory_space<smem>>
    %c37_136 = arith.constant 37 : index
    %217 = memref.load %arg6[%c37_136] : memref<81xf32, #tpu.memory_space<smem>>
    %c38_137 = arith.constant 38 : index
    %218 = memref.load %arg6[%c38_137] : memref<81xf32, #tpu.memory_space<smem>>
    %c39_138 = arith.constant 39 : index
    %219 = memref.load %arg6[%c39_138] : memref<81xf32, #tpu.memory_space<smem>>
    %c40_139 = arith.constant 40 : index
    %220 = memref.load %arg6[%c40_139] : memref<81xf32, #tpu.memory_space<smem>>
    %c41_140 = arith.constant 41 : index
    %221 = memref.load %arg6[%c41_140] : memref<81xf32, #tpu.memory_space<smem>>
    %c42_141 = arith.constant 42 : index
    %222 = memref.load %arg6[%c42_141] : memref<81xf32, #tpu.memory_space<smem>>
    %c43_142 = arith.constant 43 : index
    %223 = memref.load %arg6[%c43_142] : memref<81xf32, #tpu.memory_space<smem>>
    %c44_143 = arith.constant 44 : index
    %224 = memref.load %arg6[%c44_143] : memref<81xf32, #tpu.memory_space<smem>>
    %c45_144 = arith.constant 45 : index
    %225 = memref.load %arg6[%c45_144] : memref<81xf32, #tpu.memory_space<smem>>
    %c46_145 = arith.constant 46 : index
    %226 = memref.load %arg6[%c46_145] : memref<81xf32, #tpu.memory_space<smem>>
    %c47_146 = arith.constant 47 : index
    %227 = memref.load %arg6[%c47_146] : memref<81xf32, #tpu.memory_space<smem>>
    %c48_147 = arith.constant 48 : index
    %228 = memref.load %arg6[%c48_147] : memref<81xf32, #tpu.memory_space<smem>>
    %c49_148 = arith.constant 49 : index
    %229 = memref.load %arg6[%c49_148] : memref<81xf32, #tpu.memory_space<smem>>
    %c50_149 = arith.constant 50 : index
    %230 = memref.load %arg6[%c50_149] : memref<81xf32, #tpu.memory_space<smem>>
    %c51_150 = arith.constant 51 : index
    %231 = memref.load %arg6[%c51_150] : memref<81xf32, #tpu.memory_space<smem>>
    %c52_151 = arith.constant 52 : index
    %232 = memref.load %arg6[%c52_151] : memref<81xf32, #tpu.memory_space<smem>>
    %c53_152 = arith.constant 53 : index
    %233 = memref.load %arg6[%c53_152] : memref<81xf32, #tpu.memory_space<smem>>
    %c54_153 = arith.constant 54 : index
    %234 = memref.load %arg6[%c54_153] : memref<81xf32, #tpu.memory_space<smem>>
    %c55_154 = arith.constant 55 : index
    %235 = memref.load %arg6[%c55_154] : memref<81xf32, #tpu.memory_space<smem>>
    %c56_155 = arith.constant 56 : index
    %236 = memref.load %arg6[%c56_155] : memref<81xf32, #tpu.memory_space<smem>>
    %c57_156 = arith.constant 57 : index
    %237 = memref.load %arg6[%c57_156] : memref<81xf32, #tpu.memory_space<smem>>
    %c58_157 = arith.constant 58 : index
    %238 = memref.load %arg6[%c58_157] : memref<81xf32, #tpu.memory_space<smem>>
    %c59_158 = arith.constant 59 : index
    %239 = memref.load %arg6[%c59_158] : memref<81xf32, #tpu.memory_space<smem>>
    %c60_159 = arith.constant 60 : index
    %240 = memref.load %arg6[%c60_159] : memref<81xf32, #tpu.memory_space<smem>>
    %c61_160 = arith.constant 61 : index
    %241 = memref.load %arg6[%c61_160] : memref<81xf32, #tpu.memory_space<smem>>
    %c62_161 = arith.constant 62 : index
    %242 = memref.load %arg6[%c62_161] : memref<81xf32, #tpu.memory_space<smem>>
    %c63_162 = arith.constant 63 : index
    %243 = memref.load %arg6[%c63_162] : memref<81xf32, #tpu.memory_space<smem>>
    %c64_163 = arith.constant 64 : index
    %244 = memref.load %arg6[%c64_163] : memref<81xf32, #tpu.memory_space<smem>>
    %c65_164 = arith.constant 65 : index
    %245 = memref.load %arg6[%c65_164] : memref<81xf32, #tpu.memory_space<smem>>
    %c66_165 = arith.constant 66 : index
    %246 = memref.load %arg6[%c66_165] : memref<81xf32, #tpu.memory_space<smem>>
    %c67_166 = arith.constant 67 : index
    %247 = memref.load %arg6[%c67_166] : memref<81xf32, #tpu.memory_space<smem>>
    %c68_167 = arith.constant 68 : index
    %248 = memref.load %arg6[%c68_167] : memref<81xf32, #tpu.memory_space<smem>>
    %c69_168 = arith.constant 69 : index
    %249 = memref.load %arg6[%c69_168] : memref<81xf32, #tpu.memory_space<smem>>
    %c70_169 = arith.constant 70 : index
    %250 = memref.load %arg6[%c70_169] : memref<81xf32, #tpu.memory_space<smem>>
    %c71_170 = arith.constant 71 : index
    %251 = memref.load %arg6[%c71_170] : memref<81xf32, #tpu.memory_space<smem>>
    %c72_171 = arith.constant 72 : index
    %252 = memref.load %arg6[%c72_171] : memref<81xf32, #tpu.memory_space<smem>>
    %c73_172 = arith.constant 73 : index
    %253 = memref.load %arg6[%c73_172] : memref<81xf32, #tpu.memory_space<smem>>
    %c74_173 = arith.constant 74 : index
    %254 = memref.load %arg6[%c74_173] : memref<81xf32, #tpu.memory_space<smem>>
    %c75_174 = arith.constant 75 : index
    %255 = memref.load %arg6[%c75_174] : memref<81xf32, #tpu.memory_space<smem>>
    %c76_175 = arith.constant 76 : index
    %256 = memref.load %arg6[%c76_175] : memref<81xf32, #tpu.memory_space<smem>>
    %c77_176 = arith.constant 77 : index
    %257 = memref.load %arg6[%c77_176] : memref<81xf32, #tpu.memory_space<smem>>
    %c78_177 = arith.constant 78 : index
    %258 = memref.load %arg6[%c78_177] : memref<81xf32, #tpu.memory_space<smem>>
    %c79_178 = arith.constant 79 : index
    %259 = memref.load %arg6[%c79_178] : memref<81xf32, #tpu.memory_space<smem>>
    %c80_179 = arith.constant 80 : index
    %260 = memref.load %arg6[%c80_179] : memref<81xf32, #tpu.memory_space<smem>>
    %c0_180 = arith.constant 0 : index
    %261 = memref.load %arg7[%c0_180] : memref<9xf32, #tpu.memory_space<smem>>
    %c1_181 = arith.constant 1 : index
    %262 = memref.load %arg7[%c1_181] : memref<9xf32, #tpu.memory_space<smem>>
    %c2_182 = arith.constant 2 : index
    %263 = memref.load %arg7[%c2_182] : memref<9xf32, #tpu.memory_space<smem>>
    %c3_183 = arith.constant 3 : index
    %264 = memref.load %arg7[%c3_183] : memref<9xf32, #tpu.memory_space<smem>>
    %c4_184 = arith.constant 4 : index
    %265 = memref.load %arg7[%c4_184] : memref<9xf32, #tpu.memory_space<smem>>
    %c5_185 = arith.constant 5 : index
    %266 = memref.load %arg7[%c5_185] : memref<9xf32, #tpu.memory_space<smem>>
    %c6_186 = arith.constant 6 : index
    %267 = memref.load %arg7[%c6_186] : memref<9xf32, #tpu.memory_space<smem>>
    %c7_187 = arith.constant 7 : index
    %268 = memref.load %arg7[%c7_187] : memref<9xf32, #tpu.memory_space<smem>>
    %c8_188 = arith.constant 8 : index
    %269 = memref.load %arg7[%c8_188] : memref<9xf32, #tpu.memory_space<smem>>
    %c0_189 = arith.constant 0 : index
    %270 = memref.load %arg8[%c0_189] : memref<81xf32, #tpu.memory_space<smem>>
    %c1_190 = arith.constant 1 : index
    %271 = memref.load %arg8[%c1_190] : memref<81xf32, #tpu.memory_space<smem>>
    %c2_191 = arith.constant 2 : index
    %272 = memref.load %arg8[%c2_191] : memref<81xf32, #tpu.memory_space<smem>>
    %c3_192 = arith.constant 3 : index
    %273 = memref.load %arg8[%c3_192] : memref<81xf32, #tpu.memory_space<smem>>
    %c4_193 = arith.constant 4 : index
    %274 = memref.load %arg8[%c4_193] : memref<81xf32, #tpu.memory_space<smem>>
    %c5_194 = arith.constant 5 : index
    %275 = memref.load %arg8[%c5_194] : memref<81xf32, #tpu.memory_space<smem>>
    %c6_195 = arith.constant 6 : index
    %276 = memref.load %arg8[%c6_195] : memref<81xf32, #tpu.memory_space<smem>>
    %c7_196 = arith.constant 7 : index
    %277 = memref.load %arg8[%c7_196] : memref<81xf32, #tpu.memory_space<smem>>
    %c8_197 = arith.constant 8 : index
    %278 = memref.load %arg8[%c8_197] : memref<81xf32, #tpu.memory_space<smem>>
    %c9_198 = arith.constant 9 : index
    %279 = memref.load %arg8[%c9_198] : memref<81xf32, #tpu.memory_space<smem>>
    %c10_199 = arith.constant 10 : index
    %280 = memref.load %arg8[%c10_199] : memref<81xf32, #tpu.memory_space<smem>>
    %c11_200 = arith.constant 11 : index
    %281 = memref.load %arg8[%c11_200] : memref<81xf32, #tpu.memory_space<smem>>
    %c12_201 = arith.constant 12 : index
    %282 = memref.load %arg8[%c12_201] : memref<81xf32, #tpu.memory_space<smem>>
    %c13_202 = arith.constant 13 : index
    %283 = memref.load %arg8[%c13_202] : memref<81xf32, #tpu.memory_space<smem>>
    %c14_203 = arith.constant 14 : index
    %284 = memref.load %arg8[%c14_203] : memref<81xf32, #tpu.memory_space<smem>>
    %c15_204 = arith.constant 15 : index
    %285 = memref.load %arg8[%c15_204] : memref<81xf32, #tpu.memory_space<smem>>
    %c16_205 = arith.constant 16 : index
    %286 = memref.load %arg8[%c16_205] : memref<81xf32, #tpu.memory_space<smem>>
    %c17_206 = arith.constant 17 : index
    %287 = memref.load %arg8[%c17_206] : memref<81xf32, #tpu.memory_space<smem>>
    %c18_207 = arith.constant 18 : index
    %288 = memref.load %arg8[%c18_207] : memref<81xf32, #tpu.memory_space<smem>>
    %c19_208 = arith.constant 19 : index
    %289 = memref.load %arg8[%c19_208] : memref<81xf32, #tpu.memory_space<smem>>
    %c20_209 = arith.constant 20 : index
    %290 = memref.load %arg8[%c20_209] : memref<81xf32, #tpu.memory_space<smem>>
    %c21_210 = arith.constant 21 : index
    %291 = memref.load %arg8[%c21_210] : memref<81xf32, #tpu.memory_space<smem>>
    %c22_211 = arith.constant 22 : index
    %292 = memref.load %arg8[%c22_211] : memref<81xf32, #tpu.memory_space<smem>>
    %c23_212 = arith.constant 23 : index
    %293 = memref.load %arg8[%c23_212] : memref<81xf32, #tpu.memory_space<smem>>
    %c24_213 = arith.constant 24 : index
    %294 = memref.load %arg8[%c24_213] : memref<81xf32, #tpu.memory_space<smem>>
    %c25_214 = arith.constant 25 : index
    %295 = memref.load %arg8[%c25_214] : memref<81xf32, #tpu.memory_space<smem>>
    %c26_215 = arith.constant 26 : index
    %296 = memref.load %arg8[%c26_215] : memref<81xf32, #tpu.memory_space<smem>>
    %c27_216 = arith.constant 27 : index
    %297 = memref.load %arg8[%c27_216] : memref<81xf32, #tpu.memory_space<smem>>
    %c28_217 = arith.constant 28 : index
    %298 = memref.load %arg8[%c28_217] : memref<81xf32, #tpu.memory_space<smem>>
    %c29_218 = arith.constant 29 : index
    %299 = memref.load %arg8[%c29_218] : memref<81xf32, #tpu.memory_space<smem>>
    %c30_219 = arith.constant 30 : index
    %300 = memref.load %arg8[%c30_219] : memref<81xf32, #tpu.memory_space<smem>>
    %c31_220 = arith.constant 31 : index
    %301 = memref.load %arg8[%c31_220] : memref<81xf32, #tpu.memory_space<smem>>
    %c32_221 = arith.constant 32 : index
    %302 = memref.load %arg8[%c32_221] : memref<81xf32, #tpu.memory_space<smem>>
    %c33_222 = arith.constant 33 : index
    %303 = memref.load %arg8[%c33_222] : memref<81xf32, #tpu.memory_space<smem>>
    %c34_223 = arith.constant 34 : index
    %304 = memref.load %arg8[%c34_223] : memref<81xf32, #tpu.memory_space<smem>>
    %c35_224 = arith.constant 35 : index
    %305 = memref.load %arg8[%c35_224] : memref<81xf32, #tpu.memory_space<smem>>
    %c36_225 = arith.constant 36 : index
    %306 = memref.load %arg8[%c36_225] : memref<81xf32, #tpu.memory_space<smem>>
    %c37_226 = arith.constant 37 : index
    %307 = memref.load %arg8[%c37_226] : memref<81xf32, #tpu.memory_space<smem>>
    %c38_227 = arith.constant 38 : index
    %308 = memref.load %arg8[%c38_227] : memref<81xf32, #tpu.memory_space<smem>>
    %c39_228 = arith.constant 39 : index
    %309 = memref.load %arg8[%c39_228] : memref<81xf32, #tpu.memory_space<smem>>
    %c40_229 = arith.constant 40 : index
    %310 = memref.load %arg8[%c40_229] : memref<81xf32, #tpu.memory_space<smem>>
    %c41_230 = arith.constant 41 : index
    %311 = memref.load %arg8[%c41_230] : memref<81xf32, #tpu.memory_space<smem>>
    %c42_231 = arith.constant 42 : index
    %312 = memref.load %arg8[%c42_231] : memref<81xf32, #tpu.memory_space<smem>>
    %c43_232 = arith.constant 43 : index
    %313 = memref.load %arg8[%c43_232] : memref<81xf32, #tpu.memory_space<smem>>
    %c44_233 = arith.constant 44 : index
    %314 = memref.load %arg8[%c44_233] : memref<81xf32, #tpu.memory_space<smem>>
    %c45_234 = arith.constant 45 : index
    %315 = memref.load %arg8[%c45_234] : memref<81xf32, #tpu.memory_space<smem>>
    %c46_235 = arith.constant 46 : index
    %316 = memref.load %arg8[%c46_235] : memref<81xf32, #tpu.memory_space<smem>>
    %c47_236 = arith.constant 47 : index
    %317 = memref.load %arg8[%c47_236] : memref<81xf32, #tpu.memory_space<smem>>
    %c48_237 = arith.constant 48 : index
    %318 = memref.load %arg8[%c48_237] : memref<81xf32, #tpu.memory_space<smem>>
    %c49_238 = arith.constant 49 : index
    %319 = memref.load %arg8[%c49_238] : memref<81xf32, #tpu.memory_space<smem>>
    %c50_239 = arith.constant 50 : index
    %320 = memref.load %arg8[%c50_239] : memref<81xf32, #tpu.memory_space<smem>>
    %c51_240 = arith.constant 51 : index
    %321 = memref.load %arg8[%c51_240] : memref<81xf32, #tpu.memory_space<smem>>
    %c52_241 = arith.constant 52 : index
    %322 = memref.load %arg8[%c52_241] : memref<81xf32, #tpu.memory_space<smem>>
    %c53_242 = arith.constant 53 : index
    %323 = memref.load %arg8[%c53_242] : memref<81xf32, #tpu.memory_space<smem>>
    %c54_243 = arith.constant 54 : index
    %324 = memref.load %arg8[%c54_243] : memref<81xf32, #tpu.memory_space<smem>>
    %c55_244 = arith.constant 55 : index
    %325 = memref.load %arg8[%c55_244] : memref<81xf32, #tpu.memory_space<smem>>
    %c56_245 = arith.constant 56 : index
    %326 = memref.load %arg8[%c56_245] : memref<81xf32, #tpu.memory_space<smem>>
    %c57_246 = arith.constant 57 : index
    %327 = memref.load %arg8[%c57_246] : memref<81xf32, #tpu.memory_space<smem>>
    %c58_247 = arith.constant 58 : index
    %328 = memref.load %arg8[%c58_247] : memref<81xf32, #tpu.memory_space<smem>>
    %c59_248 = arith.constant 59 : index
    %329 = memref.load %arg8[%c59_248] : memref<81xf32, #tpu.memory_space<smem>>
    %c60_249 = arith.constant 60 : index
    %330 = memref.load %arg8[%c60_249] : memref<81xf32, #tpu.memory_space<smem>>
    %c61_250 = arith.constant 61 : index
    %331 = memref.load %arg8[%c61_250] : memref<81xf32, #tpu.memory_space<smem>>
    %c62_251 = arith.constant 62 : index
    %332 = memref.load %arg8[%c62_251] : memref<81xf32, #tpu.memory_space<smem>>
    %c63_252 = arith.constant 63 : index
    %333 = memref.load %arg8[%c63_252] : memref<81xf32, #tpu.memory_space<smem>>
    %c64_253 = arith.constant 64 : index
    %334 = memref.load %arg8[%c64_253] : memref<81xf32, #tpu.memory_space<smem>>
    %c65_254 = arith.constant 65 : index
    %335 = memref.load %arg8[%c65_254] : memref<81xf32, #tpu.memory_space<smem>>
    %c66_255 = arith.constant 66 : index
    %336 = memref.load %arg8[%c66_255] : memref<81xf32, #tpu.memory_space<smem>>
    %c67_256 = arith.constant 67 : index
    %337 = memref.load %arg8[%c67_256] : memref<81xf32, #tpu.memory_space<smem>>
    %c68_257 = arith.constant 68 : index
    %338 = memref.load %arg8[%c68_257] : memref<81xf32, #tpu.memory_space<smem>>
    %c69_258 = arith.constant 69 : index
    %339 = memref.load %arg8[%c69_258] : memref<81xf32, #tpu.memory_space<smem>>
    %c70_259 = arith.constant 70 : index
    %340 = memref.load %arg8[%c70_259] : memref<81xf32, #tpu.memory_space<smem>>
    %c71_260 = arith.constant 71 : index
    %341 = memref.load %arg8[%c71_260] : memref<81xf32, #tpu.memory_space<smem>>
    %c72_261 = arith.constant 72 : index
    %342 = memref.load %arg8[%c72_261] : memref<81xf32, #tpu.memory_space<smem>>
    %c73_262 = arith.constant 73 : index
    %343 = memref.load %arg8[%c73_262] : memref<81xf32, #tpu.memory_space<smem>>
    %c74_263 = arith.constant 74 : index
    %344 = memref.load %arg8[%c74_263] : memref<81xf32, #tpu.memory_space<smem>>
    %c75_264 = arith.constant 75 : index
    %345 = memref.load %arg8[%c75_264] : memref<81xf32, #tpu.memory_space<smem>>
    %c76_265 = arith.constant 76 : index
    %346 = memref.load %arg8[%c76_265] : memref<81xf32, #tpu.memory_space<smem>>
    %c77_266 = arith.constant 77 : index
    %347 = memref.load %arg8[%c77_266] : memref<81xf32, #tpu.memory_space<smem>>
    %c78_267 = arith.constant 78 : index
    %348 = memref.load %arg8[%c78_267] : memref<81xf32, #tpu.memory_space<smem>>
    %c79_268 = arith.constant 79 : index
    %349 = memref.load %arg8[%c79_268] : memref<81xf32, #tpu.memory_space<smem>>
    %c80_269 = arith.constant 80 : index
    %350 = memref.load %arg8[%c80_269] : memref<81xf32, #tpu.memory_space<smem>>
    %c0_270 = arith.constant 0 : index
    %351 = memref.load %arg9[%c0_270] : memref<9xf32, #tpu.memory_space<smem>>
    %c1_271 = arith.constant 1 : index
    %352 = memref.load %arg9[%c1_271] : memref<9xf32, #tpu.memory_space<smem>>
    %c2_272 = arith.constant 2 : index
    %353 = memref.load %arg9[%c2_272] : memref<9xf32, #tpu.memory_space<smem>>
    %c3_273 = arith.constant 3 : index
    %354 = memref.load %arg9[%c3_273] : memref<9xf32, #tpu.memory_space<smem>>
    %c4_274 = arith.constant 4 : index
    %355 = memref.load %arg9[%c4_274] : memref<9xf32, #tpu.memory_space<smem>>
    %c5_275 = arith.constant 5 : index
    %356 = memref.load %arg9[%c5_275] : memref<9xf32, #tpu.memory_space<smem>>
    %c6_276 = arith.constant 6 : index
    %357 = memref.load %arg9[%c6_276] : memref<9xf32, #tpu.memory_space<smem>>
    %c7_277 = arith.constant 7 : index
    %358 = memref.load %arg9[%c7_277] : memref<9xf32, #tpu.memory_space<smem>>
    %c8_278 = arith.constant 8 : index
    %359 = memref.load %arg9[%c8_278] : memref<9xf32, #tpu.memory_space<smem>>
    %c0_279 = arith.constant 0 : index
    %360 = memref.load %arg10[%c0_279] : memref<81xf32, #tpu.memory_space<smem>>
    %c1_280 = arith.constant 1 : index
    %361 = memref.load %arg10[%c1_280] : memref<81xf32, #tpu.memory_space<smem>>
    %c2_281 = arith.constant 2 : index
    %362 = memref.load %arg10[%c2_281] : memref<81xf32, #tpu.memory_space<smem>>
    %c3_282 = arith.constant 3 : index
    %363 = memref.load %arg10[%c3_282] : memref<81xf32, #tpu.memory_space<smem>>
    %c4_283 = arith.constant 4 : index
    %364 = memref.load %arg10[%c4_283] : memref<81xf32, #tpu.memory_space<smem>>
    %c5_284 = arith.constant 5 : index
    %365 = memref.load %arg10[%c5_284] : memref<81xf32, #tpu.memory_space<smem>>
    %c6_285 = arith.constant 6 : index
    %366 = memref.load %arg10[%c6_285] : memref<81xf32, #tpu.memory_space<smem>>
    %c7_286 = arith.constant 7 : index
    %367 = memref.load %arg10[%c7_286] : memref<81xf32, #tpu.memory_space<smem>>
    %c8_287 = arith.constant 8 : index
    %368 = memref.load %arg10[%c8_287] : memref<81xf32, #tpu.memory_space<smem>>
    %c9_288 = arith.constant 9 : index
    %369 = memref.load %arg10[%c9_288] : memref<81xf32, #tpu.memory_space<smem>>
    %c10_289 = arith.constant 10 : index
    %370 = memref.load %arg10[%c10_289] : memref<81xf32, #tpu.memory_space<smem>>
    %c11_290 = arith.constant 11 : index
    %371 = memref.load %arg10[%c11_290] : memref<81xf32, #tpu.memory_space<smem>>
    %c12_291 = arith.constant 12 : index
    %372 = memref.load %arg10[%c12_291] : memref<81xf32, #tpu.memory_space<smem>>
    %c13_292 = arith.constant 13 : index
    %373 = memref.load %arg10[%c13_292] : memref<81xf32, #tpu.memory_space<smem>>
    %c14_293 = arith.constant 14 : index
    %374 = memref.load %arg10[%c14_293] : memref<81xf32, #tpu.memory_space<smem>>
    %c15_294 = arith.constant 15 : index
    %375 = memref.load %arg10[%c15_294] : memref<81xf32, #tpu.memory_space<smem>>
    %c16_295 = arith.constant 16 : index
    %376 = memref.load %arg10[%c16_295] : memref<81xf32, #tpu.memory_space<smem>>
    %c17_296 = arith.constant 17 : index
    %377 = memref.load %arg10[%c17_296] : memref<81xf32, #tpu.memory_space<smem>>
    %c18_297 = arith.constant 18 : index
    %378 = memref.load %arg10[%c18_297] : memref<81xf32, #tpu.memory_space<smem>>
    %c19_298 = arith.constant 19 : index
    %379 = memref.load %arg10[%c19_298] : memref<81xf32, #tpu.memory_space<smem>>
    %c20_299 = arith.constant 20 : index
    %380 = memref.load %arg10[%c20_299] : memref<81xf32, #tpu.memory_space<smem>>
    %c21_300 = arith.constant 21 : index
    %381 = memref.load %arg10[%c21_300] : memref<81xf32, #tpu.memory_space<smem>>
    %c22_301 = arith.constant 22 : index
    %382 = memref.load %arg10[%c22_301] : memref<81xf32, #tpu.memory_space<smem>>
    %c23_302 = arith.constant 23 : index
    %383 = memref.load %arg10[%c23_302] : memref<81xf32, #tpu.memory_space<smem>>
    %c24_303 = arith.constant 24 : index
    %384 = memref.load %arg10[%c24_303] : memref<81xf32, #tpu.memory_space<smem>>
    %c25_304 = arith.constant 25 : index
    %385 = memref.load %arg10[%c25_304] : memref<81xf32, #tpu.memory_space<smem>>
    %c26_305 = arith.constant 26 : index
    %386 = memref.load %arg10[%c26_305] : memref<81xf32, #tpu.memory_space<smem>>
    %c27_306 = arith.constant 27 : index
    %387 = memref.load %arg10[%c27_306] : memref<81xf32, #tpu.memory_space<smem>>
    %c28_307 = arith.constant 28 : index
    %388 = memref.load %arg10[%c28_307] : memref<81xf32, #tpu.memory_space<smem>>
    %c29_308 = arith.constant 29 : index
    %389 = memref.load %arg10[%c29_308] : memref<81xf32, #tpu.memory_space<smem>>
    %c30_309 = arith.constant 30 : index
    %390 = memref.load %arg10[%c30_309] : memref<81xf32, #tpu.memory_space<smem>>
    %c31_310 = arith.constant 31 : index
    %391 = memref.load %arg10[%c31_310] : memref<81xf32, #tpu.memory_space<smem>>
    %c32_311 = arith.constant 32 : index
    %392 = memref.load %arg10[%c32_311] : memref<81xf32, #tpu.memory_space<smem>>
    %c33_312 = arith.constant 33 : index
    %393 = memref.load %arg10[%c33_312] : memref<81xf32, #tpu.memory_space<smem>>
    %c34_313 = arith.constant 34 : index
    %394 = memref.load %arg10[%c34_313] : memref<81xf32, #tpu.memory_space<smem>>
    %c35_314 = arith.constant 35 : index
    %395 = memref.load %arg10[%c35_314] : memref<81xf32, #tpu.memory_space<smem>>
    %c36_315 = arith.constant 36 : index
    %396 = memref.load %arg10[%c36_315] : memref<81xf32, #tpu.memory_space<smem>>
    %c37_316 = arith.constant 37 : index
    %397 = memref.load %arg10[%c37_316] : memref<81xf32, #tpu.memory_space<smem>>
    %c38_317 = arith.constant 38 : index
    %398 = memref.load %arg10[%c38_317] : memref<81xf32, #tpu.memory_space<smem>>
    %c39_318 = arith.constant 39 : index
    %399 = memref.load %arg10[%c39_318] : memref<81xf32, #tpu.memory_space<smem>>
    %c40_319 = arith.constant 40 : index
    %400 = memref.load %arg10[%c40_319] : memref<81xf32, #tpu.memory_space<smem>>
    %c41_320 = arith.constant 41 : index
    %401 = memref.load %arg10[%c41_320] : memref<81xf32, #tpu.memory_space<smem>>
    %c42_321 = arith.constant 42 : index
    %402 = memref.load %arg10[%c42_321] : memref<81xf32, #tpu.memory_space<smem>>
    %c43_322 = arith.constant 43 : index
    %403 = memref.load %arg10[%c43_322] : memref<81xf32, #tpu.memory_space<smem>>
    %c44_323 = arith.constant 44 : index
    %404 = memref.load %arg10[%c44_323] : memref<81xf32, #tpu.memory_space<smem>>
    %c45_324 = arith.constant 45 : index
    %405 = memref.load %arg10[%c45_324] : memref<81xf32, #tpu.memory_space<smem>>
    %c46_325 = arith.constant 46 : index
    %406 = memref.load %arg10[%c46_325] : memref<81xf32, #tpu.memory_space<smem>>
    %c47_326 = arith.constant 47 : index
    %407 = memref.load %arg10[%c47_326] : memref<81xf32, #tpu.memory_space<smem>>
    %c48_327 = arith.constant 48 : index
    %408 = memref.load %arg10[%c48_327] : memref<81xf32, #tpu.memory_space<smem>>
    %c49_328 = arith.constant 49 : index
    %409 = memref.load %arg10[%c49_328] : memref<81xf32, #tpu.memory_space<smem>>
    %c50_329 = arith.constant 50 : index
    %410 = memref.load %arg10[%c50_329] : memref<81xf32, #tpu.memory_space<smem>>
    %c51_330 = arith.constant 51 : index
    %411 = memref.load %arg10[%c51_330] : memref<81xf32, #tpu.memory_space<smem>>
    %c52_331 = arith.constant 52 : index
    %412 = memref.load %arg10[%c52_331] : memref<81xf32, #tpu.memory_space<smem>>
    %c53_332 = arith.constant 53 : index
    %413 = memref.load %arg10[%c53_332] : memref<81xf32, #tpu.memory_space<smem>>
    %c54_333 = arith.constant 54 : index
    %414 = memref.load %arg10[%c54_333] : memref<81xf32, #tpu.memory_space<smem>>
    %c55_334 = arith.constant 55 : index
    %415 = memref.load %arg10[%c55_334] : memref<81xf32, #tpu.memory_space<smem>>
    %c56_335 = arith.constant 56 : index
    %416 = memref.load %arg10[%c56_335] : memref<81xf32, #tpu.memory_space<smem>>
    %c57_336 = arith.constant 57 : index
    %417 = memref.load %arg10[%c57_336] : memref<81xf32, #tpu.memory_space<smem>>
    %c58_337 = arith.constant 58 : index
    %418 = memref.load %arg10[%c58_337] : memref<81xf32, #tpu.memory_space<smem>>
    %c59_338 = arith.constant 59 : index
    %419 = memref.load %arg10[%c59_338] : memref<81xf32, #tpu.memory_space<smem>>
    %c60_339 = arith.constant 60 : index
    %420 = memref.load %arg10[%c60_339] : memref<81xf32, #tpu.memory_space<smem>>
    %c61_340 = arith.constant 61 : index
    %421 = memref.load %arg10[%c61_340] : memref<81xf32, #tpu.memory_space<smem>>
    %c62_341 = arith.constant 62 : index
    %422 = memref.load %arg10[%c62_341] : memref<81xf32, #tpu.memory_space<smem>>
    %c63_342 = arith.constant 63 : index
    %423 = memref.load %arg10[%c63_342] : memref<81xf32, #tpu.memory_space<smem>>
    %c64_343 = arith.constant 64 : index
    %424 = memref.load %arg10[%c64_343] : memref<81xf32, #tpu.memory_space<smem>>
    %c65_344 = arith.constant 65 : index
    %425 = memref.load %arg10[%c65_344] : memref<81xf32, #tpu.memory_space<smem>>
    %c66_345 = arith.constant 66 : index
    %426 = memref.load %arg10[%c66_345] : memref<81xf32, #tpu.memory_space<smem>>
    %c67_346 = arith.constant 67 : index
    %427 = memref.load %arg10[%c67_346] : memref<81xf32, #tpu.memory_space<smem>>
    %c68_347 = arith.constant 68 : index
    %428 = memref.load %arg10[%c68_347] : memref<81xf32, #tpu.memory_space<smem>>
    %c69_348 = arith.constant 69 : index
    %429 = memref.load %arg10[%c69_348] : memref<81xf32, #tpu.memory_space<smem>>
    %c70_349 = arith.constant 70 : index
    %430 = memref.load %arg10[%c70_349] : memref<81xf32, #tpu.memory_space<smem>>
    %c71_350 = arith.constant 71 : index
    %431 = memref.load %arg10[%c71_350] : memref<81xf32, #tpu.memory_space<smem>>
    %c72_351 = arith.constant 72 : index
    %432 = memref.load %arg10[%c72_351] : memref<81xf32, #tpu.memory_space<smem>>
    %c73_352 = arith.constant 73 : index
    %433 = memref.load %arg10[%c73_352] : memref<81xf32, #tpu.memory_space<smem>>
    %c74_353 = arith.constant 74 : index
    %434 = memref.load %arg10[%c74_353] : memref<81xf32, #tpu.memory_space<smem>>
    %c75_354 = arith.constant 75 : index
    %435 = memref.load %arg10[%c75_354] : memref<81xf32, #tpu.memory_space<smem>>
    %c76_355 = arith.constant 76 : index
    %436 = memref.load %arg10[%c76_355] : memref<81xf32, #tpu.memory_space<smem>>
    %c77_356 = arith.constant 77 : index
    %437 = memref.load %arg10[%c77_356] : memref<81xf32, #tpu.memory_space<smem>>
    %c78_357 = arith.constant 78 : index
    %438 = memref.load %arg10[%c78_357] : memref<81xf32, #tpu.memory_space<smem>>
    %c79_358 = arith.constant 79 : index
    %439 = memref.load %arg10[%c79_358] : memref<81xf32, #tpu.memory_space<smem>>
    %c80_359 = arith.constant 80 : index
    %440 = memref.load %arg10[%c80_359] : memref<81xf32, #tpu.memory_space<smem>>
    %c0_360 = arith.constant 0 : index
    %441 = memref.load %arg11[%c0_360] : memref<9xf32, #tpu.memory_space<smem>>
    %c1_361 = arith.constant 1 : index
    %442 = memref.load %arg11[%c1_361] : memref<9xf32, #tpu.memory_space<smem>>
    %c2_362 = arith.constant 2 : index
    %443 = memref.load %arg11[%c2_362] : memref<9xf32, #tpu.memory_space<smem>>
    %c3_363 = arith.constant 3 : index
    %444 = memref.load %arg11[%c3_363] : memref<9xf32, #tpu.memory_space<smem>>
    %c4_364 = arith.constant 4 : index
    %445 = memref.load %arg11[%c4_364] : memref<9xf32, #tpu.memory_space<smem>>
    %c5_365 = arith.constant 5 : index
    %446 = memref.load %arg11[%c5_365] : memref<9xf32, #tpu.memory_space<smem>>
    %c6_366 = arith.constant 6 : index
    %447 = memref.load %arg11[%c6_366] : memref<9xf32, #tpu.memory_space<smem>>
    %c7_367 = arith.constant 7 : index
    %448 = memref.load %arg11[%c7_367] : memref<9xf32, #tpu.memory_space<smem>>
    %c8_368 = arith.constant 8 : index
    %449 = memref.load %arg11[%c8_368] : memref<9xf32, #tpu.memory_space<smem>>
    %c0_369 = arith.constant 0 : index
    %450 = memref.load %arg12[%c0_369] : memref<18xf32, #tpu.memory_space<smem>>
    %c1_370 = arith.constant 1 : index
    %451 = memref.load %arg12[%c1_370] : memref<18xf32, #tpu.memory_space<smem>>
    %c2_371 = arith.constant 2 : index
    %452 = memref.load %arg12[%c2_371] : memref<18xf32, #tpu.memory_space<smem>>
    %c3_372 = arith.constant 3 : index
    %453 = memref.load %arg12[%c3_372] : memref<18xf32, #tpu.memory_space<smem>>
    %c4_373 = arith.constant 4 : index
    %454 = memref.load %arg12[%c4_373] : memref<18xf32, #tpu.memory_space<smem>>
    %c5_374 = arith.constant 5 : index
    %455 = memref.load %arg12[%c5_374] : memref<18xf32, #tpu.memory_space<smem>>
    %c6_375 = arith.constant 6 : index
    %456 = memref.load %arg12[%c6_375] : memref<18xf32, #tpu.memory_space<smem>>
    %c7_376 = arith.constant 7 : index
    %457 = memref.load %arg12[%c7_376] : memref<18xf32, #tpu.memory_space<smem>>
    %c8_377 = arith.constant 8 : index
    %458 = memref.load %arg12[%c8_377] : memref<18xf32, #tpu.memory_space<smem>>
    %c9_378 = arith.constant 9 : index
    %459 = memref.load %arg12[%c9_378] : memref<18xf32, #tpu.memory_space<smem>>
    %c10_379 = arith.constant 10 : index
    %460 = memref.load %arg12[%c10_379] : memref<18xf32, #tpu.memory_space<smem>>
    %c11_380 = arith.constant 11 : index
    %461 = memref.load %arg12[%c11_380] : memref<18xf32, #tpu.memory_space<smem>>
    %c12_381 = arith.constant 12 : index
    %462 = memref.load %arg12[%c12_381] : memref<18xf32, #tpu.memory_space<smem>>
    %c13_382 = arith.constant 13 : index
    %463 = memref.load %arg12[%c13_382] : memref<18xf32, #tpu.memory_space<smem>>
    %c14_383 = arith.constant 14 : index
    %464 = memref.load %arg12[%c14_383] : memref<18xf32, #tpu.memory_space<smem>>
    %c15_384 = arith.constant 15 : index
    %465 = memref.load %arg12[%c15_384] : memref<18xf32, #tpu.memory_space<smem>>
    %c16_385 = arith.constant 16 : index
    %466 = memref.load %arg12[%c16_385] : memref<18xf32, #tpu.memory_space<smem>>
    %c17_386 = arith.constant 17 : index
    %467 = memref.load %arg12[%c17_386] : memref<18xf32, #tpu.memory_space<smem>>
    %c0_387 = arith.constant 0 : index
    %468 = memref.load %arg13[%c0_387] : memref<2xf32, #tpu.memory_space<smem>>
    %c1_388 = arith.constant 1 : index
    %469 = memref.load %arg13[%c1_388] : memref<2xf32, #tpu.memory_space<smem>>
    %c0_i32 = arith.constant 0 : i32
    %c1_i32 = arith.constant 1 : i32
    %470 = arith.muli %c0_i32, %c1_i32 : i32
    %c0_i32_389 = arith.constant 0 : i32
    %471 = arith.addi %c0_i32_389, %470 : i32
    %c16_i32 = arith.constant 16 : i32
    %472 = arith.muli %471, %c16_i32 : i32
    %473 = tpu.assume_multiple %472, 16 : i32
    %c0_390 = arith.constant 0 : index
    %474 = arith.index_cast %473 : i32 to index
    %c0_391 = arith.constant 0 : index
    %475 = vector.load %arg1[%c0_390, %474, %c0_391] : memref<9x16x128xf32, #tpu.memory_space<vmem>>, vector<1x16x128xf32>
    %476 = vector.shape_cast %475 : vector<1x16x128xf32> to vector<16x128xf32>
    %c1_392 = arith.constant 1 : index
    %477 = arith.index_cast %473 : i32 to index
    %c0_393 = arith.constant 0 : index
    %478 = vector.load %arg1[%c1_392, %477, %c0_393] : memref<9x16x128xf32, #tpu.memory_space<vmem>>, vector<1x16x128xf32>
    %479 = vector.shape_cast %478 : vector<1x16x128xf32> to vector<16x128xf32>
    %c2_394 = arith.constant 2 : index
    %480 = arith.index_cast %473 : i32 to index
    %c0_395 = arith.constant 0 : index
    %481 = vector.load %arg1[%c2_394, %480, %c0_395] : memref<9x16x128xf32, #tpu.memory_space<vmem>>, vector<1x16x128xf32>
    %482 = vector.shape_cast %481 : vector<1x16x128xf32> to vector<16x128xf32>
    %c3_396 = arith.constant 3 : index
    %483 = arith.index_cast %473 : i32 to index
    %c0_397 = arith.constant 0 : index
    %484 = vector.load %arg1[%c3_396, %483, %c0_397] : memref<9x16x128xf32, #tpu.memory_space<vmem>>, vector<1x16x128xf32>
    %485 = vector.shape_cast %484 : vector<1x16x128xf32> to vector<16x128xf32>
    %c4_398 = arith.constant 4 : index
    %486 = arith.index_cast %473 : i32 to index
    %c0_399 = arith.constant 0 : index
    %487 = vector.load %arg1[%c4_398, %486, %c0_399] : memref<9x16x128xf32, #tpu.memory_space<vmem>>, vector<1x16x128xf32>
    %488 = vector.shape_cast %487 : vector<1x16x128xf32> to vector<16x128xf32>
    %c5_400 = arith.constant 5 : index
    %489 = arith.index_cast %473 : i32 to index
    %c0_401 = arith.constant 0 : index
    %490 = vector.load %arg1[%c5_400, %489, %c0_401] : memref<9x16x128xf32, #tpu.memory_space<vmem>>, vector<1x16x128xf32>
    %491 = vector.shape_cast %490 : vector<1x16x128xf32> to vector<16x128xf32>
    %c6_402 = arith.constant 6 : index
    %492 = arith.index_cast %473 : i32 to index
    %c0_403 = arith.constant 0 : index
    %493 = vector.load %arg1[%c6_402, %492, %c0_403] : memref<9x16x128xf32, #tpu.memory_space<vmem>>, vector<1x16x128xf32>
    %494 = vector.shape_cast %493 : vector<1x16x128xf32> to vector<16x128xf32>
    %c7_404 = arith.constant 7 : index
    %495 = arith.index_cast %473 : i32 to index
    %c0_405 = arith.constant 0 : index
    %496 = vector.load %arg1[%c7_404, %495, %c0_405] : memref<9x16x128xf32, #tpu.memory_space<vmem>>, vector<1x16x128xf32>
    %497 = vector.shape_cast %496 : vector<1x16x128xf32> to vector<16x128xf32>
    %c8_406 = arith.constant 8 : index
    %498 = arith.index_cast %473 : i32 to index
    %c0_407 = arith.constant 0 : index
    %499 = vector.load %arg1[%c8_406, %498, %c0_407] : memref<9x16x128xf32, #tpu.memory_space<vmem>>, vector<1x16x128xf32>
    %500 = vector.shape_cast %499 : vector<1x16x128xf32> to vector<16x128xf32>
    %501 = vector.broadcast %0 : f32 to vector<16x128xf32>
    %502 = arith.mulf %476, %501 : vector<16x128xf32>
    %503 = vector.broadcast %1 : f32 to vector<16x128xf32>
    %504 = arith.mulf %479, %503 : vector<16x128xf32>
    %505 = arith.addf %502, %504 : vector<16x128xf32>
    %506 = vector.broadcast %2 : f32 to vector<16x128xf32>
    %507 = arith.mulf %482, %506 : vector<16x128xf32>
    %508 = arith.addf %505, %507 : vector<16x128xf32>
    %509 = vector.broadcast %3 : f32 to vector<16x128xf32>
    %510 = arith.mulf %485, %509 : vector<16x128xf32>
    %511 = arith.addf %508, %510 : vector<16x128xf32>
    %512 = vector.broadcast %4 : f32 to vector<16x128xf32>
    %513 = arith.mulf %488, %512 : vector<16x128xf32>
    %514 = arith.addf %511, %513 : vector<16x128xf32>
    %515 = vector.broadcast %5 : f32 to vector<16x128xf32>
    %516 = arith.mulf %491, %515 : vector<16x128xf32>
    %517 = arith.addf %514, %516 : vector<16x128xf32>
    %518 = vector.broadcast %6 : f32 to vector<16x128xf32>
    %519 = arith.mulf %494, %518 : vector<16x128xf32>
    %520 = arith.addf %517, %519 : vector<16x128xf32>
    %521 = vector.broadcast %7 : f32 to vector<16x128xf32>
    %522 = arith.mulf %497, %521 : vector<16x128xf32>
    %523 = arith.addf %520, %522 : vector<16x128xf32>
    %524 = vector.broadcast %8 : f32 to vector<16x128xf32>
    %525 = arith.mulf %500, %524 : vector<16x128xf32>
    %526 = arith.addf %523, %525 : vector<16x128xf32>
    %527 = vector.broadcast %81 : f32 to vector<16x128xf32>
    %528 = arith.addf %526, %527 : vector<16x128xf32>
    %cst = arith.constant 0.000000e+00 : f32
    %529 = vector.broadcast %cst : f32 to vector<16x128xf32>
    %530 = arith.maximumf %528, %529 : vector<16x128xf32>
    %531 = vector.broadcast %9 : f32 to vector<16x128xf32>
    %532 = arith.mulf %476, %531 : vector<16x128xf32>
    %533 = vector.broadcast %10 : f32 to vector<16x128xf32>
    %534 = arith.mulf %479, %533 : vector<16x128xf32>
    %535 = arith.addf %532, %534 : vector<16x128xf32>
    %536 = vector.broadcast %11 : f32 to vector<16x128xf32>
    %537 = arith.mulf %482, %536 : vector<16x128xf32>
    %538 = arith.addf %535, %537 : vector<16x128xf32>
    %539 = vector.broadcast %12 : f32 to vector<16x128xf32>
    %540 = arith.mulf %485, %539 : vector<16x128xf32>
    %541 = arith.addf %538, %540 : vector<16x128xf32>
    %542 = vector.broadcast %13 : f32 to vector<16x128xf32>
    %543 = arith.mulf %488, %542 : vector<16x128xf32>
    %544 = arith.addf %541, %543 : vector<16x128xf32>
    %545 = vector.broadcast %14 : f32 to vector<16x128xf32>
    %546 = arith.mulf %491, %545 : vector<16x128xf32>
    %547 = arith.addf %544, %546 : vector<16x128xf32>
    %548 = vector.broadcast %15 : f32 to vector<16x128xf32>
    %549 = arith.mulf %494, %548 : vector<16x128xf32>
    %550 = arith.addf %547, %549 : vector<16x128xf32>
    %551 = vector.broadcast %16 : f32 to vector<16x128xf32>
    %552 = arith.mulf %497, %551 : vector<16x128xf32>
    %553 = arith.addf %550, %552 : vector<16x128xf32>
    %554 = vector.broadcast %17 : f32 to vector<16x128xf32>
    %555 = arith.mulf %500, %554 : vector<16x128xf32>
    %556 = arith.addf %553, %555 : vector<16x128xf32>
    %557 = vector.broadcast %82 : f32 to vector<16x128xf32>
    %558 = arith.addf %556, %557 : vector<16x128xf32>
    %cst_408 = arith.constant 0.000000e+00 : f32
    %559 = vector.broadcast %cst_408 : f32 to vector<16x128xf32>
    %560 = arith.maximumf %558, %559 : vector<16x128xf32>
    %561 = vector.broadcast %18 : f32 to vector<16x128xf32>
    %562 = arith.mulf %476, %561 : vector<16x128xf32>
    %563 = vector.broadcast %19 : f32 to vector<16x128xf32>
    %564 = arith.mulf %479, %563 : vector<16x128xf32>
    %565 = arith.addf %562, %564 : vector<16x128xf32>
    %566 = vector.broadcast %20 : f32 to vector<16x128xf32>
    %567 = arith.mulf %482, %566 : vector<16x128xf32>
    %568 = arith.addf %565, %567 : vector<16x128xf32>
    %569 = vector.broadcast %21 : f32 to vector<16x128xf32>
    %570 = arith.mulf %485, %569 : vector<16x128xf32>
    %571 = arith.addf %568, %570 : vector<16x128xf32>
    %572 = vector.broadcast %22 : f32 to vector<16x128xf32>
    %573 = arith.mulf %488, %572 : vector<16x128xf32>
    %574 = arith.addf %571, %573 : vector<16x128xf32>
    %575 = vector.broadcast %23 : f32 to vector<16x128xf32>
    %576 = arith.mulf %491, %575 : vector<16x128xf32>
    %577 = arith.addf %574, %576 : vector<16x128xf32>
    %578 = vector.broadcast %24 : f32 to vector<16x128xf32>
    %579 = arith.mulf %494, %578 : vector<16x128xf32>
    %580 = arith.addf %577, %579 : vector<16x128xf32>
    %581 = vector.broadcast %25 : f32 to vector<16x128xf32>
    %582 = arith.mulf %497, %581 : vector<16x128xf32>
    %583 = arith.addf %580, %582 : vector<16x128xf32>
    %584 = vector.broadcast %26 : f32 to vector<16x128xf32>
    %585 = arith.mulf %500, %584 : vector<16x128xf32>
    %586 = arith.addf %583, %585 : vector<16x128xf32>
    %587 = vector.broadcast %83 : f32 to vector<16x128xf32>
    %588 = arith.addf %586, %587 : vector<16x128xf32>
    %cst_409 = arith.constant 0.000000e+00 : f32
    %589 = vector.broadcast %cst_409 : f32 to vector<16x128xf32>
    %590 = arith.maximumf %588, %589 : vector<16x128xf32>
    %591 = vector.broadcast %27 : f32 to vector<16x128xf32>
    %592 = arith.mulf %476, %591 : vector<16x128xf32>
    %593 = vector.broadcast %28 : f32 to vector<16x128xf32>
    %594 = arith.mulf %479, %593 : vector<16x128xf32>
    %595 = arith.addf %592, %594 : vector<16x128xf32>
    %596 = vector.broadcast %29 : f32 to vector<16x128xf32>
    %597 = arith.mulf %482, %596 : vector<16x128xf32>
    %598 = arith.addf %595, %597 : vector<16x128xf32>
    %599 = vector.broadcast %30 : f32 to vector<16x128xf32>
    %600 = arith.mulf %485, %599 : vector<16x128xf32>
    %601 = arith.addf %598, %600 : vector<16x128xf32>
    %602 = vector.broadcast %31 : f32 to vector<16x128xf32>
    %603 = arith.mulf %488, %602 : vector<16x128xf32>
    %604 = arith.addf %601, %603 : vector<16x128xf32>
    %605 = vector.broadcast %32 : f32 to vector<16x128xf32>
    %606 = arith.mulf %491, %605 : vector<16x128xf32>
    %607 = arith.addf %604, %606 : vector<16x128xf32>
    %608 = vector.broadcast %33 : f32 to vector<16x128xf32>
    %609 = arith.mulf %494, %608 : vector<16x128xf32>
    %610 = arith.addf %607, %609 : vector<16x128xf32>
    %611 = vector.broadcast %34 : f32 to vector<16x128xf32>
    %612 = arith.mulf %497, %611 : vector<16x128xf32>
    %613 = arith.addf %610, %612 : vector<16x128xf32>
    %614 = vector.broadcast %35 : f32 to vector<16x128xf32>
    %615 = arith.mulf %500, %614 : vector<16x128xf32>
    %616 = arith.addf %613, %615 : vector<16x128xf32>
    %617 = vector.broadcast %84 : f32 to vector<16x128xf32>
    %618 = arith.addf %616, %617 : vector<16x128xf32>
    %cst_410 = arith.constant 0.000000e+00 : f32
    %619 = vector.broadcast %cst_410 : f32 to vector<16x128xf32>
    %620 = arith.maximumf %618, %619 : vector<16x128xf32>
    %621 = vector.broadcast %36 : f32 to vector<16x128xf32>
    %622 = arith.mulf %476, %621 : vector<16x128xf32>
    %623 = vector.broadcast %37 : f32 to vector<16x128xf32>
    %624 = arith.mulf %479, %623 : vector<16x128xf32>
    %625 = arith.addf %622, %624 : vector<16x128xf32>
    %626 = vector.broadcast %38 : f32 to vector<16x128xf32>
    %627 = arith.mulf %482, %626 : vector<16x128xf32>
    %628 = arith.addf %625, %627 : vector<16x128xf32>
    %629 = vector.broadcast %39 : f32 to vector<16x128xf32>
    %630 = arith.mulf %485, %629 : vector<16x128xf32>
    %631 = arith.addf %628, %630 : vector<16x128xf32>
    %632 = vector.broadcast %40 : f32 to vector<16x128xf32>
    %633 = arith.mulf %488, %632 : vector<16x128xf32>
    %634 = arith.addf %631, %633 : vector<16x128xf32>
    %635 = vector.broadcast %41 : f32 to vector<16x128xf32>
    %636 = arith.mulf %491, %635 : vector<16x128xf32>
    %637 = arith.addf %634, %636 : vector<16x128xf32>
    %638 = vector.broadcast %42 : f32 to vector<16x128xf32>
    %639 = arith.mulf %494, %638 : vector<16x128xf32>
    %640 = arith.addf %637, %639 : vector<16x128xf32>
    %641 = vector.broadcast %43 : f32 to vector<16x128xf32>
    %642 = arith.mulf %497, %641 : vector<16x128xf32>
    %643 = arith.addf %640, %642 : vector<16x128xf32>
    %644 = vector.broadcast %44 : f32 to vector<16x128xf32>
    %645 = arith.mulf %500, %644 : vector<16x128xf32>
    %646 = arith.addf %643, %645 : vector<16x128xf32>
    %647 = vector.broadcast %85 : f32 to vector<16x128xf32>
    %648 = arith.addf %646, %647 : vector<16x128xf32>
    %cst_411 = arith.constant 0.000000e+00 : f32
    %649 = vector.broadcast %cst_411 : f32 to vector<16x128xf32>
    %650 = arith.maximumf %648, %649 : vector<16x128xf32>
    %651 = vector.broadcast %45 : f32 to vector<16x128xf32>
    %652 = arith.mulf %476, %651 : vector<16x128xf32>
    %653 = vector.broadcast %46 : f32 to vector<16x128xf32>
    %654 = arith.mulf %479, %653 : vector<16x128xf32>
    %655 = arith.addf %652, %654 : vector<16x128xf32>
    %656 = vector.broadcast %47 : f32 to vector<16x128xf32>
    %657 = arith.mulf %482, %656 : vector<16x128xf32>
    %658 = arith.addf %655, %657 : vector<16x128xf32>
    %659 = vector.broadcast %48 : f32 to vector<16x128xf32>
    %660 = arith.mulf %485, %659 : vector<16x128xf32>
    %661 = arith.addf %658, %660 : vector<16x128xf32>
    %662 = vector.broadcast %49 : f32 to vector<16x128xf32>
    %663 = arith.mulf %488, %662 : vector<16x128xf32>
    %664 = arith.addf %661, %663 : vector<16x128xf32>
    %665 = vector.broadcast %50 : f32 to vector<16x128xf32>
    %666 = arith.mulf %491, %665 : vector<16x128xf32>
    %667 = arith.addf %664, %666 : vector<16x128xf32>
    %668 = vector.broadcast %51 : f32 to vector<16x128xf32>
    %669 = arith.mulf %494, %668 : vector<16x128xf32>
    %670 = arith.addf %667, %669 : vector<16x128xf32>
    %671 = vector.broadcast %52 : f32 to vector<16x128xf32>
    %672 = arith.mulf %497, %671 : vector<16x128xf32>
    %673 = arith.addf %670, %672 : vector<16x128xf32>
    %674 = vector.broadcast %53 : f32 to vector<16x128xf32>
    %675 = arith.mulf %500, %674 : vector<16x128xf32>
    %676 = arith.addf %673, %675 : vector<16x128xf32>
    %677 = vector.broadcast %86 : f32 to vector<16x128xf32>
    %678 = arith.addf %676, %677 : vector<16x128xf32>
    %cst_412 = arith.constant 0.000000e+00 : f32
    %679 = vector.broadcast %cst_412 : f32 to vector<16x128xf32>
    %680 = arith.maximumf %678, %679 : vector<16x128xf32>
    %681 = vector.broadcast %54 : f32 to vector<16x128xf32>
    %682 = arith.mulf %476, %681 : vector<16x128xf32>
    %683 = vector.broadcast %55 : f32 to vector<16x128xf32>
    %684 = arith.mulf %479, %683 : vector<16x128xf32>
    %685 = arith.addf %682, %684 : vector<16x128xf32>
    %686 = vector.broadcast %56 : f32 to vector<16x128xf32>
    %687 = arith.mulf %482, %686 : vector<16x128xf32>
    %688 = arith.addf %685, %687 : vector<16x128xf32>
    %689 = vector.broadcast %57 : f32 to vector<16x128xf32>
    %690 = arith.mulf %485, %689 : vector<16x128xf32>
    %691 = arith.addf %688, %690 : vector<16x128xf32>
    %692 = vector.broadcast %58 : f32 to vector<16x128xf32>
    %693 = arith.mulf %488, %692 : vector<16x128xf32>
    %694 = arith.addf %691, %693 : vector<16x128xf32>
    %695 = vector.broadcast %59 : f32 to vector<16x128xf32>
    %696 = arith.mulf %491, %695 : vector<16x128xf32>
    %697 = arith.addf %694, %696 : vector<16x128xf32>
    %698 = vector.broadcast %60 : f32 to vector<16x128xf32>
    %699 = arith.mulf %494, %698 : vector<16x128xf32>
    %700 = arith.addf %697, %699 : vector<16x128xf32>
    %701 = vector.broadcast %61 : f32 to vector<16x128xf32>
    %702 = arith.mulf %497, %701 : vector<16x128xf32>
    %703 = arith.addf %700, %702 : vector<16x128xf32>
    %704 = vector.broadcast %62 : f32 to vector<16x128xf32>
    %705 = arith.mulf %500, %704 : vector<16x128xf32>
    %706 = arith.addf %703, %705 : vector<16x128xf32>
    %707 = vector.broadcast %87 : f32 to vector<16x128xf32>
    %708 = arith.addf %706, %707 : vector<16x128xf32>
    %cst_413 = arith.constant 0.000000e+00 : f32
    %709 = vector.broadcast %cst_413 : f32 to vector<16x128xf32>
    %710 = arith.maximumf %708, %709 : vector<16x128xf32>
    %711 = vector.broadcast %63 : f32 to vector<16x128xf32>
    %712 = arith.mulf %476, %711 : vector<16x128xf32>
    %713 = vector.broadcast %64 : f32 to vector<16x128xf32>
    %714 = arith.mulf %479, %713 : vector<16x128xf32>
    %715 = arith.addf %712, %714 : vector<16x128xf32>
    %716 = vector.broadcast %65 : f32 to vector<16x128xf32>
    %717 = arith.mulf %482, %716 : vector<16x128xf32>
    %718 = arith.addf %715, %717 : vector<16x128xf32>
    %719 = vector.broadcast %66 : f32 to vector<16x128xf32>
    %720 = arith.mulf %485, %719 : vector<16x128xf32>
    %721 = arith.addf %718, %720 : vector<16x128xf32>
    %722 = vector.broadcast %67 : f32 to vector<16x128xf32>
    %723 = arith.mulf %488, %722 : vector<16x128xf32>
    %724 = arith.addf %721, %723 : vector<16x128xf32>
    %725 = vector.broadcast %68 : f32 to vector<16x128xf32>
    %726 = arith.mulf %491, %725 : vector<16x128xf32>
    %727 = arith.addf %724, %726 : vector<16x128xf32>
    %728 = vector.broadcast %69 : f32 to vector<16x128xf32>
    %729 = arith.mulf %494, %728 : vector<16x128xf32>
    %730 = arith.addf %727, %729 : vector<16x128xf32>
    %731 = vector.broadcast %70 : f32 to vector<16x128xf32>
    %732 = arith.mulf %497, %731 : vector<16x128xf32>
    %733 = arith.addf %730, %732 : vector<16x128xf32>
    %734 = vector.broadcast %71 : f32 to vector<16x128xf32>
    %735 = arith.mulf %500, %734 : vector<16x128xf32>
    %736 = arith.addf %733, %735 : vector<16x128xf32>
    %737 = vector.broadcast %88 : f32 to vector<16x128xf32>
    %738 = arith.addf %736, %737 : vector<16x128xf32>
    %cst_414 = arith.constant 0.000000e+00 : f32
    %739 = vector.broadcast %cst_414 : f32 to vector<16x128xf32>
    %740 = arith.maximumf %738, %739 : vector<16x128xf32>
    %741 = vector.broadcast %72 : f32 to vector<16x128xf32>
    %742 = arith.mulf %476, %741 : vector<16x128xf32>
    %743 = vector.broadcast %73 : f32 to vector<16x128xf32>
    %744 = arith.mulf %479, %743 : vector<16x128xf32>
    %745 = arith.addf %742, %744 : vector<16x128xf32>
    %746 = vector.broadcast %74 : f32 to vector<16x128xf32>
    %747 = arith.mulf %482, %746 : vector<16x128xf32>
    %748 = arith.addf %745, %747 : vector<16x128xf32>
    %749 = vector.broadcast %75 : f32 to vector<16x128xf32>
    %750 = arith.mulf %485, %749 : vector<16x128xf32>
    %751 = arith.addf %748, %750 : vector<16x128xf32>
    %752 = vector.broadcast %76 : f32 to vector<16x128xf32>
    %753 = arith.mulf %488, %752 : vector<16x128xf32>
    %754 = arith.addf %751, %753 : vector<16x128xf32>
    %755 = vector.broadcast %77 : f32 to vector<16x128xf32>
    %756 = arith.mulf %491, %755 : vector<16x128xf32>
    %757 = arith.addf %754, %756 : vector<16x128xf32>
    %758 = vector.broadcast %78 : f32 to vector<16x128xf32>
    %759 = arith.mulf %494, %758 : vector<16x128xf32>
    %760 = arith.addf %757, %759 : vector<16x128xf32>
    %761 = vector.broadcast %79 : f32 to vector<16x128xf32>
    %762 = arith.mulf %497, %761 : vector<16x128xf32>
    %763 = arith.addf %760, %762 : vector<16x128xf32>
    %764 = vector.broadcast %80 : f32 to vector<16x128xf32>
    %765 = arith.mulf %500, %764 : vector<16x128xf32>
    %766 = arith.addf %763, %765 : vector<16x128xf32>
    %767 = vector.broadcast %89 : f32 to vector<16x128xf32>
    %768 = arith.addf %766, %767 : vector<16x128xf32>
    %cst_415 = arith.constant 0.000000e+00 : f32
    %769 = vector.broadcast %cst_415 : f32 to vector<16x128xf32>
    %770 = arith.maximumf %768, %769 : vector<16x128xf32>
    %771 = vector.broadcast %90 : f32 to vector<16x128xf32>
    %772 = arith.mulf %530, %771 : vector<16x128xf32>
    %773 = vector.broadcast %91 : f32 to vector<16x128xf32>
    %774 = arith.mulf %560, %773 : vector<16x128xf32>
    %775 = arith.addf %772, %774 : vector<16x128xf32>
    %776 = vector.broadcast %92 : f32 to vector<16x128xf32>
    %777 = arith.mulf %590, %776 : vector<16x128xf32>
    %778 = arith.addf %775, %777 : vector<16x128xf32>
    %779 = vector.broadcast %93 : f32 to vector<16x128xf32>
    %780 = arith.mulf %620, %779 : vector<16x128xf32>
    %781 = arith.addf %778, %780 : vector<16x128xf32>
    %782 = vector.broadcast %94 : f32 to vector<16x128xf32>
    %783 = arith.mulf %650, %782 : vector<16x128xf32>
    %784 = arith.addf %781, %783 : vector<16x128xf32>
    %785 = vector.broadcast %95 : f32 to vector<16x128xf32>
    %786 = arith.mulf %680, %785 : vector<16x128xf32>
    %787 = arith.addf %784, %786 : vector<16x128xf32>
    %788 = vector.broadcast %96 : f32 to vector<16x128xf32>
    %789 = arith.mulf %710, %788 : vector<16x128xf32>
    %790 = arith.addf %787, %789 : vector<16x128xf32>
    %791 = vector.broadcast %97 : f32 to vector<16x128xf32>
    %792 = arith.mulf %740, %791 : vector<16x128xf32>
    %793 = arith.addf %790, %792 : vector<16x128xf32>
    %794 = vector.broadcast %98 : f32 to vector<16x128xf32>
    %795 = arith.mulf %770, %794 : vector<16x128xf32>
    %796 = arith.addf %793, %795 : vector<16x128xf32>
    %797 = vector.broadcast %171 : f32 to vector<16x128xf32>
    %798 = arith.addf %796, %797 : vector<16x128xf32>
    %cst_416 = arith.constant 0.000000e+00 : f32
    %799 = vector.broadcast %cst_416 : f32 to vector<16x128xf32>
    %800 = arith.maximumf %798, %799 : vector<16x128xf32>
    %801 = vector.broadcast %99 : f32 to vector<16x128xf32>
    %802 = arith.mulf %530, %801 : vector<16x128xf32>
    %803 = vector.broadcast %100 : f32 to vector<16x128xf32>
    %804 = arith.mulf %560, %803 : vector<16x128xf32>
    %805 = arith.addf %802, %804 : vector<16x128xf32>
    %806 = vector.broadcast %101 : f32 to vector<16x128xf32>
    %807 = arith.mulf %590, %806 : vector<16x128xf32>
    %808 = arith.addf %805, %807 : vector<16x128xf32>
    %809 = vector.broadcast %102 : f32 to vector<16x128xf32>
    %810 = arith.mulf %620, %809 : vector<16x128xf32>
    %811 = arith.addf %808, %810 : vector<16x128xf32>
    %812 = vector.broadcast %103 : f32 to vector<16x128xf32>
    %813 = arith.mulf %650, %812 : vector<16x128xf32>
    %814 = arith.addf %811, %813 : vector<16x128xf32>
    %815 = vector.broadcast %104 : f32 to vector<16x128xf32>
    %816 = arith.mulf %680, %815 : vector<16x128xf32>
    %817 = arith.addf %814, %816 : vector<16x128xf32>
    %818 = vector.broadcast %105 : f32 to vector<16x128xf32>
    %819 = arith.mulf %710, %818 : vector<16x128xf32>
    %820 = arith.addf %817, %819 : vector<16x128xf32>
    %821 = vector.broadcast %106 : f32 to vector<16x128xf32>
    %822 = arith.mulf %740, %821 : vector<16x128xf32>
    %823 = arith.addf %820, %822 : vector<16x128xf32>
    %824 = vector.broadcast %107 : f32 to vector<16x128xf32>
    %825 = arith.mulf %770, %824 : vector<16x128xf32>
    %826 = arith.addf %823, %825 : vector<16x128xf32>
    %827 = vector.broadcast %172 : f32 to vector<16x128xf32>
    %828 = arith.addf %826, %827 : vector<16x128xf32>
    %cst_417 = arith.constant 0.000000e+00 : f32
    %829 = vector.broadcast %cst_417 : f32 to vector<16x128xf32>
    %830 = arith.maximumf %828, %829 : vector<16x128xf32>
    %831 = vector.broadcast %108 : f32 to vector<16x128xf32>
    %832 = arith.mulf %530, %831 : vector<16x128xf32>
    %833 = vector.broadcast %109 : f32 to vector<16x128xf32>
    %834 = arith.mulf %560, %833 : vector<16x128xf32>
    %835 = arith.addf %832, %834 : vector<16x128xf32>
    %836 = vector.broadcast %110 : f32 to vector<16x128xf32>
    %837 = arith.mulf %590, %836 : vector<16x128xf32>
    %838 = arith.addf %835, %837 : vector<16x128xf32>
    %839 = vector.broadcast %111 : f32 to vector<16x128xf32>
    %840 = arith.mulf %620, %839 : vector<16x128xf32>
    %841 = arith.addf %838, %840 : vector<16x128xf32>
    %842 = vector.broadcast %112 : f32 to vector<16x128xf32>
    %843 = arith.mulf %650, %842 : vector<16x128xf32>
    %844 = arith.addf %841, %843 : vector<16x128xf32>
    %845 = vector.broadcast %113 : f32 to vector<16x128xf32>
    %846 = arith.mulf %680, %845 : vector<16x128xf32>
    %847 = arith.addf %844, %846 : vector<16x128xf32>
    %848 = vector.broadcast %114 : f32 to vector<16x128xf32>
    %849 = arith.mulf %710, %848 : vector<16x128xf32>
    %850 = arith.addf %847, %849 : vector<16x128xf32>
    %851 = vector.broadcast %115 : f32 to vector<16x128xf32>
    %852 = arith.mulf %740, %851 : vector<16x128xf32>
    %853 = arith.addf %850, %852 : vector<16x128xf32>
    %854 = vector.broadcast %116 : f32 to vector<16x128xf32>
    %855 = arith.mulf %770, %854 : vector<16x128xf32>
    %856 = arith.addf %853, %855 : vector<16x128xf32>
    %857 = vector.broadcast %173 : f32 to vector<16x128xf32>
    %858 = arith.addf %856, %857 : vector<16x128xf32>
    %cst_418 = arith.constant 0.000000e+00 : f32
    %859 = vector.broadcast %cst_418 : f32 to vector<16x128xf32>
    %860 = arith.maximumf %858, %859 : vector<16x128xf32>
    %861 = vector.broadcast %117 : f32 to vector<16x128xf32>
    %862 = arith.mulf %530, %861 : vector<16x128xf32>
    %863 = vector.broadcast %118 : f32 to vector<16x128xf32>
    %864 = arith.mulf %560, %863 : vector<16x128xf32>
    %865 = arith.addf %862, %864 : vector<16x128xf32>
    %866 = vector.broadcast %119 : f32 to vector<16x128xf32>
    %867 = arith.mulf %590, %866 : vector<16x128xf32>
    %868 = arith.addf %865, %867 : vector<16x128xf32>
    %869 = vector.broadcast %120 : f32 to vector<16x128xf32>
    %870 = arith.mulf %620, %869 : vector<16x128xf32>
    %871 = arith.addf %868, %870 : vector<16x128xf32>
    %872 = vector.broadcast %121 : f32 to vector<16x128xf32>
    %873 = arith.mulf %650, %872 : vector<16x128xf32>
    %874 = arith.addf %871, %873 : vector<16x128xf32>
    %875 = vector.broadcast %122 : f32 to vector<16x128xf32>
    %876 = arith.mulf %680, %875 : vector<16x128xf32>
    %877 = arith.addf %874, %876 : vector<16x128xf32>
    %878 = vector.broadcast %123 : f32 to vector<16x128xf32>
    %879 = arith.mulf %710, %878 : vector<16x128xf32>
    %880 = arith.addf %877, %879 : vector<16x128xf32>
    %881 = vector.broadcast %124 : f32 to vector<16x128xf32>
    %882 = arith.mulf %740, %881 : vector<16x128xf32>
    %883 = arith.addf %880, %882 : vector<16x128xf32>
    %884 = vector.broadcast %125 : f32 to vector<16x128xf32>
    %885 = arith.mulf %770, %884 : vector<16x128xf32>
    %886 = arith.addf %883, %885 : vector<16x128xf32>
    %887 = vector.broadcast %174 : f32 to vector<16x128xf32>
    %888 = arith.addf %886, %887 : vector<16x128xf32>
    %cst_419 = arith.constant 0.000000e+00 : f32
    %889 = vector.broadcast %cst_419 : f32 to vector<16x128xf32>
    %890 = arith.maximumf %888, %889 : vector<16x128xf32>
    %891 = vector.broadcast %126 : f32 to vector<16x128xf32>
    %892 = arith.mulf %530, %891 : vector<16x128xf32>
    %893 = vector.broadcast %127 : f32 to vector<16x128xf32>
    %894 = arith.mulf %560, %893 : vector<16x128xf32>
    %895 = arith.addf %892, %894 : vector<16x128xf32>
    %896 = vector.broadcast %128 : f32 to vector<16x128xf32>
    %897 = arith.mulf %590, %896 : vector<16x128xf32>
    %898 = arith.addf %895, %897 : vector<16x128xf32>
    %899 = vector.broadcast %129 : f32 to vector<16x128xf32>
    %900 = arith.mulf %620, %899 : vector<16x128xf32>
    %901 = arith.addf %898, %900 : vector<16x128xf32>
    %902 = vector.broadcast %130 : f32 to vector<16x128xf32>
    %903 = arith.mulf %650, %902 : vector<16x128xf32>
    %904 = arith.addf %901, %903 : vector<16x128xf32>
    %905 = vector.broadcast %131 : f32 to vector<16x128xf32>
    %906 = arith.mulf %680, %905 : vector<16x128xf32>
    %907 = arith.addf %904, %906 : vector<16x128xf32>
    %908 = vector.broadcast %132 : f32 to vector<16x128xf32>
    %909 = arith.mulf %710, %908 : vector<16x128xf32>
    %910 = arith.addf %907, %909 : vector<16x128xf32>
    %911 = vector.broadcast %133 : f32 to vector<16x128xf32>
    %912 = arith.mulf %740, %911 : vector<16x128xf32>
    %913 = arith.addf %910, %912 : vector<16x128xf32>
    %914 = vector.broadcast %134 : f32 to vector<16x128xf32>
    %915 = arith.mulf %770, %914 : vector<16x128xf32>
    %916 = arith.addf %913, %915 : vector<16x128xf32>
    %917 = vector.broadcast %175 : f32 to vector<16x128xf32>
    %918 = arith.addf %916, %917 : vector<16x128xf32>
    %cst_420 = arith.constant 0.000000e+00 : f32
    %919 = vector.broadcast %cst_420 : f32 to vector<16x128xf32>
    %920 = arith.maximumf %918, %919 : vector<16x128xf32>
    %921 = vector.broadcast %135 : f32 to vector<16x128xf32>
    %922 = arith.mulf %530, %921 : vector<16x128xf32>
    %923 = vector.broadcast %136 : f32 to vector<16x128xf32>
    %924 = arith.mulf %560, %923 : vector<16x128xf32>
    %925 = arith.addf %922, %924 : vector<16x128xf32>
    %926 = vector.broadcast %137 : f32 to vector<16x128xf32>
    %927 = arith.mulf %590, %926 : vector<16x128xf32>
    %928 = arith.addf %925, %927 : vector<16x128xf32>
    %929 = vector.broadcast %138 : f32 to vector<16x128xf32>
    %930 = arith.mulf %620, %929 : vector<16x128xf32>
    %931 = arith.addf %928, %930 : vector<16x128xf32>
    %932 = vector.broadcast %139 : f32 to vector<16x128xf32>
    %933 = arith.mulf %650, %932 : vector<16x128xf32>
    %934 = arith.addf %931, %933 : vector<16x128xf32>
    %935 = vector.broadcast %140 : f32 to vector<16x128xf32>
    %936 = arith.mulf %680, %935 : vector<16x128xf32>
    %937 = arith.addf %934, %936 : vector<16x128xf32>
    %938 = vector.broadcast %141 : f32 to vector<16x128xf32>
    %939 = arith.mulf %710, %938 : vector<16x128xf32>
    %940 = arith.addf %937, %939 : vector<16x128xf32>
    %941 = vector.broadcast %142 : f32 to vector<16x128xf32>
    %942 = arith.mulf %740, %941 : vector<16x128xf32>
    %943 = arith.addf %940, %942 : vector<16x128xf32>
    %944 = vector.broadcast %143 : f32 to vector<16x128xf32>
    %945 = arith.mulf %770, %944 : vector<16x128xf32>
    %946 = arith.addf %943, %945 : vector<16x128xf32>
    %947 = vector.broadcast %176 : f32 to vector<16x128xf32>
    %948 = arith.addf %946, %947 : vector<16x128xf32>
    %cst_421 = arith.constant 0.000000e+00 : f32
    %949 = vector.broadcast %cst_421 : f32 to vector<16x128xf32>
    %950 = arith.maximumf %948, %949 : vector<16x128xf32>
    %951 = vector.broadcast %144 : f32 to vector<16x128xf32>
    %952 = arith.mulf %530, %951 : vector<16x128xf32>
    %953 = vector.broadcast %145 : f32 to vector<16x128xf32>
    %954 = arith.mulf %560, %953 : vector<16x128xf32>
    %955 = arith.addf %952, %954 : vector<16x128xf32>
    %956 = vector.broadcast %146 : f32 to vector<16x128xf32>
    %957 = arith.mulf %590, %956 : vector<16x128xf32>
    %958 = arith.addf %955, %957 : vector<16x128xf32>
    %959 = vector.broadcast %147 : f32 to vector<16x128xf32>
    %960 = arith.mulf %620, %959 : vector<16x128xf32>
    %961 = arith.addf %958, %960 : vector<16x128xf32>
    %962 = vector.broadcast %148 : f32 to vector<16x128xf32>
    %963 = arith.mulf %650, %962 : vector<16x128xf32>
    %964 = arith.addf %961, %963 : vector<16x128xf32>
    %965 = vector.broadcast %149 : f32 to vector<16x128xf32>
    %966 = arith.mulf %680, %965 : vector<16x128xf32>
    %967 = arith.addf %964, %966 : vector<16x128xf32>
    %968 = vector.broadcast %150 : f32 to vector<16x128xf32>
    %969 = arith.mulf %710, %968 : vector<16x128xf32>
    %970 = arith.addf %967, %969 : vector<16x128xf32>
    %971 = vector.broadcast %151 : f32 to vector<16x128xf32>
    %972 = arith.mulf %740, %971 : vector<16x128xf32>
    %973 = arith.addf %970, %972 : vector<16x128xf32>
    %974 = vector.broadcast %152 : f32 to vector<16x128xf32>
    %975 = arith.mulf %770, %974 : vector<16x128xf32>
    %976 = arith.addf %973, %975 : vector<16x128xf32>
    %977 = vector.broadcast %177 : f32 to vector<16x128xf32>
    %978 = arith.addf %976, %977 : vector<16x128xf32>
    %cst_422 = arith.constant 0.000000e+00 : f32
    %979 = vector.broadcast %cst_422 : f32 to vector<16x128xf32>
    %980 = arith.maximumf %978, %979 : vector<16x128xf32>
    %981 = vector.broadcast %153 : f32 to vector<16x128xf32>
    %982 = arith.mulf %530, %981 : vector<16x128xf32>
    %983 = vector.broadcast %154 : f32 to vector<16x128xf32>
    %984 = arith.mulf %560, %983 : vector<16x128xf32>
    %985 = arith.addf %982, %984 : vector<16x128xf32>
    %986 = vector.broadcast %155 : f32 to vector<16x128xf32>
    %987 = arith.mulf %590, %986 : vector<16x128xf32>
    %988 = arith.addf %985, %987 : vector<16x128xf32>
    %989 = vector.broadcast %156 : f32 to vector<16x128xf32>
    %990 = arith.mulf %620, %989 : vector<16x128xf32>
    %991 = arith.addf %988, %990 : vector<16x128xf32>
    %992 = vector.broadcast %157 : f32 to vector<16x128xf32>
    %993 = arith.mulf %650, %992 : vector<16x128xf32>
    %994 = arith.addf %991, %993 : vector<16x128xf32>
    %995 = vector.broadcast %158 : f32 to vector<16x128xf32>
    %996 = arith.mulf %680, %995 : vector<16x128xf32>
    %997 = arith.addf %994, %996 : vector<16x128xf32>
    %998 = vector.broadcast %159 : f32 to vector<16x128xf32>
    %999 = arith.mulf %710, %998 : vector<16x128xf32>
    %1000 = arith.addf %997, %999 : vector<16x128xf32>
    %1001 = vector.broadcast %160 : f32 to vector<16x128xf32>
    %1002 = arith.mulf %740, %1001 : vector<16x128xf32>
    %1003 = arith.addf %1000, %1002 : vector<16x128xf32>
    %1004 = vector.broadcast %161 : f32 to vector<16x128xf32>
    %1005 = arith.mulf %770, %1004 : vector<16x128xf32>
    %1006 = arith.addf %1003, %1005 : vector<16x128xf32>
    %1007 = vector.broadcast %178 : f32 to vector<16x128xf32>
    %1008 = arith.addf %1006, %1007 : vector<16x128xf32>
    %cst_423 = arith.constant 0.000000e+00 : f32
    %1009 = vector.broadcast %cst_423 : f32 to vector<16x128xf32>
    %1010 = arith.maximumf %1008, %1009 : vector<16x128xf32>
    %1011 = vector.broadcast %162 : f32 to vector<16x128xf32>
    %1012 = arith.mulf %530, %1011 : vector<16x128xf32>
    %1013 = vector.broadcast %163 : f32 to vector<16x128xf32>
    %1014 = arith.mulf %560, %1013 : vector<16x128xf32>
    %1015 = arith.addf %1012, %1014 : vector<16x128xf32>
    %1016 = vector.broadcast %164 : f32 to vector<16x128xf32>
    %1017 = arith.mulf %590, %1016 : vector<16x128xf32>
    %1018 = arith.addf %1015, %1017 : vector<16x128xf32>
    %1019 = vector.broadcast %165 : f32 to vector<16x128xf32>
    %1020 = arith.mulf %620, %1019 : vector<16x128xf32>
    %1021 = arith.addf %1018, %1020 : vector<16x128xf32>
    %1022 = vector.broadcast %166 : f32 to vector<16x128xf32>
    %1023 = arith.mulf %650, %1022 : vector<16x128xf32>
    %1024 = arith.addf %1021, %1023 : vector<16x128xf32>
    %1025 = vector.broadcast %167 : f32 to vector<16x128xf32>
    %1026 = arith.mulf %680, %1025 : vector<16x128xf32>
    %1027 = arith.addf %1024, %1026 : vector<16x128xf32>
    %1028 = vector.broadcast %168 : f32 to vector<16x128xf32>
    %1029 = arith.mulf %710, %1028 : vector<16x128xf32>
    %1030 = arith.addf %1027, %1029 : vector<16x128xf32>
    %1031 = vector.broadcast %169 : f32 to vector<16x128xf32>
    %1032 = arith.mulf %740, %1031 : vector<16x128xf32>
    %1033 = arith.addf %1030, %1032 : vector<16x128xf32>
    %1034 = vector.broadcast %170 : f32 to vector<16x128xf32>
    %1035 = arith.mulf %770, %1034 : vector<16x128xf32>
    %1036 = arith.addf %1033, %1035 : vector<16x128xf32>
    %1037 = vector.broadcast %179 : f32 to vector<16x128xf32>
    %1038 = arith.addf %1036, %1037 : vector<16x128xf32>
    %cst_424 = arith.constant 0.000000e+00 : f32
    %1039 = vector.broadcast %cst_424 : f32 to vector<16x128xf32>
    %1040 = arith.maximumf %1038, %1039 : vector<16x128xf32>
    %1041 = vector.broadcast %180 : f32 to vector<16x128xf32>
    %1042 = arith.mulf %800, %1041 : vector<16x128xf32>
    %1043 = vector.broadcast %181 : f32 to vector<16x128xf32>
    %1044 = arith.mulf %830, %1043 : vector<16x128xf32>
    %1045 = arith.addf %1042, %1044 : vector<16x128xf32>
    %1046 = vector.broadcast %182 : f32 to vector<16x128xf32>
    %1047 = arith.mulf %860, %1046 : vector<16x128xf32>
    %1048 = arith.addf %1045, %1047 : vector<16x128xf32>
    %1049 = vector.broadcast %183 : f32 to vector<16x128xf32>
    %1050 = arith.mulf %890, %1049 : vector<16x128xf32>
    %1051 = arith.addf %1048, %1050 : vector<16x128xf32>
    %1052 = vector.broadcast %184 : f32 to vector<16x128xf32>
    %1053 = arith.mulf %920, %1052 : vector<16x128xf32>
    %1054 = arith.addf %1051, %1053 : vector<16x128xf32>
    %1055 = vector.broadcast %185 : f32 to vector<16x128xf32>
    %1056 = arith.mulf %950, %1055 : vector<16x128xf32>
    %1057 = arith.addf %1054, %1056 : vector<16x128xf32>
    %1058 = vector.broadcast %186 : f32 to vector<16x128xf32>
    %1059 = arith.mulf %980, %1058 : vector<16x128xf32>
    %1060 = arith.addf %1057, %1059 : vector<16x128xf32>
    %1061 = vector.broadcast %187 : f32 to vector<16x128xf32>
    %1062 = arith.mulf %1010, %1061 : vector<16x128xf32>
    %1063 = arith.addf %1060, %1062 : vector<16x128xf32>
    %1064 = vector.broadcast %188 : f32 to vector<16x128xf32>
    %1065 = arith.mulf %1040, %1064 : vector<16x128xf32>
    %1066 = arith.addf %1063, %1065 : vector<16x128xf32>
    %1067 = vector.broadcast %261 : f32 to vector<16x128xf32>
    %1068 = arith.addf %1066, %1067 : vector<16x128xf32>
    %cst_425 = arith.constant 0.000000e+00 : f32
    %1069 = vector.broadcast %cst_425 : f32 to vector<16x128xf32>
    %1070 = arith.maximumf %1068, %1069 : vector<16x128xf32>
    %1071 = vector.broadcast %189 : f32 to vector<16x128xf32>
    %1072 = arith.mulf %800, %1071 : vector<16x128xf32>
    %1073 = vector.broadcast %190 : f32 to vector<16x128xf32>
    %1074 = arith.mulf %830, %1073 : vector<16x128xf32>
    %1075 = arith.addf %1072, %1074 : vector<16x128xf32>
    %1076 = vector.broadcast %191 : f32 to vector<16x128xf32>
    %1077 = arith.mulf %860, %1076 : vector<16x128xf32>
    %1078 = arith.addf %1075, %1077 : vector<16x128xf32>
    %1079 = vector.broadcast %192 : f32 to vector<16x128xf32>
    %1080 = arith.mulf %890, %1079 : vector<16x128xf32>
    %1081 = arith.addf %1078, %1080 : vector<16x128xf32>
    %1082 = vector.broadcast %193 : f32 to vector<16x128xf32>
    %1083 = arith.mulf %920, %1082 : vector<16x128xf32>
    %1084 = arith.addf %1081, %1083 : vector<16x128xf32>
    %1085 = vector.broadcast %194 : f32 to vector<16x128xf32>
    %1086 = arith.mulf %950, %1085 : vector<16x128xf32>
    %1087 = arith.addf %1084, %1086 : vector<16x128xf32>
    %1088 = vector.broadcast %195 : f32 to vector<16x128xf32>
    %1089 = arith.mulf %980, %1088 : vector<16x128xf32>
    %1090 = arith.addf %1087, %1089 : vector<16x128xf32>
    %1091 = vector.broadcast %196 : f32 to vector<16x128xf32>
    %1092 = arith.mulf %1010, %1091 : vector<16x128xf32>
    %1093 = arith.addf %1090, %1092 : vector<16x128xf32>
    %1094 = vector.broadcast %197 : f32 to vector<16x128xf32>
    %1095 = arith.mulf %1040, %1094 : vector<16x128xf32>
    %1096 = arith.addf %1093, %1095 : vector<16x128xf32>
    %1097 = vector.broadcast %262 : f32 to vector<16x128xf32>
    %1098 = arith.addf %1096, %1097 : vector<16x128xf32>
    %cst_426 = arith.constant 0.000000e+00 : f32
    %1099 = vector.broadcast %cst_426 : f32 to vector<16x128xf32>
    %1100 = arith.maximumf %1098, %1099 : vector<16x128xf32>
    %1101 = vector.broadcast %198 : f32 to vector<16x128xf32>
    %1102 = arith.mulf %800, %1101 : vector<16x128xf32>
    %1103 = vector.broadcast %199 : f32 to vector<16x128xf32>
    %1104 = arith.mulf %830, %1103 : vector<16x128xf32>
    %1105 = arith.addf %1102, %1104 : vector<16x128xf32>
    %1106 = vector.broadcast %200 : f32 to vector<16x128xf32>
    %1107 = arith.mulf %860, %1106 : vector<16x128xf32>
    %1108 = arith.addf %1105, %1107 : vector<16x128xf32>
    %1109 = vector.broadcast %201 : f32 to vector<16x128xf32>
    %1110 = arith.mulf %890, %1109 : vector<16x128xf32>
    %1111 = arith.addf %1108, %1110 : vector<16x128xf32>
    %1112 = vector.broadcast %202 : f32 to vector<16x128xf32>
    %1113 = arith.mulf %920, %1112 : vector<16x128xf32>
    %1114 = arith.addf %1111, %1113 : vector<16x128xf32>
    %1115 = vector.broadcast %203 : f32 to vector<16x128xf32>
    %1116 = arith.mulf %950, %1115 : vector<16x128xf32>
    %1117 = arith.addf %1114, %1116 : vector<16x128xf32>
    %1118 = vector.broadcast %204 : f32 to vector<16x128xf32>
    %1119 = arith.mulf %980, %1118 : vector<16x128xf32>
    %1120 = arith.addf %1117, %1119 : vector<16x128xf32>
    %1121 = vector.broadcast %205 : f32 to vector<16x128xf32>
    %1122 = arith.mulf %1010, %1121 : vector<16x128xf32>
    %1123 = arith.addf %1120, %1122 : vector<16x128xf32>
    %1124 = vector.broadcast %206 : f32 to vector<16x128xf32>
    %1125 = arith.mulf %1040, %1124 : vector<16x128xf32>
    %1126 = arith.addf %1123, %1125 : vector<16x128xf32>
    %1127 = vector.broadcast %263 : f32 to vector<16x128xf32>
    %1128 = arith.addf %1126, %1127 : vector<16x128xf32>
    %cst_427 = arith.constant 0.000000e+00 : f32
    %1129 = vector.broadcast %cst_427 : f32 to vector<16x128xf32>
    %1130 = arith.maximumf %1128, %1129 : vector<16x128xf32>
    %1131 = vector.broadcast %207 : f32 to vector<16x128xf32>
    %1132 = arith.mulf %800, %1131 : vector<16x128xf32>
    %1133 = vector.broadcast %208 : f32 to vector<16x128xf32>
    %1134 = arith.mulf %830, %1133 : vector<16x128xf32>
    %1135 = arith.addf %1132, %1134 : vector<16x128xf32>
    %1136 = vector.broadcast %209 : f32 to vector<16x128xf32>
    %1137 = arith.mulf %860, %1136 : vector<16x128xf32>
    %1138 = arith.addf %1135, %1137 : vector<16x128xf32>
    %1139 = vector.broadcast %210 : f32 to vector<16x128xf32>
    %1140 = arith.mulf %890, %1139 : vector<16x128xf32>
    %1141 = arith.addf %1138, %1140 : vector<16x128xf32>
    %1142 = vector.broadcast %211 : f32 to vector<16x128xf32>
    %1143 = arith.mulf %920, %1142 : vector<16x128xf32>
    %1144 = arith.addf %1141, %1143 : vector<16x128xf32>
    %1145 = vector.broadcast %212 : f32 to vector<16x128xf32>
    %1146 = arith.mulf %950, %1145 : vector<16x128xf32>
    %1147 = arith.addf %1144, %1146 : vector<16x128xf32>
    %1148 = vector.broadcast %213 : f32 to vector<16x128xf32>
    %1149 = arith.mulf %980, %1148 : vector<16x128xf32>
    %1150 = arith.addf %1147, %1149 : vector<16x128xf32>
    %1151 = vector.broadcast %214 : f32 to vector<16x128xf32>
    %1152 = arith.mulf %1010, %1151 : vector<16x128xf32>
    %1153 = arith.addf %1150, %1152 : vector<16x128xf32>
    %1154 = vector.broadcast %215 : f32 to vector<16x128xf32>
    %1155 = arith.mulf %1040, %1154 : vector<16x128xf32>
    %1156 = arith.addf %1153, %1155 : vector<16x128xf32>
    %1157 = vector.broadcast %264 : f32 to vector<16x128xf32>
    %1158 = arith.addf %1156, %1157 : vector<16x128xf32>
    %cst_428 = arith.constant 0.000000e+00 : f32
    %1159 = vector.broadcast %cst_428 : f32 to vector<16x128xf32>
    %1160 = arith.maximumf %1158, %1159 : vector<16x128xf32>
    %1161 = vector.broadcast %216 : f32 to vector<16x128xf32>
    %1162 = arith.mulf %800, %1161 : vector<16x128xf32>
    %1163 = vector.broadcast %217 : f32 to vector<16x128xf32>
    %1164 = arith.mulf %830, %1163 : vector<16x128xf32>
    %1165 = arith.addf %1162, %1164 : vector<16x128xf32>
    %1166 = vector.broadcast %218 : f32 to vector<16x128xf32>
    %1167 = arith.mulf %860, %1166 : vector<16x128xf32>
    %1168 = arith.addf %1165, %1167 : vector<16x128xf32>
    %1169 = vector.broadcast %219 : f32 to vector<16x128xf32>
    %1170 = arith.mulf %890, %1169 : vector<16x128xf32>
    %1171 = arith.addf %1168, %1170 : vector<16x128xf32>
    %1172 = vector.broadcast %220 : f32 to vector<16x128xf32>
    %1173 = arith.mulf %920, %1172 : vector<16x128xf32>
    %1174 = arith.addf %1171, %1173 : vector<16x128xf32>
    %1175 = vector.broadcast %221 : f32 to vector<16x128xf32>
    %1176 = arith.mulf %950, %1175 : vector<16x128xf32>
    %1177 = arith.addf %1174, %1176 : vector<16x128xf32>
    %1178 = vector.broadcast %222 : f32 to vector<16x128xf32>
    %1179 = arith.mulf %980, %1178 : vector<16x128xf32>
    %1180 = arith.addf %1177, %1179 : vector<16x128xf32>
    %1181 = vector.broadcast %223 : f32 to vector<16x128xf32>
    %1182 = arith.mulf %1010, %1181 : vector<16x128xf32>
    %1183 = arith.addf %1180, %1182 : vector<16x128xf32>
    %1184 = vector.broadcast %224 : f32 to vector<16x128xf32>
    %1185 = arith.mulf %1040, %1184 : vector<16x128xf32>
    %1186 = arith.addf %1183, %1185 : vector<16x128xf32>
    %1187 = vector.broadcast %265 : f32 to vector<16x128xf32>
    %1188 = arith.addf %1186, %1187 : vector<16x128xf32>
    %cst_429 = arith.constant 0.000000e+00 : f32
    %1189 = vector.broadcast %cst_429 : f32 to vector<16x128xf32>
    %1190 = arith.maximumf %1188, %1189 : vector<16x128xf32>
    %1191 = vector.broadcast %225 : f32 to vector<16x128xf32>
    %1192 = arith.mulf %800, %1191 : vector<16x128xf32>
    %1193 = vector.broadcast %226 : f32 to vector<16x128xf32>
    %1194 = arith.mulf %830, %1193 : vector<16x128xf32>
    %1195 = arith.addf %1192, %1194 : vector<16x128xf32>
    %1196 = vector.broadcast %227 : f32 to vector<16x128xf32>
    %1197 = arith.mulf %860, %1196 : vector<16x128xf32>
    %1198 = arith.addf %1195, %1197 : vector<16x128xf32>
    %1199 = vector.broadcast %228 : f32 to vector<16x128xf32>
    %1200 = arith.mulf %890, %1199 : vector<16x128xf32>
    %1201 = arith.addf %1198, %1200 : vector<16x128xf32>
    %1202 = vector.broadcast %229 : f32 to vector<16x128xf32>
    %1203 = arith.mulf %920, %1202 : vector<16x128xf32>
    %1204 = arith.addf %1201, %1203 : vector<16x128xf32>
    %1205 = vector.broadcast %230 : f32 to vector<16x128xf32>
    %1206 = arith.mulf %950, %1205 : vector<16x128xf32>
    %1207 = arith.addf %1204, %1206 : vector<16x128xf32>
    %1208 = vector.broadcast %231 : f32 to vector<16x128xf32>
    %1209 = arith.mulf %980, %1208 : vector<16x128xf32>
    %1210 = arith.addf %1207, %1209 : vector<16x128xf32>
    %1211 = vector.broadcast %232 : f32 to vector<16x128xf32>
    %1212 = arith.mulf %1010, %1211 : vector<16x128xf32>
    %1213 = arith.addf %1210, %1212 : vector<16x128xf32>
    %1214 = vector.broadcast %233 : f32 to vector<16x128xf32>
    %1215 = arith.mulf %1040, %1214 : vector<16x128xf32>
    %1216 = arith.addf %1213, %1215 : vector<16x128xf32>
    %1217 = vector.broadcast %266 : f32 to vector<16x128xf32>
    %1218 = arith.addf %1216, %1217 : vector<16x128xf32>
    %cst_430 = arith.constant 0.000000e+00 : f32
    %1219 = vector.broadcast %cst_430 : f32 to vector<16x128xf32>
    %1220 = arith.maximumf %1218, %1219 : vector<16x128xf32>
    %1221 = vector.broadcast %234 : f32 to vector<16x128xf32>
    %1222 = arith.mulf %800, %1221 : vector<16x128xf32>
    %1223 = vector.broadcast %235 : f32 to vector<16x128xf32>
    %1224 = arith.mulf %830, %1223 : vector<16x128xf32>
    %1225 = arith.addf %1222, %1224 : vector<16x128xf32>
    %1226 = vector.broadcast %236 : f32 to vector<16x128xf32>
    %1227 = arith.mulf %860, %1226 : vector<16x128xf32>
    %1228 = arith.addf %1225, %1227 : vector<16x128xf32>
    %1229 = vector.broadcast %237 : f32 to vector<16x128xf32>
    %1230 = arith.mulf %890, %1229 : vector<16x128xf32>
    %1231 = arith.addf %1228, %1230 : vector<16x128xf32>
    %1232 = vector.broadcast %238 : f32 to vector<16x128xf32>
    %1233 = arith.mulf %920, %1232 : vector<16x128xf32>
    %1234 = arith.addf %1231, %1233 : vector<16x128xf32>
    %1235 = vector.broadcast %239 : f32 to vector<16x128xf32>
    %1236 = arith.mulf %950, %1235 : vector<16x128xf32>
    %1237 = arith.addf %1234, %1236 : vector<16x128xf32>
    %1238 = vector.broadcast %240 : f32 to vector<16x128xf32>
    %1239 = arith.mulf %980, %1238 : vector<16x128xf32>
    %1240 = arith.addf %1237, %1239 : vector<16x128xf32>
    %1241 = vector.broadcast %241 : f32 to vector<16x128xf32>
    %1242 = arith.mulf %1010, %1241 : vector<16x128xf32>
    %1243 = arith.addf %1240, %1242 : vector<16x128xf32>
    %1244 = vector.broadcast %242 : f32 to vector<16x128xf32>
    %1245 = arith.mulf %1040, %1244 : vector<16x128xf32>
    %1246 = arith.addf %1243, %1245 : vector<16x128xf32>
    %1247 = vector.broadcast %267 : f32 to vector<16x128xf32>
    %1248 = arith.addf %1246, %1247 : vector<16x128xf32>
    %cst_431 = arith.constant 0.000000e+00 : f32
    %1249 = vector.broadcast %cst_431 : f32 to vector<16x128xf32>
    %1250 = arith.maximumf %1248, %1249 : vector<16x128xf32>
    %1251 = vector.broadcast %243 : f32 to vector<16x128xf32>
    %1252 = arith.mulf %800, %1251 : vector<16x128xf32>
    %1253 = vector.broadcast %244 : f32 to vector<16x128xf32>
    %1254 = arith.mulf %830, %1253 : vector<16x128xf32>
    %1255 = arith.addf %1252, %1254 : vector<16x128xf32>
    %1256 = vector.broadcast %245 : f32 to vector<16x128xf32>
    %1257 = arith.mulf %860, %1256 : vector<16x128xf32>
    %1258 = arith.addf %1255, %1257 : vector<16x128xf32>
    %1259 = vector.broadcast %246 : f32 to vector<16x128xf32>
    %1260 = arith.mulf %890, %1259 : vector<16x128xf32>
    %1261 = arith.addf %1258, %1260 : vector<16x128xf32>
    %1262 = vector.broadcast %247 : f32 to vector<16x128xf32>
    %1263 = arith.mulf %920, %1262 : vector<16x128xf32>
    %1264 = arith.addf %1261, %1263 : vector<16x128xf32>
    %1265 = vector.broadcast %248 : f32 to vector<16x128xf32>
    %1266 = arith.mulf %950, %1265 : vector<16x128xf32>
    %1267 = arith.addf %1264, %1266 : vector<16x128xf32>
    %1268 = vector.broadcast %249 : f32 to vector<16x128xf32>
    %1269 = arith.mulf %980, %1268 : vector<16x128xf32>
    %1270 = arith.addf %1267, %1269 : vector<16x128xf32>
    %1271 = vector.broadcast %250 : f32 to vector<16x128xf32>
    %1272 = arith.mulf %1010, %1271 : vector<16x128xf32>
    %1273 = arith.addf %1270, %1272 : vector<16x128xf32>
    %1274 = vector.broadcast %251 : f32 to vector<16x128xf32>
    %1275 = arith.mulf %1040, %1274 : vector<16x128xf32>
    %1276 = arith.addf %1273, %1275 : vector<16x128xf32>
    %1277 = vector.broadcast %268 : f32 to vector<16x128xf32>
    %1278 = arith.addf %1276, %1277 : vector<16x128xf32>
    %cst_432 = arith.constant 0.000000e+00 : f32
    %1279 = vector.broadcast %cst_432 : f32 to vector<16x128xf32>
    %1280 = arith.maximumf %1278, %1279 : vector<16x128xf32>
    %1281 = vector.broadcast %252 : f32 to vector<16x128xf32>
    %1282 = arith.mulf %800, %1281 : vector<16x128xf32>
    %1283 = vector.broadcast %253 : f32 to vector<16x128xf32>
    %1284 = arith.mulf %830, %1283 : vector<16x128xf32>
    %1285 = arith.addf %1282, %1284 : vector<16x128xf32>
    %1286 = vector.broadcast %254 : f32 to vector<16x128xf32>
    %1287 = arith.mulf %860, %1286 : vector<16x128xf32>
    %1288 = arith.addf %1285, %1287 : vector<16x128xf32>
    %1289 = vector.broadcast %255 : f32 to vector<16x128xf32>
    %1290 = arith.mulf %890, %1289 : vector<16x128xf32>
    %1291 = arith.addf %1288, %1290 : vector<16x128xf32>
    %1292 = vector.broadcast %256 : f32 to vector<16x128xf32>
    %1293 = arith.mulf %920, %1292 : vector<16x128xf32>
    %1294 = arith.addf %1291, %1293 : vector<16x128xf32>
    %1295 = vector.broadcast %257 : f32 to vector<16x128xf32>
    %1296 = arith.mulf %950, %1295 : vector<16x128xf32>
    %1297 = arith.addf %1294, %1296 : vector<16x128xf32>
    %1298 = vector.broadcast %258 : f32 to vector<16x128xf32>
    %1299 = arith.mulf %980, %1298 : vector<16x128xf32>
    %1300 = arith.addf %1297, %1299 : vector<16x128xf32>
    %1301 = vector.broadcast %259 : f32 to vector<16x128xf32>
    %1302 = arith.mulf %1010, %1301 : vector<16x128xf32>
    %1303 = arith.addf %1300, %1302 : vector<16x128xf32>
    %1304 = vector.broadcast %260 : f32 to vector<16x128xf32>
    %1305 = arith.mulf %1040, %1304 : vector<16x128xf32>
    %1306 = arith.addf %1303, %1305 : vector<16x128xf32>
    %1307 = vector.broadcast %269 : f32 to vector<16x128xf32>
    %1308 = arith.addf %1306, %1307 : vector<16x128xf32>
    %cst_433 = arith.constant 0.000000e+00 : f32
    %1309 = vector.broadcast %cst_433 : f32 to vector<16x128xf32>
    %1310 = arith.maximumf %1308, %1309 : vector<16x128xf32>
    %1311 = vector.broadcast %270 : f32 to vector<16x128xf32>
    %1312 = arith.mulf %1070, %1311 : vector<16x128xf32>
    %1313 = vector.broadcast %271 : f32 to vector<16x128xf32>
    %1314 = arith.mulf %1100, %1313 : vector<16x128xf32>
    %1315 = arith.addf %1312, %1314 : vector<16x128xf32>
    %1316 = vector.broadcast %272 : f32 to vector<16x128xf32>
    %1317 = arith.mulf %1130, %1316 : vector<16x128xf32>
    %1318 = arith.addf %1315, %1317 : vector<16x128xf32>
    %1319 = vector.broadcast %273 : f32 to vector<16x128xf32>
    %1320 = arith.mulf %1160, %1319 : vector<16x128xf32>
    %1321 = arith.addf %1318, %1320 : vector<16x128xf32>
    %1322 = vector.broadcast %274 : f32 to vector<16x128xf32>
    %1323 = arith.mulf %1190, %1322 : vector<16x128xf32>
    %1324 = arith.addf %1321, %1323 : vector<16x128xf32>
    %1325 = vector.broadcast %275 : f32 to vector<16x128xf32>
    %1326 = arith.mulf %1220, %1325 : vector<16x128xf32>
    %1327 = arith.addf %1324, %1326 : vector<16x128xf32>
    %1328 = vector.broadcast %276 : f32 to vector<16x128xf32>
    %1329 = arith.mulf %1250, %1328 : vector<16x128xf32>
    %1330 = arith.addf %1327, %1329 : vector<16x128xf32>
    %1331 = vector.broadcast %277 : f32 to vector<16x128xf32>
    %1332 = arith.mulf %1280, %1331 : vector<16x128xf32>
    %1333 = arith.addf %1330, %1332 : vector<16x128xf32>
    %1334 = vector.broadcast %278 : f32 to vector<16x128xf32>
    %1335 = arith.mulf %1310, %1334 : vector<16x128xf32>
    %1336 = arith.addf %1333, %1335 : vector<16x128xf32>
    %1337 = vector.broadcast %351 : f32 to vector<16x128xf32>
    %1338 = arith.addf %1336, %1337 : vector<16x128xf32>
    %cst_434 = arith.constant 0.000000e+00 : f32
    %1339 = vector.broadcast %cst_434 : f32 to vector<16x128xf32>
    %1340 = arith.maximumf %1338, %1339 : vector<16x128xf32>
    %1341 = vector.broadcast %279 : f32 to vector<16x128xf32>
    %1342 = arith.mulf %1070, %1341 : vector<16x128xf32>
    %1343 = vector.broadcast %280 : f32 to vector<16x128xf32>
    %1344 = arith.mulf %1100, %1343 : vector<16x128xf32>
    %1345 = arith.addf %1342, %1344 : vector<16x128xf32>
    %1346 = vector.broadcast %281 : f32 to vector<16x128xf32>
    %1347 = arith.mulf %1130, %1346 : vector<16x128xf32>
    %1348 = arith.addf %1345, %1347 : vector<16x128xf32>
    %1349 = vector.broadcast %282 : f32 to vector<16x128xf32>
    %1350 = arith.mulf %1160, %1349 : vector<16x128xf32>
    %1351 = arith.addf %1348, %1350 : vector<16x128xf32>
    %1352 = vector.broadcast %283 : f32 to vector<16x128xf32>
    %1353 = arith.mulf %1190, %1352 : vector<16x128xf32>
    %1354 = arith.addf %1351, %1353 : vector<16x128xf32>
    %1355 = vector.broadcast %284 : f32 to vector<16x128xf32>
    %1356 = arith.mulf %1220, %1355 : vector<16x128xf32>
    %1357 = arith.addf %1354, %1356 : vector<16x128xf32>
    %1358 = vector.broadcast %285 : f32 to vector<16x128xf32>
    %1359 = arith.mulf %1250, %1358 : vector<16x128xf32>
    %1360 = arith.addf %1357, %1359 : vector<16x128xf32>
    %1361 = vector.broadcast %286 : f32 to vector<16x128xf32>
    %1362 = arith.mulf %1280, %1361 : vector<16x128xf32>
    %1363 = arith.addf %1360, %1362 : vector<16x128xf32>
    %1364 = vector.broadcast %287 : f32 to vector<16x128xf32>
    %1365 = arith.mulf %1310, %1364 : vector<16x128xf32>
    %1366 = arith.addf %1363, %1365 : vector<16x128xf32>
    %1367 = vector.broadcast %352 : f32 to vector<16x128xf32>
    %1368 = arith.addf %1366, %1367 : vector<16x128xf32>
    %cst_435 = arith.constant 0.000000e+00 : f32
    %1369 = vector.broadcast %cst_435 : f32 to vector<16x128xf32>
    %1370 = arith.maximumf %1368, %1369 : vector<16x128xf32>
    %1371 = vector.broadcast %288 : f32 to vector<16x128xf32>
    %1372 = arith.mulf %1070, %1371 : vector<16x128xf32>
    %1373 = vector.broadcast %289 : f32 to vector<16x128xf32>
    %1374 = arith.mulf %1100, %1373 : vector<16x128xf32>
    %1375 = arith.addf %1372, %1374 : vector<16x128xf32>
    %1376 = vector.broadcast %290 : f32 to vector<16x128xf32>
    %1377 = arith.mulf %1130, %1376 : vector<16x128xf32>
    %1378 = arith.addf %1375, %1377 : vector<16x128xf32>
    %1379 = vector.broadcast %291 : f32 to vector<16x128xf32>
    %1380 = arith.mulf %1160, %1379 : vector<16x128xf32>
    %1381 = arith.addf %1378, %1380 : vector<16x128xf32>
    %1382 = vector.broadcast %292 : f32 to vector<16x128xf32>
    %1383 = arith.mulf %1190, %1382 : vector<16x128xf32>
    %1384 = arith.addf %1381, %1383 : vector<16x128xf32>
    %1385 = vector.broadcast %293 : f32 to vector<16x128xf32>
    %1386 = arith.mulf %1220, %1385 : vector<16x128xf32>
    %1387 = arith.addf %1384, %1386 : vector<16x128xf32>
    %1388 = vector.broadcast %294 : f32 to vector<16x128xf32>
    %1389 = arith.mulf %1250, %1388 : vector<16x128xf32>
    %1390 = arith.addf %1387, %1389 : vector<16x128xf32>
    %1391 = vector.broadcast %295 : f32 to vector<16x128xf32>
    %1392 = arith.mulf %1280, %1391 : vector<16x128xf32>
    %1393 = arith.addf %1390, %1392 : vector<16x128xf32>
    %1394 = vector.broadcast %296 : f32 to vector<16x128xf32>
    %1395 = arith.mulf %1310, %1394 : vector<16x128xf32>
    %1396 = arith.addf %1393, %1395 : vector<16x128xf32>
    %1397 = vector.broadcast %353 : f32 to vector<16x128xf32>
    %1398 = arith.addf %1396, %1397 : vector<16x128xf32>
    %cst_436 = arith.constant 0.000000e+00 : f32
    %1399 = vector.broadcast %cst_436 : f32 to vector<16x128xf32>
    %1400 = arith.maximumf %1398, %1399 : vector<16x128xf32>
    %1401 = vector.broadcast %297 : f32 to vector<16x128xf32>
    %1402 = arith.mulf %1070, %1401 : vector<16x128xf32>
    %1403 = vector.broadcast %298 : f32 to vector<16x128xf32>
    %1404 = arith.mulf %1100, %1403 : vector<16x128xf32>
    %1405 = arith.addf %1402, %1404 : vector<16x128xf32>
    %1406 = vector.broadcast %299 : f32 to vector<16x128xf32>
    %1407 = arith.mulf %1130, %1406 : vector<16x128xf32>
    %1408 = arith.addf %1405, %1407 : vector<16x128xf32>
    %1409 = vector.broadcast %300 : f32 to vector<16x128xf32>
    %1410 = arith.mulf %1160, %1409 : vector<16x128xf32>
    %1411 = arith.addf %1408, %1410 : vector<16x128xf32>
    %1412 = vector.broadcast %301 : f32 to vector<16x128xf32>
    %1413 = arith.mulf %1190, %1412 : vector<16x128xf32>
    %1414 = arith.addf %1411, %1413 : vector<16x128xf32>
    %1415 = vector.broadcast %302 : f32 to vector<16x128xf32>
    %1416 = arith.mulf %1220, %1415 : vector<16x128xf32>
    %1417 = arith.addf %1414, %1416 : vector<16x128xf32>
    %1418 = vector.broadcast %303 : f32 to vector<16x128xf32>
    %1419 = arith.mulf %1250, %1418 : vector<16x128xf32>
    %1420 = arith.addf %1417, %1419 : vector<16x128xf32>
    %1421 = vector.broadcast %304 : f32 to vector<16x128xf32>
    %1422 = arith.mulf %1280, %1421 : vector<16x128xf32>
    %1423 = arith.addf %1420, %1422 : vector<16x128xf32>
    %1424 = vector.broadcast %305 : f32 to vector<16x128xf32>
    %1425 = arith.mulf %1310, %1424 : vector<16x128xf32>
    %1426 = arith.addf %1423, %1425 : vector<16x128xf32>
    %1427 = vector.broadcast %354 : f32 to vector<16x128xf32>
    %1428 = arith.addf %1426, %1427 : vector<16x128xf32>
    %cst_437 = arith.constant 0.000000e+00 : f32
    %1429 = vector.broadcast %cst_437 : f32 to vector<16x128xf32>
    %1430 = arith.maximumf %1428, %1429 : vector<16x128xf32>
    %1431 = vector.broadcast %306 : f32 to vector<16x128xf32>
    %1432 = arith.mulf %1070, %1431 : vector<16x128xf32>
    %1433 = vector.broadcast %307 : f32 to vector<16x128xf32>
    %1434 = arith.mulf %1100, %1433 : vector<16x128xf32>
    %1435 = arith.addf %1432, %1434 : vector<16x128xf32>
    %1436 = vector.broadcast %308 : f32 to vector<16x128xf32>
    %1437 = arith.mulf %1130, %1436 : vector<16x128xf32>
    %1438 = arith.addf %1435, %1437 : vector<16x128xf32>
    %1439 = vector.broadcast %309 : f32 to vector<16x128xf32>
    %1440 = arith.mulf %1160, %1439 : vector<16x128xf32>
    %1441 = arith.addf %1438, %1440 : vector<16x128xf32>
    %1442 = vector.broadcast %310 : f32 to vector<16x128xf32>
    %1443 = arith.mulf %1190, %1442 : vector<16x128xf32>
    %1444 = arith.addf %1441, %1443 : vector<16x128xf32>
    %1445 = vector.broadcast %311 : f32 to vector<16x128xf32>
    %1446 = arith.mulf %1220, %1445 : vector<16x128xf32>
    %1447 = arith.addf %1444, %1446 : vector<16x128xf32>
    %1448 = vector.broadcast %312 : f32 to vector<16x128xf32>
    %1449 = arith.mulf %1250, %1448 : vector<16x128xf32>
    %1450 = arith.addf %1447, %1449 : vector<16x128xf32>
    %1451 = vector.broadcast %313 : f32 to vector<16x128xf32>
    %1452 = arith.mulf %1280, %1451 : vector<16x128xf32>
    %1453 = arith.addf %1450, %1452 : vector<16x128xf32>
    %1454 = vector.broadcast %314 : f32 to vector<16x128xf32>
    %1455 = arith.mulf %1310, %1454 : vector<16x128xf32>
    %1456 = arith.addf %1453, %1455 : vector<16x128xf32>
    %1457 = vector.broadcast %355 : f32 to vector<16x128xf32>
    %1458 = arith.addf %1456, %1457 : vector<16x128xf32>
    %cst_438 = arith.constant 0.000000e+00 : f32
    %1459 = vector.broadcast %cst_438 : f32 to vector<16x128xf32>
    %1460 = arith.maximumf %1458, %1459 : vector<16x128xf32>
    %1461 = vector.broadcast %315 : f32 to vector<16x128xf32>
    %1462 = arith.mulf %1070, %1461 : vector<16x128xf32>
    %1463 = vector.broadcast %316 : f32 to vector<16x128xf32>
    %1464 = arith.mulf %1100, %1463 : vector<16x128xf32>
    %1465 = arith.addf %1462, %1464 : vector<16x128xf32>
    %1466 = vector.broadcast %317 : f32 to vector<16x128xf32>
    %1467 = arith.mulf %1130, %1466 : vector<16x128xf32>
    %1468 = arith.addf %1465, %1467 : vector<16x128xf32>
    %1469 = vector.broadcast %318 : f32 to vector<16x128xf32>
    %1470 = arith.mulf %1160, %1469 : vector<16x128xf32>
    %1471 = arith.addf %1468, %1470 : vector<16x128xf32>
    %1472 = vector.broadcast %319 : f32 to vector<16x128xf32>
    %1473 = arith.mulf %1190, %1472 : vector<16x128xf32>
    %1474 = arith.addf %1471, %1473 : vector<16x128xf32>
    %1475 = vector.broadcast %320 : f32 to vector<16x128xf32>
    %1476 = arith.mulf %1220, %1475 : vector<16x128xf32>
    %1477 = arith.addf %1474, %1476 : vector<16x128xf32>
    %1478 = vector.broadcast %321 : f32 to vector<16x128xf32>
    %1479 = arith.mulf %1250, %1478 : vector<16x128xf32>
    %1480 = arith.addf %1477, %1479 : vector<16x128xf32>
    %1481 = vector.broadcast %322 : f32 to vector<16x128xf32>
    %1482 = arith.mulf %1280, %1481 : vector<16x128xf32>
    %1483 = arith.addf %1480, %1482 : vector<16x128xf32>
    %1484 = vector.broadcast %323 : f32 to vector<16x128xf32>
    %1485 = arith.mulf %1310, %1484 : vector<16x128xf32>
    %1486 = arith.addf %1483, %1485 : vector<16x128xf32>
    %1487 = vector.broadcast %356 : f32 to vector<16x128xf32>
    %1488 = arith.addf %1486, %1487 : vector<16x128xf32>
    %cst_439 = arith.constant 0.000000e+00 : f32
    %1489 = vector.broadcast %cst_439 : f32 to vector<16x128xf32>
    %1490 = arith.maximumf %1488, %1489 : vector<16x128xf32>
    %1491 = vector.broadcast %324 : f32 to vector<16x128xf32>
    %1492 = arith.mulf %1070, %1491 : vector<16x128xf32>
    %1493 = vector.broadcast %325 : f32 to vector<16x128xf32>
    %1494 = arith.mulf %1100, %1493 : vector<16x128xf32>
    %1495 = arith.addf %1492, %1494 : vector<16x128xf32>
    %1496 = vector.broadcast %326 : f32 to vector<16x128xf32>
    %1497 = arith.mulf %1130, %1496 : vector<16x128xf32>
    %1498 = arith.addf %1495, %1497 : vector<16x128xf32>
    %1499 = vector.broadcast %327 : f32 to vector<16x128xf32>
    %1500 = arith.mulf %1160, %1499 : vector<16x128xf32>
    %1501 = arith.addf %1498, %1500 : vector<16x128xf32>
    %1502 = vector.broadcast %328 : f32 to vector<16x128xf32>
    %1503 = arith.mulf %1190, %1502 : vector<16x128xf32>
    %1504 = arith.addf %1501, %1503 : vector<16x128xf32>
    %1505 = vector.broadcast %329 : f32 to vector<16x128xf32>
    %1506 = arith.mulf %1220, %1505 : vector<16x128xf32>
    %1507 = arith.addf %1504, %1506 : vector<16x128xf32>
    %1508 = vector.broadcast %330 : f32 to vector<16x128xf32>
    %1509 = arith.mulf %1250, %1508 : vector<16x128xf32>
    %1510 = arith.addf %1507, %1509 : vector<16x128xf32>
    %1511 = vector.broadcast %331 : f32 to vector<16x128xf32>
    %1512 = arith.mulf %1280, %1511 : vector<16x128xf32>
    %1513 = arith.addf %1510, %1512 : vector<16x128xf32>
    %1514 = vector.broadcast %332 : f32 to vector<16x128xf32>
    %1515 = arith.mulf %1310, %1514 : vector<16x128xf32>
    %1516 = arith.addf %1513, %1515 : vector<16x128xf32>
    %1517 = vector.broadcast %357 : f32 to vector<16x128xf32>
    %1518 = arith.addf %1516, %1517 : vector<16x128xf32>
    %cst_440 = arith.constant 0.000000e+00 : f32
    %1519 = vector.broadcast %cst_440 : f32 to vector<16x128xf32>
    %1520 = arith.maximumf %1518, %1519 : vector<16x128xf32>
    %1521 = vector.broadcast %333 : f32 to vector<16x128xf32>
    %1522 = arith.mulf %1070, %1521 : vector<16x128xf32>
    %1523 = vector.broadcast %334 : f32 to vector<16x128xf32>
    %1524 = arith.mulf %1100, %1523 : vector<16x128xf32>
    %1525 = arith.addf %1522, %1524 : vector<16x128xf32>
    %1526 = vector.broadcast %335 : f32 to vector<16x128xf32>
    %1527 = arith.mulf %1130, %1526 : vector<16x128xf32>
    %1528 = arith.addf %1525, %1527 : vector<16x128xf32>
    %1529 = vector.broadcast %336 : f32 to vector<16x128xf32>
    %1530 = arith.mulf %1160, %1529 : vector<16x128xf32>
    %1531 = arith.addf %1528, %1530 : vector<16x128xf32>
    %1532 = vector.broadcast %337 : f32 to vector<16x128xf32>
    %1533 = arith.mulf %1190, %1532 : vector<16x128xf32>
    %1534 = arith.addf %1531, %1533 : vector<16x128xf32>
    %1535 = vector.broadcast %338 : f32 to vector<16x128xf32>
    %1536 = arith.mulf %1220, %1535 : vector<16x128xf32>
    %1537 = arith.addf %1534, %1536 : vector<16x128xf32>
    %1538 = vector.broadcast %339 : f32 to vector<16x128xf32>
    %1539 = arith.mulf %1250, %1538 : vector<16x128xf32>
    %1540 = arith.addf %1537, %1539 : vector<16x128xf32>
    %1541 = vector.broadcast %340 : f32 to vector<16x128xf32>
    %1542 = arith.mulf %1280, %1541 : vector<16x128xf32>
    %1543 = arith.addf %1540, %1542 : vector<16x128xf32>
    %1544 = vector.broadcast %341 : f32 to vector<16x128xf32>
    %1545 = arith.mulf %1310, %1544 : vector<16x128xf32>
    %1546 = arith.addf %1543, %1545 : vector<16x128xf32>
    %1547 = vector.broadcast %358 : f32 to vector<16x128xf32>
    %1548 = arith.addf %1546, %1547 : vector<16x128xf32>
    %cst_441 = arith.constant 0.000000e+00 : f32
    %1549 = vector.broadcast %cst_441 : f32 to vector<16x128xf32>
    %1550 = arith.maximumf %1548, %1549 : vector<16x128xf32>
    %1551 = vector.broadcast %342 : f32 to vector<16x128xf32>
    %1552 = arith.mulf %1070, %1551 : vector<16x128xf32>
    %1553 = vector.broadcast %343 : f32 to vector<16x128xf32>
    %1554 = arith.mulf %1100, %1553 : vector<16x128xf32>
    %1555 = arith.addf %1552, %1554 : vector<16x128xf32>
    %1556 = vector.broadcast %344 : f32 to vector<16x128xf32>
    %1557 = arith.mulf %1130, %1556 : vector<16x128xf32>
    %1558 = arith.addf %1555, %1557 : vector<16x128xf32>
    %1559 = vector.broadcast %345 : f32 to vector<16x128xf32>
    %1560 = arith.mulf %1160, %1559 : vector<16x128xf32>
    %1561 = arith.addf %1558, %1560 : vector<16x128xf32>
    %1562 = vector.broadcast %346 : f32 to vector<16x128xf32>
    %1563 = arith.mulf %1190, %1562 : vector<16x128xf32>
    %1564 = arith.addf %1561, %1563 : vector<16x128xf32>
    %1565 = vector.broadcast %347 : f32 to vector<16x128xf32>
    %1566 = arith.mulf %1220, %1565 : vector<16x128xf32>
    %1567 = arith.addf %1564, %1566 : vector<16x128xf32>
    %1568 = vector.broadcast %348 : f32 to vector<16x128xf32>
    %1569 = arith.mulf %1250, %1568 : vector<16x128xf32>
    %1570 = arith.addf %1567, %1569 : vector<16x128xf32>
    %1571 = vector.broadcast %349 : f32 to vector<16x128xf32>
    %1572 = arith.mulf %1280, %1571 : vector<16x128xf32>
    %1573 = arith.addf %1570, %1572 : vector<16x128xf32>
    %1574 = vector.broadcast %350 : f32 to vector<16x128xf32>
    %1575 = arith.mulf %1310, %1574 : vector<16x128xf32>
    %1576 = arith.addf %1573, %1575 : vector<16x128xf32>
    %1577 = vector.broadcast %359 : f32 to vector<16x128xf32>
    %1578 = arith.addf %1576, %1577 : vector<16x128xf32>
    %cst_442 = arith.constant 0.000000e+00 : f32
    %1579 = vector.broadcast %cst_442 : f32 to vector<16x128xf32>
    %1580 = arith.maximumf %1578, %1579 : vector<16x128xf32>
    %1581 = vector.broadcast %360 : f32 to vector<16x128xf32>
    %1582 = arith.mulf %1340, %1581 : vector<16x128xf32>
    %1583 = vector.broadcast %361 : f32 to vector<16x128xf32>
    %1584 = arith.mulf %1370, %1583 : vector<16x128xf32>
    %1585 = arith.addf %1582, %1584 : vector<16x128xf32>
    %1586 = vector.broadcast %362 : f32 to vector<16x128xf32>
    %1587 = arith.mulf %1400, %1586 : vector<16x128xf32>
    %1588 = arith.addf %1585, %1587 : vector<16x128xf32>
    %1589 = vector.broadcast %363 : f32 to vector<16x128xf32>
    %1590 = arith.mulf %1430, %1589 : vector<16x128xf32>
    %1591 = arith.addf %1588, %1590 : vector<16x128xf32>
    %1592 = vector.broadcast %364 : f32 to vector<16x128xf32>
    %1593 = arith.mulf %1460, %1592 : vector<16x128xf32>
    %1594 = arith.addf %1591, %1593 : vector<16x128xf32>
    %1595 = vector.broadcast %365 : f32 to vector<16x128xf32>
    %1596 = arith.mulf %1490, %1595 : vector<16x128xf32>
    %1597 = arith.addf %1594, %1596 : vector<16x128xf32>
    %1598 = vector.broadcast %366 : f32 to vector<16x128xf32>
    %1599 = arith.mulf %1520, %1598 : vector<16x128xf32>
    %1600 = arith.addf %1597, %1599 : vector<16x128xf32>
    %1601 = vector.broadcast %367 : f32 to vector<16x128xf32>
    %1602 = arith.mulf %1550, %1601 : vector<16x128xf32>
    %1603 = arith.addf %1600, %1602 : vector<16x128xf32>
    %1604 = vector.broadcast %368 : f32 to vector<16x128xf32>
    %1605 = arith.mulf %1580, %1604 : vector<16x128xf32>
    %1606 = arith.addf %1603, %1605 : vector<16x128xf32>
    %1607 = vector.broadcast %441 : f32 to vector<16x128xf32>
    %1608 = arith.addf %1606, %1607 : vector<16x128xf32>
    %cst_443 = arith.constant 0.000000e+00 : f32
    %1609 = vector.broadcast %cst_443 : f32 to vector<16x128xf32>
    %1610 = arith.maximumf %1608, %1609 : vector<16x128xf32>
    %1611 = vector.broadcast %369 : f32 to vector<16x128xf32>
    %1612 = arith.mulf %1340, %1611 : vector<16x128xf32>
    %1613 = vector.broadcast %370 : f32 to vector<16x128xf32>
    %1614 = arith.mulf %1370, %1613 : vector<16x128xf32>
    %1615 = arith.addf %1612, %1614 : vector<16x128xf32>
    %1616 = vector.broadcast %371 : f32 to vector<16x128xf32>
    %1617 = arith.mulf %1400, %1616 : vector<16x128xf32>
    %1618 = arith.addf %1615, %1617 : vector<16x128xf32>
    %1619 = vector.broadcast %372 : f32 to vector<16x128xf32>
    %1620 = arith.mulf %1430, %1619 : vector<16x128xf32>
    %1621 = arith.addf %1618, %1620 : vector<16x128xf32>
    %1622 = vector.broadcast %373 : f32 to vector<16x128xf32>
    %1623 = arith.mulf %1460, %1622 : vector<16x128xf32>
    %1624 = arith.addf %1621, %1623 : vector<16x128xf32>
    %1625 = vector.broadcast %374 : f32 to vector<16x128xf32>
    %1626 = arith.mulf %1490, %1625 : vector<16x128xf32>
    %1627 = arith.addf %1624, %1626 : vector<16x128xf32>
    %1628 = vector.broadcast %375 : f32 to vector<16x128xf32>
    %1629 = arith.mulf %1520, %1628 : vector<16x128xf32>
    %1630 = arith.addf %1627, %1629 : vector<16x128xf32>
    %1631 = vector.broadcast %376 : f32 to vector<16x128xf32>
    %1632 = arith.mulf %1550, %1631 : vector<16x128xf32>
    %1633 = arith.addf %1630, %1632 : vector<16x128xf32>
    %1634 = vector.broadcast %377 : f32 to vector<16x128xf32>
    %1635 = arith.mulf %1580, %1634 : vector<16x128xf32>
    %1636 = arith.addf %1633, %1635 : vector<16x128xf32>
    %1637 = vector.broadcast %442 : f32 to vector<16x128xf32>
    %1638 = arith.addf %1636, %1637 : vector<16x128xf32>
    %cst_444 = arith.constant 0.000000e+00 : f32
    %1639 = vector.broadcast %cst_444 : f32 to vector<16x128xf32>
    %1640 = arith.maximumf %1638, %1639 : vector<16x128xf32>
    %1641 = vector.broadcast %378 : f32 to vector<16x128xf32>
    %1642 = arith.mulf %1340, %1641 : vector<16x128xf32>
    %1643 = vector.broadcast %379 : f32 to vector<16x128xf32>
    %1644 = arith.mulf %1370, %1643 : vector<16x128xf32>
    %1645 = arith.addf %1642, %1644 : vector<16x128xf32>
    %1646 = vector.broadcast %380 : f32 to vector<16x128xf32>
    %1647 = arith.mulf %1400, %1646 : vector<16x128xf32>
    %1648 = arith.addf %1645, %1647 : vector<16x128xf32>
    %1649 = vector.broadcast %381 : f32 to vector<16x128xf32>
    %1650 = arith.mulf %1430, %1649 : vector<16x128xf32>
    %1651 = arith.addf %1648, %1650 : vector<16x128xf32>
    %1652 = vector.broadcast %382 : f32 to vector<16x128xf32>
    %1653 = arith.mulf %1460, %1652 : vector<16x128xf32>
    %1654 = arith.addf %1651, %1653 : vector<16x128xf32>
    %1655 = vector.broadcast %383 : f32 to vector<16x128xf32>
    %1656 = arith.mulf %1490, %1655 : vector<16x128xf32>
    %1657 = arith.addf %1654, %1656 : vector<16x128xf32>
    %1658 = vector.broadcast %384 : f32 to vector<16x128xf32>
    %1659 = arith.mulf %1520, %1658 : vector<16x128xf32>
    %1660 = arith.addf %1657, %1659 : vector<16x128xf32>
    %1661 = vector.broadcast %385 : f32 to vector<16x128xf32>
    %1662 = arith.mulf %1550, %1661 : vector<16x128xf32>
    %1663 = arith.addf %1660, %1662 : vector<16x128xf32>
    %1664 = vector.broadcast %386 : f32 to vector<16x128xf32>
    %1665 = arith.mulf %1580, %1664 : vector<16x128xf32>
    %1666 = arith.addf %1663, %1665 : vector<16x128xf32>
    %1667 = vector.broadcast %443 : f32 to vector<16x128xf32>
    %1668 = arith.addf %1666, %1667 : vector<16x128xf32>
    %cst_445 = arith.constant 0.000000e+00 : f32
    %1669 = vector.broadcast %cst_445 : f32 to vector<16x128xf32>
    %1670 = arith.maximumf %1668, %1669 : vector<16x128xf32>
    %1671 = vector.broadcast %387 : f32 to vector<16x128xf32>
    %1672 = arith.mulf %1340, %1671 : vector<16x128xf32>
    %1673 = vector.broadcast %388 : f32 to vector<16x128xf32>
    %1674 = arith.mulf %1370, %1673 : vector<16x128xf32>
    %1675 = arith.addf %1672, %1674 : vector<16x128xf32>
    %1676 = vector.broadcast %389 : f32 to vector<16x128xf32>
    %1677 = arith.mulf %1400, %1676 : vector<16x128xf32>
    %1678 = arith.addf %1675, %1677 : vector<16x128xf32>
    %1679 = vector.broadcast %390 : f32 to vector<16x128xf32>
    %1680 = arith.mulf %1430, %1679 : vector<16x128xf32>
    %1681 = arith.addf %1678, %1680 : vector<16x128xf32>
    %1682 = vector.broadcast %391 : f32 to vector<16x128xf32>
    %1683 = arith.mulf %1460, %1682 : vector<16x128xf32>
    %1684 = arith.addf %1681, %1683 : vector<16x128xf32>
    %1685 = vector.broadcast %392 : f32 to vector<16x128xf32>
    %1686 = arith.mulf %1490, %1685 : vector<16x128xf32>
    %1687 = arith.addf %1684, %1686 : vector<16x128xf32>
    %1688 = vector.broadcast %393 : f32 to vector<16x128xf32>
    %1689 = arith.mulf %1520, %1688 : vector<16x128xf32>
    %1690 = arith.addf %1687, %1689 : vector<16x128xf32>
    %1691 = vector.broadcast %394 : f32 to vector<16x128xf32>
    %1692 = arith.mulf %1550, %1691 : vector<16x128xf32>
    %1693 = arith.addf %1690, %1692 : vector<16x128xf32>
    %1694 = vector.broadcast %395 : f32 to vector<16x128xf32>
    %1695 = arith.mulf %1580, %1694 : vector<16x128xf32>
    %1696 = arith.addf %1693, %1695 : vector<16x128xf32>
    %1697 = vector.broadcast %444 : f32 to vector<16x128xf32>
    %1698 = arith.addf %1696, %1697 : vector<16x128xf32>
    %cst_446 = arith.constant 0.000000e+00 : f32
    %1699 = vector.broadcast %cst_446 : f32 to vector<16x128xf32>
    %1700 = arith.maximumf %1698, %1699 : vector<16x128xf32>
    %1701 = vector.broadcast %396 : f32 to vector<16x128xf32>
    %1702 = arith.mulf %1340, %1701 : vector<16x128xf32>
    %1703 = vector.broadcast %397 : f32 to vector<16x128xf32>
    %1704 = arith.mulf %1370, %1703 : vector<16x128xf32>
    %1705 = arith.addf %1702, %1704 : vector<16x128xf32>
    %1706 = vector.broadcast %398 : f32 to vector<16x128xf32>
    %1707 = arith.mulf %1400, %1706 : vector<16x128xf32>
    %1708 = arith.addf %1705, %1707 : vector<16x128xf32>
    %1709 = vector.broadcast %399 : f32 to vector<16x128xf32>
    %1710 = arith.mulf %1430, %1709 : vector<16x128xf32>
    %1711 = arith.addf %1708, %1710 : vector<16x128xf32>
    %1712 = vector.broadcast %400 : f32 to vector<16x128xf32>
    %1713 = arith.mulf %1460, %1712 : vector<16x128xf32>
    %1714 = arith.addf %1711, %1713 : vector<16x128xf32>
    %1715 = vector.broadcast %401 : f32 to vector<16x128xf32>
    %1716 = arith.mulf %1490, %1715 : vector<16x128xf32>
    %1717 = arith.addf %1714, %1716 : vector<16x128xf32>
    %1718 = vector.broadcast %402 : f32 to vector<16x128xf32>
    %1719 = arith.mulf %1520, %1718 : vector<16x128xf32>
    %1720 = arith.addf %1717, %1719 : vector<16x128xf32>
    %1721 = vector.broadcast %403 : f32 to vector<16x128xf32>
    %1722 = arith.mulf %1550, %1721 : vector<16x128xf32>
    %1723 = arith.addf %1720, %1722 : vector<16x128xf32>
    %1724 = vector.broadcast %404 : f32 to vector<16x128xf32>
    %1725 = arith.mulf %1580, %1724 : vector<16x128xf32>
    %1726 = arith.addf %1723, %1725 : vector<16x128xf32>
    %1727 = vector.broadcast %445 : f32 to vector<16x128xf32>
    %1728 = arith.addf %1726, %1727 : vector<16x128xf32>
    %cst_447 = arith.constant 0.000000e+00 : f32
    %1729 = vector.broadcast %cst_447 : f32 to vector<16x128xf32>
    %1730 = arith.maximumf %1728, %1729 : vector<16x128xf32>
    %1731 = vector.broadcast %405 : f32 to vector<16x128xf32>
    %1732 = arith.mulf %1340, %1731 : vector<16x128xf32>
    %1733 = vector.broadcast %406 : f32 to vector<16x128xf32>
    %1734 = arith.mulf %1370, %1733 : vector<16x128xf32>
    %1735 = arith.addf %1732, %1734 : vector<16x128xf32>
    %1736 = vector.broadcast %407 : f32 to vector<16x128xf32>
    %1737 = arith.mulf %1400, %1736 : vector<16x128xf32>
    %1738 = arith.addf %1735, %1737 : vector<16x128xf32>
    %1739 = vector.broadcast %408 : f32 to vector<16x128xf32>
    %1740 = arith.mulf %1430, %1739 : vector<16x128xf32>
    %1741 = arith.addf %1738, %1740 : vector<16x128xf32>
    %1742 = vector.broadcast %409 : f32 to vector<16x128xf32>
    %1743 = arith.mulf %1460, %1742 : vector<16x128xf32>
    %1744 = arith.addf %1741, %1743 : vector<16x128xf32>
    %1745 = vector.broadcast %410 : f32 to vector<16x128xf32>
    %1746 = arith.mulf %1490, %1745 : vector<16x128xf32>
    %1747 = arith.addf %1744, %1746 : vector<16x128xf32>
    %1748 = vector.broadcast %411 : f32 to vector<16x128xf32>
    %1749 = arith.mulf %1520, %1748 : vector<16x128xf32>
    %1750 = arith.addf %1747, %1749 : vector<16x128xf32>
    %1751 = vector.broadcast %412 : f32 to vector<16x128xf32>
    %1752 = arith.mulf %1550, %1751 : vector<16x128xf32>
    %1753 = arith.addf %1750, %1752 : vector<16x128xf32>
    %1754 = vector.broadcast %413 : f32 to vector<16x128xf32>
    %1755 = arith.mulf %1580, %1754 : vector<16x128xf32>
    %1756 = arith.addf %1753, %1755 : vector<16x128xf32>
    %1757 = vector.broadcast %446 : f32 to vector<16x128xf32>
    %1758 = arith.addf %1756, %1757 : vector<16x128xf32>
    %cst_448 = arith.constant 0.000000e+00 : f32
    %1759 = vector.broadcast %cst_448 : f32 to vector<16x128xf32>
    %1760 = arith.maximumf %1758, %1759 : vector<16x128xf32>
    %1761 = vector.broadcast %414 : f32 to vector<16x128xf32>
    %1762 = arith.mulf %1340, %1761 : vector<16x128xf32>
    %1763 = vector.broadcast %415 : f32 to vector<16x128xf32>
    %1764 = arith.mulf %1370, %1763 : vector<16x128xf32>
    %1765 = arith.addf %1762, %1764 : vector<16x128xf32>
    %1766 = vector.broadcast %416 : f32 to vector<16x128xf32>
    %1767 = arith.mulf %1400, %1766 : vector<16x128xf32>
    %1768 = arith.addf %1765, %1767 : vector<16x128xf32>
    %1769 = vector.broadcast %417 : f32 to vector<16x128xf32>
    %1770 = arith.mulf %1430, %1769 : vector<16x128xf32>
    %1771 = arith.addf %1768, %1770 : vector<16x128xf32>
    %1772 = vector.broadcast %418 : f32 to vector<16x128xf32>
    %1773 = arith.mulf %1460, %1772 : vector<16x128xf32>
    %1774 = arith.addf %1771, %1773 : vector<16x128xf32>
    %1775 = vector.broadcast %419 : f32 to vector<16x128xf32>
    %1776 = arith.mulf %1490, %1775 : vector<16x128xf32>
    %1777 = arith.addf %1774, %1776 : vector<16x128xf32>
    %1778 = vector.broadcast %420 : f32 to vector<16x128xf32>
    %1779 = arith.mulf %1520, %1778 : vector<16x128xf32>
    %1780 = arith.addf %1777, %1779 : vector<16x128xf32>
    %1781 = vector.broadcast %421 : f32 to vector<16x128xf32>
    %1782 = arith.mulf %1550, %1781 : vector<16x128xf32>
    %1783 = arith.addf %1780, %1782 : vector<16x128xf32>
    %1784 = vector.broadcast %422 : f32 to vector<16x128xf32>
    %1785 = arith.mulf %1580, %1784 : vector<16x128xf32>
    %1786 = arith.addf %1783, %1785 : vector<16x128xf32>
    %1787 = vector.broadcast %447 : f32 to vector<16x128xf32>
    %1788 = arith.addf %1786, %1787 : vector<16x128xf32>
    %cst_449 = arith.constant 0.000000e+00 : f32
    %1789 = vector.broadcast %cst_449 : f32 to vector<16x128xf32>
    %1790 = arith.maximumf %1788, %1789 : vector<16x128xf32>
    %1791 = vector.broadcast %423 : f32 to vector<16x128xf32>
    %1792 = arith.mulf %1340, %1791 : vector<16x128xf32>
    %1793 = vector.broadcast %424 : f32 to vector<16x128xf32>
    %1794 = arith.mulf %1370, %1793 : vector<16x128xf32>
    %1795 = arith.addf %1792, %1794 : vector<16x128xf32>
    %1796 = vector.broadcast %425 : f32 to vector<16x128xf32>
    %1797 = arith.mulf %1400, %1796 : vector<16x128xf32>
    %1798 = arith.addf %1795, %1797 : vector<16x128xf32>
    %1799 = vector.broadcast %426 : f32 to vector<16x128xf32>
    %1800 = arith.mulf %1430, %1799 : vector<16x128xf32>
    %1801 = arith.addf %1798, %1800 : vector<16x128xf32>
    %1802 = vector.broadcast %427 : f32 to vector<16x128xf32>
    %1803 = arith.mulf %1460, %1802 : vector<16x128xf32>
    %1804 = arith.addf %1801, %1803 : vector<16x128xf32>
    %1805 = vector.broadcast %428 : f32 to vector<16x128xf32>
    %1806 = arith.mulf %1490, %1805 : vector<16x128xf32>
    %1807 = arith.addf %1804, %1806 : vector<16x128xf32>
    %1808 = vector.broadcast %429 : f32 to vector<16x128xf32>
    %1809 = arith.mulf %1520, %1808 : vector<16x128xf32>
    %1810 = arith.addf %1807, %1809 : vector<16x128xf32>
    %1811 = vector.broadcast %430 : f32 to vector<16x128xf32>
    %1812 = arith.mulf %1550, %1811 : vector<16x128xf32>
    %1813 = arith.addf %1810, %1812 : vector<16x128xf32>
    %1814 = vector.broadcast %431 : f32 to vector<16x128xf32>
    %1815 = arith.mulf %1580, %1814 : vector<16x128xf32>
    %1816 = arith.addf %1813, %1815 : vector<16x128xf32>
    %1817 = vector.broadcast %448 : f32 to vector<16x128xf32>
    %1818 = arith.addf %1816, %1817 : vector<16x128xf32>
    %cst_450 = arith.constant 0.000000e+00 : f32
    %1819 = vector.broadcast %cst_450 : f32 to vector<16x128xf32>
    %1820 = arith.maximumf %1818, %1819 : vector<16x128xf32>
    %1821 = vector.broadcast %432 : f32 to vector<16x128xf32>
    %1822 = arith.mulf %1340, %1821 : vector<16x128xf32>
    %1823 = vector.broadcast %433 : f32 to vector<16x128xf32>
    %1824 = arith.mulf %1370, %1823 : vector<16x128xf32>
    %1825 = arith.addf %1822, %1824 : vector<16x128xf32>
    %1826 = vector.broadcast %434 : f32 to vector<16x128xf32>
    %1827 = arith.mulf %1400, %1826 : vector<16x128xf32>
    %1828 = arith.addf %1825, %1827 : vector<16x128xf32>
    %1829 = vector.broadcast %435 : f32 to vector<16x128xf32>
    %1830 = arith.mulf %1430, %1829 : vector<16x128xf32>
    %1831 = arith.addf %1828, %1830 : vector<16x128xf32>
    %1832 = vector.broadcast %436 : f32 to vector<16x128xf32>
    %1833 = arith.mulf %1460, %1832 : vector<16x128xf32>
    %1834 = arith.addf %1831, %1833 : vector<16x128xf32>
    %1835 = vector.broadcast %437 : f32 to vector<16x128xf32>
    %1836 = arith.mulf %1490, %1835 : vector<16x128xf32>
    %1837 = arith.addf %1834, %1836 : vector<16x128xf32>
    %1838 = vector.broadcast %438 : f32 to vector<16x128xf32>
    %1839 = arith.mulf %1520, %1838 : vector<16x128xf32>
    %1840 = arith.addf %1837, %1839 : vector<16x128xf32>
    %1841 = vector.broadcast %439 : f32 to vector<16x128xf32>
    %1842 = arith.mulf %1550, %1841 : vector<16x128xf32>
    %1843 = arith.addf %1840, %1842 : vector<16x128xf32>
    %1844 = vector.broadcast %440 : f32 to vector<16x128xf32>
    %1845 = arith.mulf %1580, %1844 : vector<16x128xf32>
    %1846 = arith.addf %1843, %1845 : vector<16x128xf32>
    %1847 = vector.broadcast %449 : f32 to vector<16x128xf32>
    %1848 = arith.addf %1846, %1847 : vector<16x128xf32>
    %cst_451 = arith.constant 0.000000e+00 : f32
    %1849 = vector.broadcast %cst_451 : f32 to vector<16x128xf32>
    %1850 = arith.maximumf %1848, %1849 : vector<16x128xf32>
    %1851 = vector.broadcast %450 : f32 to vector<16x128xf32>
    %1852 = arith.mulf %1610, %1851 : vector<16x128xf32>
    %1853 = vector.broadcast %451 : f32 to vector<16x128xf32>
    %1854 = arith.mulf %1640, %1853 : vector<16x128xf32>
    %1855 = arith.addf %1852, %1854 : vector<16x128xf32>
    %1856 = vector.broadcast %452 : f32 to vector<16x128xf32>
    %1857 = arith.mulf %1670, %1856 : vector<16x128xf32>
    %1858 = arith.addf %1855, %1857 : vector<16x128xf32>
    %1859 = vector.broadcast %453 : f32 to vector<16x128xf32>
    %1860 = arith.mulf %1700, %1859 : vector<16x128xf32>
    %1861 = arith.addf %1858, %1860 : vector<16x128xf32>
    %1862 = vector.broadcast %454 : f32 to vector<16x128xf32>
    %1863 = arith.mulf %1730, %1862 : vector<16x128xf32>
    %1864 = arith.addf %1861, %1863 : vector<16x128xf32>
    %1865 = vector.broadcast %455 : f32 to vector<16x128xf32>
    %1866 = arith.mulf %1760, %1865 : vector<16x128xf32>
    %1867 = arith.addf %1864, %1866 : vector<16x128xf32>
    %1868 = vector.broadcast %456 : f32 to vector<16x128xf32>
    %1869 = arith.mulf %1790, %1868 : vector<16x128xf32>
    %1870 = arith.addf %1867, %1869 : vector<16x128xf32>
    %1871 = vector.broadcast %457 : f32 to vector<16x128xf32>
    %1872 = arith.mulf %1820, %1871 : vector<16x128xf32>
    %1873 = arith.addf %1870, %1872 : vector<16x128xf32>
    %1874 = vector.broadcast %458 : f32 to vector<16x128xf32>
    %1875 = arith.mulf %1850, %1874 : vector<16x128xf32>
    %1876 = arith.addf %1873, %1875 : vector<16x128xf32>
    %1877 = vector.broadcast %468 : f32 to vector<16x128xf32>
    %1878 = arith.addf %1876, %1877 : vector<16x128xf32>
    %1879 = vector.broadcast %459 : f32 to vector<16x128xf32>
    %1880 = arith.mulf %1610, %1879 : vector<16x128xf32>
    %1881 = vector.broadcast %460 : f32 to vector<16x128xf32>
    %1882 = arith.mulf %1640, %1881 : vector<16x128xf32>
    %1883 = arith.addf %1880, %1882 : vector<16x128xf32>
    %1884 = vector.broadcast %461 : f32 to vector<16x128xf32>
    %1885 = arith.mulf %1670, %1884 : vector<16x128xf32>
    %1886 = arith.addf %1883, %1885 : vector<16x128xf32>
    %1887 = vector.broadcast %462 : f32 to vector<16x128xf32>
    %1888 = arith.mulf %1700, %1887 : vector<16x128xf32>
    %1889 = arith.addf %1886, %1888 : vector<16x128xf32>
    %1890 = vector.broadcast %463 : f32 to vector<16x128xf32>
    %1891 = arith.mulf %1730, %1890 : vector<16x128xf32>
    %1892 = arith.addf %1889, %1891 : vector<16x128xf32>
    %1893 = vector.broadcast %464 : f32 to vector<16x128xf32>
    %1894 = arith.mulf %1760, %1893 : vector<16x128xf32>
    %1895 = arith.addf %1892, %1894 : vector<16x128xf32>
    %1896 = vector.broadcast %465 : f32 to vector<16x128xf32>
    %1897 = arith.mulf %1790, %1896 : vector<16x128xf32>
    %1898 = arith.addf %1895, %1897 : vector<16x128xf32>
    %1899 = vector.broadcast %466 : f32 to vector<16x128xf32>
    %1900 = arith.mulf %1820, %1899 : vector<16x128xf32>
    %1901 = arith.addf %1898, %1900 : vector<16x128xf32>
    %1902 = vector.broadcast %467 : f32 to vector<16x128xf32>
    %1903 = arith.mulf %1850, %1902 : vector<16x128xf32>
    %1904 = arith.addf %1901, %1903 : vector<16x128xf32>
    %1905 = vector.broadcast %469 : f32 to vector<16x128xf32>
    %1906 = arith.addf %1904, %1905 : vector<16x128xf32>
    %c0_452 = arith.constant 0 : index
    %1907 = arith.index_cast %473 : i32 to index
    %c0_453 = arith.constant 0 : index
    %1908 = vector.load %arg14[%c0_452, %1907, %c0_453] : memref<2x16x128xf32, #tpu.memory_space<vmem>>, vector<1x16x128xf32>
    %1909 = vector.shape_cast %1908 : vector<1x16x128xf32> to vector<16x128xf32>
    %1910 = vector.shape_cast %1878 : vector<16x128xf32> to vector<1x16x128xf32>
    tpu.vector_store %arg14[%c0_452, %1907, %c0_453], %1910 {strides = array<i32>} : memref<2x16x128xf32, #tpu.memory_space<vmem>>, vector<1x16x128xf32>,
    %c1_454 = arith.constant 1 : index
    %1911 = arith.index_cast %473 : i32 to index
    %c0_455 = arith.constant 0 : index
    %1912 = vector.load %arg14[%c1_454, %1911, %c0_455] : memref<2x16x128xf32, #tpu.memory_space<vmem>>, vector<1x16x128xf32>
    %1913 = vector.shape_cast %1912 : vector<1x16x128xf32> to vector<16x128xf32>
    %1914 = vector.shape_cast %1906 : vector<16x128xf32> to vector<1x16x128xf32>
    tpu.vector_store %arg14[%c1_454, %1911, %c0_455], %1914 {strides = array<i32>} : memref<2x16x128xf32, #tpu.memory_space<vmem>>, vector<1x16x128xf32>,
    %c1_i32_456 = arith.constant 1 : i32
    return
  }
  func.func @transform_0(%arg0: i32) -> (i32, i32, i32) {
    %c0_i32 = arith.constant 0 : i32
    %c0_i32_0 = arith.constant 0 : i32
    %c0_i32_1 = arith.constant 0 : i32
    return %c0_i32, %arg0, %c0_i32_0 : i32, i32, i32
  }
  func.func @transform_1(%arg0: i32) -> i32 {
    %c0_i32 = arith.constant 0 : i32
    %c0_i32_0 = arith.constant 0 : i32
    return %c0_i32 : i32
  }
  func.func @transform_2(%arg0: i32) -> i32 {
    %c0_i32 = arith.constant 0 : i32
    %c0_i32_0 = arith.constant 0 : i32
    return %c0_i32 : i32
  }
  func.func @transform_3(%arg0: i32) -> i32 {
    %c0_i32 = arith.constant 0 : i32
    %c0_i32_0 = arith.constant 0 : i32
    return %c0_i32 : i32
  }
  func.func @transform_4(%arg0: i32) -> i32 {
    %c0_i32 = arith.constant 0 : i32
    %c0_i32_0 = arith.constant 0 : i32
    return %c0_i32 : i32
  }
  func.func @transform_5(%arg0: i32) -> i32 {
    %c0_i32 = arith.constant 0 : i32
    %c0_i32_0 = arith.constant 0 : i32
    return %c0_i32 : i32
  }
  func.func @transform_6(%arg0: i32) -> i32 {
    %c0_i32 = arith.constant 0 : i32
    %c0_i32_0 = arith.constant 0 : i32
    return %c0_i32 : i32
  }
  func.func @transform_7(%arg0: i32) -> i32 {
    %c0_i32 = arith.constant 0 : i32
    %c0_i32_0 = arith.constant 0 : i32
    return %c0_i32 : i32
  }
  func.func @transform_8(%arg0: i32) -> i32 {
    %c0_i32 = arith.constant 0 : i32
    %c0_i32_0 = arith.constant 0 : i32
    return %c0_i32 : i32
  }
  func.func @transform_9(%arg0: i32) -> i32 {
    %c0_i32 = arith.constant 0 : i32
    %c0_i32_0 = arith.constant 0 : i32
    return %c0_i32 : i32
  }
  func.func @transform_10(%arg0: i32) -> i32 {
    %c0_i32 = arith.constant 0 : i32
    %c0_i32_0 = arith.constant 0 : i32
    return %c0_i32 : i32
  }
  func.func @transform_11(%arg0: i32) -> i32 {
    %c0_i32 = arith.constant 0 : i32
    %c0_i32_0 = arith.constant 0 : i32
    return %c0_i32 : i32
  }
  func.func @transform_12(%arg0: i32) -> i32 {
    %c0_i32 = arith.constant 0 : i32
    %c0_i32_0 = arith.constant 0 : i32
    return %c0_i32 : i32
  }
  func.func @transform_13(%arg0: i32) -> (i32, i32, i32) {
    %c0_i32 = arith.constant 0 : i32
    %c0_i32_0 = arith.constant 0 : i32
    %c0_i32_1 = arith.constant 0 : i32
    return %c0_i32, %arg0, %c0_i32_0 : i32, i32, i32
  }
}

</mosaic_0001>

<bundles_post_ra>
// kernel: tpu_custom_call.1
= control target key start
LH: loop header
LB: loop body
LE: loop exit
PB: predicated region body
PF: predicated region fallthrough
CT: control target
= control target key end

     0   :  { %18 = vsyncpa [#allocation3], 0  ;;  %s6346_s0 = inlined_call_operand.hbm [shape: f32[9,16,128], index: 0, kind: input, shape index: {}]   ;;  %s6347_s1 = inlined_call_operand.vmem [shape: f32[81], index: 1, kind: input, shape index: {}]   ;;  %s6348_s2 = inlined_call_operand.vmem [shape: f32[9], index: 2, kind: input, shape index: {}]   ;;  %s6349_s3 = inlined_call_operand.vmem [shape: f32[81], index: 3, kind: input, shape index: {}]   ;;  %s6350_s4 = inlined_call_operand.vmem [shape: f32[9], index: 4, kind: input, shape index: {}]   ;;  %s6351_s5 = inlined_call_operand.vmem [shape: f32[81], index: 5, kind: input, shape index: {}]   ;;  %s6352_s6 = inlined_call_operand.vmem [shape: f32[9], index: 6, kind: input, shape index: {}]   ;;  %s6353_s7 = inlined_call_operand.vmem [shape: f32[81], index: 7, kind: input, shape index: {}]   ;;  %s6354_s8 = inlined_call_operand.vmem [shape: f32[9], index: 8, kind: input, shape index: {}]   ;;  %s6355_s9 = inlined_call_operand.vmem [shape: f32[81], index: 9, kind: input, shape index: {}]   ;;  %s6356_s10 = inlined_call_operand.vmem [shape: f32[9], index: 10, kind: input, shape index: {}]   ;;  %s6357_s11 = inlined_call_operand.vmem [shape: f32[18], index: 11, kind: input, shape index: {}]   ;;  %s6358_s12 = inlined_call_operand.vmem [shape: f32[2], index: 12, kind: input, shape index: {}]   ;;  %s6359_s13 = inlined_call_operand.hbm [shape: f32[2,16,128], index: 13, kind: output, shape index: {}]  }
   0x1   :  { %19 = vsyncpa [#allocation5], 0 }
   0x2   :  { %20 = vsyncpa [#allocation8], 0 }
   0x3   :  { %21 = vsyncpa [#allocation11], 0 }
   0x4   :  { %22 = vsyncpa [#allocation14], 0 }
   0x5   :  { %23 = vsyncpa [#allocation17], 0 }
   0x6   :  { %24 = vsyncpa [#allocation20], 0 }
   0x7   :  { %25 = vsyncpa [#allocation23], 0  ;;  %s55_s27 = sshll.u32 %s6348_s2, 4  ;;  %s56_s27 = int_to_ptr.vmem [resolvable:$true] %s55_s27 }
   0x8   :  { %26 = vsyncpa [#allocation4], 0  ;;  %s75_s30 = sshll.u32 %s6350_s4, 4  ;;  %s3467_s14 = scalar_lea.vmem %s56_s27, 16  ;;  %s76_s30 = int_to_ptr.vmem [resolvable:$true] %s75_s30 }
   0x9   :  { %p3468_p0 = scmp.ne.s32.totalorder %s56_s27, %s3467_s14  ;;  %p3472_p1 = scmp.lt.s32.totalorder %s56_s27, %s56_s27 }
   0xa   :  { %p3473_p2 = scmp.lt.s32.totalorder %s3467_s14, %s3467_s14 }
   0xc   :  { %p3474_p3 = por %p3473_p2, %p3472_p1 }
   0xe   :  { %p3475_p4 = pnand %p3474_p3, %p3468_p0 }
  0x10   :  { %3478 = shalt.err (!%p3475_p4)
}
  0x11   :  { %s3673_s15 = smov [#allocation7]   ;;  %s3479_s16 = scalar_lea.vmem %s76_s30, 16 }
  0x12   :  { %58 = dma.vmem_to_smem %s56_s27, 16, %s3673_s15, [#allocation8]  }
  0x13   :  { %p3480_p5 = scmp.ne.s32.totalorder %s76_s30, %s3479_s16  ;;  %p3484_p6 = scmp.lt.s32.totalorder %s76_s30, %s76_s30 }
  0x14   :  { %p3485_p7 = scmp.lt.s32.totalorder %s3479_s16, %s3479_s16 }
  0x16   :  { %p3486_p8 = por %p3485_p7, %p3484_p6 }
  0x18   :  { %p3487_p9 = pnand %p3486_p8, %p3480_p5 }
  0x1a   :  { %3490 = shalt.err (!%p3487_p9)
}
  0x1b   :  { %s3674_s2 = smov [#allocation10]   ;;  %s95_s18 = sshll.u32 %s6352_s6, 4  ;;  %s96_s18 = int_to_ptr.vmem [resolvable:$true] %s95_s18 }
  0x1c   :  { %78 = dma.vmem_to_smem %s76_s30, 16, %s3674_s2, [#allocation11]  }
  0x1d   :  { %s115_s21 = sshll.u32 %s6354_s8, 4  ;;  %s3491_s22 = scalar_lea.vmem %s96_s18, 16  ;;  %s116_s21 = int_to_ptr.vmem [resolvable:$true] %s115_s21 }
  0x1e   :  { %p3492_p10 = scmp.ne.s32.totalorder %s96_s18, %s3491_s22  ;;  %p3496_p11 = scmp.lt.s32.totalorder %s96_s18, %s96_s18 }
  0x1f   :  { %p3497_p12 = scmp.lt.s32.totalorder %s3491_s22, %s3491_s22 }
  0x21   :  { %p3498_p13 = por %p3497_p12, %p3496_p11 }
  0x23   :  { %p3499_p0 = pnand %p3498_p13, %p3492_p10 }
  0x25   :  { %3502 = shalt.err (!%p3499_p0)
}
  0x26   :  { %s3675_s23 = smov [#allocation13]   ;;  %s3503_s24 = scalar_lea.vmem %s116_s21, 16 }
  0x27   :  { %98 = dma.vmem_to_smem %s96_s18, 16, %s3675_s23, [#allocation14]  }
  0x28   :  { %p3504_p1 = scmp.ne.s32.totalorder %s116_s21, %s3503_s24  ;;  %p3508_p2 = scmp.lt.s32.totalorder %s116_s21, %s116_s21 }
  0x29   :  { %p3509_p3 = scmp.lt.s32.totalorder %s3503_s24, %s3503_s24 }
  0x2b   :  { %p3510_p4 = por %p3509_p3, %p3508_p2 }
  0x2d   :  { %p3511_p5 = pnand %p3510_p4, %p3504_p1 }
  0x2f   :  { %3514 = shalt.err (!%p3511_p5)
}
  0x30   :  { %s3676_s6 = smov [#allocation16]   ;;  %s135_s26 = sshll.u32 %s6356_s10, 4  ;;  %s136_s26 = int_to_ptr.vmem [resolvable:$true] %s135_s26 }
  0x31   :  { %118 = dma.vmem_to_smem %s116_s21, 16, %s3676_s6, [#allocation17]  }
  0x32   :  { %s3515_s27 = scalar_lea.vmem %s136_s26, 16  ;;  %p3520_p7 = scmp.lt.s32.totalorder %s136_s26, %s136_s26 }
  0x33   :  { %p3516_p6 = scmp.ne.s32.totalorder %s136_s26, %s3515_s27  ;;  %p3521_p8 = scmp.lt.s32.totalorder %s3515_s27, %s3515_s27 }
  0x35   :  { %p3522_p9 = por %p3521_p8, %p3520_p7 }
  0x37   :  { %p3523_p10 = pnand %p3522_p9, %p3516_p6 }
  0x39   :  { %3526 = shalt.err (!%p3523_p10)
}
  0x3a   :  { %s3677_s28 = smov [#allocation19]   ;;  %s3678_s29 = smov [#allocation2]  }
  0x3b   :  { %138 = dma.vmem_to_smem %s136_s26, 16, %s3677_s28, [#allocation20]  }
  0x3c   :  { %s32_s30 = sshll.u32 %s3678_s29, 4  ;;  %s3527_s16 = scalar_lea.hbm %s6346_s0, 2304  ;;  %s33_s30 = int_to_ptr.vmem [resolvable:$true] %s32_s30 }
  0x3d   :  { %p3528_p11 = scmp.ne.s32.totalorder %s6346_s0, %s3527_s16  ;;  %p3531_p12 = scmp.lt.u32.totalorder %s3527_s16, %s6346_s0 }
  0x3f   :  { %p3533_p13 = pnand %p3531_p12, %p3528_p11 }
  0x41   :  { %3536 = shalt.err (!%p3533_p13)
}
  0x42   :  { %s3537_s18 = scalar_lea.vmem %s33_s30, 2304  ;;  %p3542_p1 = scmp.lt.s32.totalorder %s33_s30, %s33_s30 }
  0x43   :  { %p3538_p0 = scmp.ne.s32.totalorder %s33_s30, %s3537_s18  ;;  %p3543_p2 = scmp.lt.s32.totalorder %s3537_s18, %s3537_s18 }
  0x45   :  { %p3544_p3 = por %p3543_p2, %p3542_p1 }
  0x47   :  { %p3545_p4 = pnand %p3544_p3, %p3538_p0 }
  0x49   :  { %3548 = shalt.err (!%p3545_p4)
}
  0x4a   :  { %s3679_s19 = smov 128   ;;  %s3680_s20 = smov 8  }
  0x4b   :  { %38 = dma.hbm_to_vmem [thread:$0]  %s6346_s0, 2304, %s33_s30, [#allocation3], %s3679_s19, %s3679_s19, %s3680_s20  }
  0x4c   :  { %s45_s6 = sshll.u32 %s6347_s1, 4  ;;  %s65_s26 = sshll.u32 %s6349_s3, 4  ;;  %s46_s6 = int_to_ptr.vmem [resolvable:$true] %s45_s6  ;;  %s66_s26 = int_to_ptr.vmem [resolvable:$true] %s65_s26 }
  0x4d   :  { %s3549_s27 = scalar_lea.vmem %s46_s6, 16  ;;  %p3554_p6 = scmp.lt.s32.totalorder %s46_s6, %s46_s6 }
  0x4e   :  { %p3550_p5 = scmp.ne.s32.totalorder %s46_s6, %s3549_s27  ;;  %p3555_p7 = scmp.lt.s32.totalorder %s3549_s27, %s3549_s27 }
  0x50   :  { %p3556_p8 = por %p3555_p7, %p3554_p6 }
  0x52   :  { %p3557_p9 = pnand %p3556_p8, %p3550_p5 }
  0x54   :  { %3560 = shalt.err (!%p3557_p9)
}
  0x55   :  { %s3681_s28 = smov [#allocation6]   ;;  %s3561_s0 = scalar_lea.vmem %s66_s26, 16 }
  0x56   :  { %48 = dma.vmem_to_smem %s46_s6, 16, %s3681_s28, [#allocation5]  }
  0x57   :  { %p3562_p10 = scmp.ne.s32.totalorder %s66_s26, %s3561_s0  ;;  %p3566_p11 = scmp.lt.s32.totalorder %s66_s26, %s66_s26 }
  0x58   :  { %p3567_p12 = scmp.lt.s32.totalorder %s3561_s0, %s3561_s0 }
  0x5a   :  { %p3568_p13 = por %p3567_p12, %p3566_p11 }
  0x5c   :  { %p3569_p0 = pnand %p3568_p13, %p3562_p10 }
  0x5e   :  { %3572 = shalt.err (!%p3569_p0)
}
  0x5f   :  { %s3682_s1 = smov [#allocation9]   ;;  %s85_s30 = sshll.u32 %s6351_s5, 4  ;;  %s86_s30 = int_to_ptr.vmem [resolvable:$true] %s85_s30 }
  0x60   :  { %68 = dma.vmem_to_smem %s66_s26, 16, %s3682_s1, [#allocation8]  }
  0x61   :  { %s105_s16 = sshll.u32 %s6353_s7, 4  ;;  %s3573_s2 = scalar_lea.vmem %s86_s30, 16  ;;  %s106_s16 = int_to_ptr.vmem [resolvable:$true] %s105_s16 }
  0x62   :  { %p3574_p1 = scmp.ne.s32.totalorder %s86_s30, %s3573_s2  ;;  %p3578_p2 = scmp.lt.s32.totalorder %s86_s30, %s86_s30 }
  0x63   :  { %p3579_p3 = scmp.lt.s32.totalorder %s3573_s2, %s3573_s2 }
  0x65   :  { %p3580_p4 = por %p3579_p3, %p3578_p2 }
  0x67   :  { %p3581_p5 = pnand %p3580_p4, %p3574_p1 }
  0x69   :  { %3584 = shalt.err (!%p3581_p5)
}
  0x6a   :  { %s3683_s4 = smov [#allocation12]   ;;  %s3585_s10 = scalar_lea.vmem %s106_s16, 16 }
  0x6b   :  { %88 = dma.vmem_to_smem %s86_s30, 16, %s3683_s4, [#allocation11]  }
  0x6c   :  { %p3586_p6 = scmp.ne.s32.totalorder %s106_s16, %s3585_s10  ;;  %p3590_p7 = scmp.lt.s32.totalorder %s106_s16, %s106_s16 }
  0x6d   :  { %p3591_p8 = scmp.lt.s32.totalorder %s3585_s10, %s3585_s10 }
  0x6f   :  { %p3592_p9 = por %p3591_p8, %p3590_p7 }
  0x71   :  { %p3593_p10 = pnand %p3592_p9, %p3586_p6 }
  0x73   :  { %3596 = shalt.err (!%p3593_p10)
}
  0x74   :  { %s3684_s5 = smov [#allocation15]   ;;  %s125_s18 = sshll.u32 %s6355_s9, 4  ;;  %s126_s18 = int_to_ptr.vmem [resolvable:$true] %s125_s18 }
  0x75   :  { %108 = dma.vmem_to_smem %s106_s16, 16, %s3684_s5, [#allocation14]  }
  0x76   :  { %s145_s23 = sshll.u32 %s6357_s11, 4  ;;  %s3597_s24 = scalar_lea.vmem %s126_s18, 16  ;;  %s146_s23 = int_to_ptr.vmem [resolvable:$true] %s145_s23 }
  0x77   :  { %p3598_p11 = scmp.ne.s32.totalorder %s126_s18, %s3597_s24  ;;  %p3602_p12 = scmp.lt.s32.totalorder %s126_s18, %s126_s18 }
  0x78   :  { %p3603_p13 = scmp.lt.s32.totalorder %s3597_s24, %s3597_s24 }
  0x7a   :  { %p3604_p0 = por %p3603_p13, %p3602_p12 }
  0x7c   :  { %p3605_p1 = pnand %p3604_p0, %p3598_p11 }
  0x7e   :  { %3608 = shalt.err (!%p3605_p1)
}
  0x7f   :  { %s3685_s6 = smov [#allocation18]   ;;  %s3609_s8 = scalar_lea.vmem %s146_s23, 16 }
  0x80   :  { %128 = dma.vmem_to_smem %s126_s18, 16, %s3685_s6, [#allocation17]  }
  0x81   :  { %p3610_p2 = scmp.ne.s32.totalorder %s146_s23, %s3609_s8  ;;  %p3614_p3 = scmp.lt.s32.totalorder %s146_s23, %s146_s23 }
  0x82   :  { %p3615_p4 = scmp.lt.s32.totalorder %s3609_s8, %s3609_s8 }
  0x84   :  { %p3616_p5 = por %p3615_p4, %p3614_p3 }
  0x86   :  { %p3617_p6 = pnand %p3616_p5, %p3610_p2 }
  0x88   :  { %3620 = shalt.err (!%p3617_p6)
}
  0x89   :  { %s3686_s9 = smov [#allocation21]   ;;  %s155_s26 = sshll.u32 %s6358_s12, 4  ;;  %s156_s26 = int_to_ptr.vmem [resolvable:$true] %s155_s26 }
  0x8a   :  { %148 = dma.vmem_to_smem %s146_s23, 16, %s3686_s9, [#allocation20]  }
  0x8b   :  { %s3621_s27 = scalar_lea.vmem %s156_s26, 16  ;;  %p3626_p8 = scmp.lt.s32.totalorder %s156_s26, %s156_s26 }
  0x8c   :  { %p3622_p7 = scmp.ne.s32.totalorder %s156_s26, %s3621_s27  ;;  %p3627_p9 = scmp.lt.s32.totalorder %s3621_s27, %s3621_s27 }
  0x8e   :  { %p3628_p10 = por %p3627_p9, %p3626_p8 }
  0x90   :  { %p3629_p11 = pnand %p3628_p10, %p3622_p7 }
  0x92   :  { %3632 = shalt.err (!%p3629_p11)
}
  0x93   :  { %s3687_s28 = smov [#allocation22]  }
  0x94   :  { %158 = dma.vmem_to_smem %s156_s26, 16, %s3687_s28, [#allocation23]  }
  0x95   :  { %3655 = dma.done.wait [#allocation3], 2304  }
  0x96   :  { %3656 = vsyncadd [#allocation3], 4294964992 }
  0x97   :  { %3657 = dma.done.wait [#allocation5], 16  }
  0x98   :  { %3658 = vsyncadd [#allocation5], 4294967280 }
  0x99   :  { %3659 = dma.done.wait [#allocation8], 32  }
  0x9a   :  { %3660 = vsyncadd [#allocation8], 4294967264 }
  0x9b   :  { %3661 = dma.done.wait [#allocation11], 32  }
  0x9c   :  { %3662 = vsyncadd [#allocation11], 4294967264 }
  0x9d   :  { %3663 = dma.done.wait [#allocation14], 32  }
  0x9e   :  { %3664 = vsyncadd [#allocation14], 4294967264 }
  0x9f   :  { %3665 = dma.done.wait [#allocation17], 32  }
  0xa0   :  { %3666 = vsyncadd [#allocation17], 4294967264 }
  0xa1   :  { %3667 = dma.done.wait [#allocation20], 32  }
  0xa2   :  { %3668 = vsyncadd [#allocation20], 4294967264 }
  0xa3   :  { %3669 = dma.done.wait [#allocation23], 16  }
  0xa4   :  { %3670 = vsyncadd [#allocation23], 4294967280 }
  0xa5   :  { %198 = sfence }
  0xa6   :  { %s199_s12 = sld [smem:[#allocation6]]  ;;  %s2993_s0 = sld [smem:[#allocation6 + $0x1]]  ;;  %v3822_v0 = vld [vmem:[#allocation2] sm:$0xff]  ;;  %v3824_v1 = vld [vmem:[#allocation2 + $0x8] sm:$0xff]  ;;  %v3830_v2 = vld [vmem:[#allocation2 + $0x10] sm:$0xff] }
  0xa7   :  { %s3810_s1 = sld [smem:[#allocation6 + $0x2]]  ;;  %s3812_s3 = sld [smem:[#allocation6 + $0x3]]  ;;  %v3832_v3 = vld [vmem:[#allocation2 + $0x18] sm:$0xff]  ;;  %v3834_v4 = vld [vmem:[#allocation2 + $0x20] sm:$0xff]  ;;  %v3836_v5 = vld [vmem:[#allocation2 + $0x28] sm:$0xff] }
  0xa8   :  { %s3814_s29 = sld [smem:[#allocation6 + $0x4]]  ;;  %s3816_s30 = sld [smem:[#allocation6 + $0x5]]  ;;  %v3838_v6 = vld [vmem:[#allocation2 + $0x30] sm:$0xff]  ;;  %v3840_v7 = vld [vmem:[#allocation2 + $0x38] sm:$0xff]  ;;  %v3846_v10 = vld [vmem:[#allocation2 + $0x40] sm:$0xff] }
  0xa9   :  { %s3818_s14 = sld [smem:[#allocation6 + $0x6]]  ;;  %s3820_s15 = sld [smem:[#allocation6 + $0x7]]  ;;  %v3848_v11 = vld [vmem:[#allocation2 + $0x48] sm:$0xff]  ;;  %v3858_v16 = vld [vmem:[#allocation2 + $0x50] sm:$0xff]  ;;  %v3860_v17 = vld [vmem:[#allocation2 + $0x58] sm:$0xff] }
  0xaa   :  { %s3826_s16 = sld [smem:[#allocation6 + $0x8]]  ;;  %s3828_s2 = sld [smem:[#allocation6 + $0x9]]  ;;  %v3868_v26 = vld [vmem:[#allocation2 + $0x60] sm:$0xff]  ;;  %v3870_v27 = vld [vmem:[#allocation2 + $0x68] sm:$0xff]  ;;  %v3876_v32 = vld [vmem:[#allocation2 + $0x70] sm:$0xff] }
  0xab   :  { %s3842_s4 = sld [smem:[#allocation6 + $0xa]]  ;;  %s3844_s10 = sld [smem:[#allocation6 + $0xb]]  ;;  %v3878_v33 = vld [vmem:[#allocation2 + $0x78] sm:$0xff]  ;;  %v3886_v38 = vld [vmem:[#allocation2 + $0x80] sm:$0xff]  ;;  %v3888_v39 = vld [vmem:[#allocation2 + $0x88] sm:$0xff] }
  0xac   :  { %v703_v8 = vstv %s199_s12  ;;  %v706_v9 = vstv %s2993_s0  ;;  %s3854_s5 = sld [smem:[#allocation6 + $0xc]]  ;;  %s3856_s7 = sld [smem:[#allocation6 + $0xd]] }
  0xad   :  { %v704_v12 = vmul.f32 %v703_v8, %v3822_v0  ;;  %v705_v13 = vmul.f32 %v703_v8, %v3824_v1  ;;  %v707_v14 = vmul.f32 %v706_v9, %v3830_v2  ;;  %v708_v15 = vmul.f32 %v706_v9, %v3832_v3  ;;  %s3882_s17 = sld [smem:[#allocation6 + $0xe]]  ;;  %s3884_s18 = sld [smem:[#allocation6 + $0xf]] }
  0xae   :  { %v711_v18 = vstv %s3810_s1  ;;  %v716_v19 = vstv %s3812_s3  ;;  %v721_v20 = vstv %s3814_s29  ;;  %v726_v21 = vstv %s3816_s30  ;;  %s3900_s21 = sld [smem:[#allocation6 + $0x10]]  ;;  %s3902_s22 = sld [smem:[#allocation6 + $0x11]] }
  0xaf   :  { %v709_v22 = vadd.f32 %v707_v14, %v704_v12  ;;  %v710_v23 = vadd.f32 %v708_v15, %v705_v13  ;;  %v712_v24 = vmul.f32 %v711_v18, %v3834_v4  ;;  %v713_v25 = vmul.f32 %v711_v18, %v3836_v5  ;;  %s3906_s23 = sld [smem:[#allocation6 + $0x12]]  ;;  %s3908_s24 = sld [smem:[#allocation6 + $0x13]] }
  0xb0   :  { %v717_v28 = vmul.f32 %v716_v19, %v3838_v6  ;;  %v718_v29 = vmul.f32 %v716_v19, %v3840_v7  ;;  %v722_v30 = vmul.f32 %v721_v20, %v3846_v10  ;;  %v723_v31 = vmul.f32 %v721_v20, %v3848_v11  ;;  %s3920_s6 = sld [smem:[#allocation6 + $0x14]]  ;;  %s3922_s8 = sld [smem:[#allocation6 + $0x15]] }
  0xb1   :  { %v714_v34 = vadd.f32 %v712_v24, %v709_v22  ;;  %v715_v35 = vadd.f32 %v713_v25, %v710_v23  ;;  %v727_v36 = vmul.f32 %v726_v21, %v3858_v16  ;;  %v728_v37 = vmul.f32 %v726_v21, %v3860_v17  ;;  %s3924_s9 = sld [smem:[#allocation6 + $0x16]]  ;;  %s3926_s11 = sld [smem:[#allocation6 + $0x17]] }
  0xb2   :  { %v731_v40 = vstv %s3818_s14  ;;  %v736_v41 = vstv %s3820_s15  ;;  %v741_v42 = vstv %s3826_s16  ;;  %v751_v43 = vstv %s3828_s2  ;;  %s3944_s25 = sld [smem:[#allocation6 + $0x18]]  ;;  %s3946_s26 = sld [smem:[#allocation6 + $0x19]] }
  0xb3   :  { %v719_v44 = vadd.f32 %v717_v28, %v714_v34  ;;  %v720_v45 = vadd.f32 %v718_v29, %v715_v35  ;;  %v732_v46 = vmul.f32 %v731_v40, %v3868_v26  ;;  %v733_v47 = vmul.f32 %v731_v40, %v3870_v27  ;;  %s3954_s27 = sld [smem:[#allocation6 + $0x1a]]  ;;  %s3956_s28 = sld [smem:[#allocation6 + $0x1b]] }
  0xb4   :  { %v737_v48 = vmul.f32 %v736_v41, %v3876_v32  ;;  %v738_v49 = vmul.f32 %v736_v41, %v3878_v33  ;;  %v742_v50 = vmul.f32 %v741_v42, %v3886_v38  ;;  %v743_v51 = vmul.f32 %v741_v42, %v3888_v39  ;;  %s3964_s12 = sld [smem:[#allocation6 + $0x1c]]  ;;  %s3966_s0 = sld [smem:[#allocation6 + $0x1d]] }
  0xb5   :  { %v724_v52 = vadd.f32 %v722_v30, %v719_v44  ;;  %v725_v53 = vadd.f32 %v723_v31, %v720_v45  ;;  %v752_v54 = vmul.f32 %v751_v43, %v3822_v0  ;;  %v753_v55 = vmul.f32 %v751_v43, %v3824_v1  ;;  %s3972_s1 = sld [smem:[#allocation6 + $0x1e]]  ;;  %s3974_s3 = sld [smem:[#allocation6 + $0x1f]] }
  0xb6   :  { %v754_v56 = vstv %s3842_s4  ;;  %v759_v57 = vstv %s3844_s10  ;;  %v764_v58 = vstv %s3854_s5  ;;  %v769_v59 = vstv %s3856_s7  ;;  %s3986_s29 = sld [smem:[#allocation6 + $0x20]]  ;;  %s3988_s30 = sld [smem:[#allocation6 + $0x21]] }
  0xb7   :  { %v729_v60 = vadd.f32 %v727_v36, %v724_v52  ;;  %v730_v61 = vadd.f32 %v728_v37, %v725_v53  ;;  %v755_v62 = vmul.f32 %v754_v56, %v3830_v2  ;;  %v756_v63 = vmul.f32 %v754_v56, %v3832_v3  ;;  %s3992_s14 = sld [smem:[#allocation6 + $0x22]]  ;;  %s3994_s15 = sld [smem:[#allocation6 + $0x23]] }
  0xb8   :  { %v760_v8 = vmul.f32 %v759_v57, %v3834_v4  ;;  %v761_v9 = vmul.f32 %v759_v57, %v3836_v5  ;;  %v765_v12 = vmul.f32 %v764_v58, %v3838_v6  ;;  %v766_v13 = vmul.f32 %v764_v58, %v3840_v7  ;;  %s4012_s16 = sld [smem:[#allocation7]]  ;;  %s4014_s2 = sld [smem:[#allocation7 + $0x1]] }
  0xb9   :  { %v734_v14 = vadd.f32 %v732_v46, %v729_v60  ;;  %v735_v15 = vadd.f32 %v733_v47, %v730_v61  ;;  %v757_v18 = vadd.f32 %v755_v62, %v752_v54  ;;  %v758_v19 = vadd.f32 %v756_v63, %v753_v55  ;;  %s4016_s4 = sld [smem:[#allocation7 + $0x2]]  ;;  %s4022_s10 = sld [smem:[#allocation6 + $0x24]] }
  0xba   :  { %v770_v20 = vmul.f32 %v769_v59, %v3846_v10  ;;  %v771_v21 = vmul.f32 %v769_v59, %v3848_v11  ;;  %v774_v22 = vstv %s3882_s17  ;;  %v779_v23 = vstv %s3884_s18  ;;  %s4028_s5 = sld [smem:[#allocation6 + $0x25]]  ;;  %s4030_s7 = sld [smem:[#allocation7 + $0x3]] }
  0xbb   :  { %v739_v24 = vadd.f32 %v737_v48, %v734_v14  ;;  %v740_v25 = vadd.f32 %v738_v49, %v735_v15  ;;  %v762_v28 = vadd.f32 %v760_v8, %v757_v18  ;;  %v763_v29 = vadd.f32 %v761_v9, %v758_v19  ;;  %s4036_s17 = sld [smem:[#allocation6 + $0x26]]  ;;  %s4038_s18 = sld [smem:[#allocation6 + $0x27]] }
  0xbc   :  { %v775_v30 = vmul.f32 %v774_v22, %v3858_v16  ;;  %v776_v31 = vmul.f32 %v774_v22, %v3860_v17  ;;  %v780_v34 = vmul.f32 %v779_v23, %v3868_v26  ;;  %v781_v35 = vmul.f32 %v779_v23, %v3870_v27 }
  0xbd   :  { %v3936_v36 = vadd.f32 %v742_v50, %v739_v24  ;;  %v3938_v37 = vadd.f32 %v743_v51, %v740_v25  ;;  %v767_v40 = vadd.f32 %v765_v12, %v762_v28  ;;  %v768_v41 = vadd.f32 %v766_v13, %v763_v29 }
  0xbe   :  { %v784_v42 = vstv %s3900_s21  ;;  %v789_v43 = vstv %s3902_s22  ;;  %v799_v44 = vstv %s3906_s23  ;;  %v802_v45 = vstv %s3908_s24  ;;  %s4048_s21 = sld [smem:[#allocation6 + $0x28]]  ;;  %s4050_s22 = sld [smem:[#allocation6 + $0x29]] }
  0xbf   :  { %v772_v46 = vadd.f32 %v770_v20, %v767_v40  ;;  %v773_v47 = vadd.f32 %v771_v21, %v768_v41  ;;  %v785_v48 = vmul.f32 %v784_v42, %v3876_v32  ;;  %v786_v49 = vmul.f32 %v784_v42, %v3878_v33  ;;  %s4066_s23 = sld [smem:[#allocation6 + $0x2a]]  ;;  %s4068_s24 = sld [smem:[#allocation6 + $0x2b]] }
  0xc0   :  { %v790_v50 = vmul.f32 %v789_v43, %v3886_v38  ;;  %v791_v51 = vmul.f32 %v789_v43, %v3888_v39  ;;  %v800_v52 = vmul.f32 %v799_v44, %v3822_v0  ;;  %v801_v53 = vmul.f32 %v799_v44, %v3824_v1 }
  0xc1   :  { %v777_v54 = vadd.f32 %v775_v30, %v772_v46  ;;  %v778_v55 = vadd.f32 %v776_v31, %v773_v47  ;;  %v803_v56 = vmul.f32 %v802_v45, %v3830_v2  ;;  %v804_v57 = vmul.f32 %v802_v45, %v3832_v3 }
  0xc2   :  { %v807_v58 = vstv %s3920_s6  ;;  %v812_v59 = vstv %s3922_s8  ;;  %v817_v60 = vstv %s3924_s9  ;;  %v822_v61 = vstv %s3926_s11  ;;  %s4076_s6 = sld [smem:[#allocation6 + $0x2c]]  ;;  %s4084_s9 = sld [smem:[#allocation6 + $0x2d]] }
  0xc3   :  { %v782_v62 = vadd.f32 %v780_v34, %v777_v54  ;;  %v783_v63 = vadd.f32 %v781_v35, %v778_v55  ;;  %v805_v8 = vadd.f32 %v803_v56, %v800_v52  ;;  %v806_v9 = vadd.f32 %v804_v57, %v801_v53  ;;  %s4078_s8 = sld [smem:[#allocation7 + $0x4]]  ;;  %s4086_s11 = sld [smem:[#allocation6 + $0x2e]] }
  0xc4   :  { %v808_v12 = vmul.f32 %v807_v58, %v3834_v4  ;;  %v809_v13 = vmul.f32 %v807_v58, %v3836_v5  ;;  %v813_v14 = vmul.f32 %v812_v59, %v3838_v6  ;;  %v814_v15 = vmul.f32 %v812_v59, %v3840_v7 }
  0xc5   :  { %v787_v18 = vadd.f32 %v785_v48, %v782_v62  ;;  %v788_v19 = vadd.f32 %v786_v49, %v783_v63  ;;  %v818_v20 = vmul.f32 %v817_v60, %v3846_v10  ;;  %v819_v21 = vmul.f32 %v817_v60, %v3848_v11 }
  0xc6   :  { %v810_v22 = vadd.f32 %v808_v12, %v805_v8  ;;  %v811_v23 = vadd.f32 %v809_v13, %v806_v9  ;;  %v823_v24 = vmul.f32 %v822_v61, %v3858_v16  ;;  %v824_v25 = vmul.f32 %v822_v61, %v3860_v17 }
  0xc7   :  { %v3980_v28 = vadd.f32 %v790_v50, %v787_v18  ;;  %v3982_v29 = vadd.f32 %v791_v51, %v788_v19  ;;  %v827_v30 = vstv %s3944_s25  ;;  %v832_v31 = vstv %s3946_s26  ;;  %s4092_s25 = sld [smem:[#allocation6 + $0x2f]]  ;;  %s4094_s26 = sld [smem:[#allocation6 + $0x30]] }
  0xc8   :  { %v815_v34 = vadd.f32 %v813_v14, %v810_v22  ;;  %v816_v35 = vadd.f32 %v814_v15, %v811_v23  ;;  %v828_v40 = vmul.f32 %v827_v30, %v3868_v26  ;;  %v829_v41 = vmul.f32 %v827_v30, %v3870_v27 }
  0xc9   :  { %v833_v42 = vmul.f32 %v832_v31, %v3876_v32  ;;  %v834_v43 = vmul.f32 %v832_v31, %v3878_v33  ;;  %v837_v44 = vstv %s3954_s27  ;;  %v847_v45 = vstv %s3956_s28  ;;  %s4106_s27 = sld [smem:[#allocation6 + $0x31]]  ;;  %s4108_s28 = sld [smem:[#allocation6 + $0x32]] }
  0xca   :  { %v820_v46 = vadd.f32 %v818_v20, %v815_v34  ;;  %v821_v47 = vadd.f32 %v819_v21, %v816_v35  ;;  %v838_v48 = vmul.f32 %v837_v44, %v3886_v38  ;;  %v839_v49 = vmul.f32 %v837_v44, %v3888_v39 }
  0xcb   :  { %v848_v50 = vmul.f32 %v847_v45, %v3822_v0  ;;  %v849_v51 = vmul.f32 %v847_v45, %v3824_v1  ;;  %v850_v52 = vstv %s3964_s12  ;;  %v855_v53 = vstv %s3966_s0  ;;  %s4118_s12 = sld [smem:[#allocation6 + $0x33]]  ;;  %s4120_s0 = sld [smem:[#allocation6 + $0x34]] }
  0xcc   :  { %v825_v54 = vadd.f32 %v823_v24, %v820_v46  ;;  %v826_v55 = vadd.f32 %v824_v25, %v821_v47  ;;  %v851_v56 = vmul.f32 %v850_v52, %v3830_v2  ;;  %v852_v57 = vmul.f32 %v850_v52, %v3832_v3 }
  0xcd   :  { %v856_v58 = vmul.f32 %v855_v53, %v3834_v4  ;;  %v857_v59 = vmul.f32 %v855_v53, %v3836_v5  ;;  %v860_v60 = vstv %s3972_s1  ;;  %v865_v61 = vstv %s3974_s3  ;;  %s4132_s1 = sld [smem:[#allocation6 + $0x35]] }
  0xce   :  { %v830_v62 = vadd.f32 %v828_v40, %v825_v54  ;;  %v831_v63 = vadd.f32 %v829_v41, %v826_v55  ;;  %v853_v8 = vadd.f32 %v851_v56, %v848_v50  ;;  %v854_v9 = vadd.f32 %v852_v57, %v849_v51  ;;  %s4134_s3 = sld [smem:[#allocation7 + $0x5]] }
  0xcf   :  { %v861_v12 = vmul.f32 %v860_v60, %v3838_v6  ;;  %v862_v13 = vmul.f32 %v860_v60, %v3840_v7  ;;  %v866_v14 = vmul.f32 %v865_v61, %v3846_v10  ;;  %v867_v15 = vmul.f32 %v865_v61, %v3848_v11 }
  0xd0   :  { %v835_v18 = vadd.f32 %v833_v42, %v830_v62  ;;  %v836_v19 = vadd.f32 %v834_v43, %v831_v63  ;;  %v858_v20 = vadd.f32 %v856_v58, %v853_v8  ;;  %v859_v21 = vadd.f32 %v857_v59, %v854_v9 }
  0xd1   :  { %v870_v22 = vstv %s3986_s29  ;;  %v875_v23 = vstv %s3988_s30  ;;  %v880_v24 = vstv %s3992_s14  ;;  %v885_v25 = vstv %s3994_s15  ;;  %s4138_s29 = sld [smem:[#allocation6 + $0x36]]  ;;  %s4140_s30 = sld [smem:[#allocation6 + $0x37]] }
  0xd2   :  { %v840_v30 = vadd.f32 %v838_v48, %v835_v18  ;;  %v841_v31 = vadd.f32 %v839_v49, %v836_v19  ;;  %v863_v34 = vadd.f32 %v861_v12, %v858_v20  ;;  %v864_v35 = vadd.f32 %v862_v13, %v859_v21  ;;  %s4144_s14 = sld [smem:[#allocation6 + $0x38]]  ;;  %s4146_s15 = sld [smem:[#allocation6 + $0x39]] }
  0xd3   :  { %v871_v40 = vmul.f32 %v870_v22, %v3858_v16  ;;  %v872_v41 = vmul.f32 %v870_v22, %v3860_v17  ;;  %v876_v42 = vmul.f32 %v875_v23, %v3868_v26  ;;  %v877_v43 = vmul.f32 %v875_v23, %v3870_v27 }
  0xd4   :  { %v746_v44 = vstv %s4012_s16  ;;  %v868_v45 = vadd.f32 %v866_v14, %v863_v34  ;;  %v869_v46 = vadd.f32 %v867_v15, %v864_v35  ;;  %v881_v47 = vmul.f32 %v880_v24, %v3876_v32  ;;  %s4156_s16 = sld [smem:[#allocation6 + $0x3a]] }
  0xd5   :  { %v747_v48 = vadd.f32 %v746_v44, %v3936_v36  ;;  %v748_v49 = vadd.f32 %v746_v44, %v3938_v37  ;;  %v794_v50 = vstv %s4014_s2  ;;  %v842_v51 = vstv %s4016_s4  ;;  %s4158_s2 = sld [smem:[#allocation6 + $0x3b]]  ;;  %s4170_s4 = sld [smem:[#allocation6 + $0x3c]] }
  0xd6   :  { %v795_v52 = vadd.f32 %v794_v50, %v3980_v28  ;;  %v796_v53 = vadd.f32 %v794_v50, %v3982_v29  ;;  %v843_v54 = vadd.f32 %v842_v51, %v840_v30  ;;  %v844_v55 = vadd.f32 %v842_v51, %v841_v31 }
  0xd7   :  { %v4052_v56 = vmax.f32 %v747_v48, 0.0  ;;  %v4054_v57 = vmax.f32 %v748_v49, 0.0  ;;  %v873_v36 = vadd.f32 %v871_v40, %v868_v45  ;;  %v874_v37 = vadd.f32 %v872_v41, %v869_v46 }
  0xd8   :  { %v4056_v58 = vmax.f32 %v795_v52, 0.0  ;;  %v4058_v28 = vmax.f32 %v796_v53, 0.0  ;;  %v882_v29 = vmul.f32 %v880_v24, %v3878_v33  ;;  %v886_v59 = vmul.f32 %v885_v25, %v3886_v38 }
  0xd9   :  { %v4062_v60 = vmax.f32 %v843_v54, 0.0  ;;  %v4064_v61 = vmax.f32 %v844_v55, 0.0  ;;  %v878_v62 = vadd.f32 %v876_v42, %v873_v36  ;;  %v879_v63 = vadd.f32 %v877_v43, %v874_v37 }
  0xda   :  { %v887_v8 = vmul.f32 %v885_v25, %v3888_v39  ;;  %v890_v9 = vstv %s4030_s7  ;;  %v895_v12 = vstv %s4022_s10  ;;  %v898_v13 = vstv %s4028_s5  ;;  %s4172_s10 = sld [smem:[#allocation6 + $0x3d]]  ;;  %s4182_s5 = sld [smem:[#allocation6 + $0x3e]] }
  0xdb   :  { %v883_v14 = vadd.f32 %v881_v47, %v878_v62  ;;  %v884_v15 = vadd.f32 %v882_v29, %v879_v63  ;;  %v896_v18 = vmul.f32 %v895_v12, %v3822_v0  ;;  %v897_v19 = vmul.f32 %v895_v12, %v3824_v1  ;;  %s4184_s7 = sld [smem:[#allocation7 + $0x6]] }
  0xdc   :  { %v899_v20 = vmul.f32 %v898_v13, %v3830_v2  ;;  %v900_v21 = vmul.f32 %v898_v13, %v3832_v3  ;;  %v903_v22 = vstv %s4036_s17  ;;  %v908_v23 = vstv %s4038_s18  ;;  %s4190_s17 = sld [smem:[#allocation6 + $0x3f]]  ;;  %s4192_s18 = sld [smem:[#allocation6 + $0x40]] }
  0xdd   :  { %v888_v24 = vadd.f32 %v886_v59, %v883_v14  ;;  %v889_v25 = vadd.f32 %v887_v8, %v884_v15  ;;  %v904_v30 = vmul.f32 %v903_v22, %v3834_v4  ;;  %v905_v31 = vmul.f32 %v903_v22, %v3836_v5 }
  0xde   :  { %v901_v34 = vadd.f32 %v899_v20, %v896_v18  ;;  %v902_v35 = vadd.f32 %v900_v21, %v897_v19  ;;  %v909_v40 = vmul.f32 %v908_v23, %v3838_v6  ;;  %v910_v41 = vmul.f32 %v908_v23, %v3840_v7 }
  0xdf   :  { %v891_v42 = vadd.f32 %v890_v9, %v888_v24  ;;  %v892_v43 = vadd.f32 %v890_v9, %v889_v25  ;;  %v913_v44 = vstv %s4048_s21  ;;  %v918_v45 = vstv %s4050_s22  ;;  %s4198_s21 = sld [smem:[#allocation6 + $0x41]]  ;;  %s4200_s22 = sld [smem:[#allocation6 + $0x42]] }
  0xe0   :  { %v906_v46 = vadd.f32 %v904_v30, %v901_v34  ;;  %v907_v47 = vadd.f32 %v905_v31, %v902_v35  ;;  %v914_v48 = vmul.f32 %v913_v44, %v3846_v10  ;;  %v915_v49 = vmul.f32 %v913_v44, %v3848_v11 }
  0xe1   :  { %v4100_v50 = vmax.f32 %v891_v42, 0.0  ;;  %v4102_v51 = vmax.f32 %v892_v43, 0.0  ;;  %v919_v52 = vmul.f32 %v918_v45, %v3858_v16  ;;  %v920_v53 = vmul.f32 %v918_v45, %v3860_v17 }
  0xe2   :  { %v911_v54 = vadd.f32 %v909_v40, %v906_v46  ;;  %v912_v55 = vadd.f32 %v910_v41, %v907_v47  ;;  %v923_v36 = vstv %s4066_s23  ;;  %v928_v37 = vstv %s4068_s24  ;;  %s4208_s23 = sld [smem:[#allocation6 + $0x43]]  ;;  %s4210_s24 = sld [smem:[#allocation6 + $0x44]] }
  0xe3   :  { %v924_v29 = vmul.f32 %v923_v36, %v3868_v26  ;;  %v925_v59 = vmul.f32 %v923_v36, %v3870_v27  ;;  %v929_v62 = vmul.f32 %v928_v37, %v3876_v32  ;;  %v930_v63 = vmul.f32 %v928_v37, %v3878_v33 }
  0xe4   :  { %v916_v8 = vadd.f32 %v914_v48, %v911_v54  ;;  %v917_v9 = vadd.f32 %v915_v49, %v912_v55  ;;  %v933_v12 = vstv %s4076_s6  ;;  %v938_v13 = vstv %s4078_s8  ;;  %s4222_s6 = sld [smem:[#allocation6 + $0x45]]  ;;  %s4224_s8 = sld [smem:[#allocation6 + $0x46]] }
  0xe5   :  { %v934_v14 = vmul.f32 %v933_v12, %v3886_v38  ;;  %v935_v15 = vmul.f32 %v933_v12, %v3888_v39  ;;  %v943_v18 = vstv %s4084_s9  ;;  %v946_v19 = vstv %s4086_s11  ;;  %s4236_s9 = sld [smem:[#allocation6 + $0x47]] }
  0xe6   :  { %v921_v20 = vadd.f32 %v919_v52, %v916_v8  ;;  %v922_v21 = vadd.f32 %v920_v53, %v917_v9  ;;  %v944_v22 = vmul.f32 %v943_v18, %v3822_v0  ;;  %v945_v23 = vmul.f32 %v943_v18, %v3824_v1  ;;  %s4238_s11 = sld [smem:[#allocation7 + $0x7]] }
  0xe7   :  { %v947_v24 = vmul.f32 %v946_v19, %v3830_v2  ;;  %v948_v25 = vmul.f32 %v946_v19, %v3832_v3  ;;  %v951_v30 = vstv %s4092_s25  ;;  %v956_v31 = vstv %s4094_s26  ;;  %s4242_s25 = sld [smem:[#allocation6 + $0x48]]  ;;  %s4244_s26 = sld [smem:[#allocation6 + $0x49]] }
  0xe8   :  { %v926_v34 = vadd.f32 %v924_v29, %v921_v20  ;;  %v927_v35 = vadd.f32 %v925_v59, %v922_v21  ;;  %v952_v40 = vmul.f32 %v951_v30, %v3834_v4  ;;  %v953_v41 = vmul.f32 %v951_v30, %v3836_v5 }
  0xe9   :  { %v949_v42 = vadd.f32 %v947_v24, %v944_v22  ;;  %v950_v43 = vadd.f32 %v948_v25, %v945_v23  ;;  %v957_v44 = vmul.f32 %v956_v31, %v3838_v6  ;;  %v958_v45 = vmul.f32 %v956_v31, %v3840_v7 }
  0xea   :  { %v931_v46 = vadd.f32 %v929_v62, %v926_v34  ;;  %v932_v47 = vadd.f32 %v930_v63, %v927_v35  ;;  %v961_v48 = vstv %s4106_s27  ;;  %v966_v49 = vstv %s4108_s28  ;;  %s4248_s27 = sld [smem:[#allocation6 + $0x4a]]  ;;  %s4250_s28 = sld [smem:[#allocation6 + $0x4b]] }
  0xeb   :  { %v954_v52 = vadd.f32 %v952_v40, %v949_v42  ;;  %v955_v53 = vadd.f32 %v953_v41, %v950_v43  ;;  %v962_v54 = vmul.f32 %v961_v48, %v3846_v10  ;;  %v963_v55 = vmul.f32 %v961_v48, %v3848_v11 }
  0xec   :  { %v936_v36 = vadd.f32 %v934_v14, %v931_v46  ;;  %v937_v37 = vadd.f32 %v935_v15, %v932_v47  ;;  %v967_v29 = vmul.f32 %v966_v49, %v3858_v16  ;;  %v968_v59 = vmul.f32 %v966_v49, %v3860_v17 }
  0xed   :  { %v959_v8 = vadd.f32 %v957_v44, %v954_v52  ;;  %v960_v9 = vadd.f32 %v958_v45, %v955_v53  ;;  %v971_v62 = vstv %s4118_s12  ;;  %v976_v63 = vstv %s4120_s0  ;;  %s4260_s12 = sld [smem:[#allocation6 + $0x4c]]  ;;  %s4262_s0 = sld [smem:[#allocation6 + $0x4d]] }
  0xee   :  { %v939_v12 = vadd.f32 %v938_v13, %v936_v36  ;;  %v940_v18 = vadd.f32 %v938_v13, %v937_v37  ;;  %v972_v19 = vmul.f32 %v971_v62, %v3868_v26  ;;  %v973_v14 = vmul.f32 %v971_v62, %v3870_v27 }
  0xef   :  { %v964_v15 = vadd.f32 %v962_v54, %v959_v8  ;;  %v965_v20 = vadd.f32 %v963_v55, %v960_v9  ;;  %v977_v21 = vmul.f32 %v976_v63, %v3876_v32  ;;  %v978_v22 = vmul.f32 %v976_v63, %v3878_v33 }
  0xf0   :  { %v4164_v23 = vmax.f32 %v939_v12, 0.0  ;;  %v4166_v24 = vmax.f32 %v940_v18, 0.0  ;;  %v981_v25 = vstv %s4132_s1  ;;  %v986_v13 = vstv %s4134_s3  ;;  %s4274_s1 = sld [smem:[#allocation6 + $0x4e]]  ;;  %s4276_s3 = sld [smem:[#allocation6 + $0x4f]] }
  0xf1   :  { %v969_v30 = vadd.f32 %v967_v29, %v964_v15  ;;  %v970_v31 = vadd.f32 %v968_v59, %v965_v20  ;;  %v982_v34 = vmul.f32 %v981_v25, %v3886_v38  ;;  %v983_v35 = vmul.f32 %v981_v25, %v3888_v39 }
  0xf2   :  { %v991_v40 = vstv %s4138_s29  ;;  %v994_v41 = vstv %s4140_s30  ;;  %v999_v42 = vstv %s4144_s14  ;;  %v1004_v43 = vstv %s4146_s15  ;;  %s4286_s29 = sld [smem:[#allocation6 + $0x50]]  ;;  %s4296_s15 = sld [smem:[#allocation9 + $0x1]] }
  0xf3   :  { %v974_v44 = vadd.f32 %v972_v19, %v969_v30  ;;  %v975_v45 = vadd.f32 %v973_v14, %v970_v31  ;;  %v992_v46 = vmul.f32 %v991_v40, %v3822_v0  ;;  %v993_v47 = vmul.f32 %v991_v40, %v3824_v1  ;;  %s4288_s30 = sld [smem:[#allocation7 + $0x8]] }
  0xf4   :  { %v995_v48 = vmul.f32 %v994_v41, %v3830_v2  ;;  %v996_v49 = vmul.f32 %v994_v41, %v3832_v3  ;;  %v1000_v52 = vmul.f32 %v999_v42, %v3834_v4  ;;  %v1001_v53 = vmul.f32 %v999_v42, %v3836_v5  ;;  %s4294_s14 = sld [smem:[#allocation9]] }
  0xf5   :  { %v979_v54 = vadd.f32 %v977_v21, %v974_v44  ;;  %v980_v55 = vadd.f32 %v978_v22, %v975_v45  ;;  %v1005_v36 = vmul.f32 %v1004_v43, %v3838_v6  ;;  %v1006_v37 = vmul.f32 %v1004_v43, %v3840_v7 }
  0xf6   :  { %v997_v29 = vadd.f32 %v995_v48, %v992_v46  ;;  %v998_v59 = vadd.f32 %v996_v49, %v993_v47  ;;  %v1009_v8 = vstv %s4156_s16  ;;  %v1014_v9 = vstv %s4158_s2  ;;  %s4302_s16 = sld [smem:[#allocation9 + $0x2]]  ;;  %s4304_s2 = sld [smem:[#allocation9 + $0x3]] }
  0xf7   :  { %v984_v62 = vadd.f32 %v982_v34, %v979_v54  ;;  %v985_v63 = vadd.f32 %v983_v35, %v980_v55  ;;  %v1010_v12 = vmul.f32 %v1009_v8, %v3846_v10  ;;  %v1011_v18 = vmul.f32 %v1009_v8, %v3848_v11 }
  0xf8   :  { %v1002_v19 = vadd.f32 %v1000_v52, %v997_v29  ;;  %v1003_v14 = vadd.f32 %v1001_v53, %v998_v59  ;;  %v1015_v15 = vmul.f32 %v1014_v9, %v3858_v16  ;;  %v1016_v20 = vmul.f32 %v1014_v9, %v3860_v17 }
  0xf9   :  { %v987_v21 = vadd.f32 %v986_v13, %v984_v62  ;;  %v988_v22 = vadd.f32 %v986_v13, %v985_v63  ;;  %v1019_v25 = vstv %s4170_s4  ;;  %v1024_v30 = vstv %s4172_s10  ;;  %s4312_s4 = sld [smem:[#allocation9 + $0x4]]  ;;  %s4314_s10 = sld [smem:[#allocation9 + $0x5]] }
  0xfa   :  { %v1007_v31 = vadd.f32 %v1005_v36, %v1002_v19  ;;  %v1008_v34 = vadd.f32 %v1006_v37, %v1003_v14  ;;  %v1020_v35 = vmul.f32 %v1019_v25, %v3868_v26  ;;  %v1021_v40 = vmul.f32 %v1019_v25, %v3870_v27 }
  0xfb   :  { %v4214_v41 = vmax.f32 %v987_v21, 0.0  ;;  %v4216_v42 = vmax.f32 %v988_v22, 0.0  ;;  %v1025_v13 = vmul.f32 %v1024_v30, %v3876_v32  ;;  %v1026_v43 = vmul.f32 %v1024_v30, %v3878_v33 }
  0xfc   :  { %v1012_v44 = vadd.f32 %v1010_v12, %v1007_v31  ;;  %v1013_v45 = vadd.f32 %v1011_v18, %v1008_v34  ;;  %v1029_v46 = vstv %s4182_s5  ;;  %v1034_v47 = vstv %s4184_s7  ;;  %s4326_s5 = sld [smem:[#allocation9 + $0x6]]  ;;  %s4328_s7 = sld [smem:[#allocation9 + $0x7]] }
  0xfd   :  { %v1030_v48 = vmul.f32 %v1029_v46, %v3886_v38  ;;  %v1031_v49 = vmul.f32 %v1029_v46, %v3888_v39  ;;  %v1039_v52 = vstv %s4190_s17  ;;  %v1042_v53 = vstv %s4192_s18  ;;  %s4340_s17 = sld [smem:[#allocation9 + $0x8]] }
  0xfe   :  { %v1017_v54 = vadd.f32 %v1015_v15, %v1012_v44  ;;  %v1018_v55 = vadd.f32 %v1016_v20, %v1013_v45  ;;  %v1040_v36 = vmul.f32 %v1039_v52, %v3822_v0  ;;  %v1041_v37 = vmul.f32 %v1039_v52, %v3824_v1  ;;  %s4342_s18 = sld [smem:[#allocation10]] }
  0xff   :  { %v1043_v29 = vmul.f32 %v1042_v53, %v3830_v2  ;;  %v1044_v59 = vmul.f32 %v1042_v53, %v3832_v3  ;;  %v1047_v8 = vstv %s4198_s21  ;;  %v1052_v9 = vstv %s4200_s22  ;;  %s4346_s21 = sld [smem:[#allocation9 + $0x9]]  ;;  %s4348_s22 = sld [smem:[#allocation9 + $0xa]] }
 0x100   :  { %v1022_v62 = vadd.f32 %v1020_v35, %v1017_v54  ;;  %v1023_v63 = vadd.f32 %v1021_v40, %v1018_v55  ;;  %v1048_v12 = vmul.f32 %v1047_v8, %v3834_v4  ;;  %v1049_v18 = vmul.f32 %v1047_v8, %v3836_v5 }
 0x101   :  { %v1045_v19 = vadd.f32 %v1043_v29, %v1040_v36  ;;  %v1046_v14 = vadd.f32 %v1044_v59, %v1041_v37  ;;  %v1053_v15 = vmul.f32 %v1052_v9, %v3838_v6  ;;  %v1054_v20 = vmul.f32 %v1052_v9, %v3840_v7 }
 0x102   :  { %v1027_v21 = vadd.f32 %v1025_v13, %v1022_v62  ;;  %v1028_v22 = vadd.f32 %v1026_v43, %v1023_v63  ;;  %v1057_v25 = vstv %s4208_s23  ;;  %v1062_v30 = vstv %s4210_s24  ;;  %s4354_s23 = sld [smem:[#allocation9 + $0xb]]  ;;  %s4356_s24 = sld [smem:[#allocation9 + $0xc]] }
 0x103   :  { %v1050_v31 = vadd.f32 %v1048_v12, %v1045_v19  ;;  %v1051_v34 = vadd.f32 %v1049_v18, %v1046_v14  ;;  %v1058_v35 = vmul.f32 %v1057_v25, %v3846_v10  ;;  %v1059_v40 = vmul.f32 %v1057_v25, %v3848_v11 }
 0x104   :  { %v1032_v44 = vadd.f32 %v1030_v48, %v1027_v21  ;;  %v1033_v45 = vadd.f32 %v1031_v49, %v1028_v22  ;;  %v1063_v46 = vmul.f32 %v1062_v30, %v3858_v16  ;;  %v1064_v52 = vmul.f32 %v1062_v30, %v3860_v17 }
 0x105   :  { %v1055_v53 = vadd.f32 %v1053_v15, %v1050_v31  ;;  %v1056_v54 = vadd.f32 %v1054_v20, %v1051_v34  ;;  %v1067_v13 = vstv %s4222_s6  ;;  %v1072_v43 = vstv %s4224_s8  ;;  %s4360_s6 = sld [smem:[#allocation9 + $0xd]]  ;;  %s4362_s8 = sld [smem:[#allocation9 + $0xe]] }
 0x106   :  { %v1035_v55 = vadd.f32 %v1034_v47, %v1032_v44  ;;  %v1036_v36 = vadd.f32 %v1034_v47, %v1033_v45  ;;  %v1068_v37 = vmul.f32 %v1067_v13, %v3868_v26  ;;  %v1069_v48 = vmul.f32 %v1067_v13, %v3870_v27 }
 0x107   :  { %v1060_v49 = vadd.f32 %v1058_v35, %v1055_v53  ;;  %v1061_v29 = vadd.f32 %v1059_v40, %v1056_v54  ;;  %v1073_v59 = vmul.f32 %v1072_v43, %v3876_v32  ;;  %v1074_v8 = vmul.f32 %v1072_v43, %v3878_v33 }
 0x108   :  { %v4268_v9 = vmax.f32 %v1035_v55, 0.0  ;;  %v4270_v62 = vmax.f32 %v1036_v36, 0.0  ;;  %v1077_v63 = vstv %s4236_s9  ;;  %v1082_v47 = vstv %s4238_s11  ;;  %s4378_s9 = sld [smem:[#allocation9 + $0xf]]  ;;  %s4380_s11 = sld [smem:[#allocation9 + $0x10]] }
 0x109   :  { %v1065_v12 = vadd.f32 %v1063_v46, %v1060_v49  ;;  %v1066_v18 = vadd.f32 %v1064_v52, %v1061_v29  ;;  %v1078_v19 = vmul.f32 %v1077_v63, %v3886_v38  ;;  %v1079_v14 = vmul.f32 %v1077_v63, %v3888_v39 }
 0x10a   :  { %v1087_v15 = vstv %s4242_s25  ;;  %v1090_v20 = vstv %s4244_s26  ;;  %v1095_v21 = vstv %s4248_s27  ;;  %v1100_v22 = vstv %s4250_s28  ;;  %s4390_s25 = sld [smem:[#allocation9 + $0x11]]  ;;  %s4398_s27 = sld [smem:[#allocation9 + $0x12]] }
 0x10b   :  { %v1070_v25 = vadd.f32 %v1068_v37, %v1065_v12  ;;  %v1071_v30 = vadd.f32 %v1069_v48, %v1066_v18  ;;  %v1088_v31 = vmul.f32 %v1087_v15, %v3822_v0  ;;  %v1089_v34 = vmul.f32 %v1087_v15, %v3824_v1  ;;  %s4392_s26 = sld [smem:[#allocation10 + $0x1]]  ;;  %s4400_s28 = sld [smem:[#allocation9 + $0x13]] }
 0x10c   :  { %v1091_v35 = vmul.f32 %v1090_v20, %v3830_v2  ;;  %v1092_v40 = vmul.f32 %v1090_v20, %v3832_v3  ;;  %v1096_v44 = vmul.f32 %v1095_v21, %v3834_v4  ;;  %v1097_v45 = vmul.f32 %v1095_v21, %v3836_v5 }
 0x10d   :  { %v1075_v0 = vadd.f32 %v1073_v59, %v1070_v25  ;;  %v1076_v46 = vadd.f32 %v1074_v8, %v1071_v30  ;;  %v1101_v1 = vmul.f32 %v1100_v22, %v3838_v6  ;;  %v1102_v52 = vmul.f32 %v1100_v22, %v3840_v7 }
 0x10e   :  { %v1093_v53 = vadd.f32 %v1091_v35, %v1088_v31  ;;  %v1094_v54 = vadd.f32 %v1092_v40, %v1089_v34  ;;  %v1105_v2 = vstv %s4260_s12  ;;  %v1110_v3 = vstv %s4262_s0  ;;  %s4406_s12 = sld [smem:[#allocation9 + $0x14]]  ;;  %s4408_s0 = sld [smem:[#allocation9 + $0x15]] }
 0x10f   :  { %v1080_v4 = vadd.f32 %v1078_v19, %v1075_v0  ;;  %v1081_v5 = vadd.f32 %v1079_v14, %v1076_v46  ;;  %v1106_v13 = vmul.f32 %v1105_v2, %v3846_v10  ;;  %v1107_v43 = vmul.f32 %v1105_v2, %v3848_v11 }
 0x110   :  { %v1098_v55 = vadd.f32 %v1096_v44, %v1093_v53  ;;  %v1099_v6 = vadd.f32 %v1097_v45, %v1094_v54  ;;  %v1111_v7 = vmul.f32 %v1110_v3, %v3858_v16  ;;  %v1112_v36 = vmul.f32 %v1110_v3, %v3860_v17 }
 0x111   :  { %v1083_v37 = vadd.f32 %v1082_v47, %v1080_v4  ;;  %v1084_v48 = vadd.f32 %v1082_v47, %v1081_v5  ;;  %v1115_v49 = vstv %s4274_s1  ;;  %v1120_v29 = vstv %s4276_s3  ;;  %s4416_s1 = sld [smem:[#allocation9 + $0x16]]  ;;  %s4418_s3 = sld [smem:[#allocation9 + $0x17]] }
 0x112   :  { %v1103_v59 = vadd.f32 %v1101_v1, %v1098_v55  ;;  %v1104_v10 = vadd.f32 %v1102_v52, %v1099_v6  ;;  %v1116_v11 = vmul.f32 %v1115_v49, %v3868_v26  ;;  %v1117_v16 = vmul.f32 %v1115_v49, %v3870_v27 }
 0x113   :  { %v4318_v8 = vmax.f32 %v1083_v37, 0.0  ;;  %v4320_v17 = vmax.f32 %v1084_v48, 0.0  ;;  %v1121_v63 = vmul.f32 %v1120_v29, %v3876_v32  ;;  %v1122_v47 = vmul.f32 %v1120_v29, %v3878_v33 }
 0x114   :  { %v1108_v12 = vadd.f32 %v1106_v13, %v1103_v59  ;;  %v1109_v18 = vadd.f32 %v1107_v43, %v1104_v10  ;;  %v1125_v19 = vstv %s4286_s29  ;;  %v1130_v14 = vstv %s4288_s30  ;;  %s4430_s29 = sld [smem:[#allocation9 + $0x18]]  ;;  %s4432_s30 = sld [smem:[#allocation9 + $0x19]] }
 0x115   :  { %v1126_v26 = vmul.f32 %v1125_v19, %v3886_v38  ;;  %v1127_v27 = vmul.f32 %v1125_v19, %v3888_v39  ;;  %v1135_v15 = vstv %s4294_s14  ;;  %v1138_v20 = vstv %s4296_s15  ;;  %s4444_s14 = sld [smem:[#allocation9 + $0x1a]] }
 0x116   :  { %v1113_v21 = vadd.f32 %v1111_v7, %v1108_v12  ;;  %v1114_v32 = vadd.f32 %v1112_v36, %v1109_v18  ;;  %v1136_v33 = vmul.f32 %v1135_v15, %v4052_v56  ;;  %v1137_v22 = vmul.f32 %v1135_v15, %v4054_v57  ;;  %s4446_s15 = sld [smem:[#allocation10 + $0x2]] }
 0x117   :  { %v1139_v25 = vmul.f32 %v1138_v20, %v4056_v58  ;;  %v1140_v30 = vmul.f32 %v1138_v20, %v4058_v28  ;;  %v1143_v31 = vstv %s4302_s16  ;;  %v1148_v34 = vstv %s4304_s2  ;;  %s4450_s16 = sld [smem:[#allocation9 + $0x1b]]  ;;  %s4452_s2 = sld [smem:[#allocation9 + $0x1c]] }
 0x118   :  { %v1118_v38 = vadd.f32 %v1116_v11, %v1113_v21  ;;  %v1119_v39 = vadd.f32 %v1117_v16, %v1114_v32  ;;  %v1144_v35 = vmul.f32 %v1143_v31, %v4062_v60  ;;  %v1145_v40 = vmul.f32 %v1143_v31, %v4064_v61 }
 0x119   :  { %v1141_v44 = vadd.f32 %v1139_v25, %v1136_v33  ;;  %v1142_v45 = vadd.f32 %v1140_v30, %v1137_v22  ;;  %v1149_v0 = vmul.f32 %v1148_v34, %v4100_v50  ;;  %v1150_v46 = vmul.f32 %v1148_v34, %v4102_v51 }
 0x11a   :  { %v1123_v1 = vadd.f32 %v1121_v63, %v1118_v38  ;;  %v1124_v52 = vadd.f32 %v1122_v47, %v1119_v39  ;;  %v1153_v53 = vstv %s4312_s4  ;;  %v1158_v54 = vstv %s4314_s10  ;;  %s4456_s4 = sld [smem:[#allocation9 + $0x1d]]  ;;  %s4458_s10 = sld [smem:[#allocation9 + $0x1e]] }
 0x11b   :  { %v1146_v2 = vadd.f32 %v1144_v35, %v1141_v44  ;;  %v1147_v3 = vadd.f32 %v1145_v40, %v1142_v45  ;;  %v1154_v4 = vmul.f32 %v1153_v53, %v4164_v23  ;;  %v1155_v5 = vmul.f32 %v1153_v53, %v4166_v24 }
 0x11c   :  { %v1128_v13 = vadd.f32 %v1126_v26, %v1123_v1  ;;  %v1129_v43 = vadd.f32 %v1127_v27, %v1124_v52  ;;  %v1159_v55 = vmul.f32 %v1158_v54, %v4214_v41  ;;  %v1160_v6 = vmul.f32 %v1158_v54, %v4216_v42 }
 0x11d   :  { %v1151_v7 = vadd.f32 %v1149_v0, %v1146_v2  ;;  %v1152_v36 = vadd.f32 %v1150_v46, %v1147_v3  ;;  %v1163_v37 = vstv %s4326_s5  ;;  %v1168_v48 = vstv %s4328_s7  ;;  %s4468_s5 = sld [smem:[#allocation9 + $0x1f]]  ;;  %s4470_s7 = sld [smem:[#allocation9 + $0x20]] }
 0x11e   :  { %v1131_v49 = vadd.f32 %v1130_v14, %v1128_v13  ;;  %v1132_v29 = vadd.f32 %v1130_v14, %v1129_v43  ;;  %v1164_v59 = vmul.f32 %v1163_v37, %v4268_v9  ;;  %v1165_v10 = vmul.f32 %v1163_v37, %v4270_v62 }
 0x11f   :  { %v1156_v11 = vadd.f32 %v1154_v4, %v1151_v7  ;;  %v1157_v16 = vadd.f32 %v1155_v5, %v1152_v36  ;;  %v1169_v63 = vmul.f32 %v1168_v48, %v4318_v8  ;;  %v1170_v47 = vmul.f32 %v1168_v48, %v4320_v17 }
 0x120   :  { %v4372_v12 = vmax.f32 %v1131_v49, 0.0  ;;  %v4374_v18 = vmax.f32 %v1132_v29, 0.0  ;;  %v1173_v19 = vstv %s4340_s17  ;;  %v1178_v26 = vstv %s4342_s18  ;;  %s4482_s17 = sld [smem:[#allocation9 + $0x21]]  ;;  %s4484_s18 = sld [smem:[#allocation9 + $0x22]] }
 0x121   :  { %v1161_v14 = vadd.f32 %v1159_v55, %v1156_v11  ;;  %v1162_v27 = vadd.f32 %v1160_v6, %v1157_v16  ;;  %v1183_v15 = vstv %s4346_s21  ;;  %v1186_v20 = vstv %s4348_s22  ;;  %s4494_s21 = sld [smem:[#allocation9 + $0x23]] }
 0x122   :  { %v1174_v21 = vmul.f32 %v1173_v19, %v4372_v12  ;;  %v1175_v32 = vmul.f32 %v1173_v19, %v4374_v18  ;;  %v1184_v33 = vmul.f32 %v1183_v15, %v4052_v56  ;;  %v1185_v22 = vmul.f32 %v1183_v15, %v4054_v57  ;;  %s4496_s22 = sld [smem:[#allocation10 + $0x3]] }
 0x123   :  { %v1166_v25 = vadd.f32 %v1164_v59, %v1161_v14  ;;  %v1167_v30 = vadd.f32 %v1165_v10, %v1162_v27  ;;  %v1187_v31 = vmul.f32 %v1186_v20, %v4056_v58  ;;  %v1188_v34 = vmul.f32 %v1186_v20, %v4058_v28 }
 0x124   :  { %v1191_v38 = vstv %s4354_s23  ;;  %v1196_v39 = vstv %s4356_s24  ;;  %v1201_v35 = vstv %s4360_s6  ;;  %v1206_v40 = vstv %s4362_s8  ;;  %s4502_s23 = sld [smem:[#allocation9 + $0x24]]  ;;  %s4504_s24 = sld [smem:[#allocation9 + $0x25]] }
 0x125   :  { %v1171_v44 = vadd.f32 %v1169_v63, %v1166_v25  ;;  %v1172_v45 = vadd.f32 %v1170_v47, %v1167_v30  ;;  %v1189_v0 = vadd.f32 %v1187_v31, %v1184_v33  ;;  %v1190_v46 = vadd.f32 %v1188_v34, %v1185_v22  ;;  %s4510_s6 = sld [smem:[#allocation9 + $0x26]]  ;;  %s4512_s8 = sld [smem:[#allocation9 + $0x27]] }
 0x126   :  { %v1192_v1 = vmul.f32 %v1191_v38, %v4062_v60  ;;  %v1193_v52 = vmul.f32 %v1191_v38, %v4064_v61  ;;  %v1197_v53 = vmul.f32 %v1196_v39, %v4100_v50  ;;  %v1198_v54 = vmul.f32 %v1196_v39, %v4102_v51 }
 0x127   :  { %v1176_v2 = vadd.f32 %v1174_v21, %v1171_v44  ;;  %v1177_v3 = vadd.f32 %v1175_v32, %v1172_v45  ;;  %v1202_v4 = vmul.f32 %v1201_v35, %v4164_v23  ;;  %v1203_v5 = vmul.f32 %v1201_v35, %v4166_v24 }
 0x128   :  { %v1194_v13 = vadd.f32 %v1192_v1, %v1189_v0  ;;  %v1195_v43 = vadd.f32 %v1193_v52, %v1190_v46  ;;  %v1207_v55 = vmul.f32 %v1206_v40, %v4214_v41  ;;  %v1208_v6 = vmul.f32 %v1206_v40, %v4216_v42 }
 0x129   :  { %v1179_v7 = vadd.f32 %v1178_v26, %v1176_v2  ;;  %v1180_v36 = vadd.f32 %v1178_v26, %v1177_v3  ;;  %v1211_v37 = vstv %s4378_s9  ;;  %v1216_v48 = vstv %s4380_s11  ;;  %s4520_s9 = sld [smem:[#allocation9 + $0x28]]  ;;  %s4522_s11 = sld [smem:[#allocation9 + $0x29]] }
 0x12a   :  { %v1199_v49 = vadd.f32 %v1197_v53, %v1194_v13  ;;  %v1200_v29 = vadd.f32 %v1198_v54, %v1195_v43  ;;  %v1212_v59 = vmul.f32 %v1211_v37, %v4268_v9  ;;  %v1213_v10 = vmul.f32 %v1211_v37, %v4270_v62 }
 0x12b   :  { %v4422_v11 = vmax.f32 %v1179_v7, 0.0  ;;  %v4424_v16 = vmax.f32 %v1180_v36, 0.0  ;;  %v1217_v63 = vmul.f32 %v1216_v48, %v4318_v8  ;;  %v1218_v47 = vmul.f32 %v1216_v48, %v4320_v17 }
 0x12c   :  { %v1204_v19 = vadd.f32 %v1202_v4, %v1199_v49  ;;  %v1205_v26 = vadd.f32 %v1203_v5, %v1200_v29  ;;  %v1221_v14 = vstv %s4390_s25  ;;  %v1226_v27 = vstv %s4392_s26  ;;  %s4534_s25 = sld [smem:[#allocation9 + $0x2a]]  ;;  %s4536_s26 = sld [smem:[#allocation9 + $0x2b]] }
 0x12d   :  { %v1222_v15 = vmul.f32 %v1221_v14, %v4372_v12  ;;  %v1223_v20 = vmul.f32 %v1221_v14, %v4374_v18  ;;  %v1231_v21 = vstv %s4398_s27  ;;  %v1234_v32 = vstv %s4400_s28  ;;  %s4548_s27 = sld [smem:[#allocation9 + $0x2c]] }
 0x12e   :  { %v1209_v33 = vadd.f32 %v1207_v55, %v1204_v19  ;;  %v1210_v22 = vadd.f32 %v1208_v6, %v1205_v26  ;;  %v1232_v25 = vmul.f32 %v1231_v21, %v4052_v56  ;;  %v1233_v30 = vmul.f32 %v1231_v21, %v4054_v57  ;;  %s4550_s28 = sld [smem:[#allocation10 + $0x4]] }
 0x12f   :  { %v1235_v31 = vmul.f32 %v1234_v32, %v4056_v58  ;;  %v1236_v34 = vmul.f32 %v1234_v32, %v4058_v28  ;;  %v1239_v38 = vstv %s4406_s12  ;;  %v1244_v39 = vstv %s4408_s0  ;;  %s4554_s12 = sld [smem:[#allocation9 + $0x2d]]  ;;  %s4556_s0 = sld [smem:[#allocation9 + $0x2e]] }
 0x130   :  { %v1214_v35 = vadd.f32 %v1212_v59, %v1209_v33  ;;  %v1215_v40 = vadd.f32 %v1213_v10, %v1210_v22  ;;  %v1240_v44 = vmul.f32 %v1239_v38, %v4062_v60  ;;  %v1241_v45 = vmul.f32 %v1239_v38, %v4064_v61 }
 0x131   :  { %v1237_v0 = vadd.f32 %v1235_v31, %v1232_v25  ;;  %v1238_v46 = vadd.f32 %v1236_v34, %v1233_v30  ;;  %v1245_v1 = vmul.f32 %v1244_v39, %v4100_v50  ;;  %v1246_v52 = vmul.f32 %v1244_v39, %v4102_v51 }
 0x132   :  { %v1219_v53 = vadd.f32 %v1217_v63, %v1214_v35  ;;  %v1220_v54 = vadd.f32 %v1218_v47, %v1215_v40  ;;  %v1249_v2 = vstv %s4416_s1  ;;  %v1254_v3 = vstv %s4418_s3  ;;  %s4560_s1 = sld [smem:[#allocation9 + $0x2f]]  ;;  %s4562_s3 = sld [smem:[#allocation9 + $0x30]] }
 0x133   :  { %v1242_v4 = vadd.f32 %v1240_v44, %v1237_v0  ;;  %v1243_v5 = vadd.f32 %v1241_v45, %v1238_v46  ;;  %v1250_v13 = vmul.f32 %v1249_v2, %v4164_v23  ;;  %v1251_v43 = vmul.f32 %v1249_v2, %v4166_v24 }
 0x134   :  { %v1224_v55 = vadd.f32 %v1222_v15, %v1219_v53  ;;  %v1225_v6 = vadd.f32 %v1223_v20, %v1220_v54  ;;  %v1255_v7 = vmul.f32 %v1254_v3, %v4214_v41  ;;  %v1256_v36 = vmul.f32 %v1254_v3, %v4216_v42 }
 0x135   :  { %v1247_v37 = vadd.f32 %v1245_v1, %v1242_v4  ;;  %v1248_v48 = vadd.f32 %v1246_v52, %v1243_v5  ;;  %v1259_v49 = vstv %s4430_s29  ;;  %v1264_v29 = vstv %s4432_s30  ;;  %s4572_s29 = sld [smem:[#allocation9 + $0x31]]  ;;  %s4574_s30 = sld [smem:[#allocation9 + $0x32]] }
 0x136   :  { %v1227_v59 = vadd.f32 %v1226_v27, %v1224_v55  ;;  %v1228_v10 = vadd.f32 %v1226_v27, %v1225_v6  ;;  %v1260_v63 = vmul.f32 %v1259_v49, %v4268_v9  ;;  %v1261_v47 = vmul.f32 %v1259_v49, %v4270_v62 }
 0x137   :  { %v1252_v19 = vadd.f32 %v1250_v13, %v1247_v37  ;;  %v1253_v26 = vadd.f32 %v1251_v43, %v1248_v48  ;;  %v1265_v14 = vmul.f32 %v1264_v29, %v4318_v8  ;;  %v1266_v15 = vmul.f32 %v1264_v29, %v4320_v17 }
 0x138   :  { %v4476_v20 = vmax.f32 %v1227_v59, 0.0  ;;  %v4478_v21 = vmax.f32 %v1228_v10, 0.0  ;;  %v1269_v32 = vstv %s4444_s14  ;;  %v1274_v27 = vstv %s4446_s15  ;;  %s4586_s14 = sld [smem:[#allocation9 + $0x33]]  ;;  %s4588_s15 = sld [smem:[#allocation9 + $0x34]] }
 0x139   :  { %v1257_v33 = vadd.f32 %v1255_v7, %v1252_v19  ;;  %v1258_v22 = vadd.f32 %v1256_v36, %v1253_v26  ;;  %v1270_v25 = vmul.f32 %v1269_v32, %v4372_v12  ;;  %v1271_v30 = vmul.f32 %v1269_v32, %v4374_v18 }
 0x13a   :  { %v1279_v31 = vstv %s4450_s16  ;;  %v1282_v34 = vstv %s4452_s2  ;;  %v1287_v38 = vstv %s4456_s4  ;;  %v1292_v39 = vstv %s4458_s10  ;;  %s4598_s16 = sld [smem:[#allocation9 + $0x35]]  ;;  %s4606_s4 = sld [smem:[#allocation9 + $0x36]] }
 0x13b   :  { %v1262_v35 = vadd.f32 %v1260_v63, %v1257_v33  ;;  %v1263_v40 = vadd.f32 %v1261_v47, %v1258_v22  ;;  %v1280_v44 = vmul.f32 %v1279_v31, %v4052_v56  ;;  %v1281_v45 = vmul.f32 %v1279_v31, %v4054_v57  ;;  %s4600_s2 = sld [smem:[#allocation10 + $0x5]]  ;;  %s4608_s10 = sld [smem:[#allocation9 + $0x37]] }
 0x13c   :  { %v1283_v0 = vmul.f32 %v1282_v34, %v4056_v58  ;;  %v1284_v46 = vmul.f32 %v1282_v34, %v4058_v28  ;;  %v1288_v1 = vmul.f32 %v1287_v38, %v4062_v60  ;;  %v1289_v52 = vmul.f32 %v1287_v38, %v4064_v61 }
 0x13d   :  { %v1267_v53 = vadd.f32 %v1265_v14, %v1262_v35  ;;  %v1268_v54 = vadd.f32 %v1266_v15, %v1263_v40  ;;  %v1293_v2 = vmul.f32 %v1292_v39, %v4100_v50  ;;  %v1294_v3 = vmul.f32 %v1292_v39, %v4102_v51 }
 0x13e   :  { %v1285_v4 = vadd.f32 %v1283_v0, %v1280_v44  ;;  %v1286_v5 = vadd.f32 %v1284_v46, %v1281_v45  ;;  %v1297_v13 = vstv %s4468_s5  ;;  %v1302_v43 = vstv %s4470_s7  ;;  %s4614_s5 = sld [smem:[#allocation9 + $0x38]]  ;;  %s4616_s7 = sld [smem:[#allocation9 + $0x39]] }
 0x13f   :  { %v1272_v55 = vadd.f32 %v1270_v25, %v1267_v53  ;;  %v1273_v6 = vadd.f32 %v1271_v30, %v1268_v54  ;;  %v1298_v7 = vmul.f32 %v1297_v13, %v4164_v23  ;;  %v1299_v36 = vmul.f32 %v1297_v13, %v4166_v24 }
 0x140   :  { %v1290_v37 = vadd.f32 %v1288_v1, %v1285_v4  ;;  %v1291_v48 = vadd.f32 %v1289_v52, %v1286_v5  ;;  %v1303_v49 = vmul.f32 %v1302_v43, %v4214_v41  ;;  %v1304_v29 = vmul.f32 %v1302_v43, %v4216_v42 }
 0x141   :  { %v1275_v59 = vadd.f32 %v1274_v27, %v1272_v55  ;;  %v1276_v10 = vadd.f32 %v1274_v27, %v1273_v6  ;;  %v1307_v63 = vstv %s4482_s17  ;;  %v1312_v47 = vstv %s4484_s18  ;;  %s4624_s17 = sld [smem:[#allocation9 + $0x3a]]  ;;  %s4626_s18 = sld [smem:[#allocation9 + $0x3b]] }
 0x142   :  { %v1295_v19 = vadd.f32 %v1293_v2, %v1290_v37  ;;  %v1296_v26 = vadd.f32 %v1294_v3, %v1291_v48  ;;  %v1308_v14 = vmul.f32 %v1307_v63, %v4268_v9  ;;  %v1309_v15 = vmul.f32 %v1307_v63, %v4270_v62 }
 0x143   :  { %v4526_v32 = vmax.f32 %v1275_v59, 0.0  ;;  %v4528_v33 = vmax.f32 %v1276_v10, 0.0  ;;  %v1313_v27 = vmul.f32 %v1312_v47, %v4318_v8  ;;  %v1314_v22 = vmul.f32 %v1312_v47, %v4320_v17 }
 0x144   :  { %v1300_v25 = vadd.f32 %v1298_v7, %v1295_v19  ;;  %v1301_v30 = vadd.f32 %v1299_v36, %v1296_v26  ;;  %v1317_v31 = vstv %s4494_s21  ;;  %v1322_v34 = vstv %s4496_s22  ;;  %s4638_s21 = sld [smem:[#allocation9 + $0x3c]]  ;;  %s4640_s22 = sld [smem:[#allocation9 + $0x3d]] }
 0x145   :  { %v1318_v38 = vmul.f32 %v1317_v31, %v4372_v12  ;;  %v1319_v39 = vmul.f32 %v1317_v31, %v4374_v18  ;;  %v1327_v35 = vstv %s4502_s23  ;;  %v1330_v40 = vstv %s4504_s24  ;;  %s4652_s23 = sld [smem:[#allocation9 + $0x3e]] }
 0x146   :  { %v1305_v44 = vadd.f32 %v1303_v49, %v1300_v25  ;;  %v1306_v45 = vadd.f32 %v1304_v29, %v1301_v30  ;;  %v1328_v0 = vmul.f32 %v1327_v35, %v4052_v56  ;;  %v1329_v46 = vmul.f32 %v1327_v35, %v4054_v57  ;;  %s4654_s24 = sld [smem:[#allocation10 + $0x6]] }
 0x147   :  { %v1331_v1 = vmul.f32 %v1330_v40, %v4056_v58  ;;  %v1332_v52 = vmul.f32 %v1330_v40, %v4058_v28  ;;  %v1335_v53 = vstv %s4510_s6  ;;  %v1340_v54 = vstv %s4512_s8  ;;  %s4658_s6 = sld [smem:[#allocation9 + $0x3f]]  ;;  %s4660_s8 = sld [smem:[#allocation9 + $0x40]] }
 0x148   :  { %v1310_v2 = vadd.f32 %v1308_v14, %v1305_v44  ;;  %v1311_v3 = vadd.f32 %v1309_v15, %v1306_v45  ;;  %v1336_v4 = vmul.f32 %v1335_v53, %v4062_v60  ;;  %v1337_v5 = vmul.f32 %v1335_v53, %v4064_v61 }
 0x149   :  { %v1333_v13 = vadd.f32 %v1331_v1, %v1328_v0  ;;  %v1334_v43 = vadd.f32 %v1332_v52, %v1329_v46  ;;  %v1341_v55 = vmul.f32 %v1340_v54, %v4100_v50  ;;  %v1342_v6 = vmul.f32 %v1340_v54, %v4102_v51 }
 0x14a   :  { %v1315_v7 = vadd.f32 %v1313_v27, %v1310_v2  ;;  %v1316_v36 = vadd.f32 %v1314_v22, %v1311_v3  ;;  %v1345_v37 = vstv %s4520_s9  ;;  %v1350_v48 = vstv %s4522_s11  ;;  %s4664_s9 = sld [smem:[#allocation9 + $0x41]]  ;;  %s4666_s11 = sld [smem:[#allocation9 + $0x42]] }
 0x14b   :  { %v1338_v49 = vadd.f32 %v1336_v4, %v1333_v13  ;;  %v1339_v29 = vadd.f32 %v1337_v5, %v1334_v43  ;;  %v1346_v59 = vmul.f32 %v1345_v37, %v4164_v23  ;;  %v1347_v10 = vmul.f32 %v1345_v37, %v4166_v24 }
 0x14c   :  { %v1320_v63 = vadd.f32 %v1318_v38, %v1315_v7  ;;  %v1321_v47 = vadd.f32 %v1319_v39, %v1316_v36  ;;  %v1351_v19 = vmul.f32 %v1350_v48, %v4214_v41  ;;  %v1352_v26 = vmul.f32 %v1350_v48, %v4216_v42 }
 0x14d   :  { %v1343_v14 = vadd.f32 %v1341_v55, %v1338_v49  ;;  %v1344_v15 = vadd.f32 %v1342_v6, %v1339_v29  ;;  %v1355_v27 = vstv %s4534_s25  ;;  %v1360_v22 = vstv %s4536_s26  ;;  %s4676_s25 = sld [smem:[#allocation9 + $0x43]]  ;;  %s4678_s26 = sld [smem:[#allocation9 + $0x44]] }
 0x14e   :  { %v1323_v25 = vadd.f32 %v1322_v34, %v1320_v63  ;;  %v1324_v30 = vadd.f32 %v1322_v34, %v1321_v47  ;;  %v1356_v31 = vmul.f32 %v1355_v27, %v4268_v9  ;;  %v1357_v38 = vmul.f32 %v1355_v27, %v4270_v62 }
 0x14f   :  { %v1348_v39 = vadd.f32 %v1346_v59, %v1343_v14  ;;  %v1349_v35 = vadd.f32 %v1347_v10, %v1344_v15  ;;  %v1361_v40 = vmul.f32 %v1360_v22, %v4318_v8  ;;  %v1362_v44 = vmul.f32 %v1360_v22, %v4320_v17 }
 0x150   :  { %v4580_v45 = vmax.f32 %v1323_v25, 0.0  ;;  %v4582_v0 = vmax.f32 %v1324_v30, 0.0  ;;  %v1365_v46 = vstv %s4548_s27  ;;  %v1370_v34 = vstv %s4550_s28  ;;  %s4690_s27 = sld [smem:[#allocation9 + $0x45]]  ;;  %s4692_s28 = sld [smem:[#allocation9 + $0x46]] }
 0x151   :  { %v1353_v1 = vadd.f32 %v1351_v19, %v1348_v39  ;;  %v1354_v52 = vadd.f32 %v1352_v26, %v1349_v35  ;;  %v1366_v53 = vmul.f32 %v1365_v46, %v4372_v12  ;;  %v1367_v54 = vmul.f32 %v1365_v46, %v4374_v18 }
 0x152   :  { %v1375_v2 = vstv %s4554_s12  ;;  %v1378_v3 = vstv %s4556_s0  ;;  %v1383_v4 = vstv %s4560_s1  ;;  %v1388_v5 = vstv %s4562_s3  ;;  %s4702_s12 = sld [smem:[#allocation9 + $0x47]]  ;;  %s4710_s1 = sld [smem:[#allocation9 + $0x48]] }
 0x153   :  { %v1358_v13 = vadd.f32 %v1356_v31, %v1353_v1  ;;  %v1359_v43 = vadd.f32 %v1357_v38, %v1354_v52  ;;  %v1376_v55 = vmul.f32 %v1375_v2, %v4052_v56  ;;  %v1377_v6 = vmul.f32 %v1375_v2, %v4054_v57  ;;  %s4704_s0 = sld [smem:[#allocation10 + $0x7]]  ;;  %s4712_s3 = sld [smem:[#allocation9 + $0x49]] }
 0x154   :  { %v1379_v7 = vmul.f32 %v1378_v3, %v4056_v58  ;;  %v1380_v36 = vmul.f32 %v1378_v3, %v4058_v28  ;;  %v1384_v37 = vmul.f32 %v1383_v4, %v4062_v60  ;;  %v1385_v48 = vmul.f32 %v1383_v4, %v4064_v61 }
 0x155   :  { %v1363_v49 = vadd.f32 %v1361_v40, %v1358_v13  ;;  %v1364_v29 = vadd.f32 %v1362_v44, %v1359_v43  ;;  %v1389_v59 = vmul.f32 %v1388_v5, %v4100_v50  ;;  %v1390_v10 = vmul.f32 %v1388_v5, %v4102_v51 }
 0x156   :  { %v1381_v63 = vadd.f32 %v1379_v7, %v1376_v55  ;;  %v1382_v47 = vadd.f32 %v1380_v36, %v1377_v6  ;;  %v1393_v19 = vstv %s4572_s29  ;;  %v1398_v26 = vstv %s4574_s30  ;;  %s4718_s29 = sld [smem:[#allocation9 + $0x4a]]  ;;  %s4720_s30 = sld [smem:[#allocation9 + $0x4b]] }
 0x157   :  { %v1368_v14 = vadd.f32 %v1366_v53, %v1363_v49  ;;  %v1369_v15 = vadd.f32 %v1367_v54, %v1364_v29  ;;  %v1394_v27 = vmul.f32 %v1393_v19, %v4164_v23  ;;  %v1395_v22 = vmul.f32 %v1393_v19, %v4166_v24 }
 0x158   :  { %v1386_v25 = vadd.f32 %v1384_v37, %v1381_v63  ;;  %v1387_v30 = vadd.f32 %v1385_v48, %v1382_v47  ;;  %v1399_v31 = vmul.f32 %v1398_v26, %v4214_v41  ;;  %v1400_v38 = vmul.f32 %v1398_v26, %v4216_v42 }
 0x159   :  { %v1371_v39 = vadd.f32 %v1370_v34, %v1368_v14  ;;  %v1372_v35 = vadd.f32 %v1370_v34, %v1369_v15  ;;  %v1403_v40 = vstv %s4586_s14  ;;  %v1408_v44 = vstv %s4588_s15  ;;  %s4728_s14 = sld [smem:[#allocation9 + $0x4c]]  ;;  %s4730_s15 = sld [smem:[#allocation9 + $0x4d]] }
 0x15a   :  { %v1391_v46 = vadd.f32 %v1389_v59, %v1386_v25  ;;  %v1392_v1 = vadd.f32 %v1390_v10, %v1387_v30  ;;  %v1404_v52 = vmul.f32 %v1403_v40, %v4268_v9  ;;  %v1405_v53 = vmul.f32 %v1403_v40, %v4270_v62 }
 0x15b   :  { %v4630_v54 = vmax.f32 %v1371_v39, 0.0  ;;  %v4632_v2 = vmax.f32 %v1372_v35, 0.0  ;;  %v1409_v34 = vmul.f32 %v1408_v44, %v4318_v8  ;;  %v1410_v3 = vmul.f32 %v1408_v44, %v4320_v17 }
 0x15c   :  { %v1396_v4 = vadd.f32 %v1394_v27, %v1391_v46  ;;  %v1397_v5 = vadd.f32 %v1395_v22, %v1392_v1  ;;  %v1413_v13 = vstv %s4598_s16  ;;  %v1418_v43 = vstv %s4600_s2  ;;  %s4742_s16 = sld [smem:[#allocation9 + $0x4e]]  ;;  %s4744_s2 = sld [smem:[#allocation9 + $0x4f]] }
 0x15d   :  { %v1414_v55 = vmul.f32 %v1413_v13, %v4372_v12  ;;  %v1415_v6 = vmul.f32 %v1413_v13, %v4374_v18  ;;  %v1423_v7 = vstv %s4606_s4  ;;  %v1426_v36 = vstv %s4608_s10  ;;  %s4756_s4 = sld [smem:[#allocation9 + $0x50]] }
 0x15e   :  { %v1401_v37 = vadd.f32 %v1399_v31, %v1396_v4  ;;  %v1402_v48 = vadd.f32 %v1400_v38, %v1397_v5  ;;  %v1424_v49 = vmul.f32 %v1423_v7, %v4052_v56  ;;  %v1425_v29 = vmul.f32 %v1423_v7, %v4054_v57  ;;  %s4758_s10 = sld [smem:[#allocation10 + $0x8]] }
 0x15f   :  { %v1427_v59 = vmul.f32 %v1426_v36, %v4056_v58  ;;  %v1428_v10 = vmul.f32 %v1426_v36, %v4058_v28  ;;  %v1431_v63 = vstv %s4614_s5  ;;  %v1436_v47 = vstv %s4616_s7  ;;  %s4762_s5 = sld [smem:[#allocation12]]  ;;  %s4764_s7 = sld [smem:[#allocation12 + $0x1]] }
 0x160   :  { %v1406_v19 = vadd.f32 %v1404_v52, %v1401_v37  ;;  %v1407_v26 = vadd.f32 %v1405_v53, %v1402_v48  ;;  %v1432_v14 = vmul.f32 %v1431_v63, %v4062_v60  ;;  %v1433_v15 = vmul.f32 %v1431_v63, %v4064_v61 }
 0x161   :  { %v1429_v27 = vadd.f32 %v1427_v59, %v1424_v49  ;;  %v1430_v22 = vadd.f32 %v1428_v10, %v1425_v29  ;;  %v1437_v25 = vmul.f32 %v1436_v47, %v4100_v50  ;;  %v1438_v30 = vmul.f32 %v1436_v47, %v4102_v51 }
 0x162   :  { %v1411_v31 = vadd.f32 %v1409_v34, %v1406_v19  ;;  %v1412_v38 = vadd.f32 %v1410_v3, %v1407_v26  ;;  %v1441_v39 = vstv %s4624_s17  ;;  %v1446_v35 = vstv %s4626_s18  ;;  %s4768_s17 = sld [smem:[#allocation12 + $0x2]]  ;;  %s4770_s18 = sld [smem:[#allocation12 + $0x3]] }
 0x163   :  { %v1434_v40 = vadd.f32 %v1432_v14, %v1429_v27  ;;  %v1435_v44 = vadd.f32 %v1433_v15, %v1430_v22  ;;  %v1442_v46 = vmul.f32 %v1441_v39, %v4164_v23  ;;  %v1443_v1 = vmul.f32 %v1441_v39, %v4166_v24 }
 0x164   :  { %v1416_v52 = vadd.f32 %v1414_v55, %v1411_v31  ;;  %v1417_v53 = vadd.f32 %v1415_v6, %v1412_v38  ;;  %v1447_v4 = vmul.f32 %v1446_v35, %v4214_v41  ;;  %v1448_v5 = vmul.f32 %v1446_v35, %v4216_v42 }
 0x165   :  { %v1439_v13 = vadd.f32 %v1437_v25, %v1434_v40  ;;  %v1440_v7 = vadd.f32 %v1438_v30, %v1435_v44  ;;  %v1451_v34 = vstv %s4638_s21  ;;  %v1456_v3 = vstv %s4640_s22  ;;  %s4780_s21 = sld [smem:[#allocation12 + $0x4]]  ;;  %s4782_s22 = sld [smem:[#allocation12 + $0x5]] }
 0x166   :  { %v1419_v36 = vadd.f32 %v1418_v43, %v1416_v52  ;;  %v1420_v37 = vadd.f32 %v1418_v43, %v1417_v53  ;;  %v1452_v48 = vmul.f32 %v1451_v34, %v4268_v9  ;;  %v1453_v55 = vmul.f32 %v1451_v34, %v4270_v62 }
 0x167   :  { %v1444_v6 = vadd.f32 %v1442_v46, %v1439_v13  ;;  %v1445_v49 = vadd.f32 %v1443_v1, %v1440_v7  ;;  %v1457_v29 = vmul.f32 %v1456_v3, %v4318_v8  ;;  %v1458_v59 = vmul.f32 %v1456_v3, %v4320_v17 }
 0x168   :  { %v4684_v10 = vmax.f32 %v1419_v36, 0.0  ;;  %v4686_v63 = vmax.f32 %v1420_v37, 0.0  ;;  %v1461_v47 = vstv %s4652_s23  ;;  %v1466_v43 = vstv %s4654_s24  ;;  %s4794_s23 = sld [smem:[#allocation12 + $0x6]]  ;;  %s4796_s24 = sld [smem:[#allocation12 + $0x7]] }
 0x169   :  { %v1449_v19 = vadd.f32 %v1447_v4, %v1444_v6  ;;  %v1450_v26 = vadd.f32 %v1448_v5, %v1445_v49  ;;  %v1462_v14 = vmul.f32 %v1461_v47, %v4372_v12  ;;  %v1463_v15 = vmul.f32 %v1461_v47, %v4374_v18 }
 0x16a   :  { %v1471_v27 = vstv %s4658_s6  ;;  %v1474_v22 = vstv %s4660_s8  ;;  %v1479_v25 = vstv %s4664_s9  ;;  %v1484_v30 = vstv %s4666_s11  ;;  %s4806_s6 = sld [smem:[#allocation12 + $0x8]]  ;;  %s4814_s9 = sld [smem:[#allocation12 + $0x9]] }
 0x16b   :  { %v1454_v31 = vadd.f32 %v1452_v48, %v1449_v19  ;;  %v1455_v38 = vadd.f32 %v1453_v55, %v1450_v26  ;;  %v1472_v39 = vmul.f32 %v1471_v27, %v4052_v56  ;;  %v1473_v35 = vmul.f32 %v1471_v27, %v4054_v57  ;;  %s4808_s8 = sld [smem:[#allocation13]]  ;;  %s4816_s11 = sld [smem:[#allocation12 + $0xa]] }
 0x16c   :  { %v1475_v40 = vmul.f32 %v1474_v22, %v4056_v58  ;;  %v1476_v44 = vmul.f32 %v1474_v22, %v4058_v28  ;;  %v1480_v46 = vmul.f32 %v1479_v25, %v4062_v60  ;;  %v1481_v1 = vmul.f32 %v1479_v25, %v4064_v61 }
 0x16d   :  { %v1459_v52 = vadd.f32 %v1457_v29, %v1454_v31  ;;  %v1460_v53 = vadd.f32 %v1458_v59, %v1455_v38  ;;  %v1485_v4 = vmul.f32 %v1484_v30, %v4100_v50  ;;  %v1486_v5 = vmul.f32 %v1484_v30, %v4102_v51 }
 0x16e   :  { %v1477_v13 = vadd.f32 %v1475_v40, %v1472_v39  ;;  %v1478_v7 = vadd.f32 %v1476_v44, %v1473_v35  ;;  %v1489_v34 = vstv %s4676_s25  ;;  %v1494_v3 = vstv %s4678_s26  ;;  %s4822_s25 = sld [smem:[#allocation12 + $0xb]]  ;;  %s4824_s26 = sld [smem:[#allocation12 + $0xc]] }
 0x16f   :  { %v1464_v36 = vadd.f32 %v1462_v14, %v1459_v52  ;;  %v1465_v37 = vadd.f32 %v1463_v15, %v1460_v53  ;;  %v1490_v48 = vmul.f32 %v1489_v34, %v4164_v23  ;;  %v1491_v55 = vmul.f32 %v1489_v34, %v4166_v24 }
 0x170   :  { %v1482_v6 = vadd.f32 %v1480_v46, %v1477_v13  ;;  %v1483_v49 = vadd.f32 %v1481_v1, %v1478_v7  ;;  %v1495_v29 = vmul.f32 %v1494_v3, %v4214_v41  ;;  %v1496_v59 = vmul.f32 %v1494_v3, %v4216_v42 }
 0x171   :  { %v1467_v47 = vadd.f32 %v1466_v43, %v1464_v36  ;;  %v1468_v19 = vadd.f32 %v1466_v43, %v1465_v37  ;;  %v1499_v26 = vstv %s4690_s27  ;;  %v1504_v27 = vstv %s4692_s28  ;;  %s4832_s27 = sld [smem:[#allocation12 + $0xd]]  ;;  %s4834_s28 = sld [smem:[#allocation12 + $0xe]] }
 0x172   :  { %v1487_v14 = vadd.f32 %v1485_v4, %v1482_v6  ;;  %v1488_v15 = vadd.f32 %v1486_v5, %v1483_v49  ;;  %v1500_v22 = vmul.f32 %v1499_v26, %v4268_v9  ;;  %v1501_v25 = vmul.f32 %v1499_v26, %v4270_v62 }
 0x173   :  { %v4734_v30 = vmax.f32 %v1467_v47, 0.0  ;;  %v4736_v31 = vmax.f32 %v1468_v19, 0.0  ;;  %v1505_v43 = vmul.f32 %v1504_v27, %v4318_v8  ;;  %v1506_v38 = vmul.f32 %v1504_v27, %v4320_v17 }
 0x174   :  { %v1492_v39 = vadd.f32 %v1490_v48, %v1487_v14  ;;  %v1493_v35 = vadd.f32 %v1491_v55, %v1488_v15  ;;  %v1509_v40 = vstv %s4702_s12  ;;  %v1514_v44 = vstv %s4704_s0  ;;  %s4846_s12 = sld [smem:[#allocation12 + $0xf]]  ;;  %s4848_s0 = sld [smem:[#allocation12 + $0x10]] }
 0x175   :  { %v1510_v46 = vmul.f32 %v1509_v40, %v4372_v12  ;;  %v1511_v1 = vmul.f32 %v1509_v40, %v4374_v18  ;;  %v1519_v52 = vstv %s4710_s1  ;;  %v1522_v53 = vstv %s4712_s3  ;;  %s4860_s1 = sld [smem:[#allocation12 + $0x11]] }
 0x176   :  { %v1497_v4 = vadd.f32 %v1495_v29, %v1492_v39  ;;  %v1498_v5 = vadd.f32 %v1496_v59, %v1493_v35  ;;  %v1520_v13 = vmul.f32 %v1519_v52, %v4052_v56  ;;  %v1521_v7 = vmul.f32 %v1519_v52, %v4054_v57  ;;  %s4862_s3 = sld [smem:[#allocation13 + $0x1]] }
 0x177   :  { %v1523_v34 = vmul.f32 %v1522_v53, %v4056_v58  ;;  %v1524_v3 = vmul.f32 %v1522_v53, %v4058_v28  ;;  %v1527_v36 = vstv %s4718_s29  ;;  %v1532_v37 = vstv %s4720_s30  ;;  %s4866_s29 = sld [smem:[#allocation12 + $0x12]]  ;;  %s4868_s30 = sld [smem:[#allocation12 + $0x13]] }
 0x178   :  { %v1502_v48 = vadd.f32 %v1500_v22, %v1497_v4  ;;  %v1503_v55 = vadd.f32 %v1501_v25, %v1498_v5  ;;  %v1528_v6 = vmul.f32 %v1527_v36, %v4062_v60  ;;  %v1529_v56 = vmul.f32 %v1527_v36, %v4064_v61 }
 0x179   :  { %v1525_v57 = vadd.f32 %v1523_v34, %v1520_v13  ;;  %v1526_v58 = vadd.f32 %v1524_v3, %v1521_v7  ;;  %v1533_v28 = vmul.f32 %v1532_v37, %v4100_v50  ;;  %v1534_v49 = vmul.f32 %v1532_v37, %v4102_v51 }
 0x17a   :  { %v1507_v29 = vadd.f32 %v1505_v43, %v1502_v48  ;;  %v1508_v60 = vadd.f32 %v1506_v38, %v1503_v55  ;;  %v1537_v59 = vstv %s4728_s14  ;;  %v1542_v61 = vstv %s4730_s15  ;;  %s4872_s14 = sld [smem:[#allocation12 + $0x14]]  ;;  %s4874_s15 = sld [smem:[#allocation12 + $0x15]] }
 0x17b   :  { %v1530_v47 = vadd.f32 %v1528_v6, %v1525_v57  ;;  %v1531_v19 = vadd.f32 %v1529_v56, %v1526_v58  ;;  %v1538_v26 = vmul.f32 %v1537_v59, %v4164_v23  ;;  %v1539_v27 = vmul.f32 %v1537_v59, %v4166_v24 }
 0x17c   :  { %v1512_v14 = vadd.f32 %v1510_v46, %v1507_v29  ;;  %v1513_v50 = vadd.f32 %v1511_v1, %v1508_v60  ;;  %v1543_v51 = vmul.f32 %v1542_v61, %v4214_v41  ;;  %v1544_v15 = vmul.f32 %v1542_v61, %v4216_v42 }
 0x17d   :  { %v1535_v22 = vadd.f32 %v1533_v28, %v1530_v47  ;;  %v1536_v25 = vadd.f32 %v1534_v49, %v1531_v19  ;;  %v1547_v43 = vstv %s4742_s16  ;;  %v1552_v38 = vstv %s4744_s2  ;;  %s4884_s16 = sld [smem:[#allocation12 + $0x16]]  ;;  %s4886_s2 = sld [smem:[#allocation12 + $0x17]] }
 0x17e   :  { %v1515_v39 = vadd.f32 %v1514_v44, %v1512_v14  ;;  %v1516_v23 = vadd.f32 %v1514_v44, %v1513_v50  ;;  %v1548_v24 = vmul.f32 %v1547_v43, %v4268_v9  ;;  %v1549_v35 = vmul.f32 %v1547_v43, %v4270_v62 }
 0x17f   :  { %v1540_v41 = vadd.f32 %v1538_v26, %v1535_v22  ;;  %v1541_v42 = vadd.f32 %v1539_v27, %v1536_v25  ;;  %v1553_v40 = vmul.f32 %v1552_v38, %v4318_v8  ;;  %v1554_v46 = vmul.f32 %v1552_v38, %v4320_v17 }
 0x180   :  { %v4788_v1 = vmax.f32 %v1515_v39, 0.0  ;;  %v4790_v52 = vmax.f32 %v1516_v23, 0.0  ;;  %v1557_v53 = vstv %s4756_s4  ;;  %v1562_v44 = vstv %s4758_s10  ;;  %s4898_s4 = sld [smem:[#allocation12 + $0x18]]  ;;  %s4900_s10 = sld [smem:[#allocation12 + $0x19]] }
 0x181   :  { %v1545_v9 = vadd.f32 %v1543_v51, %v1540_v41  ;;  %v1546_v62 = vadd.f32 %v1544_v15, %v1541_v42  ;;  %v1558_v4 = vmul.f32 %v1557_v53, %v4372_v12  ;;  %v1559_v5 = vmul.f32 %v1557_v53, %v4374_v18 }
 0x182   :  { %v1567_v13 = vstv %s4762_s5  ;;  %v1570_v8 = vstv %s4764_s7  ;;  %v1575_v7 = vstv %s4768_s17  ;;  %v1580_v17 = vstv %s4770_s18  ;;  %s4910_s5 = sld [smem:[#allocation12 + $0x1a]]  ;;  %s4918_s17 = sld [smem:[#allocation12 + $0x1b]] }
 0x183   :  { %v1550_v34 = vadd.f32 %v1548_v24, %v1545_v9  ;;  %v1551_v3 = vadd.f32 %v1549_v35, %v1546_v62  ;;  %v1568_v36 = vmul.f32 %v1567_v13, %v4422_v11  ;;  %v1569_v37 = vmul.f32 %v1567_v13, %v4424_v16  ;;  %s4912_s7 = sld [smem:[#allocation13 + $0x2]]  ;;  %s4920_s18 = sld [smem:[#allocation12 + $0x1c]] }
 0x184   :  { %v1571_v12 = vmul.f32 %v1570_v8, %v4476_v20  ;;  %v1572_v18 = vmul.f32 %v1570_v8, %v4478_v21  ;;  %v1576_v48 = vmul.f32 %v1575_v7, %v4526_v32  ;;  %v1577_v55 = vmul.f32 %v1575_v7, %v4528_v33 }
 0x185   :  { %v1555_v6 = vadd.f32 %v1553_v40, %v1550_v34  ;;  %v1556_v56 = vadd.f32 %v1554_v46, %v1551_v3  ;;  %v1581_v57 = vmul.f32 %v1580_v17, %v4580_v45  ;;  %v1582_v58 = vmul.f32 %v1580_v17, %v4582_v0 }
 0x186   :  { %v1573_v28 = vadd.f32 %v1571_v12, %v1568_v36  ;;  %v1574_v49 = vadd.f32 %v1572_v18, %v1569_v37  ;;  %v1585_v29 = vstv %s4780_s21  ;;  %v1590_v60 = vstv %s4782_s22  ;;  %s4926_s21 = sld [smem:[#allocation12 + $0x1d]]  ;;  %s4928_s22 = sld [smem:[#allocation12 + $0x1e]] }
 0x187   :  { %v1560_v59 = vadd.f32 %v1558_v4, %v1555_v6  ;;  %v1561_v61 = vadd.f32 %v1559_v5, %v1556_v56  ;;  %v1586_v47 = vmul.f32 %v1585_v29, %v4630_v54  ;;  %v1587_v19 = vmul.f32 %v1585_v29, %v4632_v2 }
 0x188   :  { %v1578_v26 = vadd.f32 %v1576_v48, %v1573_v28  ;;  %v1579_v27 = vadd.f32 %v1577_v55, %v1574_v49  ;;  %v1591_v14 = vmul.f32 %v1590_v60, %v4684_v10  ;;  %v1592_v50 = vmul.f32 %v1590_v60, %v4686_v63 }
 0x189   :  { %v1563_v51 = vadd.f32 %v1562_v44, %v1560_v59  ;;  %v1564_v15 = vadd.f32 %v1562_v44, %v1561_v61  ;;  %v1595_v22 = vstv %s4794_s23  ;;  %v1600_v25 = vstv %s4796_s24  ;;  %s4936_s23 = sld [smem:[#allocation12 + $0x1f]]  ;;  %s4938_s24 = sld [smem:[#allocation12 + $0x20]] }
 0x18a   :  { %v1583_v43 = vadd.f32 %v1581_v57, %v1578_v26  ;;  %v1584_v38 = vadd.f32 %v1582_v58, %v1579_v27  ;;  %v1596_v39 = vmul.f32 %v1595_v22, %v4734_v30  ;;  %v1597_v23 = vmul.f32 %v1595_v22, %v4736_v31 }
 0x18b   :  { %v4838_v24 = vmax.f32 %v1563_v51, 0.0  ;;  %v4840_v35 = vmax.f32 %v1564_v15, 0.0  ;;  %v1601_v41 = vmul.f32 %v1600_v25, %v4788_v1  ;;  %v1602_v42 = vmul.f32 %v1600_v25, %v4790_v52 }
 0x18c   :  { %v1588_v40 = vadd.f32 %v1586_v47, %v1583_v43  ;;  %v1589_v46 = vadd.f32 %v1587_v19, %v1584_v38  ;;  %v1605_v53 = vstv %s4806_s6  ;;  %v1610_v44 = vstv %s4808_s8  ;;  %s4950_s6 = sld [smem:[#allocation12 + $0x21]]  ;;  %s4952_s8 = sld [smem:[#allocation12 + $0x22]] }
 0x18d   :  { %v1606_v9 = vmul.f32 %v1605_v53, %v4838_v24  ;;  %v1607_v62 = vmul.f32 %v1605_v53, %v4840_v35  ;;  %v1615_v4 = vstv %s4814_s9  ;;  %v1618_v5 = vstv %s4816_s11  ;;  %s4964_s9 = sld [smem:[#allocation12 + $0x23]] }
 0x18e   :  { %v1593_v13 = vadd.f32 %v1591_v14, %v1588_v40  ;;  %v1594_v8 = vadd.f32 %v1592_v50, %v1589_v46  ;;  %v1616_v7 = vmul.f32 %v1615_v4, %v4422_v11  ;;  %v1617_v17 = vmul.f32 %v1615_v4, %v4424_v16  ;;  %s4966_s11 = sld [smem:[#allocation13 + $0x3]] }
 0x18f   :  { %v1619_v34 = vmul.f32 %v1618_v5, %v4476_v20  ;;  %v1620_v3 = vmul.f32 %v1618_v5, %v4478_v21  ;;  %v1623_v36 = vstv %s4822_s25  ;;  %v1628_v37 = vstv %s4824_s26  ;;  %s4970_s25 = sld [smem:[#allocation12 + $0x24]]  ;;  %s4972_s26 = sld [smem:[#allocation12 + $0x25]] }
 0x190   :  { %v1598_v12 = vadd.f32 %v1596_v39, %v1593_v13  ;;  %v1599_v18 = vadd.f32 %v1597_v23, %v1594_v8  ;;  %v1624_v48 = vmul.f32 %v1623_v36, %v4526_v32  ;;  %v1625_v55 = vmul.f32 %v1623_v36, %v4528_v33 }
 0x191   :  { %v1621_v6 = vadd.f32 %v1619_v34, %v1616_v7  ;;  %v1622_v56 = vadd.f32 %v1620_v3, %v1617_v17  ;;  %v1629_v57 = vmul.f32 %v1628_v37, %v4580_v45  ;;  %v1630_v58 = vmul.f32 %v1628_v37, %v4582_v0 }
 0x192   :  { %v1603_v28 = vadd.f32 %v1601_v41, %v1598_v12  ;;  %v1604_v49 = vadd.f32 %v1602_v42, %v1599_v18  ;;  %v1633_v29 = vstv %s4832_s27  ;;  %v1638_v60 = vstv %s4834_s28  ;;  %s4976_s27 = sld [smem:[#allocation12 + $0x26]]  ;;  %s4978_s28 = sld [smem:[#allocation12 + $0x27]] }
 0x193   :  { %v1626_v59 = vadd.f32 %v1624_v48, %v1621_v6  ;;  %v1627_v61 = vadd.f32 %v1625_v55, %v1622_v56  ;;  %v1634_v47 = vmul.f32 %v1633_v29, %v4630_v54  ;;  %v1635_v19 = vmul.f32 %v1633_v29, %v4632_v2 }
 0x194   :  { %v1608_v26 = vadd.f32 %v1606_v9, %v1603_v28  ;;  %v1609_v27 = vadd.f32 %v1607_v62, %v1604_v49  ;;  %v1639_v14 = vmul.f32 %v1638_v60, %v4684_v10  ;;  %v1640_v50 = vmul.f32 %v1638_v60, %v4686_v63 }
 0x195   :  { %v1631_v51 = vadd.f32 %v1629_v57, %v1626_v59  ;;  %v1632_v15 = vadd.f32 %v1630_v58, %v1627_v61  ;;  %v1643_v22 = vstv %s4846_s12  ;;  %v1648_v25 = vstv %s4848_s0  ;;  %s4988_s12 = sld [smem:[#allocation12 + $0x28]]  ;;  %s4990_s0 = sld [smem:[#allocation12 + $0x29]] }
 0x196   :  { %v1611_v43 = vadd.f32 %v1610_v44, %v1608_v26  ;;  %v1612_v38 = vadd.f32 %v1610_v44, %v1609_v27  ;;  %v1644_v39 = vmul.f32 %v1643_v22, %v4734_v30  ;;  %v1645_v23 = vmul.f32 %v1643_v22, %v4736_v31 }
 0x197   :  { %v1636_v41 = vadd.f32 %v1634_v47, %v1631_v51  ;;  %v1637_v42 = vadd.f32 %v1635_v19, %v1632_v15  ;;  %v1649_v40 = vmul.f32 %v1648_v25, %v4788_v1  ;;  %v1650_v46 = vmul.f32 %v1648_v25, %v4790_v52 }
 0x198   :  { %v4892_v53 = vmax.f32 %v1611_v43, 0.0  ;;  %v4894_v9 = vmax.f32 %v1612_v38, 0.0  ;;  %v1653_v62 = vstv %s4860_s1  ;;  %v1658_v44 = vstv %s4862_s3  ;;  %s5002_s1 = sld [smem:[#allocation12 + $0x2a]]  ;;  %s5004_s3 = sld [smem:[#allocation12 + $0x2b]] }
 0x199   :  { %v1641_v4 = vadd.f32 %v1639_v14, %v1636_v41  ;;  %v1642_v5 = vadd.f32 %v1640_v50, %v1637_v42  ;;  %v1654_v13 = vmul.f32 %v1653_v62, %v4838_v24  ;;  %v1655_v8 = vmul.f32 %v1653_v62, %v4840_v35 }
 0x19a   :  { %v1663_v7 = vstv %s4866_s29  ;;  %v1666_v17 = vstv %s4868_s30  ;;  %v1671_v34 = vstv %s4872_s14  ;;  %v1676_v3 = vstv %s4874_s15  ;;  %s5014_s29 = sld [smem:[#allocation12 + $0x2c]]  ;;  %s5022_s14 = sld [smem:[#allocation12 + $0x2d]] }
 0x19b   :  { %v1646_v36 = vadd.f32 %v1644_v39, %v1641_v4  ;;  %v1647_v37 = vadd.f32 %v1645_v23, %v1642_v5  ;;  %v1664_v12 = vmul.f32 %v1663_v7, %v4422_v11  ;;  %v1665_v18 = vmul.f32 %v1663_v7, %v4424_v16  ;;  %s5016_s30 = sld [smem:[#allocation13 + $0x4]]  ;;  %s5024_s15 = sld [smem:[#allocation12 + $0x2e]] }
 0x19c   :  { %v1667_v48 = vmul.f32 %v1666_v17, %v4476_v20  ;;  %v1668_v55 = vmul.f32 %v1666_v17, %v4478_v21  ;;  %v1672_v6 = vmul.f32 %v1671_v34, %v4526_v32  ;;  %v1673_v56 = vmul.f32 %v1671_v34, %v4528_v33 }
 0x19d   :  { %v1651_v57 = vadd.f32 %v1649_v40, %v1646_v36  ;;  %v1652_v58 = vadd.f32 %v1650_v46, %v1647_v37  ;;  %v1677_v28 = vmul.f32 %v1676_v3, %v4580_v45  ;;  %v1678_v49 = vmul.f32 %v1676_v3, %v4582_v0 }
 0x19e   :  { %v1669_v29 = vadd.f32 %v1667_v48, %v1664_v12  ;;  %v1670_v60 = vadd.f32 %v1668_v55, %v1665_v18  ;;  %v1681_v59 = vstv %s4884_s16  ;;  %v1686_v61 = vstv %s4886_s2  ;;  %s5030_s16 = sld [smem:[#allocation12 + $0x2f]]  ;;  %s5032_s2 = sld [smem:[#allocation12 + $0x30]] }
 0x19f   :  { %v1656_v47 = vadd.f32 %v1654_v13, %v1651_v57  ;;  %v1657_v19 = vadd.f32 %v1655_v8, %v1652_v58  ;;  %v1682_v26 = vmul.f32 %v1681_v59, %v4630_v54  ;;  %v1683_v27 = vmul.f32 %v1681_v59, %v4632_v2 }
 0x1a0   :  { %v1674_v14 = vadd.f32 %v1672_v6, %v1669_v29  ;;  %v1675_v50 = vadd.f32 %v1673_v56, %v1670_v60  ;;  %v1687_v51 = vmul.f32 %v1686_v61, %v4684_v10  ;;  %v1688_v15 = vmul.f32 %v1686_v61, %v4686_v63 }
 0x1a1   :  { %v1659_v22 = vadd.f32 %v1658_v44, %v1656_v47  ;;  %v1660_v25 = vadd.f32 %v1658_v44, %v1657_v19  ;;  %v1691_v43 = vstv %s4898_s4  ;;  %v1696_v38 = vstv %s4900_s10  ;;  %s5040_s4 = sld [smem:[#allocation12 + $0x31]]  ;;  %s5042_s10 = sld [smem:[#allocation12 + $0x32]] }
 0x1a2   :  { %v1679_v39 = vadd.f32 %v1677_v28, %v1674_v14  ;;  %v1680_v23 = vadd.f32 %v1678_v49, %v1675_v50  ;;  %v1692_v41 = vmul.f32 %v1691_v43, %v4734_v30  ;;  %v1693_v42 = vmul.f32 %v1691_v43, %v4736_v31 }
 0x1a3   :  { %v4942_v40 = vmax.f32 %v1659_v22, 0.0  ;;  %v4944_v46 = vmax.f32 %v1660_v25, 0.0  ;;  %v1697_v62 = vmul.f32 %v1696_v38, %v4788_v1  ;;  %v1698_v44 = vmul.f32 %v1696_v38, %v4790_v52 }
 0x1a4   :  { %v1684_v4 = vadd.f32 %v1682_v26, %v1679_v39  ;;  %v1685_v5 = vadd.f32 %v1683_v27, %v1680_v23  ;;  %v1701_v13 = vstv %s4910_s5  ;;  %v1706_v8 = vstv %s4912_s7  ;;  %s5054_s5 = sld [smem:[#allocation12 + $0x33]]  ;;  %s5056_s7 = sld [smem:[#allocation12 + $0x34]] }
 0x1a5   :  { %v1702_v7 = vmul.f32 %v1701_v13, %v4838_v24  ;;  %v1703_v17 = vmul.f32 %v1701_v13, %v4840_v35  ;;  %v1711_v34 = vstv %s4918_s17  ;;  %v1714_v3 = vstv %s4920_s18  ;;  %s5068_s17 = sld [smem:[#allocation12 + $0x35]] }
 0x1a6   :  { %v1689_v36 = vadd.f32 %v1687_v51, %v1684_v4  ;;  %v1690_v37 = vadd.f32 %v1688_v15, %v1685_v5  ;;  %v1712_v12 = vmul.f32 %v1711_v34, %v4422_v11  ;;  %v1713_v18 = vmul.f32 %v1711_v34, %v4424_v16  ;;  %s5070_s18 = sld [smem:[#allocation13 + $0x5]] }
 0x1a7   :  { %v1715_v48 = vmul.f32 %v1714_v3, %v4476_v20  ;;  %v1716_v55 = vmul.f32 %v1714_v3, %v4478_v21  ;;  %v1719_v6 = vstv %s4926_s21  ;;  %v1724_v56 = vstv %s4928_s22  ;;  %s5074_s21 = sld [smem:[#allocation12 + $0x36]]  ;;  %s5076_s22 = sld [smem:[#allocation12 + $0x37]] }
 0x1a8   :  { %v1694_v57 = vadd.f32 %v1692_v41, %v1689_v36  ;;  %v1695_v58 = vadd.f32 %v1693_v42, %v1690_v37  ;;  %v1720_v28 = vmul.f32 %v1719_v6, %v4526_v32  ;;  %v1721_v49 = vmul.f32 %v1719_v6, %v4528_v33 }
 0x1a9   :  { %v1717_v29 = vadd.f32 %v1715_v48, %v1712_v12  ;;  %v1718_v60 = vadd.f32 %v1716_v55, %v1713_v18  ;;  %v1725_v59 = vmul.f32 %v1724_v56, %v4580_v45  ;;  %v1726_v61 = vmul.f32 %v1724_v56, %v4582_v0 }
 0x1aa   :  { %v1699_v47 = vadd.f32 %v1697_v62, %v1694_v57  ;;  %v1700_v19 = vadd.f32 %v1698_v44, %v1695_v58  ;;  %v1729_v26 = vstv %s4936_s23  ;;  %v1734_v27 = vstv %s4938_s24  ;;  %s5080_s23 = sld [smem:[#allocation12 + $0x38]]  ;;  %s5082_s24 = sld [smem:[#allocation12 + $0x39]] }
 0x1ab   :  { %v1722_v14 = vadd.f32 %v1720_v28, %v1717_v29  ;;  %v1723_v50 = vadd.f32 %v1721_v49, %v1718_v60  ;;  %v1730_v51 = vmul.f32 %v1729_v26, %v4630_v54  ;;  %v1731_v15 = vmul.f32 %v1729_v26, %v4632_v2 }
 0x1ac   :  { %v1704_v22 = vadd.f32 %v1702_v7, %v1699_v47  ;;  %v1705_v25 = vadd.f32 %v1703_v17, %v1700_v19  ;;  %v1735_v43 = vmul.f32 %v1734_v27, %v4684_v10  ;;  %v1736_v38 = vmul.f32 %v1734_v27, %v4686_v63 }
 0x1ad   :  { %v1727_v39 = vadd.f32 %v1725_v59, %v1722_v14  ;;  %v1728_v23 = vadd.f32 %v1726_v61, %v1723_v50  ;;  %v1739_v41 = vstv %s4950_s6  ;;  %v1744_v42 = vstv %s4952_s8  ;;  %s5092_s6 = sld [smem:[#allocation12 + $0x3a]]  ;;  %s5094_s8 = sld [smem:[#allocation12 + $0x3b]] }
 0x1ae   :  { %v1707_v62 = vadd.f32 %v1706_v8, %v1704_v22  ;;  %v1708_v44 = vadd.f32 %v1706_v8, %v1705_v25  ;;  %v1740_v4 = vmul.f32 %v1739_v41, %v4734_v30  ;;  %v1741_v5 = vmul.f32 %v1739_v41, %v4736_v31 }
 0x1af   :  { %v1732_v13 = vadd.f32 %v1730_v51, %v1727_v39  ;;  %v1733_v7 = vadd.f32 %v1731_v15, %v1728_v23  ;;  %v1745_v17 = vmul.f32 %v1744_v42, %v4788_v1  ;;  %v1746_v34 = vmul.f32 %v1744_v42, %v4790_v52 }
 0x1b0   :  { %v4996_v3 = vmax.f32 %v1707_v62, 0.0  ;;  %v4998_v36 = vmax.f32 %v1708_v44, 0.0  ;;  %v1749_v37 = vstv %s4964_s9  ;;  %v1754_v8 = vstv %s4966_s11  ;;  %s5106_s9 = sld [smem:[#allocation12 + $0x3c]]  ;;  %s5108_s11 = sld [smem:[#allocation12 + $0x3d]] }
 0x1b1   :  { %v1737_v12 = vadd.f32 %v1735_v43, %v1732_v13  ;;  %v1738_v18 = vadd.f32 %v1736_v38, %v1733_v7  ;;  %v1750_v48 = vmul.f32 %v1749_v37, %v4838_v24  ;;  %v1751_v55 = vmul.f32 %v1749_v37, %v4840_v35 }
 0x1b2   :  { %v1759_v6 = vstv %s4970_s25  ;;  %v1762_v56 = vstv %s4972_s26  ;;  %v1767_v57 = vstv %s4976_s27  ;;  %v1772_v58 = vstv %s4978_s28  ;;  %s5118_s25 = sld [smem:[#allocation12 + $0x3e]]  ;;  %s5126_s27 = sld [smem:[#allocation12 + $0x3f]] }
 0x1b3   :  { %v1742_v28 = vadd.f32 %v1740_v4, %v1737_v12  ;;  %v1743_v49 = vadd.f32 %v1741_v5, %v1738_v18  ;;  %v1760_v29 = vmul.f32 %v1759_v6, %v4422_v11  ;;  %v1761_v60 = vmul.f32 %v1759_v6, %v4424_v16  ;;  %s5120_s26 = sld [smem:[#allocation13 + $0x6]]  ;;  %s5128_s28 = sld [smem:[#allocation12 + $0x40]] }
 0x1b4   :  { %v1763_v59 = vmul.f32 %v1762_v56, %v4476_v20  ;;  %v1764_v61 = vmul.f32 %v1762_v56, %v4478_v21  ;;  %v1768_v47 = vmul.f32 %v1767_v57, %v4526_v32  ;;  %v1769_v19 = vmul.f32 %v1767_v57, %v4528_v33 }
 0x1b5   :  { %v1747_v26 = vadd.f32 %v1745_v17, %v1742_v28  ;;  %v1748_v27 = vadd.f32 %v1746_v34, %v1743_v49  ;;  %v1773_v14 = vmul.f32 %v1772_v58, %v4580_v45  ;;  %v1774_v50 = vmul.f32 %v1772_v58, %v4582_v0 }
 0x1b6   :  { %v1765_v51 = vadd.f32 %v1763_v59, %v1760_v29  ;;  %v1766_v15 = vadd.f32 %v1764_v61, %v1761_v60  ;;  %v1777_v22 = vstv %s4988_s12  ;;  %v1782_v25 = vstv %s4990_s0  ;;  %s5134_s12 = sld [smem:[#allocation12 + $0x41]]  ;;  %s5136_s0 = sld [smem:[#allocation12 + $0x42]] }
 0x1b7   :  { %v1752_v43 = vadd.f32 %v1750_v48, %v1747_v26  ;;  %v1753_v38 = vadd.f32 %v1751_v55, %v1748_v27  ;;  %v1778_v39 = vmul.f32 %v1777_v22, %v4630_v54  ;;  %v1779_v23 = vmul.f32 %v1777_v22, %v4632_v2 }
 0x1b8   :  { %v1770_v41 = vadd.f32 %v1768_v47, %v1765_v51  ;;  %v1771_v42 = vadd.f32 %v1769_v19, %v1766_v15  ;;  %v1783_v62 = vmul.f32 %v1782_v25, %v4684_v10  ;;  %v1784_v44 = vmul.f32 %v1782_v25, %v4686_v63 }
 0x1b9   :  { %v1755_v4 = vadd.f32 %v1754_v8, %v1752_v43  ;;  %v1756_v5 = vadd.f32 %v1754_v8, %v1753_v38  ;;  %v1787_v13 = vstv %s5002_s1  ;;  %v1792_v7 = vstv %s5004_s3  ;;  %s5144_s1 = sld [smem:[#allocation12 + $0x43]]  ;;  %s5146_s3 = sld [smem:[#allocation12 + $0x44]] }
 0x1ba   :  { %v1775_v17 = vadd.f32 %v1773_v14, %v1770_v41  ;;  %v1776_v34 = vadd.f32 %v1774_v50, %v1771_v42  ;;  %v1788_v37 = vmul.f32 %v1787_v13, %v4734_v30  ;;  %v1789_v12 = vmul.f32 %v1787_v13, %v4736_v31 }
 0x1bb   :  { %v5046_v18 = vmax.f32 %v1755_v4, 0.0  ;;  %v5048_v48 = vmax.f32 %v1756_v5, 0.0  ;;  %v1793_v8 = vmul.f32 %v1792_v7, %v4788_v1  ;;  %v1794_v55 = vmul.f32 %v1792_v7, %v4790_v52 }
 0x1bc   :  { %v1780_v6 = vadd.f32 %v1778_v39, %v1775_v17  ;;  %v1781_v56 = vadd.f32 %v1779_v23, %v1776_v34  ;;  %v1797_v57 = vstv %s5014_s29  ;;  %v1802_v58 = vstv %s5016_s30  ;;  %s5158_s29 = sld [smem:[#allocation12 + $0x45]]  ;;  %s5160_s30 = sld [smem:[#allocation12 + $0x46]] }
 0x1bd   :  { %v1798_v28 = vmul.f32 %v1797_v57, %v4838_v24  ;;  %v1799_v49 = vmul.f32 %v1797_v57, %v4840_v35  ;;  %v1807_v29 = vstv %s5022_s14  ;;  %v1810_v60 = vstv %s5024_s15  ;;  %s5172_s14 = sld [smem:[#allocation12 + $0x47]] }
 0x1be   :  { %v1785_v59 = vadd.f32 %v1783_v62, %v1780_v6  ;;  %v1786_v61 = vadd.f32 %v1784_v44, %v1781_v56  ;;  %v1808_v47 = vmul.f32 %v1807_v29, %v4422_v11  ;;  %v1809_v19 = vmul.f32 %v1807_v29, %v4424_v16  ;;  %s5174_s15 = sld [smem:[#allocation13 + $0x7]] }
 0x1bf   :  { %v1811_v26 = vmul.f32 %v1810_v60, %v4476_v20  ;;  %v1812_v27 = vmul.f32 %v1810_v60, %v4478_v21  ;;  %v1815_v14 = vstv %s5030_s16  ;;  %v1820_v50 = vstv %s5032_s2  ;;  %s5178_s16 = sld [smem:[#allocation12 + $0x48]]  ;;  %s5180_s2 = sld [smem:[#allocation12 + $0x49]] }
 0x1c0   :  { %v1790_v51 = vadd.f32 %v1788_v37, %v1785_v59  ;;  %v1791_v15 = vadd.f32 %v1789_v12, %v1786_v61  ;;  %v1816_v22 = vmul.f32 %v1815_v14, %v4526_v32  ;;  %v1817_v25 = vmul.f32 %v1815_v14, %v4528_v33 }
 0x1c1   :  { %v1813_v43 = vadd.f32 %v1811_v26, %v1808_v47  ;;  %v1814_v38 = vadd.f32 %v1812_v27, %v1809_v19  ;;  %v1821_v39 = vmul.f32 %v1820_v50, %v4580_v45  ;;  %v1822_v23 = vmul.f32 %v1820_v50, %v4582_v0 }
 0x1c2   :  { %v1795_v41 = vadd.f32 %v1793_v8, %v1790_v51  ;;  %v1796_v42 = vadd.f32 %v1794_v55, %v1791_v15  ;;  %v1825_v62 = vstv %s5040_s4  ;;  %v1830_v44 = vstv %s5042_s10  ;;  %s5184_s4 = sld [smem:[#allocation12 + $0x4a]]  ;;  %s5186_s10 = sld [smem:[#allocation12 + $0x4b]] }
 0x1c3   :  { %v1818_v4 = vadd.f32 %v1816_v22, %v1813_v43  ;;  %v1819_v5 = vadd.f32 %v1817_v25, %v1814_v38  ;;  %v1826_v13 = vmul.f32 %v1825_v62, %v4630_v54  ;;  %v1827_v7 = vmul.f32 %v1825_v62, %v4632_v2 }
 0x1c4   :  { %v1800_v17 = vadd.f32 %v1798_v28, %v1795_v41  ;;  %v1801_v34 = vadd.f32 %v1799_v49, %v1796_v42  ;;  %v1831_v37 = vmul.f32 %v1830_v44, %v4684_v10  ;;  %v1832_v12 = vmul.f32 %v1830_v44, %v4686_v63 }
 0x1c5   :  { %v1823_v6 = vadd.f32 %v1821_v39, %v1818_v4  ;;  %v1824_v56 = vadd.f32 %v1822_v23, %v1819_v5  ;;  %v1835_v8 = vstv %s5054_s5  ;;  %v1840_v55 = vstv %s5056_s7  ;;  %s5196_s5 = sld [smem:[#allocation12 + $0x4c]]  ;;  %s5198_s7 = sld [smem:[#allocation12 + $0x4d]] }
 0x1c6   :  { %v1803_v57 = vadd.f32 %v1802_v58, %v1800_v17  ;;  %v1804_v29 = vadd.f32 %v1802_v58, %v1801_v34  ;;  %v1836_v60 = vmul.f32 %v1835_v8, %v4734_v30  ;;  %v1837_v28 = vmul.f32 %v1835_v8, %v4736_v31 }
 0x1c7   :  { %v1828_v49 = vadd.f32 %v1826_v13, %v1823_v6  ;;  %v1829_v59 = vadd.f32 %v1827_v7, %v1824_v56  ;;  %v1841_v61 = vmul.f32 %v1840_v55, %v4788_v1  ;;  %v1842_v47 = vmul.f32 %v1840_v55, %v4790_v52 }
 0x1c8   :  { %v5100_v19 = vmax.f32 %v1803_v57, 0.0  ;;  %v5102_v26 = vmax.f32 %v1804_v29, 0.0  ;;  %v1845_v27 = vstv %s5068_s17  ;;  %v1850_v58 = vstv %s5070_s18  ;;  %s5210_s17 = sld [smem:[#allocation12 + $0x4e]]  ;;  %s5212_s18 = sld [smem:[#allocation12 + $0x4f]] }
 0x1c9   :  { %v1833_v14 = vadd.f32 %v1831_v37, %v1828_v49  ;;  %v1834_v50 = vadd.f32 %v1832_v12, %v1829_v59  ;;  %v1846_v51 = vmul.f32 %v1845_v27, %v4838_v24  ;;  %v1847_v15 = vmul.f32 %v1845_v27, %v4840_v35 }
 0x1ca   :  { %v1855_v22 = vstv %s5074_s21  ;;  %v1858_v25 = vstv %s5076_s22  ;;  %v1863_v43 = vstv %s5080_s23  ;;  %v1868_v38 = vstv %s5082_s24  ;;  %s5222_s21 = sld [smem:[#allocation12 + $0x50]]  ;;  %s5232_s24 = sld [smem:[#allocation15 + $0x1]] }
 0x1cb   :  { %v1838_v39 = vadd.f32 %v1836_v60, %v1833_v14  ;;  %v1839_v23 = vadd.f32 %v1837_v28, %v1834_v50  ;;  %v1856_v41 = vmul.f32 %v1855_v22, %v4422_v11  ;;  %v1857_v42 = vmul.f32 %v1855_v22, %v4424_v16  ;;  %s5224_s22 = sld [smem:[#allocation13 + $0x8]] }
 0x1cc   :  { %v1859_v62 = vmul.f32 %v1858_v25, %v4476_v20  ;;  %v1860_v44 = vmul.f32 %v1858_v25, %v4478_v21  ;;  %v1864_v4 = vmul.f32 %v1863_v43, %v4526_v32  ;;  %v1865_v5 = vmul.f32 %v1863_v43, %v4528_v33  ;;  %s5230_s23 = sld [smem:[#allocation15]] }
 0x1cd   :  { %v1843_v13 = vadd.f32 %v1841_v61, %v1838_v39  ;;  %v1844_v7 = vadd.f32 %v1842_v47, %v1839_v23  ;;  %v1869_v17 = vmul.f32 %v1868_v38, %v4580_v45  ;;  %v1870_v34 = vmul.f32 %v1868_v38, %v4582_v0 }
 0x1ce   :  { %v1861_v37 = vadd.f32 %v1859_v62, %v1856_v41  ;;  %v1862_v12 = vadd.f32 %v1860_v44, %v1857_v42  ;;  %v1873_v6 = vstv %s5092_s6  ;;  %v1878_v56 = vstv %s5094_s8  ;;  %s5238_s6 = sld [smem:[#allocation15 + $0x2]]  ;;  %s5240_s8 = sld [smem:[#allocation15 + $0x3]] }
 0x1cf   :  { %v1848_v8 = vadd.f32 %v1846_v51, %v1843_v13  ;;  %v1849_v55 = vadd.f32 %v1847_v15, %v1844_v7  ;;  %v1874_v57 = vmul.f32 %v1873_v6, %v4630_v54  ;;  %v1875_v29 = vmul.f32 %v1873_v6, %v4632_v2 }
 0x1d0   :  { %v1866_v60 = vadd.f32 %v1864_v4, %v1861_v37  ;;  %v1867_v28 = vadd.f32 %v1865_v5, %v1862_v12  ;;  %v1879_v49 = vmul.f32 %v1878_v56, %v4684_v10  ;;  %v1880_v59 = vmul.f32 %v1878_v56, %v4686_v63 }
 0x1d1   :  { %v1851_v61 = vadd.f32 %v1850_v58, %v1848_v8  ;;  %v1852_v47 = vadd.f32 %v1850_v58, %v1849_v55  ;;  %v1883_v27 = vstv %s5106_s9  ;;  %v1888_v14 = vstv %s5108_s11  ;;  %s5248_s9 = sld [smem:[#allocation15 + $0x4]]  ;;  %s5250_s11 = sld [smem:[#allocation15 + $0x5]] }
 0x1d2   :  { %v1871_v50 = vadd.f32 %v1869_v17, %v1866_v60  ;;  %v1872_v51 = vadd.f32 %v1870_v34, %v1867_v28  ;;  %v1884_v15 = vmul.f32 %v1883_v27, %v4734_v30  ;;  %v1885_v22 = vmul.f32 %v1883_v27, %v4736_v31 }
 0x1d3   :  { %v5150_v25 = vmax.f32 %v1851_v61, 0.0  ;;  %v5152_v43 = vmax.f32 %v1852_v47, 0.0  ;;  %v1889_v58 = vmul.f32 %v1888_v14, %v4788_v1  ;;  %v1890_v38 = vmul.f32 %v1888_v14, %v4790_v52 }
 0x1d4   :  { %v1876_v39 = vadd.f32 %v1874_v57, %v1871_v50  ;;  %v1877_v23 = vadd.f32 %v1875_v29, %v1872_v51  ;;  %v1893_v41 = vstv %s5118_s25  ;;  %v1898_v42 = vstv %s5120_s26  ;;  %s5262_s25 = sld [smem:[#allocation15 + $0x6]]  ;;  %s5264_s26 = sld [smem:[#allocation15 + $0x7]] }
 0x1d5   :  { %v1894_v62 = vmul.f32 %v1893_v41, %v4838_v24  ;;  %v1895_v44 = vmul.f32 %v1893_v41, %v4840_v35  ;;  %v1903_v4 = vstv %s5126_s27  ;;  %v1906_v5 = vstv %s5128_s28  ;;  %s5276_s27 = sld [smem:[#allocation15 + $0x8]] }
 0x1d6   :  { %v1881_v13 = vadd.f32 %v1879_v49, %v1876_v39  ;;  %v1882_v7 = vadd.f32 %v1880_v59, %v1877_v23  ;;  %v1904_v17 = vmul.f32 %v1903_v4, %v4422_v11  ;;  %v1905_v34 = vmul.f32 %v1903_v4, %v4424_v16  ;;  %s5278_s28 = sld [smem:[#allocation16]] }
 0x1d7   :  { %v1907_v37 = vmul.f32 %v1906_v5, %v4476_v20  ;;  %v1908_v12 = vmul.f32 %v1906_v5, %v4478_v21  ;;  %v1911_v6 = vstv %s5134_s12  ;;  %v1916_v56 = vstv %s5136_s0  ;;  %s5282_s12 = sld [smem:[#allocation15 + $0x9]]  ;;  %s5284_s0 = sld [smem:[#allocation15 + $0xa]] }
 0x1d8   :  { %v1886_v8 = vadd.f32 %v1884_v15, %v1881_v13  ;;  %v1887_v55 = vadd.f32 %v1885_v22, %v1882_v7  ;;  %v1912_v57 = vmul.f32 %v1911_v6, %v4526_v32  ;;  %v1913_v29 = vmul.f32 %v1911_v6, %v4528_v33 }
 0x1d9   :  { %v1909_v60 = vadd.f32 %v1907_v37, %v1904_v17  ;;  %v1910_v28 = vadd.f32 %v1908_v12, %v1905_v34  ;;  %v1917_v49 = vmul.f32 %v1916_v56, %v4580_v45  ;;  %v1918_v59 = vmul.f32 %v1916_v56, %v4582_v0 }
 0x1da   :  { %v1891_v61 = vadd.f32 %v1889_v58, %v1886_v8  ;;  %v1892_v47 = vadd.f32 %v1890_v38, %v1887_v55  ;;  %v1921_v27 = vstv %s5144_s1  ;;  %v1926_v14 = vstv %s5146_s3  ;;  %s5290_s1 = sld [smem:[#allocation15 + $0xb]]  ;;  %s5292_s3 = sld [smem:[#allocation15 + $0xc]] }
 0x1db   :  { %v1914_v50 = vadd.f32 %v1912_v57, %v1909_v60  ;;  %v1915_v51 = vadd.f32 %v1913_v29, %v1910_v28  ;;  %v1922_v15 = vmul.f32 %v1921_v27, %v4630_v54  ;;  %v1923_v22 = vmul.f32 %v1921_v27, %v4632_v2 }
 0x1dc   :  { %v1896_v39 = vadd.f32 %v1894_v62, %v1891_v61  ;;  %v1897_v23 = vadd.f32 %v1895_v44, %v1892_v47  ;;  %v1927_v41 = vmul.f32 %v1926_v14, %v4684_v10  ;;  %v1928_v4 = vmul.f32 %v1926_v14, %v4686_v63 }
 0x1dd   :  { %v1919_v5 = vadd.f32 %v1917_v49, %v1914_v50  ;;  %v1920_v13 = vadd.f32 %v1918_v59, %v1915_v51  ;;  %v1931_v58 = vstv %s5158_s29  ;;  %v1936_v38 = vstv %s5160_s30  ;;  %s5296_s29 = sld [smem:[#allocation15 + $0xd]]  ;;  %s5298_s30 = sld [smem:[#allocation15 + $0xe]] }
 0x1de   :  { %v1899_v7 = vadd.f32 %v1898_v42, %v1896_v39  ;;  %v1900_v17 = vadd.f32 %v1898_v42, %v1897_v23  ;;  %v1932_v34 = vmul.f32 %v1931_v58, %v4734_v30  ;;  %v1933_v62 = vmul.f32 %v1931_v58, %v4736_v31 }
 0x1df   :  { %v1924_v44 = vadd.f32 %v1922_v15, %v1919_v5  ;;  %v1925_v37 = vadd.f32 %v1923_v22, %v1920_v13  ;;  %v1937_v12 = vmul.f32 %v1936_v38, %v4788_v1  ;;  %v1938_v6 = vmul.f32 %v1936_v38, %v4790_v52 }
 0x1e0   :  { %v5204_v56 = vmax.f32 %v1899_v7, 0.0  ;;  %v5206_v8 = vmax.f32 %v1900_v17, 0.0  ;;  %v1941_v55 = vstv %s5172_s14  ;;  %v1946_v42 = vstv %s5174_s15  ;;  %s5314_s14 = sld [smem:[#allocation15 + $0xf]]  ;;  %s5316_s15 = sld [smem:[#allocation15 + $0x10]] }
 0x1e1   :  { %v1929_v57 = vadd.f32 %v1927_v41, %v1924_v44  ;;  %v1930_v29 = vadd.f32 %v1928_v4, %v1925_v37  ;;  %v1942_v60 = vmul.f32 %v1941_v55, %v4838_v24  ;;  %v1943_v28 = vmul.f32 %v1941_v55, %v4840_v35 }
 0x1e2   :  { %v1951_v49 = vstv %s5178_s16  ;;  %v1954_v59 = vstv %s5180_s2  ;;  %v1959_v61 = vstv %s5184_s4  ;;  %v1964_v47 = vstv %s5186_s10  ;;  %s5326_s16 = sld [smem:[#allocation15 + $0x11]]  ;;  %s5334_s4 = sld [smem:[#allocation15 + $0x12]] }
 0x1e3   :  { %v1934_v27 = vadd.f32 %v1932_v34, %v1929_v57  ;;  %v1935_v14 = vadd.f32 %v1933_v62, %v1930_v29  ;;  %v1952_v50 = vmul.f32 %v1951_v49, %v4422_v11  ;;  %v1953_v51 = vmul.f32 %v1951_v49, %v4424_v16  ;;  %s5328_s2 = sld [smem:[#allocation16 + $0x1]]  ;;  %s5336_s10 = sld [smem:[#allocation15 + $0x13]] }
 0x1e4   :  { %v1955_v15 = vmul.f32 %v1954_v59, %v4476_v20  ;;  %v1956_v22 = vmul.f32 %v1954_v59, %v4478_v21  ;;  %v1960_v39 = vmul.f32 %v1959_v61, %v4526_v32  ;;  %v1961_v23 = vmul.f32 %v1959_v61, %v4528_v33 }
 0x1e5   :  { %v1939_v11 = vadd.f32 %v1937_v12, %v1934_v27  ;;  %v1940_v41 = vadd.f32 %v1938_v6, %v1935_v14  ;;  %v1965_v16 = vmul.f32 %v1964_v47, %v4580_v45  ;;  %v1966_v4 = vmul.f32 %v1964_v47, %v4582_v0 }
 0x1e6   :  { %v1957_v5 = vadd.f32 %v1955_v15, %v1952_v50  ;;  %v1958_v13 = vadd.f32 %v1956_v22, %v1953_v51  ;;  %v1969_v20 = vstv %s5196_s5  ;;  %v1974_v21 = vstv %s5198_s7  ;;  %s5342_s5 = sld [smem:[#allocation15 + $0x14]]  ;;  %s5344_s7 = sld [smem:[#allocation15 + $0x15]] }
 0x1e7   :  { %v1944_v32 = vadd.f32 %v1942_v60, %v1939_v11  ;;  %v1945_v33 = vadd.f32 %v1943_v28, %v1940_v41  ;;  %v1970_v58 = vmul.f32 %v1969_v20, %v4630_v54  ;;  %v1971_v38 = vmul.f32 %v1969_v20, %v4632_v2 }
 0x1e8   :  { %v1962_v7 = vadd.f32 %v1960_v39, %v1957_v5  ;;  %v1963_v45 = vadd.f32 %v1961_v23, %v1958_v13  ;;  %v1975_v0 = vmul.f32 %v1974_v21, %v4684_v10  ;;  %v1976_v17 = vmul.f32 %v1974_v21, %v4686_v63 }
 0x1e9   :  { %v1947_v34 = vadd.f32 %v1946_v42, %v1944_v32  ;;  %v1948_v62 = vadd.f32 %v1946_v42, %v1945_v33  ;;  %v1979_v44 = vstv %s5210_s17  ;;  %v1984_v37 = vstv %s5212_s18  ;;  %s5352_s17 = sld [smem:[#allocation15 + $0x16]]  ;;  %s5354_s18 = sld [smem:[#allocation15 + $0x17]] }
 0x1ea   :  { %v1967_v12 = vadd.f32 %v1965_v16, %v1962_v7  ;;  %v1968_v54 = vadd.f32 %v1966_v4, %v1963_v45  ;;  %v1980_v2 = vmul.f32 %v1979_v44, %v4734_v30  ;;  %v1981_v10 = vmul.f32 %v1979_v44, %v4736_v31 }
 0x1eb   :  { %v5254_v6 = vmax.f32 %v1947_v34, 0.0  ;;  %v5256_v63 = vmax.f32 %v1948_v62, 0.0  ;;  %v1985_v55 = vmul.f32 %v1984_v37, %v4788_v1  ;;  %v1986_v42 = vmul.f32 %v1984_v37, %v4790_v52 }
 0x1ec   :  { %v1972_v57 = vadd.f32 %v1970_v58, %v1967_v12  ;;  %v1973_v29 = vadd.f32 %v1971_v38, %v1968_v54  ;;  %v1989_v60 = vstv %s5222_s21  ;;  %v1994_v28 = vstv %s5224_s22  ;;  %s5366_s21 = sld [smem:[#allocation15 + $0x18]]  ;;  %s5368_s22 = sld [smem:[#allocation15 + $0x19]] }
 0x1ed   :  { %v1990_v30 = vmul.f32 %v1989_v60, %v4838_v24  ;;  %v1991_v31 = vmul.f32 %v1989_v60, %v4840_v35  ;;  %v1999_v49 = vstv %s5230_s23  ;;  %v2002_v59 = vstv %s5232_s24  ;;  %s5380_s23 = sld [smem:[#allocation15 + $0x1a]] }
 0x1ee   :  { %v1977_v61 = vadd.f32 %v1975_v0, %v1972_v57  ;;  %v1978_v1 = vadd.f32 %v1976_v17, %v1973_v29  ;;  %v2000_v52 = vmul.f32 %v1999_v49, %v4892_v53  ;;  %v2001_v47 = vmul.f32 %v1999_v49, %v4894_v9  ;;  %s5382_s24 = sld [smem:[#allocation16 + $0x2]] }
 0x1ef   :  { %v2003_v27 = vmul.f32 %v2002_v59, %v4942_v40  ;;  %v2004_v14 = vmul.f32 %v2002_v59, %v4944_v46  ;;  %v2007_v50 = vstv %s5238_s6  ;;  %v2012_v51 = vstv %s5240_s8  ;;  %s5386_s6 = sld [smem:[#allocation15 + $0x1b]]  ;;  %s5388_s8 = sld [smem:[#allocation15 + $0x1c]] }
 0x1f0   :  { %v1982_v24 = vadd.f32 %v1980_v2, %v1977_v61  ;;  %v1983_v35 = vadd.f32 %v1981_v10, %v1978_v1  ;;  %v2008_v15 = vmul.f32 %v2007_v50, %v4996_v3  ;;  %v2009_v22 = vmul.f32 %v2007_v50, %v4998_v36 }
 0x1f1   :  { %v2005_v39 = vadd.f32 %v2003_v27, %v2000_v52  ;;  %v2006_v23 = vadd.f32 %v2004_v14, %v2001_v47  ;;  %v2013_v11 = vmul.f32 %v2012_v51, %v5046_v18  ;;  %v2014_v41 = vmul.f32 %v2012_v51, %v5048_v48 }
 0x1f2   :  { %v1987_v16 = vadd.f32 %v1985_v55, %v1982_v24  ;;  %v1988_v4 = vadd.f32 %v1986_v42, %v1983_v35  ;;  %v2017_v5 = vstv %s5248_s9  ;;  %v2022_v13 = vstv %s5250_s11  ;;  %s5392_s9 = sld [smem:[#allocation15 + $0x1d]]  ;;  %s5394_s11 = sld [smem:[#allocation15 + $0x1e]] }
 0x1f3   :  { %v2010_v20 = vadd.f32 %v2008_v15, %v2005_v39  ;;  %v2011_v21 = vadd.f32 %v2009_v22, %v2006_v23  ;;  %v2018_v32 = vmul.f32 %v2017_v5, %v5100_v19  ;;  %v2019_v33 = vmul.f32 %v2017_v5, %v5102_v26 }
 0x1f4   :  { %v1992_v58 = vadd.f32 %v1990_v30, %v1987_v16  ;;  %v1993_v38 = vadd.f32 %v1991_v31, %v1988_v4  ;;  %v2023_v7 = vmul.f32 %v2022_v13, %v5150_v25  ;;  %v2024_v45 = vmul.f32 %v2022_v13, %v5152_v43 }
 0x1f5   :  { %v2015_v0 = vadd.f32 %v2013_v11, %v2010_v20  ;;  %v2016_v17 = vadd.f32 %v2014_v41, %v2011_v21  ;;  %v2027_v34 = vstv %s5262_s25  ;;  %v2032_v62 = vstv %s5264_s26  ;;  %s5404_s25 = sld [smem:[#allocation15 + $0x1f]]  ;;  %s5406_s26 = sld [smem:[#allocation15 + $0x20]] }
 0x1f6   :  { %v1995_v44 = vadd.f32 %v1994_v28, %v1992_v58  ;;  %v1996_v37 = vadd.f32 %v1994_v28, %v1993_v38  ;;  %v2028_v12 = vmul.f32 %v2027_v34, %v5204_v56  ;;  %v2029_v54 = vmul.f32 %v2027_v34, %v5206_v8 }
 0x1f7   :  { %v2020_v2 = vadd.f32 %v2018_v32, %v2015_v0  ;;  %v2021_v10 = vadd.f32 %v2019_v33, %v2016_v17  ;;  %v2033_v55 = vmul.f32 %v2032_v62, %v5254_v6  ;;  %v2034_v42 = vmul.f32 %v2032_v62, %v5256_v63 }
 0x1f8   :  { %v5308_v57 = vmax.f32 %v1995_v44, 0.0  ;;  %v5310_v29 = vmax.f32 %v1996_v37, 0.0  ;;  %v2037_v60 = vstv %s5276_s27  ;;  %v2042_v30 = vstv %s5278_s28  ;;  %s5418_s27 = sld [smem:[#allocation15 + $0x21]]  ;;  %s5420_s28 = sld [smem:[#allocation15 + $0x22]] }
 0x1f9   :  { %v2025_v28 = vadd.f32 %v2023_v7, %v2020_v2  ;;  %v2026_v31 = vadd.f32 %v2024_v45, %v2021_v10  ;;  %v2047_v49 = vstv %s5282_s12  ;;  %v2050_v59 = vstv %s5284_s0  ;;  %s5430_s12 = sld [smem:[#allocation15 + $0x23]] }
 0x1fa   :  { %v2038_v61 = vmul.f32 %v2037_v60, %v5308_v57  ;;  %v2039_v1 = vmul.f32 %v2037_v60, %v5310_v29  ;;  %v2048_v52 = vmul.f32 %v2047_v49, %v4892_v53  ;;  %v2049_v47 = vmul.f32 %v2047_v49, %v4894_v9  ;;  %s5432_s0 = sld [smem:[#allocation16 + $0x3]] }
 0x1fb   :  { %v2030_v27 = vadd.f32 %v2028_v12, %v2025_v28  ;;  %v2031_v14 = vadd.f32 %v2029_v54, %v2026_v31  ;;  %v2051_v50 = vmul.f32 %v2050_v59, %v4942_v40  ;;  %v2052_v51 = vmul.f32 %v2050_v59, %v4944_v46 }
 0x1fc   :  { %v2055_v24 = vstv %s5290_s1  ;;  %v2060_v35 = vstv %s5292_s3  ;;  %v2065_v15 = vstv %s5296_s29  ;;  %v2070_v22 = vstv %s5298_s30  ;;  %s5438_s1 = sld [smem:[#allocation15 + $0x24]]  ;;  %s5440_s3 = sld [smem:[#allocation15 + $0x25]] }
 0x1fd   :  { %v2035_v39 = vadd.f32 %v2033_v55, %v2030_v27  ;;  %v2036_v23 = vadd.f32 %v2034_v42, %v2031_v14  ;;  %v2053_v11 = vadd.f32 %v2051_v50, %v2048_v52  ;;  %v2054_v41 = vadd.f32 %v2052_v51, %v2049_v47  ;;  %s5446_s29 = sld [smem:[#allocation15 + $0x26]]  ;;  %s5448_s30 = sld [smem:[#allocation15 + $0x27]] }
 0x1fe   :  { %v2056_v16 = vmul.f32 %v2055_v24, %v4996_v3  ;;  %v2057_v4 = vmul.f32 %v2055_v24, %v4998_v36  ;;  %v2061_v5 = vmul.f32 %v2060_v35, %v5046_v18  ;;  %v2062_v13 = vmul.f32 %v2060_v35, %v5048_v48 }
 0x1ff   :  { %v2040_v20 = vadd.f32 %v2038_v61, %v2035_v39  ;;  %v2041_v21 = vadd.f32 %v2039_v1, %v2036_v23  ;;  %v2066_v32 = vmul.f32 %v2065_v15, %v5100_v19  ;;  %v2067_v33 = vmul.f32 %v2065_v15, %v5102_v26 }
 0x200   :  { %v2058_v58 = vadd.f32 %v2056_v16, %v2053_v11  ;;  %v2059_v38 = vadd.f32 %v2057_v4, %v2054_v41  ;;  %v2071_v7 = vmul.f32 %v2070_v22, %v5150_v25  ;;  %v2072_v45 = vmul.f32 %v2070_v22, %v5152_v43 }
 0x201   :  { %v2043_v0 = vadd.f32 %v2042_v30, %v2040_v20  ;;  %v2044_v17 = vadd.f32 %v2042_v30, %v2041_v21  ;;  %v2075_v34 = vstv %s5314_s14  ;;  %v2080_v62 = vstv %s5316_s15  ;;  %s5456_s14 = sld [smem:[#allocation15 + $0x28]]  ;;  %s5458_s15 = sld [smem:[#allocation15 + $0x29]] }
 0x202   :  { %v2063_v44 = vadd.f32 %v2061_v5, %v2058_v58  ;;  %v2064_v37 = vadd.f32 %v2062_v13, %v2059_v38  ;;  %v2076_v12 = vmul.f32 %v2075_v34, %v5204_v56  ;;  %v2077_v54 = vmul.f32 %v2075_v34, %v5206_v8 }
 0x203   :  { %v5358_v2 = vmax.f32 %v2043_v0, 0.0  ;;  %v5360_v10 = vmax.f32 %v2044_v17, 0.0  ;;  %v2081_v55 = vmul.f32 %v2080_v62, %v5254_v6  ;;  %v2082_v42 = vmul.f32 %v2080_v62, %v5256_v63 }
 0x204   :  { %v2068_v60 = vadd.f32 %v2066_v32, %v2063_v44  ;;  %v2069_v30 = vadd.f32 %v2067_v33, %v2064_v37  ;;  %v2085_v28 = vstv %s5326_s16  ;;  %v2090_v31 = vstv %s5328_s2  ;;  %s5470_s16 = sld [smem:[#allocation15 + $0x2a]]  ;;  %s5472_s2 = sld [smem:[#allocation15 + $0x2b]] }
 0x205   :  { %v2086_v49 = vmul.f32 %v2085_v28, %v5308_v57  ;;  %v2087_v59 = vmul.f32 %v2085_v28, %v5310_v29  ;;  %v2095_v61 = vstv %s5334_s4  ;;  %v2098_v1 = vstv %s5336_s10  ;;  %s5484_s4 = sld [smem:[#allocation15 + $0x2c]] }
 0x206   :  { %v2073_v52 = vadd.f32 %v2071_v7, %v2068_v60  ;;  %v2074_v47 = vadd.f32 %v2072_v45, %v2069_v30  ;;  %v2096_v27 = vmul.f32 %v2095_v61, %v4892_v53  ;;  %v2097_v14 = vmul.f32 %v2095_v61, %v4894_v9  ;;  %s5486_s10 = sld [smem:[#allocation16 + $0x4]] }
 0x207   :  { %v2099_v50 = vmul.f32 %v2098_v1, %v4942_v40  ;;  %v2100_v51 = vmul.f32 %v2098_v1, %v4944_v46  ;;  %v2103_v24 = vstv %s5342_s5  ;;  %v2108_v35 = vstv %s5344_s7  ;;  %s5490_s5 = sld [smem:[#allocation15 + $0x2d]]  ;;  %s5492_s7 = sld [smem:[#allocation15 + $0x2e]] }
 0x208   :  { %v2078_v15 = vadd.f32 %v2076_v12, %v2073_v52  ;;  %v2079_v22 = vadd.f32 %v2077_v54, %v2074_v47  ;;  %v2104_v39 = vmul.f32 %v2103_v24, %v4996_v3  ;;  %v2105_v23 = vmul.f32 %v2103_v24, %v4998_v36 }
 0x209   :  { %v2101_v11 = vadd.f32 %v2099_v50, %v2096_v27  ;;  %v2102_v41 = vadd.f32 %v2100_v51, %v2097_v14  ;;  %v2109_v16 = vmul.f32 %v2108_v35, %v5046_v18  ;;  %v2110_v4 = vmul.f32 %v2108_v35, %v5048_v48 }
 0x20a   :  { %v2083_v5 = vadd.f32 %v2081_v55, %v2078_v15  ;;  %v2084_v13 = vadd.f32 %v2082_v42, %v2079_v22  ;;  %v2113_v20 = vstv %s5352_s17  ;;  %v2118_v21 = vstv %s5354_s18  ;;  %s5496_s17 = sld [smem:[#allocation15 + $0x2f]]  ;;  %s5498_s18 = sld [smem:[#allocation15 + $0x30]] }
 0x20b   :  { %v2106_v32 = vadd.f32 %v2104_v39, %v2101_v11  ;;  %v2107_v33 = vadd.f32 %v2105_v23, %v2102_v41  ;;  %v2114_v58 = vmul.f32 %v2113_v20, %v5100_v19  ;;  %v2115_v38 = vmul.f32 %v2113_v20, %v5102_v26 }
 0x20c   :  { %v2088_v7 = vadd.f32 %v2086_v49, %v2083_v5  ;;  %v2089_v45 = vadd.f32 %v2087_v59, %v2084_v13  ;;  %v2119_v0 = vmul.f32 %v2118_v21, %v5150_v25  ;;  %v2120_v17 = vmul.f32 %v2118_v21, %v5152_v43 }
 0x20d   :  { %v2111_v34 = vadd.f32 %v2109_v16, %v2106_v32  ;;  %v2112_v62 = vadd.f32 %v2110_v4, %v2107_v33  ;;  %v2123_v44 = vstv %s5366_s21  ;;  %v2128_v37 = vstv %s5368_s22  ;;  %s5508_s21 = sld [smem:[#allocation15 + $0x31]]  ;;  %s5510_s22 = sld [smem:[#allocation15 + $0x32]] }
 0x20e   :  { %v2091_v12 = vadd.f32 %v2090_v31, %v2088_v7  ;;  %v2092_v54 = vadd.f32 %v2090_v31, %v2089_v45  ;;  %v2124_v55 = vmul.f32 %v2123_v44, %v5204_v56  ;;  %v2125_v42 = vmul.f32 %v2123_v44, %v5206_v8 }
 0x20f   :  { %v2116_v60 = vadd.f32 %v2114_v58, %v2111_v34  ;;  %v2117_v30 = vadd.f32 %v2115_v38, %v2112_v62  ;;  %v2129_v28 = vmul.f32 %v2128_v37, %v5254_v6  ;;  %v2130_v49 = vmul.f32 %v2128_v37, %v5256_v63 }
 0x210   :  { %v5412_v59 = vmax.f32 %v2091_v12, 0.0  ;;  %v5414_v61 = vmax.f32 %v2092_v54, 0.0  ;;  %v2133_v1 = vstv %s5380_s23  ;;  %v2138_v31 = vstv %s5382_s24  ;;  %s5522_s23 = sld [smem:[#allocation15 + $0x33]]  ;;  %s5524_s24 = sld [smem:[#allocation15 + $0x34]] }
 0x211   :  { %v2121_v52 = vadd.f32 %v2119_v0, %v2116_v60  ;;  %v2122_v47 = vadd.f32 %v2120_v17, %v2117_v30  ;;  %v2134_v27 = vmul.f32 %v2133_v1, %v5308_v57  ;;  %v2135_v14 = vmul.f32 %v2133_v1, %v5310_v29 }
 0x212   :  { %v2143_v50 = vstv %s5386_s6  ;;  %v2146_v51 = vstv %s5388_s8  ;;  %v2151_v24 = vstv %s5392_s9  ;;  %v2156_v35 = vstv %s5394_s11  ;;  %s5534_s6 = sld [smem:[#allocation15 + $0x35]]  ;;  %s5542_s9 = sld [smem:[#allocation15 + $0x36]] }
 0x213   :  { %v2126_v15 = vadd.f32 %v2124_v55, %v2121_v52  ;;  %v2127_v22 = vadd.f32 %v2125_v42, %v2122_v47  ;;  %v2144_v39 = vmul.f32 %v2143_v50, %v4892_v53  ;;  %v2145_v23 = vmul.f32 %v2143_v50, %v4894_v9  ;;  %s5536_s8 = sld [smem:[#allocation16 + $0x5]]  ;;  %s5544_s11 = sld [smem:[#allocation15 + $0x37]] }
 0x214   :  { %v2147_v11 = vmul.f32 %v2146_v51, %v4942_v40  ;;  %v2148_v41 = vmul.f32 %v2146_v51, %v4944_v46  ;;  %v2152_v16 = vmul.f32 %v2151_v24, %v4996_v3  ;;  %v2153_v4 = vmul.f32 %v2151_v24, %v4998_v36 }
 0x215   :  { %v2131_v5 = vadd.f32 %v2129_v28, %v2126_v15  ;;  %v2132_v13 = vadd.f32 %v2130_v49, %v2127_v22  ;;  %v2157_v20 = vmul.f32 %v2156_v35, %v5046_v18  ;;  %v2158_v21 = vmul.f32 %v2156_v35, %v5048_v48 }
 0x216   :  { %v2149_v32 = vadd.f32 %v2147_v11, %v2144_v39  ;;  %v2150_v33 = vadd.f32 %v2148_v41, %v2145_v23  ;;  %v2161_v58 = vstv %s5404_s25  ;;  %v2166_v38 = vstv %s5406_s26  ;;  %s5550_s25 = sld [smem:[#allocation15 + $0x38]]  ;;  %s5552_s26 = sld [smem:[#allocation15 + $0x39]] }
 0x217   :  { %v2136_v7 = vadd.f32 %v2134_v27, %v2131_v5  ;;  %v2137_v45 = vadd.f32 %v2135_v14, %v2132_v13  ;;  %v2162_v0 = vmul.f32 %v2161_v58, %v5100_v19  ;;  %v2163_v17 = vmul.f32 %v2161_v58, %v5102_v26 }
 0x218   :  { %v2154_v34 = vadd.f32 %v2152_v16, %v2149_v32  ;;  %v2155_v62 = vadd.f32 %v2153_v4, %v2150_v33  ;;  %v2167_v44 = vmul.f32 %v2166_v38, %v5150_v25  ;;  %v2168_v37 = vmul.f32 %v2166_v38, %v5152_v43 }
 0x219   :  { %v2139_v12 = vadd.f32 %v2138_v31, %v2136_v7  ;;  %v2140_v54 = vadd.f32 %v2138_v31, %v2137_v45  ;;  %v2171_v55 = vstv %s5418_s27  ;;  %v2176_v42 = vstv %s5420_s28  ;;  %s5560_s27 = sld [smem:[#allocation15 + $0x3a]]  ;;  %s5562_s28 = sld [smem:[#allocation15 + $0x3b]] }
 0x21a   :  { %v2159_v60 = vadd.f32 %v2157_v20, %v2154_v34  ;;  %v2160_v30 = vadd.f32 %v2158_v21, %v2155_v62  ;;  %v2172_v28 = vmul.f32 %v2171_v55, %v5204_v56  ;;  %v2173_v49 = vmul.f32 %v2171_v55, %v5206_v8 }
 0x21b   :  { %v5462_v1 = vmax.f32 %v2139_v12, 0.0  ;;  %v5464_v52 = vmax.f32 %v2140_v54, 0.0  ;;  %v2177_v31 = vmul.f32 %v2176_v42, %v5254_v6  ;;  %v2178_v47 = vmul.f32 %v2176_v42, %v5256_v63 }
 0x21c   :  { %v2164_v27 = vadd.f32 %v2162_v0, %v2159_v60  ;;  %v2165_v14 = vadd.f32 %v2163_v17, %v2160_v30  ;;  %v2181_v50 = vstv %s5430_s12  ;;  %v2186_v51 = vstv %s5432_s0  ;;  %s5574_s12 = sld [smem:[#allocation15 + $0x3c]]  ;;  %s5576_s0 = sld [smem:[#allocation15 + $0x3d]] }
 0x21d   :  { %v2182_v24 = vmul.f32 %v2181_v50, %v5308_v57  ;;  %v2183_v35 = vmul.f32 %v2181_v50, %v5310_v29  ;;  %v2191_v15 = vstv %s5438_s1  ;;  %v2194_v22 = vstv %s5440_s3  ;;  %s5588_s1 = sld [smem:[#allocation15 + $0x3e]] }
 0x21e   :  { %v2169_v39 = vadd.f32 %v2167_v44, %v2164_v27  ;;  %v2170_v23 = vadd.f32 %v2168_v37, %v2165_v14  ;;  %v2192_v11 = vmul.f32 %v2191_v15, %v4892_v53  ;;  %v2193_v41 = vmul.f32 %v2191_v15, %v4894_v9  ;;  %s5590_s3 = sld [smem:[#allocation16 + $0x6]] }
 0x21f   :  { %v2195_v16 = vmul.f32 %v2194_v22, %v4942_v40  ;;  %v2196_v4 = vmul.f32 %v2194_v22, %v4944_v46  ;;  %v2199_v5 = vstv %s5446_s29  ;;  %v2204_v13 = vstv %s5448_s30  ;;  %s5594_s29 = sld [smem:[#allocation15 + $0x3f]]  ;;  %s5596_s30 = sld [smem:[#allocation15 + $0x40]] }
 0x220   :  { %v2174_v20 = vadd.f32 %v2172_v28, %v2169_v39  ;;  %v2175_v21 = vadd.f32 %v2173_v49, %v2170_v23  ;;  %v2200_v32 = vmul.f32 %v2199_v5, %v4996_v3  ;;  %v2201_v33 = vmul.f32 %v2199_v5, %v4998_v36 }
 0x221   :  { %v2197_v58 = vadd.f32 %v2195_v16, %v2192_v11  ;;  %v2198_v38 = vadd.f32 %v2196_v4, %v2193_v41  ;;  %v2205_v7 = vmul.f32 %v2204_v13, %v5046_v18  ;;  %v2206_v45 = vmul.f32 %v2204_v13, %v5048_v48 }
 0x222   :  { %v2179_v0 = vadd.f32 %v2177_v31, %v2174_v20  ;;  %v2180_v17 = vadd.f32 %v2178_v47, %v2175_v21  ;;  %v2209_v34 = vstv %s5456_s14  ;;  %v2214_v62 = vstv %s5458_s15  ;;  %s5600_s14 = sld [smem:[#allocation15 + $0x41]]  ;;  %s5602_s15 = sld [smem:[#allocation15 + $0x42]] }
 0x223   :  { %v2202_v44 = vadd.f32 %v2200_v32, %v2197_v58  ;;  %v2203_v37 = vadd.f32 %v2201_v33, %v2198_v38  ;;  %v2210_v12 = vmul.f32 %v2209_v34, %v5100_v19  ;;  %v2211_v54 = vmul.f32 %v2209_v34, %v5102_v26 }
 0x224   :  { %v2184_v55 = vadd.f32 %v2182_v24, %v2179_v0  ;;  %v2185_v42 = vadd.f32 %v2183_v35, %v2180_v17  ;;  %v2215_v60 = vmul.f32 %v2214_v62, %v5150_v25  ;;  %v2216_v30 = vmul.f32 %v2214_v62, %v5152_v43 }
 0x225   :  { %v2207_v28 = vadd.f32 %v2205_v7, %v2202_v44  ;;  %v2208_v49 = vadd.f32 %v2206_v45, %v2203_v37  ;;  %v2219_v31 = vstv %s5470_s16  ;;  %v2224_v47 = vstv %s5472_s2  ;;  %s5612_s16 = sld [smem:[#allocation15 + $0x43]]  ;;  %s5614_s2 = sld [smem:[#allocation15 + $0x44]] }
 0x226   :  { %v2187_v27 = vadd.f32 %v2186_v51, %v2184_v55  ;;  %v2188_v14 = vadd.f32 %v2186_v51, %v2185_v42  ;;  %v2220_v50 = vmul.f32 %v2219_v31, %v5204_v56  ;;  %v2221_v24 = vmul.f32 %v2219_v31, %v5206_v8 }
 0x227   :  { %v2212_v35 = vadd.f32 %v2210_v12, %v2207_v28  ;;  %v2213_v15 = vadd.f32 %v2211_v54, %v2208_v49  ;;  %v2225_v22 = vmul.f32 %v2224_v47, %v5254_v6  ;;  %v2226_v39 = vmul.f32 %v2224_v47, %v5256_v63 }
 0x228   :  { %v5516_v23 = vmax.f32 %v2187_v27, 0.0  ;;  %v5518_v11 = vmax.f32 %v2188_v14, 0.0  ;;  %v2229_v41 = vstv %s5484_s4  ;;  %v2234_v51 = vstv %s5486_s10  ;;  %s5626_s4 = sld [smem:[#allocation15 + $0x45]]  ;;  %s5628_s10 = sld [smem:[#allocation15 + $0x46]] }
 0x229   :  { %v2217_v16 = vadd.f32 %v2215_v60, %v2212_v35  ;;  %v2218_v4 = vadd.f32 %v2216_v30, %v2213_v15  ;;  %v2230_v5 = vmul.f32 %v2229_v41, %v5308_v57  ;;  %v2231_v13 = vmul.f32 %v2229_v41, %v5310_v29 }
 0x22a   :  { %v2239_v20 = vstv %s5490_s5  ;;  %v2242_v21 = vstv %s5492_s7  ;;  %v2247_v32 = vstv %s5496_s17  ;;  %v2252_v33 = vstv %s5498_s18  ;;  %s5638_s5 = sld [smem:[#allocation15 + $0x47]]  ;;  %s5646_s17 = sld [smem:[#allocation15 + $0x48]] }
 0x22b   :  { %v2222_v58 = vadd.f32 %v2220_v50, %v2217_v16  ;;  %v2223_v38 = vadd.f32 %v2221_v24, %v2218_v4  ;;  %v2240_v7 = vmul.f32 %v2239_v20, %v4892_v53  ;;  %v2241_v45 = vmul.f32 %v2239_v20, %v4894_v9  ;;  %s5640_s7 = sld [smem:[#allocation16 + $0x7]]  ;;  %s5648_s18 = sld [smem:[#allocation15 + $0x49]] }
 0x22c   :  { %v2243_v0 = vmul.f32 %v2242_v21, %v4942_v40  ;;  %v2244_v17 = vmul.f32 %v2242_v21, %v4944_v46  ;;  %v2248_v34 = vmul.f32 %v2247_v32, %v4996_v3  ;;  %v2249_v62 = vmul.f32 %v2247_v32, %v4998_v36 }
 0x22d   :  { %v2227_v44 = vadd.f32 %v2225_v22, %v2222_v58  ;;  %v2228_v37 = vadd.f32 %v2226_v39, %v2223_v38  ;;  %v2253_v12 = vmul.f32 %v2252_v33, %v5046_v18  ;;  %v2254_v54 = vmul.f32 %v2252_v33, %v5048_v48 }
 0x22e   :  { %v2245_v55 = vadd.f32 %v2243_v0, %v2240_v7  ;;  %v2246_v42 = vadd.f32 %v2244_v17, %v2241_v45  ;;  %v2257_v60 = vstv %s5508_s21  ;;  %v2262_v30 = vstv %s5510_s22  ;;  %s5654_s21 = sld [smem:[#allocation15 + $0x4a]]  ;;  %s5656_s22 = sld [smem:[#allocation15 + $0x4b]] }
 0x22f   :  { %v2232_v28 = vadd.f32 %v2230_v5, %v2227_v44  ;;  %v2233_v49 = vadd.f32 %v2231_v13, %v2228_v37  ;;  %v2258_v31 = vmul.f32 %v2257_v60, %v5100_v19  ;;  %v2259_v47 = vmul.f32 %v2257_v60, %v5102_v26 }
 0x230   :  { %v2250_v27 = vadd.f32 %v2248_v34, %v2245_v55  ;;  %v2251_v14 = vadd.f32 %v2249_v62, %v2246_v42  ;;  %v2263_v50 = vmul.f32 %v2262_v30, %v5150_v25  ;;  %v2264_v24 = vmul.f32 %v2262_v30, %v5152_v43 }
 0x231   :  { %v2235_v35 = vadd.f32 %v2234_v51, %v2232_v28  ;;  %v2236_v15 = vadd.f32 %v2234_v51, %v2233_v49  ;;  %v2267_v22 = vstv %s5522_s23  ;;  %v2272_v39 = vstv %s5524_s24  ;;  %s5664_s23 = sld [smem:[#allocation15 + $0x4c]]  ;;  %s5666_s24 = sld [smem:[#allocation15 + $0x4d]] }
 0x232   :  { %v2255_v41 = vadd.f32 %v2253_v12, %v2250_v27  ;;  %v2256_v16 = vadd.f32 %v2254_v54, %v2251_v14  ;;  %v2268_v4 = vmul.f32 %v2267_v22, %v5204_v56  ;;  %v2269_v5 = vmul.f32 %v2267_v22, %v5206_v8 }
 0x233   :  { %v5566_v13 = vmax.f32 %v2235_v35, 0.0  ;;  %v5568_v20 = vmax.f32 %v2236_v15, 0.0  ;;  %v2273_v51 = vmul.f32 %v2272_v39, %v5254_v6  ;;  %v2274_v21 = vmul.f32 %v2272_v39, %v5256_v63 }
 0x234   :  { %v2260_v32 = vadd.f32 %v2258_v31, %v2255_v41  ;;  %v2261_v33 = vadd.f32 %v2259_v47, %v2256_v16  ;;  %v2277_v58 = vstv %s5534_s6  ;;  %v2282_v38 = vstv %s5536_s8  ;;  %s5678_s6 = sld [smem:[#allocation15 + $0x4e]]  ;;  %s5680_s8 = sld [smem:[#allocation15 + $0x4f]] }
 0x235   :  { %v2278_v7 = vmul.f32 %v2277_v58, %v5308_v57  ;;  %v2279_v45 = vmul.f32 %v2277_v58, %v5310_v29  ;;  %v2287_v0 = vstv %s5542_s9  ;;  %v2290_v17 = vstv %s5544_s11  ;;  %s5692_s9 = sld [smem:[#allocation15 + $0x50]] }
 0x236   :  { %v2265_v34 = vadd.f32 %v2263_v50, %v2260_v32  ;;  %v2266_v62 = vadd.f32 %v2264_v24, %v2261_v33  ;;  %v2288_v44 = vmul.f32 %v2287_v0, %v4892_v53  ;;  %v2289_v37 = vmul.f32 %v2287_v0, %v4894_v9  ;;  %s5694_s11 = sld [smem:[#allocation16 + $0x8]] }
 0x237   :  { %v2291_v12 = vmul.f32 %v2290_v17, %v4942_v40  ;;  %v2292_v54 = vmul.f32 %v2290_v17, %v4944_v46  ;;  %v2295_v55 = vstv %s5550_s25  ;;  %v2300_v42 = vstv %s5552_s26  ;;  %s5698_s25 = sld [smem:[#allocation18]]  ;;  %s5700_s26 = sld [smem:[#allocation18 + $0x1]] }
 0x238   :  { %v2270_v60 = vadd.f32 %v2268_v4, %v2265_v34  ;;  %v2271_v30 = vadd.f32 %v2269_v5, %v2266_v62  ;;  %v2296_v28 = vmul.f32 %v2295_v55, %v4996_v3  ;;  %v2297_v49 = vmul.f32 %v2295_v55, %v4998_v36 }
 0x239   :  { %v2293_v31 = vadd.f32 %v2291_v12, %v2288_v44  ;;  %v2294_v47 = vadd.f32 %v2292_v54, %v2289_v37  ;;  %v2301_v27 = vmul.f32 %v2300_v42, %v5046_v18  ;;  %v2302_v14 = vmul.f32 %v2300_v42, %v5048_v48 }
 0x23a   :  { %v2275_v50 = vadd.f32 %v2273_v51, %v2270_v60  ;;  %v2276_v24 = vadd.f32 %v2274_v21, %v2271_v30  ;;  %v2305_v35 = vstv %s5560_s27  ;;  %v2310_v15 = vstv %s5562_s28  ;;  %s5704_s27 = sld [smem:[#allocation18 + $0x2]]  ;;  %s5706_s28 = sld [smem:[#allocation18 + $0x3]] }
 0x23b   :  { %v2298_v22 = vadd.f32 %v2296_v28, %v2293_v31  ;;  %v2299_v39 = vadd.f32 %v2297_v49, %v2294_v47  ;;  %v2306_v41 = vmul.f32 %v2305_v35, %v5100_v19  ;;  %v2307_v16 = vmul.f32 %v2305_v35, %v5102_v26 }
 0x23c   :  { %v2280_v4 = vadd.f32 %v2278_v7, %v2275_v50  ;;  %v2281_v5 = vadd.f32 %v2279_v45, %v2276_v24  ;;  %v2311_v32 = vmul.f32 %v2310_v15, %v5150_v25  ;;  %v2312_v33 = vmul.f32 %v2310_v15, %v5152_v43 }
 0x23d   :  { %v2303_v58 = vadd.f32 %v2301_v27, %v2298_v22  ;;  %v2304_v0 = vadd.f32 %v2302_v14, %v2299_v39  ;;  %v2315_v51 = vstv %s5574_s12  ;;  %v2320_v21 = vstv %s5576_s0  ;;  %s5716_s12 = sld [smem:[#allocation18 + $0x4]]  ;;  %s5718_s0 = sld [smem:[#allocation18 + $0x5]] }
 0x23e   :  { %v2283_v17 = vadd.f32 %v2282_v38, %v2280_v4  ;;  %v2284_v34 = vadd.f32 %v2282_v38, %v2281_v5  ;;  %v2316_v62 = vmul.f32 %v2315_v51, %v5204_v56  ;;  %v2317_v7 = vmul.f32 %v2315_v51, %v5206_v8 }
 0x23f   :  { %v2308_v45 = vadd.f32 %v2306_v41, %v2303_v58  ;;  %v2309_v44 = vadd.f32 %v2307_v16, %v2304_v0  ;;  %v2321_v37 = vmul.f32 %v2320_v21, %v5254_v6  ;;  %v2322_v12 = vmul.f32 %v2320_v21, %v5256_v63 }
 0x240   :  { %v5620_v54 = vmax.f32 %v2283_v17, 0.0  ;;  %v5622_v55 = vmax.f32 %v2284_v34, 0.0  ;;  %v2325_v42 = vstv %s5588_s1  ;;  %v2330_v38 = vstv %s5590_s3  ;;  %s5730_s1 = sld [smem:[#allocation18 + $0x6]]  ;;  %s5732_s3 = sld [smem:[#allocation18 + $0x7]] }
 0x241   :  { %v2313_v60 = vadd.f32 %v2311_v32, %v2308_v45  ;;  %v2314_v30 = vadd.f32 %v2312_v33, %v2309_v44  ;;  %v2326_v28 = vmul.f32 %v2325_v42, %v5308_v57  ;;  %v2327_v49 = vmul.f32 %v2325_v42, %v5310_v29 }
 0x242   :  { %v2335_v31 = vstv %s5594_s29  ;;  %v2338_v47 = vstv %s5596_s30  ;;  %v2343_v27 = vstv %s5600_s14  ;;  %v2348_v14 = vstv %s5602_s15  ;;  %s5742_s29 = sld [smem:[#allocation18 + $0x8]]  ;;  %s5750_s14 = sld [smem:[#allocation18 + $0x9]] }
 0x243   :  { %v2318_v50 = vadd.f32 %v2316_v62, %v2313_v60  ;;  %v2319_v24 = vadd.f32 %v2317_v7, %v2314_v30  ;;  %v2336_v35 = vmul.f32 %v2335_v31, %v4892_v53  ;;  %v2337_v15 = vmul.f32 %v2335_v31, %v4894_v9  ;;  %s5744_s30 = sld [smem:[#allocation19]]  ;;  %s5752_s15 = sld [smem:[#allocation18 + $0xa]] }
 0x244   :  { %v2339_v22 = vmul.f32 %v2338_v47, %v4942_v40  ;;  %v2340_v39 = vmul.f32 %v2338_v47, %v4944_v46  ;;  %v2344_v41 = vmul.f32 %v2343_v27, %v4996_v3  ;;  %v2345_v16 = vmul.f32 %v2343_v27, %v4998_v36 }
 0x245   :  { %v2323_v4 = vadd.f32 %v2321_v37, %v2318_v50  ;;  %v2324_v5 = vadd.f32 %v2322_v12, %v2319_v24  ;;  %v2349_v32 = vmul.f32 %v2348_v14, %v5046_v18  ;;  %v2350_v33 = vmul.f32 %v2348_v14, %v5048_v48 }
 0x246   :  { %v2341_v58 = vadd.f32 %v2339_v22, %v2336_v35  ;;  %v2342_v0 = vadd.f32 %v2340_v39, %v2337_v15  ;;  %v2353_v51 = vstv %s5612_s16  ;;  %v2358_v21 = vstv %s5614_s2  ;;  %s5758_s16 = sld [smem:[#allocation18 + $0xb]]  ;;  %s5760_s2 = sld [smem:[#allocation18 + $0xc]] }
 0x247   :  { %v2328_v17 = vadd.f32 %v2326_v28, %v2323_v4  ;;  %v2329_v34 = vadd.f32 %v2327_v49, %v2324_v5  ;;  %v2354_v62 = vmul.f32 %v2353_v51, %v5100_v19  ;;  %v2355_v7 = vmul.f32 %v2353_v51, %v5102_v26 }
 0x248   :  { %v2346_v45 = vadd.f32 %v2344_v41, %v2341_v58  ;;  %v2347_v44 = vadd.f32 %v2345_v16, %v2342_v0  ;;  %v2359_v37 = vmul.f32 %v2358_v21, %v5150_v25  ;;  %v2360_v12 = vmul.f32 %v2358_v21, %v5152_v43 }
 0x249   :  { %v2331_v42 = vadd.f32 %v2330_v38, %v2328_v17  ;;  %v2332_v60 = vadd.f32 %v2330_v38, %v2329_v34  ;;  %v2363_v30 = vstv %s5626_s4  ;;  %v2368_v31 = vstv %s5628_s10  ;;  %s5768_s4 = sld [smem:[#allocation18 + $0xd]]  ;;  %s5770_s10 = sld [smem:[#allocation18 + $0xe]] }
 0x24a   :  { %v2351_v28 = vadd.f32 %v2349_v32, %v2346_v45  ;;  %v2352_v49 = vadd.f32 %v2350_v33, %v2347_v44  ;;  %v2364_v47 = vmul.f32 %v2363_v30, %v5204_v56  ;;  %v2365_v27 = vmul.f32 %v2363_v30, %v5206_v8 }
 0x24b   :  { %v5670_v14 = vmax.f32 %v2331_v42, 0.0  ;;  %v5672_v50 = vmax.f32 %v2332_v60, 0.0  ;;  %v2369_v38 = vmul.f32 %v2368_v31, %v5254_v6  ;;  %v2370_v24 = vmul.f32 %v2368_v31, %v5256_v63 }
 0x24c   :  { %v2356_v35 = vadd.f32 %v2354_v62, %v2351_v28  ;;  %v2357_v15 = vadd.f32 %v2355_v7, %v2352_v49  ;;  %v2373_v22 = vstv %s5638_s5  ;;  %v2378_v39 = vstv %s5640_s7  ;;  %s5782_s5 = sld [smem:[#allocation18 + $0xf]]  ;;  %s5784_s7 = sld [smem:[#allocation18 + $0x10]] }
 0x24d   :  { %v2374_v41 = vmul.f32 %v2373_v22, %v5308_v57  ;;  %v2375_v16 = vmul.f32 %v2373_v22, %v5310_v29  ;;  %v2383_v4 = vstv %s5646_s17  ;;  %v2386_v5 = vstv %s5648_s18  ;;  %s5796_s17 = sld [smem:[#allocation18 + $0x11]] }
 0x24e   :  { %v2361_v32 = vadd.f32 %v2359_v37, %v2356_v35  ;;  %v2362_v33 = vadd.f32 %v2360_v12, %v2357_v15  ;;  %v2384_v58 = vmul.f32 %v2383_v4, %v4892_v53  ;;  %v2385_v0 = vmul.f32 %v2383_v4, %v4894_v9  ;;  %s5798_s18 = sld [smem:[#allocation19 + $0x1]] }
 0x24f   :  { %v2387_v51 = vmul.f32 %v2386_v5, %v4942_v40  ;;  %v2388_v21 = vmul.f32 %v2386_v5, %v4944_v46  ;;  %v2391_v17 = vstv %s5654_s21  ;;  %v2396_v34 = vstv %s5656_s22  ;;  %s5802_s21 = sld [smem:[#allocation18 + $0x12]]  ;;  %s5804_s22 = sld [smem:[#allocation18 + $0x13]] }
 0x250   :  { %v2366_v62 = vadd.f32 %v2364_v47, %v2361_v32  ;;  %v2367_v7 = vadd.f32 %v2365_v27, %v2362_v33  ;;  %v2392_v45 = vmul.f32 %v2391_v17, %v4996_v3  ;;  %v2393_v53 = vmul.f32 %v2391_v17, %v4998_v36 }
 0x251   :  { %v2389_v9 = vadd.f32 %v2387_v51, %v2384_v58  ;;  %v2390_v40 = vadd.f32 %v2388_v21, %v2385_v0  ;;  %v2397_v46 = vmul.f32 %v2396_v34, %v5046_v18  ;;  %v2398_v44 = vmul.f32 %v2396_v34, %v5048_v48 }
 0x252   :  { %v2371_v37 = vadd.f32 %v2369_v38, %v2366_v62  ;;  %v2372_v3 = vadd.f32 %v2370_v24, %v2367_v7  ;;  %v2401_v12 = vstv %s5664_s23  ;;  %v2406_v36 = vstv %s5666_s24  ;;  %s5808_s23 = sld [smem:[#allocation18 + $0x14]]  ;;  %s5810_s24 = sld [smem:[#allocation18 + $0x15]] }
 0x253   :  { %v2394_v42 = vadd.f32 %v2392_v45, %v2389_v9  ;;  %v2395_v60 = vadd.f32 %v2393_v53, %v2390_v40  ;;  %v2402_v30 = vmul.f32 %v2401_v12, %v5100_v19  ;;  %v2403_v31 = vmul.f32 %v2401_v12, %v5102_v26 }
 0x254   :  { %v2376_v28 = vadd.f32 %v2374_v41, %v2371_v37  ;;  %v2377_v18 = vadd.f32 %v2375_v16, %v2372_v3  ;;  %v2407_v48 = vmul.f32 %v2406_v36, %v5150_v25  ;;  %v2408_v49 = vmul.f32 %v2406_v36, %v5152_v43 }
 0x255   :  { %v2399_v47 = vadd.f32 %v2397_v46, %v2394_v42  ;;  %v2400_v27 = vadd.f32 %v2398_v44, %v2395_v60  ;;  %v2411_v38 = vstv %s5678_s6  ;;  %v2416_v24 = vstv %s5680_s8  ;;  %s5820_s6 = sld [smem:[#allocation18 + $0x16]]  ;;  %s5822_s8 = sld [smem:[#allocation18 + $0x17]] }
 0x256   :  { %v2379_v35 = vadd.f32 %v2378_v39, %v2376_v28  ;;  %v2380_v19 = vadd.f32 %v2378_v39, %v2377_v18  ;;  %v2412_v26 = vmul.f32 %v2411_v38, %v5204_v56  ;;  %v2413_v15 = vmul.f32 %v2411_v38, %v5206_v8 }
 0x257   :  { %v2404_v25 = vadd.f32 %v2402_v30, %v2399_v47  ;;  %v2405_v43 = vadd.f32 %v2403_v31, %v2400_v27  ;;  %v2417_v22 = vmul.f32 %v2416_v24, %v5254_v6  ;;  %v2418_v41 = vmul.f32 %v2416_v24, %v5256_v63 }
 0x258   :  { %v5724_v16 = vmax.f32 %v2379_v35, 0.0  ;;  %v5726_v4 = vmax.f32 %v2380_v19, 0.0  ;;  %v2421_v5 = vstv %s5692_s9  ;;  %v2426_v39 = vstv %s5694_s11  ;;  %s5836_s9 = sld [smem:[#allocation18 + $0x18]]  ;;  %s5838_s11 = sld [smem:[#allocation18 + $0x19]] }
 0x259   :  { %v2409_v56 = vadd.f32 %v2407_v48, %v2404_v25  ;;  %v2410_v8 = vadd.f32 %v2408_v49, %v2405_v43  ;;  %v2422_v32 = vmul.f32 %v2421_v5, %v5308_v57  ;;  %v2423_v33 = vmul.f32 %v2421_v5, %v5310_v29 }
 0x25a   :  { %v2431_v58 = vstv %s5698_s25  ;;  %v2434_v6 = vstv %s5700_s26  ;;  %v2439_v0 = vstv %s5704_s27  ;;  %v2444_v63 = vstv %s5706_s28  ;;  %s5848_s25 = sld [smem:[#allocation18 + $0x1a]]  ;;  %s5856_s27 = sld [smem:[#allocation18 + $0x1b]] }
 0x25b   :  { %v2414_v51 = vadd.f32 %v2412_v26, %v2409_v56  ;;  %v2415_v21 = vadd.f32 %v2413_v15, %v2410_v8  ;;  %v2432_v17 = vmul.f32 %v2431_v58, %v5358_v2  ;;  %v2433_v34 = vmul.f32 %v2431_v58, %v5360_v10  ;;  %s5850_s26 = sld [smem:[#allocation19 + $0x2]]  ;;  %s5858_s28 = sld [smem:[#allocation18 + $0x1c]] }
 0x25c   :  { %v2435_v57 = vmul.f32 %v2434_v6, %v5412_v59  ;;  %v2436_v29 = vmul.f32 %v2434_v6, %v5414_v61  ;;  %v2440_v62 = vmul.f32 %v2439_v0, %v5462_v1  ;;  %v2441_v7 = vmul.f32 %v2439_v0, %v5464_v52 }
 0x25d   :  { %v2419_v45 = vadd.f32 %v2417_v22, %v2414_v51  ;;  %v2420_v53 = vadd.f32 %v2418_v41, %v2415_v21  ;;  %v2445_v9 = vmul.f32 %v2444_v63, %v5516_v23  ;;  %v2446_v40 = vmul.f32 %v2444_v63, %v5518_v11 }
 0x25e   :  { %v2437_v46 = vadd.f32 %v2435_v57, %v2432_v17  ;;  %v2438_v44 = vadd.f32 %v2436_v29, %v2433_v34  ;;  %v2449_v37 = vstv %s5716_s12  ;;  %v2454_v3 = vstv %s5718_s0  ;;  %s5864_s12 = sld [smem:[#allocation18 + $0x1d]]  ;;  %s5866_s0 = sld [smem:[#allocation18 + $0x1e]] }
 0x25f   :  { %v2424_v12 = vadd.f32 %v2422_v32, %v2419_v45  ;;  %v2425_v36 = vadd.f32 %v2423_v33, %v2420_v53  ;;  %v2450_v42 = vmul.f32 %v2449_v37, %v5566_v13  ;;  %v2451_v60 = vmul.f32 %v2449_v37, %v5568_v20 }
 0x260   :  { %v2442_v30 = vadd.f32 %v2440_v62, %v2437_v46  ;;  %v2443_v31 = vadd.f32 %v2441_v7, %v2438_v44  ;;  %v2455_v28 = vmul.f32 %v2454_v3, %v5620_v54  ;;  %v2456_v18 = vmul.f32 %v2454_v3, %v5622_v55 }
 0x261   :  { %v2427_v48 = vadd.f32 %v2426_v39, %v2424_v12  ;;  %v2428_v49 = vadd.f32 %v2426_v39, %v2425_v36  ;;  %v2459_v47 = vstv %s5730_s1  ;;  %v2464_v27 = vstv %s5732_s3  ;;  %s5878_s1 = sld [smem:[#allocation18 + $0x1f]]  ;;  %s5880_s3 = sld [smem:[#allocation18 + $0x20]] }
 0x262   :  { %v2447_v38 = vadd.f32 %v2445_v9, %v2442_v30  ;;  %v2448_v24 = vadd.f32 %v2446_v40, %v2443_v31  ;;  %v2460_v35 = vmul.f32 %v2459_v47, %v5670_v14  ;;  %v2461_v19 = vmul.f32 %v2459_v47, %v5672_v50 }
 0x263   :  { %v5774_v26 = vmax.f32 %v2427_v48, 0.0  ;;  %v5776_v15 = vmax.f32 %v2428_v49, 0.0  ;;  %v2465_v25 = vmul.f32 %v2464_v27, %v5724_v16  ;;  %v2466_v43 = vmul.f32 %v2464_v27, %v5726_v4 }
 0x264   :  { %v2452_v22 = vadd.f32 %v2450_v42, %v2447_v38  ;;  %v2453_v41 = vadd.f32 %v2451_v60, %v2448_v24  ;;  %v2469_v5 = vstv %s5742_s29  ;;  %v2474_v39 = vstv %s5744_s30  ;;  %s5890_s29 = sld [smem:[#allocation18 + $0x21]]  ;;  %s5892_s30 = sld [smem:[#allocation18 + $0x22]] }
 0x265   :  { %v2470_v56 = vmul.f32 %v2469_v5, %v5774_v26  ;;  %v2471_v8 = vmul.f32 %v2469_v5, %v5776_v15  ;;  %v2479_v32 = vstv %s5750_s14  ;;  %v2482_v33 = vstv %s5752_s15  ;;  %s5904_s14 = sld [smem:[#allocation18 + $0x23]] }
 0x266   :  { %v2457_v58 = vadd.f32 %v2455_v28, %v2452_v22  ;;  %v2458_v6 = vadd.f32 %v2456_v18, %v2453_v41  ;;  %v2480_v0 = vmul.f32 %v2479_v32, %v5358_v2  ;;  %v2481_v63 = vmul.f32 %v2479_v32, %v5360_v10  ;;  %s5906_s15 = sld [smem:[#allocation19 + $0x3]] }
 0x267   :  { %v2483_v51 = vmul.f32 %v2482_v33, %v5412_v59  ;;  %v2484_v21 = vmul.f32 %v2482_v33, %v5414_v61  ;;  %v2487_v17 = vstv %s5758_s16  ;;  %v2492_v34 = vstv %s5760_s2  ;;  %s5910_s16 = sld [smem:[#allocation18 + $0x24]]  ;;  %s5912_s2 = sld [smem:[#allocation18 + $0x25]] }
 0x268   :  { %v2462_v57 = vadd.f32 %v2460_v35, %v2457_v58  ;;  %v2463_v29 = vadd.f32 %v2461_v19, %v2458_v6  ;;  %v2488_v62 = vmul.f32 %v2487_v17, %v5462_v1  ;;  %v2489_v7 = vmul.f32 %v2487_v17, %v5464_v52 }
 0x269   :  { %v2485_v45 = vadd.f32 %v2483_v51, %v2480_v0  ;;  %v2486_v53 = vadd.f32 %v2484_v21, %v2481_v63  ;;  %v2493_v9 = vmul.f32 %v2492_v34, %v5516_v23  ;;  %v2494_v40 = vmul.f32 %v2492_v34, %v5518_v11 }
 0x26a   :  { %v2467_v46 = vadd.f32 %v2465_v25, %v2462_v57  ;;  %v2468_v44 = vadd.f32 %v2466_v43, %v2463_v29  ;;  %v2497_v37 = vstv %s5768_s4  ;;  %v2502_v3 = vstv %s5770_s10  ;;  %s5916_s4 = sld [smem:[#allocation18 + $0x26]]  ;;  %s5918_s10 = sld [smem:[#allocation18 + $0x27]] }
 0x26b   :  { %v2490_v12 = vadd.f32 %v2488_v62, %v2485_v45  ;;  %v2491_v36 = vadd.f32 %v2489_v7, %v2486_v53  ;;  %v2498_v42 = vmul.f32 %v2497_v37, %v5566_v13  ;;  %v2499_v60 = vmul.f32 %v2497_v37, %v5568_v20 }
 0x26c   :  { %v2472_v30 = vadd.f32 %v2470_v56, %v2467_v46  ;;  %v2473_v31 = vadd.f32 %v2471_v8, %v2468_v44  ;;  %v2503_v28 = vmul.f32 %v2502_v3, %v5620_v54  ;;  %v2504_v18 = vmul.f32 %v2502_v3, %v5622_v55 }
 0x26d   :  { %v2495_v48 = vadd.f32 %v2493_v9, %v2490_v12  ;;  %v2496_v49 = vadd.f32 %v2494_v40, %v2491_v36  ;;  %v2507_v47 = vstv %s5782_s5  ;;  %v2512_v27 = vstv %s5784_s7  ;;  %s5928_s5 = sld [smem:[#allocation18 + $0x28]]  ;;  %s5930_s7 = sld [smem:[#allocation18 + $0x29]] }
 0x26e   :  { %v5824_v38 = vadd.f32 %v2474_v39, %v2472_v30  ;;  %v5826_v24 = vadd.f32 %v2474_v39, %v2473_v31  ;;  %v2508_v35 = vmul.f32 %v2507_v47, %v5670_v14  ;;  %v2509_v19 = vmul.f32 %v2507_v47, %v5672_v50 }
 0x26f   :  { %v2500_v25 = vadd.f32 %v2498_v42, %v2495_v48  ;;  %v2501_v43 = vadd.f32 %v2499_v60, %v2496_v49  ;;  %v2513_v22 = vmul.f32 %v2512_v27, %v5724_v16  ;;  %v2514_v41 = vmul.f32 %v2512_v27, %v5726_v4 }
 0x270   :  { %v2477_v5 = vmax.f32 %v5824_v38, 0.0  ;;  %v2478_v56 = vmax.f32 %v5826_v24, 0.0  ;;  %v2517_v39 = vstv %s5796_s17  ;;  %v2522_v8 = vstv %s5798_s18  ;;  %s5944_s17 = sld [smem:[#allocation18 + $0x2a]]  ;;  %s5946_s18 = sld [smem:[#allocation18 + $0x2b]] }
 0x271   :  { %v2505_v32 = vadd.f32 %v2503_v28, %v2500_v25  ;;  %v2506_v33 = vadd.f32 %v2504_v18, %v2501_v43  ;;  %v2518_v58 = vmul.f32 %v2517_v39, %v5774_v26  ;;  %v2519_v6 = vmul.f32 %v2517_v39, %v5776_v15 }
 0x272   :  { %v2527_v0 = vstv %s5802_s21  ;;  %v2530_v63 = vstv %s5804_s22  ;;  %v2535_v51 = vstv %s5808_s23  ;;  %v2540_v21 = vstv %s5810_s24  ;;  %s5956_s21 = sld [smem:[#allocation18 + $0x2c]]  ;;  %s5964_s23 = sld [smem:[#allocation18 + $0x2d]] }
 0x273   :  { %v2510_v17 = vadd.f32 %v2508_v35, %v2505_v32  ;;  %v2511_v34 = vadd.f32 %v2509_v19, %v2506_v33  ;;  %v2528_v57 = vmul.f32 %v2527_v0, %v5358_v2  ;;  %v2529_v29 = vmul.f32 %v2527_v0, %v5360_v10  ;;  %s5958_s22 = sld [smem:[#allocation19 + $0x4]]  ;;  %s5966_s24 = sld [smem:[#allocation18 + $0x2e]] }
 0x274   :  { %v2531_v62 = vmul.f32 %v2530_v63, %v5412_v59  ;;  %v2532_v7 = vmul.f32 %v2530_v63, %v5414_v61  ;;  %v2536_v45 = vmul.f32 %v2535_v51, %v5462_v1  ;;  %v2537_v53 = vmul.f32 %v2535_v51, %v5464_v52 }
 0x275   :  { %v2515_v9 = vadd.f32 %v2513_v22, %v2510_v17  ;;  %v2516_v40 = vadd.f32 %v2514_v41, %v2511_v34  ;;  %v2541_v46 = vmul.f32 %v2540_v21, %v5516_v23  ;;  %v2542_v44 = vmul.f32 %v2540_v21, %v5518_v11 }
 0x276   :  { %v2533_v37 = vadd.f32 %v2531_v62, %v2528_v57  ;;  %v2534_v3 = vadd.f32 %v2532_v7, %v2529_v29  ;;  %v2545_v12 = vstv %s5820_s6  ;;  %v2550_v36 = vstv %s5822_s8  ;;  %s5972_s6 = sld [smem:[#allocation18 + $0x2f]]  ;;  %s5974_s8 = sld [smem:[#allocation18 + $0x30]] }
 0x277   :  { %v2520_v42 = vadd.f32 %v2518_v58, %v2515_v9  ;;  %v2521_v60 = vadd.f32 %v2519_v6, %v2516_v40  ;;  %v2546_v30 = vmul.f32 %v2545_v12, %v5566_v13  ;;  %v2547_v31 = vmul.f32 %v2545_v12, %v5568_v20 }
 0x278   :  { %v2538_v28 = vadd.f32 %v2536_v45, %v2533_v37  ;;  %v2539_v18 = vadd.f32 %v2537_v53, %v2534_v3  ;;  %v2551_v48 = vmul.f32 %v2550_v36, %v5620_v54  ;;  %v2552_v49 = vmul.f32 %v2550_v36, %v5622_v55 }
 0x279   :  { %v5872_v47 = vadd.f32 %v2522_v8, %v2520_v42  ;;  %v5874_v27 = vadd.f32 %v2522_v8, %v2521_v60  ;;  %v2555_v35 = vstv %s5836_s9  ;;  %v2560_v19 = vstv %s5838_s11  ;;  %s5986_s9 = sld [smem:[#allocation18 + $0x31]]  ;;  %s5988_s11 = sld [smem:[#allocation18 + $0x32]] }
 0x27a   :  { %v2543_v25 = vadd.f32 %v2541_v46, %v2538_v28  ;;  %v2544_v43 = vadd.f32 %v2542_v44, %v2539_v18  ;;  %v2556_v22 = vmul.f32 %v2555_v35, %v5670_v14  ;;  %v2557_v41 = vmul.f32 %v2555_v35, %v5672_v50 }
 0x27b   :  { %v2525_v39 = vmax.f32 %v5872_v47, 0.0  ;;  %v2526_v8 = vmax.f32 %v5874_v27, 0.0  ;;  %v2561_v32 = vmul.f32 %v2560_v19, %v5724_v16  ;;  %v2562_v33 = vmul.f32 %v2560_v19, %v5726_v4 }
 0x27c   :  { %v2548_v58 = vadd.f32 %v2546_v30, %v2543_v25  ;;  %v2549_v6 = vadd.f32 %v2547_v31, %v2544_v43  ;;  %v2565_v0 = vstv %s5848_s25  ;;  %v2570_v63 = vstv %s5850_s26  ;;  %s5998_s25 = sld [smem:[#allocation18 + $0x33]]  ;;  %s6000_s26 = sld [smem:[#allocation18 + $0x34]] }
 0x27d   :  { %v2566_v51 = vmul.f32 %v2565_v0, %v5774_v26  ;;  %v2567_v21 = vmul.f32 %v2565_v0, %v5776_v15  ;;  %v2575_v17 = vstv %s5856_s27  ;;  %v2578_v34 = vstv %s5858_s28  ;;  %s6012_s27 = sld [smem:[#allocation18 + $0x35]] }
 0x27e   :  { %v2553_v57 = vadd.f32 %v2551_v48, %v2548_v58  ;;  %v2554_v29 = vadd.f32 %v2552_v49, %v2549_v6  ;;  %v2576_v62 = vmul.f32 %v2575_v17, %v5358_v2  ;;  %v2577_v7 = vmul.f32 %v2575_v17, %v5360_v10  ;;  %s6014_s28 = sld [smem:[#allocation19 + $0x5]] }
 0x27f   :  { %v2579_v45 = vmul.f32 %v2578_v34, %v5412_v59  ;;  %v2580_v53 = vmul.f32 %v2578_v34, %v5414_v61  ;;  %v2583_v9 = vstv %s5864_s12  ;;  %v2588_v40 = vstv %s5866_s0  ;;  %s6018_s12 = sld [smem:[#allocation18 + $0x36]]  ;;  %s6020_s0 = sld [smem:[#allocation18 + $0x37]] }
 0x280   :  { %v2558_v46 = vadd.f32 %v2556_v22, %v2553_v57  ;;  %v2559_v44 = vadd.f32 %v2557_v41, %v2554_v29  ;;  %v2584_v37 = vmul.f32 %v2583_v9, %v5462_v1  ;;  %v2585_v3 = vmul.f32 %v2583_v9, %v5464_v52 }
 0x281   :  { %v2581_v12 = vadd.f32 %v2579_v45, %v2576_v62  ;;  %v2582_v36 = vadd.f32 %v2580_v53, %v2577_v7  ;;  %v2589_v42 = vmul.f32 %v2588_v40, %v5516_v23  ;;  %v2590_v60 = vmul.f32 %v2588_v40, %v5518_v11 }
 0x282   :  { %v2563_v30 = vadd.f32 %v2561_v32, %v2558_v46  ;;  %v2564_v31 = vadd.f32 %v2562_v33, %v2559_v44  ;;  %v2593_v28 = vstv %s5878_s1  ;;  %v2598_v18 = vstv %s5880_s3  ;;  %s6024_s1 = sld [smem:[#allocation18 + $0x38]]  ;;  %s6026_s3 = sld [smem:[#allocation18 + $0x39]] }
 0x283   :  { %v2586_v48 = vadd.f32 %v2584_v37, %v2581_v12  ;;  %v2587_v49 = vadd.f32 %v2585_v3, %v2582_v36  ;;  %v2594_v35 = vmul.f32 %v2593_v28, %v5566_v13  ;;  %v2595_v19 = vmul.f32 %v2593_v28, %v5568_v20 }
 0x284   :  { %v2568_v25 = vadd.f32 %v2566_v51, %v2563_v30  ;;  %v2569_v43 = vadd.f32 %v2567_v21, %v2564_v31  ;;  %v2599_v22 = vmul.f32 %v2598_v18, %v5620_v54  ;;  %v2600_v41 = vmul.f32 %v2598_v18, %v5622_v55 }
 0x285   :  { %v2591_v58 = vadd.f32 %v2589_v42, %v2586_v48  ;;  %v2592_v6 = vadd.f32 %v2590_v60, %v2587_v49  ;;  %v2603_v32 = vstv %s5890_s29  ;;  %v2608_v33 = vstv %s5892_s30  ;;  %s6036_s29 = sld [smem:[#allocation18 + $0x3a]]  ;;  %s6038_s30 = sld [smem:[#allocation18 + $0x3b]] }
 0x286   :  { %v5932_v0 = vadd.f32 %v2570_v63, %v2568_v25  ;;  %v5934_v17 = vadd.f32 %v2570_v63, %v2569_v43  ;;  %v2604_v51 = vmul.f32 %v2603_v32, %v5670_v14  ;;  %v2605_v21 = vmul.f32 %v2603_v32, %v5672_v50 }
 0x287   :  { %v2596_v34 = vadd.f32 %v2594_v35, %v2591_v58  ;;  %v2597_v57 = vadd.f32 %v2595_v19, %v2592_v6  ;;  %v2609_v29 = vmul.f32 %v2608_v33, %v5724_v16  ;;  %v2610_v62 = vmul.f32 %v2608_v33, %v5726_v4 }
 0x288   :  { %v2573_v7 = vmax.f32 %v5932_v0, 0.0  ;;  %v2574_v45 = vmax.f32 %v5934_v17, 0.0  ;;  %v2613_v63 = vstv %s5904_s14  ;;  %v2618_v53 = vstv %s5906_s15  ;;  %s6052_s14 = sld [smem:[#allocation18 + $0x3c]]  ;;  %s6054_s15 = sld [smem:[#allocation18 + $0x3d]] }
 0x289   :  { %v2601_v9 = vadd.f32 %v2599_v22, %v2596_v34  ;;  %v2602_v40 = vadd.f32 %v2600_v41, %v2597_v57  ;;  %v2614_v46 = vmul.f32 %v2613_v63, %v5774_v26  ;;  %v2615_v44 = vmul.f32 %v2613_v63, %v5776_v15 }
 0x28a   :  { %v2623_v37 = vstv %s5910_s16  ;;  %v2626_v3 = vstv %s5912_s2  ;;  %v2631_v12 = vstv %s5916_s4  ;;  %v2636_v36 = vstv %s5918_s10  ;;  %s6064_s16 = sld [smem:[#allocation18 + $0x3e]]  ;;  %s6072_s4 = sld [smem:[#allocation18 + $0x3f]] }
 0x28b   :  { %v2606_v42 = vadd.f32 %v2604_v51, %v2601_v9  ;;  %v2607_v60 = vadd.f32 %v2605_v21, %v2602_v40  ;;  %v2624_v30 = vmul.f32 %v2623_v37, %v5358_v2  ;;  %v2625_v31 = vmul.f32 %v2623_v37, %v5360_v10  ;;  %s6066_s2 = sld [smem:[#allocation19 + $0x6]]  ;;  %s6074_s10 = sld [smem:[#allocation18 + $0x40]] }
 0x28c   :  { %v2627_v28 = vmul.f32 %v2626_v3, %v5412_v59  ;;  %v2628_v18 = vmul.f32 %v2626_v3, %v5414_v61  ;;  %v2632_v48 = vmul.f32 %v2631_v12, %v5462_v1  ;;  %v2633_v49 = vmul.f32 %v2631_v12, %v5464_v52 }
 0x28d   :  { %v2611_v35 = vadd.f32 %v2609_v29, %v2606_v42  ;;  %v2612_v19 = vadd.f32 %v2610_v62, %v2607_v60  ;;  %v2637_v25 = vmul.f32 %v2636_v36, %v5516_v23  ;;  %v2638_v43 = vmul.f32 %v2636_v36, %v5518_v11 }
 0x28e   :  { %v2629_v22 = vadd.f32 %v2627_v28, %v2624_v30  ;;  %v2630_v41 = vadd.f32 %v2628_v18, %v2625_v31  ;;  %v2641_v58 = vstv %s5928_s5  ;;  %v2646_v6 = vstv %s5930_s7  ;;  %s6080_s5 = sld [smem:[#allocation18 + $0x41]]  ;;  %s6082_s7 = sld [smem:[#allocation18 + $0x42]] }
 0x28f   :  { %v2616_v32 = vadd.f32 %v2614_v46, %v2611_v35  ;;  %v2617_v33 = vadd.f32 %v2615_v44, %v2612_v19  ;;  %v2642_v51 = vmul.f32 %v2641_v58, %v5566_v13  ;;  %v2643_v21 = vmul.f32 %v2641_v58, %v5568_v20 }
 0x290   :  { %v2634_v34 = vadd.f32 %v2632_v48, %v2629_v22  ;;  %v2635_v57 = vadd.f32 %v2633_v49, %v2630_v41  ;;  %v2647_v29 = vmul.f32 %v2646_v6, %v5620_v54  ;;  %v2648_v62 = vmul.f32 %v2646_v6, %v5622_v55 }
 0x291   :  { %v5980_v63 = vadd.f32 %v2618_v53, %v2616_v32  ;;  %v5982_v9 = vadd.f32 %v2618_v53, %v2617_v33  ;;  %v2651_v40 = vstv %s5944_s17  ;;  %v2656_v37 = vstv %s5946_s18  ;;  %s6094_s17 = sld [smem:[#allocation18 + $0x43]]  ;;  %s6096_s18 = sld [smem:[#allocation18 + $0x44]] }
 0x292   :  { %v2639_v46 = vadd.f32 %v2637_v25, %v2634_v34  ;;  %v2640_v44 = vadd.f32 %v2638_v43, %v2635_v57  ;;  %v2652_v3 = vmul.f32 %v2651_v40, %v5670_v14  ;;  %v2653_v12 = vmul.f32 %v2651_v40, %v5672_v50 }
 0x293   :  { %v2621_v36 = vmax.f32 %v5980_v63, 0.0  ;;  %v2657_v42 = vmul.f32 %v2656_v37, %v5724_v16  ;;  %v2658_v60 = vmul.f32 %v2656_v37, %v5726_v4  ;;  %v2661_v28 = vstv %s5956_s21  ;;  %s6106_s21 = sld [smem:[#allocation18 + $0x45]] }
 0x294   :  { %v2644_v30 = vadd.f32 %v2642_v51, %v2639_v46  ;;  %v2645_v31 = vadd.f32 %v2643_v21, %v2640_v44  ;;  %v2666_v18 = vstv %s5958_s22  ;;  %v2662_v48 = vmul.f32 %v2661_v28, %v5774_v26  ;;  %s6108_s22 = sld [smem:[#allocation18 + $0x46]] }
 0x295   :  { %v2663_v49 = vmul.f32 %v2661_v28, %v5776_v15  ;;  %v2671_v35 = vstv %s5964_s23  ;;  %v2674_v19 = vstv %s5966_s24  ;;  %v2679_v32 = vstv %s5972_s6  ;;  %s6120_s23 = sld [smem:[#allocation18 + $0x47]]  ;;  %s6126_s6 = sld [smem:[#allocation18 + $0x48]] }
 0x296   :  { %v2649_v25 = vadd.f32 %v2647_v29, %v2644_v30  ;;  %v2650_v43 = vadd.f32 %v2648_v62, %v2645_v31  ;;  %v2672_v22 = vmul.f32 %v2671_v35, %v5358_v2  ;;  %v2673_v41 = vmul.f32 %v2671_v35, %v5360_v10  ;;  %s6122_s24 = sld [smem:[#allocation19 + $0x7]] }
 0x297   :  { %v2675_v58 = vmul.f32 %v2674_v19, %v5412_v59  ;;  %v2676_v6 = vmul.f32 %v2674_v19, %v5414_v61  ;;  %v2684_v33 = vstv %s5974_s8  ;;  %v2680_v34 = vmul.f32 %v2679_v32, %v5462_v1  ;;  %s6128_s8 = sld [smem:[#allocation18 + $0x49]] }
 0x298   :  { %v2654_v51 = vadd.f32 %v2652_v3, %v2649_v25  ;;  %v2655_v21 = vadd.f32 %v2653_v12, %v2650_v43  ;;  %v2681_v57 = vmul.f32 %v2679_v32, %v5464_v52  ;;  %v2685_v40 = vmul.f32 %v2684_v33, %v5516_v23 }
 0x299   :  { %v2677_v29 = vadd.f32 %v2675_v58, %v2672_v22  ;;  %v2678_v62 = vadd.f32 %v2676_v6, %v2673_v41  ;;  %v2686_v37 = vmul.f32 %v2684_v33, %v5518_v11  ;;  %v2689_v3 = vstv %s5986_s9  ;;  %s6132_s9 = sld [smem:[#allocation18 + $0x4a]] }
 0x29a   :  { %v2659_v46 = vadd.f32 %v2657_v42, %v2654_v51  ;;  %v2660_v44 = vadd.f32 %v2658_v60, %v2655_v21  ;;  %v2694_v12 = vstv %s5988_s11  ;;  %v2690_v28 = vmul.f32 %v2689_v3, %v5566_v13  ;;  %s6134_s11 = sld [smem:[#allocation18 + $0x4b]] }
 0x29b   :  { %v2682_v30 = vadd.f32 %v2680_v34, %v2677_v29  ;;  %v2683_v31 = vadd.f32 %v2681_v57, %v2678_v62  ;;  %v2691_v35 = vmul.f32 %v2689_v3, %v5568_v20  ;;  %v2695_v43 = vmul.f32 %v2694_v12, %v5620_v54 }
 0x29c   :  { %v2664_v19 = vadd.f32 %v2662_v48, %v2659_v46  ;;  %v2665_v25 = vadd.f32 %v2663_v49, %v2660_v44  ;;  %v2696_v22 = vmul.f32 %v2694_v12, %v5622_v55  ;;  %v2699_v42 = vstv %s5998_s25  ;;  %s6144_s25 = sld [smem:[#allocation18 + $0x4c]] }
 0x29d   :  { %v2687_v41 = vadd.f32 %v2685_v40, %v2682_v30  ;;  %v2688_v58 = vadd.f32 %v2686_v37, %v2683_v31  ;;  %v2704_v60 = vstv %s6000_s26  ;;  %v2700_v48 = vmul.f32 %v2699_v42, %v5670_v14  ;;  %s6146_s26 = sld [smem:[#allocation18 + $0x4d]] }
 0x29e   :  { %v6040_v6 = vadd.f32 %v2666_v18, %v2664_v19  ;;  %v6042_v32 = vadd.f32 %v2666_v18, %v2665_v25  ;;  %v2701_v49 = vmul.f32 %v2699_v42, %v5672_v50  ;;  %v2705_v21 = vmul.f32 %v2704_v60, %v5724_v16 }
 0x29f   :  { %v2692_v33 = vadd.f32 %v2690_v28, %v2687_v41  ;;  %v2693_v51 = vadd.f32 %v2691_v35, %v2688_v58  ;;  %v2706_v34 = vmul.f32 %v2704_v60, %v5726_v4  ;;  %v2709_v18 = vstv %s6012_s27  ;;  %s6160_s27 = sld [smem:[#allocation18 + $0x4e]] }
 0x2a0   :  { %v2714_v62 = vstv %s6014_s28  ;;  %v2710_v46 = vmul.f32 %v2709_v18, %v5774_v26  ;;  %v2711_v44 = vmul.f32 %v2709_v18, %v5776_v15  ;;  %v2719_v3 = vstv %s6018_s12  ;;  %s6162_s28 = sld [smem:[#allocation18 + $0x4f]]  ;;  %s6172_s12 = sld [smem:[#allocation18 + $0x50]] }
 0x2a1   :  { %v2697_v40 = vadd.f32 %v2695_v43, %v2692_v33  ;;  %v2698_v37 = vadd.f32 %v2696_v22, %v2693_v51  ;;  %v2722_v12 = vstv %s6020_s0  ;;  %v2727_v30 = vstv %s6024_s1  ;;  %s6174_s0 = sld [smem:[#allocation19 + $0x8]] }
 0x2a2   :  { %v2732_v31 = vstv %s6026_s3  ;;  %v2720_v19 = vmul.f32 %v2719_v3, %v5358_v2  ;;  %v2721_v25 = vmul.f32 %v2719_v3, %v5360_v10  ;;  %v2723_v43 = vmul.f32 %v2722_v12, %v5412_v59  ;;  %s6180_s1 = sld [smem:[#allocation21]]  ;;  %s6182_s3 = sld [smem:[#allocation21 + $0x1]] }
 0x2a3   :  { %v2702_v28 = vadd.f32 %v2700_v48, %v2697_v40  ;;  %v2703_v35 = vadd.f32 %v2701_v49, %v2698_v37  ;;  %v2724_v22 = vmul.f32 %v2722_v12, %v5414_v61  ;;  %v2728_v41 = vmul.f32 %v2727_v30, %v5462_v1 }
 0x2a4   :  { %v2729_v58 = vmul.f32 %v2727_v30, %v5464_v52  ;;  %v2733_v48 = vmul.f32 %v2732_v31, %v5516_v23  ;;  %v2734_v49 = vmul.f32 %v2732_v31, %v5518_v11  ;;  %v2725_v33 = vadd.f32 %v2723_v43, %v2720_v19 }
 0x2a5   :  { %v2707_v42 = vadd.f32 %v2705_v21, %v2702_v28  ;;  %v2708_v60 = vadd.f32 %v2706_v34, %v2703_v35  ;;  %v2726_v51 = vadd.f32 %v2724_v22, %v2721_v25  ;;  %v2737_v18 = vstv %s6036_s29  ;;  %s6188_s29 = sld [smem:[#allocation21 + $0x2]] }
 0x2a6   :  { %v2742_v40 = vstv %s6038_s30  ;;  %v2738_v12 = vmul.f32 %v2737_v18, %v5566_v13  ;;  %v2739_v21 = vmul.f32 %v2737_v18, %v5568_v20  ;;  %v2730_v34 = vadd.f32 %v2728_v41, %v2725_v33  ;;  %s6190_s30 = sld [smem:[#allocation21 + $0x3]] }
 0x2a7   :  { %v2712_v37 = vadd.f32 %v2710_v46, %v2707_v42  ;;  %v2713_v3 = vadd.f32 %v2711_v44, %v2708_v60  ;;  %v2731_v30 = vadd.f32 %v2729_v58, %v2726_v51  ;;  %v2743_v31 = vmul.f32 %v2742_v40, %v5620_v54 }
 0x2a8   :  { %v2744_v28 = vmul.f32 %v2742_v40, %v5622_v55  ;;  %v2747_v25 = vstv %s6052_s14  ;;  %v2752_v43 = vstv %s6054_s15  ;;  %v2735_v46 = vadd.f32 %v2733_v48, %v2730_v34  ;;  %s6202_s14 = sld [smem:[#allocation21 + $0x4]]  ;;  %s6204_s15 = sld [smem:[#allocation21 + $0x5]] }
 0x2a9   :  { %v6088_v35 = vadd.f32 %v2714_v62, %v2712_v37  ;;  %v6090_v19 = vadd.f32 %v2714_v62, %v2713_v3  ;;  %v2736_v44 = vadd.f32 %v2734_v49, %v2731_v30  ;;  %v2748_v22 = vmul.f32 %v2747_v25, %v5670_v14 }
 0x2aa   :  { %v2749_v41 = vmul.f32 %v2747_v25, %v5672_v50  ;;  %v2753_v42 = vmul.f32 %v2752_v43, %v5724_v16  ;;  %v2754_v60 = vmul.f32 %v2752_v43, %v5726_v4  ;;  %v2740_v33 = vadd.f32 %v2738_v12, %v2735_v46 }
 0x2ab   :  { %v2741_v51 = vadd.f32 %v2739_v21, %v2736_v44  ;;  %v2757_v48 = vstv %s6064_s16  ;;  %v2762_v18 = vstv %s6066_s2  ;;  %v2767_v37 = vstv %s6072_s4  ;;  %s6214_s16 = sld [smem:[#allocation21 + $0x6]]  ;;  %s6216_s2 = sld [smem:[#allocation21 + $0x7]] }
 0x2ac   :  { %v2758_v49 = vmul.f32 %v2757_v48, %v5774_v26  ;;  %v2759_v40 = vmul.f32 %v2757_v48, %v5776_v15  ;;  %v2770_v3 = vstv %s6074_s10  ;;  %v2745_v34 = vadd.f32 %v2743_v31, %v2740_v33  ;;  %s6232_s4 = sld [smem:[#allocation21 + $0x8]]  ;;  %s6238_s10 = sld [smem:[#allocation21 + $0x9]] }
 0x2ad   :  { %v2746_v30 = vadd.f32 %v2744_v28, %v2741_v51  ;;  %v2768_v25 = vmul.f32 %v2767_v37, %v5358_v2  ;;  %v2769_v12 = vmul.f32 %v2767_v37, %v5360_v10  ;;  %v2771_v21 = vmul.f32 %v2770_v3, %v5412_v59 }
 0x2ae   :  { %v2772_v43 = vmul.f32 %v2770_v3, %v5414_v61  ;;  %v2775_v46 = vstv %s6080_s5  ;;  %v2780_v44 = vstv %s6082_s7  ;;  %v2750_v48 = vadd.f32 %v2748_v22, %v2745_v34  ;;  %s6240_s5 = sld [smem:[#allocation21 + $0xa]]  ;;  %s6248_s7 = sld [smem:[#allocation21 + $0xb]] }
 0x2af   :  { %v2751_v62 = vadd.f32 %v2749_v41, %v2746_v30  ;;  %v2776_v31 = vmul.f32 %v2775_v46, %v5462_v1  ;;  %v2777_v28 = vmul.f32 %v2775_v46, %v5464_v52  ;;  %v2773_v33 = vadd.f32 %v2771_v21, %v2768_v25 }
 0x2b0   :  { %v2774_v51 = vadd.f32 %v2772_v43, %v2769_v12  ;;  %v2781_v37 = vmul.f32 %v2780_v44, %v5516_v23  ;;  %v2782_v3 = vmul.f32 %v2780_v44, %v5518_v11  ;;  %v2755_v22 = vadd.f32 %v2753_v42, %v2750_v48 }
 0x2b1   :  { %v2756_v41 = vadd.f32 %v2754_v60, %v2751_v62  ;;  %v2785_v34 = vstv %s6094_s17  ;;  %v2790_v30 = vstv %s6096_s18  ;;  %v2778_v46 = vadd.f32 %v2776_v31, %v2773_v33  ;;  %s6250_s17 = sld [smem:[#allocation21 + $0xc]]  ;;  %s6256_s18 = sld [smem:[#allocation21 + $0xd]] }
 0x2b2   :  { %v2779_v58 = vadd.f32 %v2777_v28, %v2774_v51  ;;  %v2786_v29 = vmul.f32 %v2785_v34, %v5566_v13  ;;  %v2787_v25 = vmul.f32 %v2785_v34, %v5568_v20  ;;  %v2760_v12 = vadd.f32 %v2758_v49, %v2755_v22 }
 0x2b3   :  { %v2761_v21 = vadd.f32 %v2759_v40, %v2756_v41  ;;  %v2791_v43 = vmul.f32 %v2790_v30, %v5620_v54  ;;  %v2792_v44 = vmul.f32 %v2790_v30, %v5622_v55  ;;  %v2783_v57 = vadd.f32 %v2781_v37, %v2778_v46 }
 0x2b4   :  { %v2784_v53 = vadd.f32 %v2782_v3, %v2779_v58  ;;  %v2795_v42 = vstv %s6106_s21  ;;  %v2800_v62 = vstv %s6108_s22  ;;  %v6148_v60 = vadd.f32 %v2762_v18, %v2760_v12  ;;  %s6258_s21 = sld [smem:[#allocation22]]  ;;  %s6272_s22 = sld [smem:[#allocation21 + $0xe]] }
 0x2b5   :  { %v6150_v48 = vadd.f32 %v2762_v18, %v2761_v21  ;;  %v2796_v49 = vmul.f32 %v2795_v42, %v5670_v14  ;;  %v2797_v40 = vmul.f32 %v2795_v42, %v5672_v50  ;;  %v2788_v31 = vadd.f32 %v2786_v29, %v2783_v57 }
 0x2b6   :  { %v2789_v58 = vadd.f32 %v2787_v25, %v2784_v53  ;;  %v2801_v28 = vmul.f32 %v2800_v62, %v5724_v16  ;;  %v2802_v33 = vmul.f32 %v2800_v62, %v5726_v4  ;;  %v2765_v51 = vmax.f32 %v6148_v60, 0.0 }
 0x2b7   :  { %v2766_v37 = vmax.f32 %v6150_v48, 0.0  ;;  %v2805_v18 = vstv %s6120_s23  ;;  %v2810_v3 = vstv %s6122_s24  ;;  %v2793_v22 = vadd.f32 %v2791_v43, %v2788_v31  ;;  %s6283_s23 = sld [smem:[#allocation21 + $0xf]]  ;;  %s6291_s24 = sld [smem:[#allocation21 + $0x10]] }
 0x2b8   :  { %v2794_v41 = vadd.f32 %v2792_v44, %v2789_v58  ;;  %v2806_v57 = vmul.f32 %v2805_v18, %v5774_v26  ;;  %v2807_v53 = vmul.f32 %v2805_v18, %v5776_v15  ;;  %v2815_v29 = vstv %s6126_s6  ;;  %s6301_s6 = sld [smem:[#allocation21 + $0x11]] }
 0x2b9   :  { %v2818_v34 = vstv %s6128_s8  ;;  %v2823_v30 = vstv %s6132_s9  ;;  %v2828_v46 = vstv %s6134_s11  ;;  %v2798_v25 = vadd.f32 %v2796_v49, %v2793_v22  ;;  %s3450_s8 = sld [smem:[#allocation22 + $0x1]]  ;;  %s3688_s9 = smov [#allocation24]  }
 0x2ba   :  { %v2799_v12 = vadd.f32 %v2797_v40, %v2794_v41  ;;  %v2816_v21 = vmul.f32 %v2815_v29, %v5358_v2  ;;  %v2817_v42 = vmul.f32 %v2815_v29, %v5360_v10  ;;  %v2819_v43 = vmul.f32 %v2818_v34, %v5412_v59  ;;  %s2965_s11 = sshll.u32 %s3688_s9, 4  ;;  %s2966_s11 = int_to_ptr.vmem [resolvable:$true] %s2965_s11 }
 0x2bb   :  { %v2820_v44 = vmul.f32 %v2818_v34, %v5414_v61  ;;  %v2824_v62 = vmul.f32 %v2823_v30, %v5462_v1  ;;  %v2825_v31 = vmul.f32 %v2823_v30, %v5464_v52  ;;  %v2803_v2 = vadd.f32 %v2801_v28, %v2798_v25  ;;  %p3638_p13 = scmp.lt.s32.totalorder %s2966_s11, %s2966_s11 }
 0x2bc   :  { %v2804_v49 = vadd.f32 %v2802_v33, %v2799_v12  ;;  %v2829_v10 = vmul.f32 %v2828_v46, %v5516_v23  ;;  %v2830_v40 = vmul.f32 %v2828_v46, %v5518_v11  ;;  %v2821_v58 = vadd.f32 %v2819_v43, %v2816_v21 }
 0x2bd   :  { %v2822_v18 = vadd.f32 %v2820_v44, %v2817_v42  ;;  %v2833_v59 = vstv %s6144_s25  ;;  %v2838_v61 = vstv %s6146_s26  ;;  %v2808_v1 = vadd.f32 %v2806_v57, %v2803_v2  ;;  %s3633_s25 = scalar_lea.vmem %s2966_s11, 512 }
 0x2be   :  { %v2809_v52 = vadd.f32 %v2807_v53, %v2804_v49  ;;  %v2834_v22 = vmul.f32 %v2833_v59, %v5566_v13  ;;  %v2835_v28 = vmul.f32 %v2833_v59, %v5568_v20  ;;  %v2826_v33 = vadd.f32 %v2824_v62, %v2821_v58  ;;  %p3634_p12 = scmp.ne.s32.totalorder %s2966_s11, %s3633_s25  ;;  %p3639_p0 = scmp.lt.s32.totalorder %s3633_s25, %s3633_s25 }
 0x2bf   :  { %v2827_v23 = vadd.f32 %v2825_v31, %v2822_v18  ;;  %v2839_v11 = vmul.f32 %v2838_v61, %v5620_v54  ;;  %v2840_v41 = vmul.f32 %v2838_v61, %v5622_v55  ;;  %v6196_v29 = vadd.f32 %v2810_v3, %v2808_v1 }
 0x2c0   :  { %v6198_v34 = vadd.f32 %v2810_v3, %v2809_v52  ;;  %v2843_v30 = vstv %s6160_s27  ;;  %v2848_v46 = vstv %s6162_s28  ;;  %v2831_v13 = vadd.f32 %v2829_v10, %v2826_v33  ;;  %p3640_p1 = por %p3639_p0, %p3638_p13 }
 0x2c1   :  { %v2832_v20 = vadd.f32 %v2830_v40, %v2827_v23  ;;  %v2844_v54 = vmul.f32 %v2843_v30, %v5670_v14  ;;  %v2845_v55 = vmul.f32 %v2843_v30, %v5672_v50  ;;  %v2813_v57 = vmax.f32 %v6196_v29, 0.0 }
 0x2c2   :  { %v2814_v3 = vmax.f32 %v6198_v34, 0.0  ;;  %v2849_v53 = vmul.f32 %v2848_v46, %v5724_v16  ;;  %v2850_v25 = vmul.f32 %v2848_v46, %v5726_v4  ;;  %v2836_v12 = vadd.f32 %v2834_v22, %v2831_v13  ;;  %p3641_p2 = pnand %p3640_p1, %p3634_p12 }
 0x2c3   :  { %v2837_v21 = vadd.f32 %v2835_v28, %v2832_v20  ;;  %v2853_v42 = vstv %s6172_s12  ;;  %v2858_v43 = vstv %s6174_s0  ;;  %v2863_v44 = vstv %s6180_s1 }
 0x2c4   :  { %v2854_v14 = vmul.f32 %v2853_v42, %v5774_v26  ;;  %v2855_v50 = vmul.f32 %v2853_v42, %v5776_v15  ;;  %v2866_v62 = vstv %s6182_s3  ;;  %v2841_v31 = vadd.f32 %v2839_v11, %v2836_v12 }
 0x2c5   :  { %v2842_v16 = vadd.f32 %v2840_v41, %v2837_v21  ;;  %v2864_v4 = vmul.f32 %v2863_v44, %v2477_v5  ;;  %v2865_v2 = vmul.f32 %v2863_v44, %v2478_v56  ;;  %v2867_v49 = vmul.f32 %v2866_v62, %v2525_v39 }
 0x2c6   :  { %v2868_v10 = vmul.f32 %v2866_v62, %v2526_v8  ;;  %v2871_v26 = vstv %s6188_s29  ;;  %v2876_v15 = vstv %s6190_s30  ;;  %v2846_v40 = vadd.f32 %v2844_v54, %v2841_v31 }
 0x2c7   :  { %v2847_v58 = vadd.f32 %v2845_v55, %v2842_v16  ;;  %v2872_v18 = vmul.f32 %v2871_v26, %v2573_v7  ;;  %v2873_v59 = vmul.f32 %v2871_v26, %v2574_v45  ;;  %v2869_v61 = vadd.f32 %v2867_v49, %v2864_v4 }
 0x2c8   :  { %v2870_v1 = vadd.f32 %v2868_v10, %v2865_v2  ;;  %v2877_v52 = vmul.f32 %v2876_v15, %v2621_v36  ;;  %v6360_v22 = vmax.f32 %v5982_v9, 0.0  ;;  %v2851_v33 = vadd.f32 %v2849_v53, %v2846_v40 }
 0x2c9   :  { %v2852_v23 = vadd.f32 %v2850_v25, %v2847_v58  ;;  %v2881_v11 = vstv %s6202_s14  ;;  %v2886_v41 = vstv %s6204_s15  ;;  %v2874_v30 = vadd.f32 %v2872_v18, %v2869_v61 }
 0x2ca   :  { %v2878_v28 = vmul.f32 %v2876_v15, %v6360_v22  ;;  %v2875_v46 = vadd.f32 %v2873_v59, %v2870_v1  ;;  %v6361_v13 = vmax.f32 %v6040_v6, 0.0  ;;  %v6362_v54 = vmax.f32 %v6042_v32, 0.0 }
 0x2cb   :  { %v2856_v53 = vadd.f32 %v2854_v14, %v2851_v33  ;;  %v2857_v25 = vadd.f32 %v2855_v50, %v2852_v23  ;;  %v6363_v12 = vmax.f32 %v6088_v35, 0.0  ;;  %v6364_v42 = vmax.f32 %v6090_v19, 0.0 }
 0x2cc   :  { %v2882_v20 = vmul.f32 %v2881_v11, %v6361_v13  ;;  %v2883_v55 = vmul.f32 %v2881_v11, %v6362_v54  ;;  %v2879_v62 = vadd.f32 %v2877_v52, %v2874_v30  ;;  %v2880_v31 = vadd.f32 %v2878_v28, %v2875_v46 }
 0x2cd   :  { %v2887_v21 = vmul.f32 %v2886_v41, %v6363_v12  ;;  %v2888_v44 = vmul.f32 %v2886_v41, %v6364_v42  ;;  %v2891_v16 = vstv %s6214_s16  ;;  %v2896_v4 = vstv %s6216_s2 }
 0x2ce   :  { %v6266_v2 = vadd.f32 %v2858_v43, %v2856_v53  ;;  %v6268_v49 = vadd.f32 %v2858_v43, %v2857_v25  ;;  %v2892_v14 = vmul.f32 %v2891_v16, %v2765_v51  ;;  %v2884_v50 = vadd.f32 %v2882_v20, %v2879_v62 }
 0x2cf   :  { %v2885_v10 = vadd.f32 %v2883_v55, %v2880_v31  ;;  %v2893_v26 = vmul.f32 %v2891_v16, %v2766_v37  ;;  %v2897_v15 = vmul.f32 %v2896_v4, %v2813_v57  ;;  %v2898_v43 = vmul.f32 %v2896_v4, %v2814_v3 }
 0x2d0   :  { %v2861_v40 = vmax.f32 %v6266_v2, 0.0  ;;  %v2862_v58 = vmax.f32 %v6268_v49, 0.0  ;;  %v2901_v18 = vstv %s6232_s4  ;;  %v2889_v59 = vadd.f32 %v2887_v21, %v2884_v50 }
 0x2d1   :  { %v2890_v61 = vadd.f32 %v2888_v44, %v2885_v10  ;;  %v2909_v1 = vstv %s6238_s10  ;;  %v2912_v52 = vstv %s6240_s5  ;;  %v2906_v13 = vstv %s6258_s21 }
 0x2d2   :  { %v2902_v22 = vmul.f32 %v2901_v18, %v2861_v40  ;;  %v2903_v28 = vmul.f32 %v2901_v18, %v2862_v58  ;;  %v2910_v33 = vmul.f32 %v2909_v1, %v2477_v5  ;;  %v2911_v23 = vmul.f32 %v2909_v1, %v2478_v56 }
 0x2d3   :  { %v2894_v11 = vadd.f32 %v2892_v14, %v2889_v59  ;;  %v2895_v41 = vadd.f32 %v2893_v26, %v2890_v61  ;;  %v2913_v30 = vmul.f32 %v2912_v52, %v2525_v39  ;;  %v2914_v46 = vmul.f32 %v2912_v52, %v2526_v8 }
 0x2d4   :  { %v2917_v20 = vstv %s6248_s7  ;;  %v2922_v54 = vstv %s6250_s17  ;;  %v2927_v55 = vstv %s6256_s18  ;;  %v6365_v39 = vmax.f32 %v5982_v9, 0.0 }
 0x2d5   :  { %v2899_v38 = vadd.f32 %v2897_v15, %v2894_v11  ;;  %v2900_v24 = vadd.f32 %v2898_v43, %v2895_v41  ;;  %v2915_v5 = vadd.f32 %v2913_v30, %v2910_v33  ;;  %v2916_v56 = vadd.f32 %v2914_v46, %v2911_v23 }
 0x2d6   :  { %v2918_v53 = vmul.f32 %v2917_v20, %v2573_v7  ;;  %v2919_v47 = vmul.f32 %v2917_v20, %v2574_v45  ;;  %v2923_v27 = vmul.f32 %v2922_v54, %v2621_v36  ;;  %v2924_v8 = vmul.f32 %v2922_v54, %v6365_v39 }
 0x2d7   :  { %v2904_v25 = vadd.f32 %v2902_v22, %v2899_v38  ;;  %v2905_v12 = vadd.f32 %v2903_v28, %v2900_v24  ;;  %v2932_v21 = vstv %s6272_s22  ;;  %v6366_v62 = vmax.f32 %v6040_v6, 0.0 }
 0x2d8   :  { %v2920_v42 = vadd.f32 %v2918_v53, %v2915_v5  ;;  %v2921_v44 = vadd.f32 %v2919_v47, %v2916_v56  ;;  %v6367_v0 = vmax.f32 %v6042_v32, 0.0  ;;  %v2937_v63 = vstv %s6283_s23 }
 0x2d9   :  { %v2928_v31 = vmul.f32 %v2927_v55, %v6366_v62  ;;  %v2907_v17 = vadd.f32 %v2906_v13, %v2904_v25  ;;  %v2908_v45 = vadd.f32 %v2906_v13, %v2905_v12  ;;  %v6368_v9 = vmax.f32 %v6088_v35, 0.0 }
 0x2da   :  { %v2929_v7 = vmul.f32 %v2927_v55, %v6367_v0  ;;  %v2925_v36 = vadd.f32 %v2923_v27, %v2920_v42  ;;  %v2926_v16 = vadd.f32 %v2924_v8, %v2921_v44  ;;  %v6369_v2 = vmax.f32 %v6090_v19, 0.0 }
 0x2db   :  { %v2933_v4 = vmul.f32 %v2932_v21, %v6368_v9  ;;  %v2942_v14 = vstv %s6291_s24  ;;  %2955 = vst [vmem:[#allocation24] sm:$0xff] %v2907_v17  ;;  %2956 = vst [vmem:[#allocation24 + $0x8] sm:$0xff] %v2908_v45  ;;  %v2938_v32 = vmul.f32 %v2937_v63, %v2765_v51  ;;  %v2939_v10 = vmul.f32 %v2937_v63, %v2766_v37 }
 0x2dc   :  { %v2934_v49 = vmul.f32 %v2932_v21, %v6369_v2  ;;  %v2930_v6 = vadd.f32 %v2928_v31, %v2925_v36  ;;  %v2931_v50 = vadd.f32 %v2929_v7, %v2926_v16  ;;  %v2947_v26 = vstv %s6301_s6 }
 0x2dd   :  { %v2943_v35 = vmul.f32 %v2942_v14, %v2813_v57  ;;  %v2944_v19 = vmul.f32 %v2942_v14, %v2814_v3  ;;  %v2948_v61 = vmul.f32 %v2947_v26, %v2861_v40  ;;  %v2949_v1 = vmul.f32 %v2947_v26, %v2862_v58 }
 0x2de   :  { %v2935_v15 = vadd.f32 %v2933_v4, %v2930_v6  ;;  %v2936_v43 = vadd.f32 %v2934_v49, %v2931_v50  ;;  %v2952_v60 = vstv %s3450_s8 }
 0x2e0   :  { %v2940_v18 = vadd.f32 %v2938_v32, %v2935_v15  ;;  %v2941_v59 = vadd.f32 %v2939_v10, %v2936_v43 }
 0x2e2   :  { %v2945_v52 = vadd.f32 %v2943_v35, %v2940_v18  ;;  %v2946_v22 = vadd.f32 %v2944_v19, %v2941_v59 }
 0x2e4   :  { %v2950_v48 = vadd.f32 %v2948_v61, %v2945_v52  ;;  %v2951_v51 = vadd.f32 %v2949_v1, %v2946_v22 }
 0x2e6   :  { %v2953_v37 = vadd.f32 %v2952_v60, %v2950_v48  ;;  %v2954_v28 = vadd.f32 %v2952_v60, %v2951_v51 }
 0x2e8   :  { %2958 = vst [vmem:[#allocation24 + $0x10] sm:$0xff] %v2953_v37  ;;  %2959 = vst [vmem:[#allocation24 + $0x18] sm:$0xff] %v2954_v28 }
 0x2e9   :  { %3644 = shalt.err (!%p3641_p2)
}
 0x2ea   :  { %s3645_s28 = scalar_lea.hbm %s6359_s13, 512 }
 0x2eb   :  { %p3646_p3 = scmp.ne.s32.totalorder %s6359_s13, %s3645_s28  ;;  %p3649_p4 = scmp.lt.u32.totalorder %s3645_s28, %s6359_s13 }
 0x2ed   :  { %p3651_p5 = pnand %p3649_p4, %p3646_p3 }
 0x2ef   :  { %3654 = shalt.err (!%p3651_p5)
}
 0x2f0   :  { %2971 = dma.vmem_to_hbm [thread:$0]  %s2966_s11, 512, %s6359_s13, [#allocation4], %s3679_s19, %s3679_s19, %s3680_s20  }
 0x2f1   :  { %3671 = dma.done.wait [#allocation4], 512  }
 0x2f2   :  { %3672 = vsyncadd [#allocation4], 4294966784 }
 0x2f3   :  { %2975 = vsyncpa [#allocation3], 1 }
 0x2f4   :  { %2976 = vsyncpa [#allocation4], 1 }
 0x2f5   :  { %2977 = vsyncpa [#allocation5], 1 }
 0x2f6   :  { %2978 = vsyncpa [#allocation8], 1 }
 0x2f7   :  { %2979 = vsyncpa [#allocation11], 1 }
 0x2f8   :  { %2980 = vsyncpa [#allocation14], 1 }
 0x2f9   :  { %2981 = vsyncpa [#allocation17], 1 }
 0x2fa   :  { %2982 = vsyncpa [#allocation20], 1 }
 0x2fb   :  { %2983 = vsyncpa [#allocation23], 1 }

</bundles_post_ra>
